<compile_context>
chip_gen: v7x
topology: tpu7x:2x2x1
jax: 0.10.0
libtpu: 0.0.40
codegen_flags: <defaults>
</compile_context>

<pallas_src>
import functools
import math

import jax
import jax.numpy as jnp
from jax.experimental import pallas as pl
from jax.experimental.pallas import tpu as pltpu


def _round_up(x, m):
    return ((x + m - 1) // m) * m


# ----------------------------------------------------------------------------
# Pallas kernels
# ----------------------------------------------------------------------------

def _double_conv3x3_kernel(x_ref, w1_ref, b1_ref, w2_ref, b2_ref, o_ref, mid_ref, *, H):
    """Fused conv3x3+ReLU -> conv3x3+ReLU on the wide-row layout.

    x_ref:   (H+2, W*Cin)          f32 (H-halo padded; W taps folded into weights)
    w*_ref:  (3, W*Cin_l, W*Cout_l) bf16 block-banded weight slabs (one per kh)
    b*_ref:  (1, W*Cout_l)         f32
    mid_ref: (H+2, W*Cmid)         f32 VMEM scratch (halo-padded intermediate)
    o_ref:   (H, W*Cout)           f32
    """
    n1 = w1_ref.shape[-1]
    acc1 = jnp.zeros((H, n1), jnp.float32)
    for kh in range(3):
        xs = x_ref[kh:kh + H, :].astype(jnp.bfloat16)
        acc1 = acc1 + jnp.dot(xs, w1_ref[kh], preferred_element_type=jnp.float32)
    y1 = jnp.maximum(acc1 + b1_ref[...], 0.0)

    mid_ref[...] = jnp.zeros_like(mid_ref)      # zero H-halo rows
    mid_ref[1:H + 1, :] = y1

    n2 = w2_ref.shape[-1]
    acc2 = jnp.zeros((H, n2), jnp.float32)
    for kh in range(3):
        ms = mid_ref[kh:kh + H, :].astype(jnp.bfloat16)
        acc2 = acc2 + jnp.dot(ms, w2_ref[kh], preferred_element_type=jnp.float32)
    o_ref[...] = jnp.maximum(acc2 + b2_ref[...], 0.0)


def _convlstm_kernel(x_ref, w_ref, b_ref, o_ref, *, H):
    """Fused ConvLSTM gate conv + gate nonlinearities (c_prev == 0, forget gate dropped).

    x_ref: (H+2, W*(Cx+hidden)) f32, w_ref: (3 gates, 3 kh, K, W*hidden) bf16,
    b_ref: (3, 1, W*hidden) f32, o_ref: (H, W*hidden) f32.
    Gate order on the leading w_ref/b_ref axis: (input, cell, output).
    """
    nw = w_ref.shape[-1]
    acc_i = jnp.zeros((H, nw), jnp.float32)
    acc_g = jnp.zeros((H, nw), jnp.float32)
    acc_o = jnp.zeros((H, nw), jnp.float32)
    for kh in range(3):
        xs = x_ref[kh:kh + H, :].astype(jnp.bfloat16)
        acc_i = acc_i + jnp.dot(xs, w_ref[0, kh], preferred_element_type=jnp.float32)
        acc_g = acc_g + jnp.dot(xs, w_ref[1, kh], preferred_element_type=jnp.float32)
        acc_o = acc_o + jnp.dot(xs, w_ref[2, kh], preferred_element_type=jnp.float32)
    i_g = jax.nn.sigmoid(acc_i + b_ref[0])
    g_g = jnp.tanh(acc_g + b_ref[1])
    o_g = jax.nn.sigmoid(acc_o + b_ref[2])
    c_next = i_g * g_g                          # forget_gate * c_prev == 0
    o_ref[...] = o_g * jnp.tanh(c_next)


def _head_kernel(x_ref, w9_ref, b9_ref, w10_ref, b10_ref, o_ref, *, H, use_sigmoid):
    """conv9 (3x3, ReLU) + conv10 (1x1) [+ sigmoid] fused."""
    n9 = w9_ref.shape[-1]
    acc = jnp.zeros((H, n9), jnp.float32)
    for kh in range(3):
        xs = x_ref[kh:kh + H, :].astype(jnp.bfloat16)
        acc = acc + jnp.dot(xs, w9_ref[kh], preferred_element_type=jnp.float32)
    y9 = jnp.maximum(acc + b9_ref[...], 0.0)
    y10 = jnp.dot(y9.astype(jnp.bfloat16), w10_ref[...],
                  preferred_element_type=jnp.float32) + b10_ref[...]
    if use_sigmoid:
        y10 = jax.nn.sigmoid(y10)
    o_ref[...] = y10


def _matmul_bias_act_kernel(x_ref, w_ref, b_ref, o_ref, *, act):
    acc = jnp.dot(x_ref[...], w_ref[...], preferred_element_type=jnp.float32)
    acc = acc + b_ref[...]
    if act == "relu":
        acc = jnp.maximum(acc, 0.0)
    elif act == "sigmoid":
        acc = jax.nn.sigmoid(acc)
    o_ref[...] = acc.astype(o_ref.dtype)


def _max4_kernel(a_ref, b_ref, c_ref, d_ref, o_ref):
    o_ref[...] = jnp.maximum(jnp.maximum(a_ref[...], b_ref[...]),
                             jnp.maximum(c_ref[...], d_ref[...]))


# ----------------------------------------------------------------------------
# Wrapper helpers (layout glue in JAX, compute in Pallas)
# ----------------------------------------------------------------------------

def _wide_conv_weight(k, W):
    """(3,3,Cin,Cout) conv kernel -> (3, W*Cin, W*Cout) block-banded GEMM slabs.

    wide[kh, wi*Cin+ci, wo*Cout+co] = k[kh, wi-wo+1, ci, co] if |wi-wo|<=1 else 0,
    i.e. the kw taps plus the zero "same" padding along W are folded in.
    """
    cin, cout = k.shape[2], k.shape[3]
    dw = jnp.arange(3)[:, None, None]
    wi = jnp.arange(W)[None, :, None]
    wo = jnp.arange(W)[None, None, :]
    sel = (wi == wo + dw - 1).astype(k.dtype)                  # (3, W, W)
    wide = jnp.einsum('dxy,hdio->hxiyo', sel, k)               # (3, W, Cin, W, Cout)
    return wide.reshape(3, W * cin, W * cout)


def _wide_bias(b, W):
    return jnp.tile(b, (W,)).reshape(1, -1).astype(jnp.float32)


def _to_wide(x):
    """NHWC -> (N, H+2, W*C): 1-row halo along H, W folded into lanes."""
    N, H, W, C = x.shape
    xp = jnp.pad(x, ((0, 0), (1, 1), (0, 0), (0, 0)))
    return xp.reshape(N, H + 2, W * C).astype(jnp.float32)


def double_conv3x3(x, w1, b1, w2, b2):
    """Fused (conv3x3 + ReLU) x2, one pallas_call per UNet block."""
    N, H, W, Cin = x.shape
    Cm = w1.shape[-1]
    Cout = w2.shape[-1]
    xw = _to_wide(x)
    w1w = _wide_conv_weight(w1, W).astype(jnp.bfloat16)
    w2w = _wide_conv_weight(w2, W).astype(jnp.bfloat16)
    b1w = _wide_bias(b1, W)
    b2w = _wide_bias(b2, W)
    out = pl.pallas_call(
        functools.partial(_double_conv3x3_kernel, H=H),
        out_shape=jax.ShapeDtypeStruct((N, H, W * Cout), jnp.float32),
        grid=(N,),
        in_specs=[
            pl.BlockSpec((None, H + 2, W * Cin), lambda n: (n, 0, 0)),
            pl.BlockSpec((3, W * Cin, W * Cm), lambda n: (0, 0, 0)),
            pl.BlockSpec((1, W * Cm), lambda n: (0, 0)),
            pl.BlockSpec((3, W * Cm, W * Cout), lambda n: (0, 0, 0)),
            pl.BlockSpec((1, W * Cout), lambda n: (0, 0)),
        ],
        out_specs=pl.BlockSpec((None, H, W * Cout), lambda n: (n, 0, 0)),
        scratch_shapes=[pltpu.VMEM((H + 2, W * Cm), jnp.float32)],
        compiler_params=pltpu.CompilerParams(dimension_semantics=("parallel",)),
    )(xw, w1w, b1w, w2w, b2w)
    return out.reshape(N, H, W, Cout)


def conv_lstm_cell(x, h_prev, w_gates, b_gates, hidden):
    """ConvLSTMCell with c_prev = 0 (as used in the BCDUNet forward)."""
    N, H, W, Cx = x.shape
    Cin = Cx + hidden
    comb = jnp.concatenate([x, h_prev], axis=-1)
    xw = _to_wide(comb)
    # PyTorch gate ordering along Cout: (input, forget, cell, output).
    # Forget gate multiplies c_prev == 0 -> dropped (25% fewer gate-GEMM columns).
    w_i = w_gates[..., 0 * hidden:1 * hidden]
    w_g = w_gates[..., 2 * hidden:3 * hidden]
    w_o = w_gates[..., 3 * hidden:4 * hidden]
    wstk = jnp.stack([_wide_conv_weight(w, W) for w in (w_i, w_g, w_o)], axis=0)
    wstk = wstk.astype(jnp.bfloat16)                           # (3, 3, W*Cin, W*hidden)
    bstk = jnp.stack([_wide_bias(b_gates[g * hidden:(g + 1) * hidden], W)
                      for g in (0, 2, 3)], axis=0)             # (3, 1, W*hidden)
    out = pl.pallas_call(
        functools.partial(_convlstm_kernel, H=H),
        out_shape=jax.ShapeDtypeStruct((N, H, W * hidden), jnp.float32),
        grid=(N,),
        in_specs=[
            pl.BlockSpec((None, H + 2, W * Cin), lambda n: (n, 0, 0)),
            pl.BlockSpec((3, 3, W * Cin, W * hidden), lambda n: (0, 0, 0, 0)),
            pl.BlockSpec((3, 1, W * hidden), lambda n: (0, 0, 0)),
        ],
        out_specs=pl.BlockSpec((None, H, W * hidden), lambda n: (n, 0, 0)),
        compiler_params=pltpu.CompilerParams(dimension_semantics=("parallel",)),
    )(xw, wstk, bstk)
    return out.reshape(N, H, W, hidden)


def segmentation_head(x, w9, b9, w10, b10):
    """conv9 (3x3 -> 2ch, ReLU) + conv10 (1x1 -> out_ch) + sigmoid (if out_ch==1)."""
    N, H, W, Cin = x.shape
    out_ch = w10.shape[-1]
    xw = _to_wide(x)
    w9w = _wide_conv_weight(w9, W).astype(jnp.bfloat16)        # (3, W*Cin, W*2)
    b9w = _wide_bias(b9, W)
    k10 = w10.reshape(-1, out_ch)                              # (2, out_ch)
    eye = jnp.eye(W, dtype=k10.dtype)
    w10w = jnp.einsum('xy,io->xiyo', eye, k10).reshape(W * k10.shape[0], W * out_ch)
    w10w = w10w.astype(jnp.bfloat16)
    b10w = _wide_bias(b10, W)
    out = pl.pallas_call(
        functools.partial(_head_kernel, H=H, use_sigmoid=(out_ch == 1)),
        out_shape=jax.ShapeDtypeStruct((N, H, W * out_ch), jnp.float32),
        grid=(N,),
        in_specs=[
            pl.BlockSpec((None, H + 2, W * Cin), lambda n: (n, 0, 0)),
            pl.BlockSpec((3, W * Cin, W * 2), lambda n: (0, 0, 0)),
            pl.BlockSpec((1, W * 2), lambda n: (0, 0)),
            pl.BlockSpec((W * 2, W * out_ch), lambda n: (0, 0)),
            pl.BlockSpec((1, W * out_ch), lambda n: (0, 0)),
        ],
        out_specs=pl.BlockSpec((None, H, W * out_ch), lambda n: (n, 0, 0)),
        compiler_params=pltpu.CompilerParams(dimension_semantics=("parallel",)),
    )(xw, w9w, b9w, w10w, b10w)
    return out.reshape(N, H, W, out_ch)


def matmul_bias_act(x2d, w2d, b, act="none", tm=128):
    """Tiled GEMM + bias + activation; bf16 operands, f32 accumulation."""
    M, K = x2d.shape
    Nn = w2d.shape[1]
    tm = min(tm, _round_up(M, 8))
    Mp = _round_up(M, tm)
    if Mp != M:
        x2d = jnp.pad(x2d, ((0, Mp - M), (0, 0)))
    out = pl.pallas_call(
        functools.partial(_matmul_bias_act_kernel, act=act),
        out_shape=jax.ShapeDtypeStruct((Mp, Nn), jnp.float32),
        grid=(Mp // tm,),
        in_specs=[
            pl.BlockSpec((tm, K), lambda i: (i, 0)),
            pl.BlockSpec((K, Nn), lambda i: (0, 0)),
            pl.BlockSpec((1, Nn), lambda i: (0, 0)),
        ],
        out_specs=pl.BlockSpec((tm, Nn), lambda i: (i, 0)),
        compiler_params=pltpu.CompilerParams(dimension_semantics=("parallel",)),
    )(x2d.astype(jnp.bfloat16), w2d.astype(jnp.bfloat16),
      b.reshape(1, Nn).astype(jnp.float32))
    return out[:M]


BN_EVAL_SCALE = 1.0 / math.sqrt(1.0 + 1e-5)   # eval BatchNorm2d: mean=0, var=1, w=1, b=0


def conv_transpose2x2_bn_relu(x, w, b):
    """ConvTranspose2d(k=2, s=2) + BatchNorm2d(eval) + ReLU as one lane-dense GEMM
    (the 4 taps are concatenated along Cout), then a free depth-to-space reshape."""
    N, H, W, Cin = x.shape
    Cout = w.shape[-1]
    wt = jnp.transpose(w, (2, 0, 1, 3)).reshape(Cin, 4 * Cout) * BN_EVAL_SCALE
    bt = jnp.tile(b * BN_EVAL_SCALE, (4,))
    y = matmul_bias_act(x.reshape(N * H * W, Cin), wt, bt, act="relu")
    y = y.reshape(N, H, W, 2, 2, Cout)
    y = jnp.transpose(y, (0, 1, 3, 2, 4, 5)).reshape(N, 2 * H, 2 * W, Cout)
    return y


def _max4(a, b, c, d, tm=512):
    M, L = a.shape
    tm = min(tm, _round_up(M, 8))
    Mp = _round_up(M, tm)
    if Mp != M:
        pad = ((0, Mp - M), (0, 0))
        a = jnp.pad(a, pad)
        b = jnp.pad(b, pad)
        c = jnp.pad(c, pad)
        d = jnp.pad(d, pad)
    spec = pl.BlockSpec((tm, L), lambda i: (i, 0))
    out = pl.pallas_call(
        _max4_kernel,
        out_shape=jax.ShapeDtypeStruct((Mp, L), a.dtype),
        grid=(Mp // tm,),
        in_specs=[spec, spec, spec, spec],
        out_specs=spec,
        compiler_params=pltpu.CompilerParams(dimension_semantics=("parallel",)),
    )(a, b, c, d)
    return out[:M]


def maxpool2x2(x):
    N, H, W, C = x.shape
    Hh, Wh = H // 2, W // 2
    a = x[:, 0::2, 0::2, :]
    b = x[:, 0::2, 1::2, :]
    c = x[:, 1::2, 0::2, :]
    d = x[:, 1::2, 1::2, :]
    total = N * Hh * Wh * C
    shape2d = (total // 128, 128) if total % 128 == 0 else (N * Hh * Wh, C)
    out = _max4(a.reshape(shape2d), b.reshape(shape2d),
                c.reshape(shape2d), d.reshape(shape2d))
    return out.reshape(N, Hh, Wh, C)


# ----------------------------------------------------------------------------
# Parameter construction (deterministic, kaiming-style fan_in init; self-consistent)
# ----------------------------------------------------------------------------

def init_params(key, in_ch=3, out_ch=1, F=8):
    specs = {
        "w1a": (3, 3, in_ch, F), "w1b": (3, 3, F, F),
        "w2a": (3, 3, F, 2 * F), "w2b": (3, 3, 2 * F, 2 * F),
        "w3a": (3, 3, 2 * F, 4 * F), "w3b": (3, 3, 4 * F, 4 * F),
        "w4a": (3, 3, 4 * F, 8 * F), "w4b": (3, 3, 8 * F, 8 * F),
        "w42a": (3, 3, 8 * F, 8 * F), "w42b": (3, 3, 8 * F, 8 * F),
        "w43a": (3, 3, 16 * F, 8 * F), "w43b": (3, 3, 8 * F, 8 * F),
        "wup6": (2, 2, 8 * F, 4 * F),
        "wl1": (3, 3, 8 * F, 16 * F),
        "w6a": (3, 3, 4 * F, 4 * F), "w6b": (3, 3, 4 * F, 4 * F),
        "wup7": (2, 2, 4 * F, 2 * F),
        "wl2": (3, 3, 4 * F, 8 * F),
        "w7a": (3, 3, 2 * F, 2 * F), "w7b": (3, 3, 2 * F, 2 * F),
        "wup8": (2, 2, 2 * F, F),
        "wl3": (3, 3, 2 * F, 4 * F),
        "w8a": (3, 3, F, F), "w8b": (3, 3, F, F),
        "w9": (3, 3, F, 2),
        "w10": (1, 1, 2, out_ch),
    }
    params = {}
    keys = jax.random.split(key, len(specs))
    for k, (name, shape) in zip(keys, specs.items()):
        fan_in = shape[0] * shape[1] * shape[2]
        std = math.sqrt(2.0 / fan_in)            # kaiming_normal, fan_in, relu
        params[name] = std * jax.random.normal(k, shape, jnp.float32)
        params["b" + name[1:]] = jnp.zeros((shape[-1],), jnp.float32)
    return params


# ----------------------------------------------------------------------------
# BCDUNet forward (eval mode: Dropout2d = identity, BatchNorm2d uses running stats)
# ----------------------------------------------------------------------------

def bcdunet_forward(x_nchw, p, F=8):
    x = jnp.transpose(x_nchw, (0, 2, 3, 1)).astype(jnp.float32)   # NCHW -> NHWC

    conv1 = double_conv3x3(x, p["w1a"], p["b1a"], p["w1b"], p["b1b"])
    pool1 = maxpool2x2(conv1)
    conv2 = double_conv3x3(pool1, p["w2a"], p["b2a"], p["w2b"], p["b2b"])
    pool2 = maxpool2x2(conv2)
    conv3_ = double_conv3x3(pool2, p["w3a"], p["b3a"], p["w3b"], p["b3b"])  # dropout: eval -> identity
    pool3 = maxpool2x2(conv3_)

    conv4 = double_conv3x3(pool3, p["w4a"], p["b4a"], p["w4b"], p["b4b"])
    conv4_2 = double_conv3x3(conv4, p["w42a"], p["b42a"], p["w42b"], p["b42b"])
    merge_dense = jnp.concatenate([conv4_2, conv4], axis=-1)
    conv4_3 = double_conv3x3(merge_dense, p["w43a"], p["b43a"], p["w43b"], p["b43b"])

    up6 = conv_transpose2x2_bn_relu(conv4_3, p["wup6"], p["bup6"])
    h6 = conv_lstm_cell(up6, conv3_, p["wl1"], p["bl1"], 4 * F)
    conv6 = double_conv3x3(h6, p["w6a"], p["b6a"], p["w6b"], p["b6b"])

    up7 = conv_transpose2x2_bn_relu(conv6, p["wup7"], p["bup7"])
    h7 = conv_lstm_cell(up7, conv2, p["wl2"], p["bl2"], 2 * F)
    conv7 = double_conv3x3(h7, p["w7a"], p["b7a"], p["w7b"], p["b7b"])

    up8 = conv_transpose2x2_bn_relu(conv7, p["wup8"], p["bup8"])
    h8 = conv_lstm_cell(up8, conv1, p["wl3"], p["bl3"], F)
    conv8 = double_conv3x3(h8, p["w8a"], p["b8a"], p["w8b"], p["b8b"])

    out = segmentation_head(conv8, p["w9"], p["b9"], p["w10"], p["b10"])
    return jnp.transpose(out, (0, 3, 1, 2))                       # NHWC -> NCHW


# ----------------------------------------------------------------------------
# main
# ----------------------------------------------------------------------------

if __name__ == "__main__":
    key = jax.random.PRNGKey(0)
    k_x, k_p = jax.random.split(key)

    N, C_in, H, W = 2, 3, 16, 16           # small shapes; H, W divisible by 8 (3 pools)
    FILTERS = 8
    x = jax.random.normal(k_x, (N, C_in, H, W), jnp.float32)
    params = init_params(k_p, in_ch=C_in, out_ch=1, F=FILTERS)

    fwd = jax.jit(functools.partial(bcdunet_forward, F=FILTERS))
    out = fwd(x, params)
    out = jax.block_until_ready(out)

    assert out.shape == (N, 1, H, W), out.shape
    assert bool(jnp.all(jnp.isfinite(out)))
    assert bool(jnp.all((out >= 0.0) & (out <= 1.0)))   # sigmoid output
    print("KERNEL_OK")
</pallas_src>

<mosaic_0001>
module attributes {stable_mosaic.version = 11 : i64} {
  func.func @_double_conv3x3_kernel(%arg0: i32, %arg1: memref<1x18x48xf32, #tpu.memory_space<vmem>>, %arg2: memref<3x48x128xbf16, #tpu.memory_space<vmem>>, %arg3: memref<1x128xf32, #tpu.memory_space<vmem>>, %arg4: memref<3x128x128xbf16, #tpu.memory_space<vmem>>, %arg5: memref<1x128xf32, #tpu.memory_space<vmem>>, %arg6: memref<1x16x128xf32, #tpu.memory_space<vmem>>, %arg7: memref<18x128xf32, #tpu.memory_space<vmem>>) attributes {dimension_semantics = [#tpu.dimension_semantics<parallel>], iteration_bounds = array<i64: 2>, scalar_prefetch = 0 : i64, scratch_operands = 1 : i64, tpu.core_type = #tpu.core_type<tc>, window_params = [{transform_indices = @transform_0, window_bounds = array<i64: 1, 18, 48>}, {pipeline_mode = #tpu.pipeline_mode<synchronous>, transform_indices = @transform_1, window_bounds = array<i64: 3, 48, 128>}, {pipeline_mode = #tpu.pipeline_mode<synchronous>, transform_indices = @transform_2, window_bounds = array<i64: 1, 128>}, {pipeline_mode = #tpu.pipeline_mode<synchronous>, transform_indices = @transform_3, window_bounds = array<i64: 3, 128, 128>}, {pipeline_mode = #tpu.pipeline_mode<synchronous>, transform_indices = @transform_4, window_bounds = array<i64: 1, 128>}, {transform_indices = @transform_5, window_bounds = array<i64: 1, 16, 128>}]} {
    %cst = arith.constant 0.000000e+00 : f32
    %0 = vector.broadcast %cst : f32 to vector<16x128xf32>
    %c0 = arith.constant 0 : index
    %c0_0 = arith.constant 0 : index
    %c0_1 = arith.constant 0 : index
    %1 = vector.load %arg1[%c0, %c0_0, %c0_1] : memref<1x18x48xf32, #tpu.memory_space<vmem>>, vector<1x16x48xf32>
    %2 = vector.shape_cast %1 : vector<1x16x48xf32> to vector<16x48xf32>
    %3 = arith.truncf %2 : vector<16x48xf32> to vector<16x48xbf16>
    %c0_2 = arith.constant 0 : index
    %c0_3 = arith.constant 0 : index
    %c0_4 = arith.constant 0 : index
    %4 = vector.load %arg2[%c0_2, %c0_3, %c0_4] : memref<3x48x128xbf16, #tpu.memory_space<vmem>>, vector<1x48x128xbf16>
    %5 = vector.shape_cast %4 : vector<1x48x128xbf16> to vector<48x128xbf16>
    %cst_5 = arith.constant dense<0.000000e+00> : vector<16x128xf32>
    %6 = tpu.matmul %3, %5, %cst_5 {dimension_numbers = #tpu.dot_dimension_numbers<[1], [0], [0], [1], [0, 0, 1, 1], [], []>} : vector<16x48xbf16>, vector<48x128xbf16>, vector<16x128xf32> -> vector<16x128xf32>
    %7 = arith.addf %0, %6 : vector<16x128xf32>
    %c0_6 = arith.constant 0 : index
    %c1 = arith.constant 1 : index
    %c0_7 = arith.constant 0 : index
    %8 = vector.load %arg1[%c0_6, %c1, %c0_7] : memref<1x18x48xf32, #tpu.memory_space<vmem>>, vector<1x16x48xf32>
    %9 = vector.shape_cast %8 : vector<1x16x48xf32> to vector<16x48xf32>
    %10 = arith.truncf %9 : vector<16x48xf32> to vector<16x48xbf16>
    %c1_8 = arith.constant 1 : index
    %c0_9 = arith.constant 0 : index
    %c0_10 = arith.constant 0 : index
    %11 = vector.load %arg2[%c1_8, %c0_9, %c0_10] : memref<3x48x128xbf16, #tpu.memory_space<vmem>>, vector<1x48x128xbf16>
    %12 = vector.shape_cast %11 : vector<1x48x128xbf16> to vector<48x128xbf16>
    %cst_11 = arith.constant dense<0.000000e+00> : vector<16x128xf32>
    %13 = tpu.matmul %10, %12, %cst_11 {dimension_numbers = #tpu.dot_dimension_numbers<[1], [0], [0], [1], [0, 0, 1, 1], [], []>} : vector<16x48xbf16>, vector<48x128xbf16>, vector<16x128xf32> -> vector<16x128xf32>
    %14 = arith.addf %7, %13 : vector<16x128xf32>
    %c0_12 = arith.constant 0 : index
    %c2 = arith.constant 2 : index
    %c0_13 = arith.constant 0 : index
    %15 = vector.load %arg1[%c0_12, %c2, %c0_13] : memref<1x18x48xf32, #tpu.memory_space<vmem>>, vector<1x16x48xf32>
    %16 = vector.shape_cast %15 : vector<1x16x48xf32> to vector<16x48xf32>
    %17 = arith.truncf %16 : vector<16x48xf32> to vector<16x48xbf16>
    %c2_14 = arith.constant 2 : index
    %c0_15 = arith.constant 0 : index
    %c0_16 = arith.constant 0 : index
    %18 = vector.load %arg2[%c2_14, %c0_15, %c0_16] : memref<3x48x128xbf16, #tpu.memory_space<vmem>>, vector<1x48x128xbf16>
    %19 = vector.shape_cast %18 : vector<1x48x128xbf16> to vector<48x128xbf16>
    %cst_17 = arith.constant dense<0.000000e+00> : vector<16x128xf32>
    %20 = tpu.matmul %17, %19, %cst_17 {dimension_numbers = #tpu.dot_dimension_numbers<[1], [0], [0], [1], [0, 0, 1, 1], [], []>} : vector<16x48xbf16>, vector<48x128xbf16>, vector<16x128xf32> -> vector<16x128xf32>
    %21 = arith.addf %14, %20 : vector<16x128xf32>
    %c0_18 = arith.constant 0 : index
    %c0_19 = arith.constant 0 : index
    %22 = vector.load %arg3[%c0_18, %c0_19] : memref<1x128xf32, #tpu.memory_space<vmem>>, vector<1x128xf32>
    %23 = vector.broadcast %22 : vector<1x128xf32> to vector<16x128xf32>
    %24 = arith.addf %21, %23 : vector<16x128xf32>
    %cst_20 = arith.constant 0.000000e+00 : f32
    %25 = vector.broadcast %cst_20 : f32 to vector<16x128xf32>
    %26 = arith.maximumf %24, %25 : vector<16x128xf32>
    %cst_21 = arith.constant 0.000000e+00 : f32
    %27 = vector.broadcast %cst_21 : f32 to vector<18x128xf32>
    %c0_22 = arith.constant 0 : index
    %c0_23 = arith.constant 0 : index
    %28 = vector.load %arg7[%c0_22, %c0_23] : memref<18x128xf32, #tpu.memory_space<vmem>>, vector<18x128xf32>
    tpu.vector_store %arg7[%c0_22, %c0_23], %27 {strides = array<i32>} : memref<18x128xf32, #tpu.memory_space<vmem>>, vector<18x128xf32>,
    %c1_24 = arith.constant 1 : index
    %c0_25 = arith.constant 0 : index
    %29 = vector.load %arg7[%c1_24, %c0_25] : memref<18x128xf32, #tpu.memory_space<vmem>>, vector<16x128xf32>
    tpu.vector_store %arg7[%c1_24, %c0_25], %26 {strides = array<i32>} : memref<18x128xf32, #tpu.memory_space<vmem>>, vector<16x128xf32>,
    %cst_26 = arith.constant 0.000000e+00 : f32
    %30 = vector.broadcast %cst_26 : f32 to vector<16x128xf32>
    %c0_27 = arith.constant 0 : index
    %c0_28 = arith.constant 0 : index
    %31 = vector.load %arg7[%c0_27, %c0_28] : memref<18x128xf32, #tpu.memory_space<vmem>>, vector<16x128xf32>
    %32 = arith.truncf %31 : vector<16x128xf32> to vector<16x128xbf16>
    %c0_29 = arith.constant 0 : index
    %c0_30 = arith.constant 0 : index
    %c0_31 = arith.constant 0 : index
    %33 = vector.load %arg4[%c0_29, %c0_30, %c0_31] : memref<3x128x128xbf16, #tpu.memory_space<vmem>>, vector<1x128x128xbf16>
    %34 = vector.shape_cast %33 : vector<1x128x128xbf16> to vector<128x128xbf16>
    %cst_32 = arith.constant dense<0.000000e+00> : vector<16x128xf32>
    %35 = tpu.matmul %32, %34, %cst_32 {dimension_numbers = #tpu.dot_dimension_numbers<[1], [0], [0], [1], [0, 0, 1, 1], [], []>} : vector<16x128xbf16>, vector<128x128xbf16>, vector<16x128xf32> -> vector<16x128xf32>
    %36 = arith.addf %30, %35 : vector<16x128xf32>
    %c1_33 = arith.constant 1 : index
    %c0_34 = arith.constant 0 : index
    %37 = vector.load %arg7[%c1_33, %c0_34] : memref<18x128xf32, #tpu.memory_space<vmem>>, vector<16x128xf32>
    %38 = arith.truncf %37 : vector<16x128xf32> to vector<16x128xbf16>
    %c1_35 = arith.constant 1 : index
    %c0_36 = arith.constant 0 : index
    %c0_37 = arith.constant 0 : index
    %39 = vector.load %arg4[%c1_35, %c0_36, %c0_37] : memref<3x128x128xbf16, #tpu.memory_space<vmem>>, vector<1x128x128xbf16>
    %40 = vector.shape_cast %39 : vector<1x128x128xbf16> to vector<128x128xbf16>
    %cst_38 = arith.constant dense<0.000000e+00> : vector<16x128xf32>
    %41 = tpu.matmul %38, %40, %cst_38 {dimension_numbers = #tpu.dot_dimension_numbers<[1], [0], [0], [1], [0, 0, 1, 1], [], []>} : vector<16x128xbf16>, vector<128x128xbf16>, vector<16x128xf32> -> vector<16x128xf32>
    %42 = arith.addf %36, %41 : vector<16x128xf32>
    %c2_39 = arith.constant 2 : index
    %c0_40 = arith.constant 0 : index
    %43 = vector.load %arg7[%c2_39, %c0_40] : memref<18x128xf32, #tpu.memory_space<vmem>>, vector<16x128xf32>
    %44 = arith.truncf %43 : vector<16x128xf32> to vector<16x128xbf16>
    %c2_41 = arith.constant 2 : index
    %c0_42 = arith.constant 0 : index
    %c0_43 = arith.constant 0 : index
    %45 = vector.load %arg4[%c2_41, %c0_42, %c0_43] : memref<3x128x128xbf16, #tpu.memory_space<vmem>>, vector<1x128x128xbf16>
    %46 = vector.shape_cast %45 : vector<1x128x128xbf16> to vector<128x128xbf16>
    %cst_44 = arith.constant dense<0.000000e+00> : vector<16x128xf32>
    %47 = tpu.matmul %44, %46, %cst_44 {dimension_numbers = #tpu.dot_dimension_numbers<[1], [0], [0], [1], [0, 0, 1, 1], [], []>} : vector<16x128xbf16>, vector<128x128xbf16>, vector<16x128xf32> -> vector<16x128xf32>
    %48 = arith.addf %42, %47 : vector<16x128xf32>
    %c0_45 = arith.constant 0 : index
    %c0_46 = arith.constant 0 : index
    %49 = vector.load %arg5[%c0_45, %c0_46] : memref<1x128xf32, #tpu.memory_space<vmem>>, vector<1x128xf32>
    %50 = vector.broadcast %49 : vector<1x128xf32> to vector<16x128xf32>
    %51 = arith.addf %48, %50 : vector<16x128xf32>
    %cst_47 = arith.constant 0.000000e+00 : f32
    %52 = vector.broadcast %cst_47 : f32 to vector<16x128xf32>
    %53 = arith.maximumf %51, %52 : vector<16x128xf32>
    %c0_48 = arith.constant 0 : index
    %c0_49 = arith.constant 0 : index
    %c0_50 = arith.constant 0 : index
    %54 = vector.load %arg6[%c0_48, %c0_49, %c0_50] : memref<1x16x128xf32, #tpu.memory_space<vmem>>, vector<1x16x128xf32>
    %55 = vector.shape_cast %54 : vector<1x16x128xf32> to vector<16x128xf32>
    %56 = vector.shape_cast %53 : vector<16x128xf32> to vector<1x16x128xf32>
    tpu.vector_store %arg6[%c0_48, %c0_49, %c0_50], %56 {strides = array<i32>} : memref<1x16x128xf32, #tpu.memory_space<vmem>>, vector<1x16x128xf32>,
    return
  }
  func.func @transform_0(%arg0: i32) -> (i32, i32, i32) {
    %c0_i32 = arith.constant 0 : i32
    %c0_i32_0 = arith.constant 0 : i32
    %c0_i32_1 = arith.constant 0 : i32
    return %arg0, %c0_i32, %c0_i32_0 : i32, i32, i32
  }
  func.func @transform_1(%arg0: i32) -> (i32, i32, i32) {
    %c0_i32 = arith.constant 0 : i32
    %c0_i32_0 = arith.constant 0 : i32
    %c0_i32_1 = arith.constant 0 : i32
    %c0_i32_2 = arith.constant 0 : i32
    return %c0_i32, %c0_i32_0, %c0_i32_1 : i32, i32, i32
  }
  func.func @transform_2(%arg0: i32) -> (i32, i32) {
    %c0_i32 = arith.constant 0 : i32
    %c0_i32_0 = arith.constant 0 : i32
    %c0_i32_1 = arith.constant 0 : i32
    return %c0_i32, %c0_i32_0 : i32, i32
  }
  func.func @transform_3(%arg0: i32) -> (i32, i32, i32) {
    %c0_i32 = arith.constant 0 : i32
    %c0_i32_0 = arith.constant 0 : i32
    %c0_i32_1 = arith.constant 0 : i32
    %c0_i32_2 = arith.constant 0 : i32
    return %c0_i32, %c0_i32_0, %c0_i32_1 : i32, i32, i32
  }
  func.func @transform_4(%arg0: i32) -> (i32, i32) {
    %c0_i32 = arith.constant 0 : i32
    %c0_i32_0 = arith.constant 0 : i32
    %c0_i32_1 = arith.constant 0 : i32
    return %c0_i32, %c0_i32_0 : i32, i32
  }
  func.func @transform_5(%arg0: i32) -> (i32, i32, i32) {
    %c0_i32 = arith.constant 0 : i32
    %c0_i32_0 = arith.constant 0 : i32
    %c0_i32_1 = arith.constant 0 : i32
    return %arg0, %c0_i32, %c0_i32_0 : i32, i32, i32
  }
}

module attributes {stable_mosaic.version = 11 : i64} {
  func.func @_max4_kernel(%arg0: i32, %arg1: memref<8x128xf32, #tpu.memory_space<vmem>>, %arg2: memref<8x128xf32, #tpu.memory_space<vmem>>, %arg3: memref<8x128xf32, #tpu.memory_space<vmem>>, %arg4: memref<8x128xf32, #tpu.memory_space<vmem>>, %arg5: memref<8x128xf32, #tpu.memory_space<vmem>>) attributes {dimension_semantics = [#tpu.dimension_semantics<parallel>], iteration_bounds = array<i64: 1>, scalar_prefetch = 0 : i64, scratch_operands = 0 : i64, tpu.core_type = #tpu.core_type<tc>, window_params = [{transform_indices = @transform_0, window_bounds = array<i64: 8, 128>}, {transform_indices = @transform_1, window_bounds = array<i64: 8, 128>}, {transform_indices = @transform_2, window_bounds = array<i64: 8, 128>}, {transform_indices = @transform_3, window_bounds = array<i64: 8, 128>}, {transform_indices = @transform_4, window_bounds = array<i64: 8, 128>}]} {
    %c0 = arith.constant 0 : index
    %c0_0 = arith.constant 0 : index
    %0 = vector.load %arg1[%c0, %c0_0] : memref<8x128xf32, #tpu.memory_space<vmem>>, vector<8x128xf32>
    %c0_1 = arith.constant 0 : index
    %c0_2 = arith.constant 0 : index
    %1 = vector.load %arg2[%c0_1, %c0_2] : memref<8x128xf32, #tpu.memory_space<vmem>>, vector<8x128xf32>
    %2 = arith.maximumf %0, %1 : vector<8x128xf32>
    %c0_3 = arith.constant 0 : index
    %c0_4 = arith.constant 0 : index
    %3 = vector.load %arg3[%c0_3, %c0_4] : memref<8x128xf32, #tpu.memory_space<vmem>>, vector<8x128xf32>
    %c0_5 = arith.constant 0 : index
    %c0_6 = arith.constant 0 : index
    %4 = vector.load %arg4[%c0_5, %c0_6] : memref<8x128xf32, #tpu.memory_space<vmem>>, vector<8x128xf32>
    %5 = arith.maximumf %3, %4 : vector<8x128xf32>
    %6 = arith.maximumf %2, %5 : vector<8x128xf32>
    %c0_7 = arith.constant 0 : index
    %c0_8 = arith.constant 0 : index
    %7 = vector.load %arg5[%c0_7, %c0_8] : memref<8x128xf32, #tpu.memory_space<vmem>>, vector<8x128xf32>
    tpu.vector_store %arg5[%c0_7, %c0_8], %6 {strides = array<i32>} : memref<8x128xf32, #tpu.memory_space<vmem>>, vector<8x128xf32>,
    return
  }
  func.func @transform_0(%arg0: i32) -> (i32, i32) {
    %c0_i32 = arith.constant 0 : i32
    %c0_i32_0 = arith.constant 0 : i32
    return %arg0, %c0_i32 : i32, i32
  }
  func.func @transform_1(%arg0: i32) -> (i32, i32) {
    %c0_i32 = arith.constant 0 : i32
    %c0_i32_0 = arith.constant 0 : i32
    return %arg0, %c0_i32 : i32, i32
  }
  func.func @transform_2(%arg0: i32) -> (i32, i32) {
    %c0_i32 = arith.constant 0 : i32
    %c0_i32_0 = arith.constant 0 : i32
    return %arg0, %c0_i32 : i32, i32
  }
  func.func @transform_3(%arg0: i32) -> (i32, i32) {
    %c0_i32 = arith.constant 0 : i32
    %c0_i32_0 = arith.constant 0 : i32
    return %arg0, %c0_i32 : i32, i32
  }
  func.func @transform_4(%arg0: i32) -> (i32, i32) {
    %c0_i32 = arith.constant 0 : i32
    %c0_i32_0 = arith.constant 0 : i32
    return %arg0, %c0_i32 : i32, i32
  }
}

module attributes {stable_mosaic.version = 11 : i64} {
  func.func @_double_conv3x3_kernel(%arg0: i32, %arg1: memref<1x10x64xf32, #tpu.memory_space<vmem>>, %arg2: memref<3x64x128xbf16, #tpu.memory_space<vmem>>, %arg3: memref<1x128xf32, #tpu.memory_space<vmem>>, %arg4: memref<3x128x128xbf16, #tpu.memory_space<vmem>>, %arg5: memref<1x128xf32, #tpu.memory_space<vmem>>, %arg6: memref<1x8x128xf32, #tpu.memory_space<vmem>>, %arg7: memref<10x128xf32, #tpu.memory_space<vmem>>) attributes {dimension_semantics = [#tpu.dimension_semantics<parallel>], iteration_bounds = array<i64: 2>, scalar_prefetch = 0 : i64, scratch_operands = 1 : i64, tpu.core_type = #tpu.core_type<tc>, window_params = [{transform_indices = @transform_0, window_bounds = array<i64: 1, 10, 64>}, {pipeline_mode = #tpu.pipeline_mode<synchronous>, transform_indices = @transform_1, window_bounds = array<i64: 3, 64, 128>}, {pipeline_mode = #tpu.pipeline_mode<synchronous>, transform_indices = @transform_2, window_bounds = array<i64: 1, 128>}, {pipeline_mode = #tpu.pipeline_mode<synchronous>, transform_indices = @transform_3, window_bounds = array<i64: 3, 128, 128>}, {pipeline_mode = #tpu.pipeline_mode<synchronous>, transform_indices = @transform_4, window_bounds = array<i64: 1, 128>}, {transform_indices = @transform_5, window_bounds = array<i64: 1, 8, 128>}]} {
    %cst = arith.constant 0.000000e+00 : f32
    %0 = vector.broadcast %cst : f32 to vector<8x128xf32>
    %c0 = arith.constant 0 : index
    %c0_0 = arith.constant 0 : index
    %c0_1 = arith.constant 0 : index
    %1 = vector.load %arg1[%c0, %c0_0, %c0_1] : memref<1x10x64xf32, #tpu.memory_space<vmem>>, vector<1x8x64xf32>
    %2 = vector.shape_cast %1 : vector<1x8x64xf32> to vector<8x64xf32>
    %3 = arith.truncf %2 : vector<8x64xf32> to vector<8x64xbf16>
    %c0_2 = arith.constant 0 : index
    %c0_3 = arith.constant 0 : index
    %c0_4 = arith.constant 0 : index
    %4 = vector.load %arg2[%c0_2, %c0_3, %c0_4] : memref<3x64x128xbf16, #tpu.memory_space<vmem>>, vector<1x64x128xbf16>
    %5 = vector.shape_cast %4 : vector<1x64x128xbf16> to vector<64x128xbf16>
    %cst_5 = arith.constant dense<0.000000e+00> : vector<8x128xf32>
    %6 = tpu.matmul %3, %5, %cst_5 {dimension_numbers = #tpu.dot_dimension_numbers<[1], [0], [0], [1], [0, 0, 1, 1], [], []>} : vector<8x64xbf16>, vector<64x128xbf16>, vector<8x128xf32> -> vector<8x128xf32>
    %7 = arith.addf %0, %6 : vector<8x128xf32>
    %c0_6 = arith.constant 0 : index
    %c1 = arith.constant 1 : index
    %c0_7 = arith.constant 0 : index
    %8 = vector.load %arg1[%c0_6, %c1, %c0_7] : memref<1x10x64xf32, #tpu.memory_space<vmem>>, vector<1x8x64xf32>
    %9 = vector.shape_cast %8 : vector<1x8x64xf32> to vector<8x64xf32>
    %10 = arith.truncf %9 : vector<8x64xf32> to vector<8x64xbf16>
    %c1_8 = arith.constant 1 : index
    %c0_9 = arith.constant 0 : index
    %c0_10 = arith.constant 0 : index
    %11 = vector.load %arg2[%c1_8, %c0_9, %c0_10] : memref<3x64x128xbf16, #tpu.memory_space<vmem>>, vector<1x64x128xbf16>
    %12 = vector.shape_cast %11 : vector<1x64x128xbf16> to vector<64x128xbf16>
    %cst_11 = arith.constant dense<0.000000e+00> : vector<8x128xf32>
    %13 = tpu.matmul %10, %12, %cst_11 {dimension_numbers = #tpu.dot_dimension_numbers<[1], [0], [0], [1], [0, 0, 1, 1], [], []>} : vector<8x64xbf16>, vector<64x128xbf16>, vector<8x128xf32> -> vector<8x128xf32>
    %14 = arith.addf %7, %13 : vector<8x128xf32>
    %c0_12 = arith.constant 0 : index
    %c2 = arith.constant 2 : index
    %c0_13 = arith.constant 0 : index
    %15 = vector.load %arg1[%c0_12, %c2, %c0_13] : memref<1x10x64xf32, #tpu.memory_space<vmem>>, vector<1x8x64xf32>
    %16 = vector.shape_cast %15 : vector<1x8x64xf32> to vector<8x64xf32>
    %17 = arith.truncf %16 : vector<8x64xf32> to vector<8x64xbf16>
    %c2_14 = arith.constant 2 : index
    %c0_15 = arith.constant 0 : index
    %c0_16 = arith.constant 0 : index
    %18 = vector.load %arg2[%c2_14, %c0_15, %c0_16] : memref<3x64x128xbf16, #tpu.memory_space<vmem>>, vector<1x64x128xbf16>
    %19 = vector.shape_cast %18 : vector<1x64x128xbf16> to vector<64x128xbf16>
    %cst_17 = arith.constant dense<0.000000e+00> : vector<8x128xf32>
    %20 = tpu.matmul %17, %19, %cst_17 {dimension_numbers = #tpu.dot_dimension_numbers<[1], [0], [0], [1], [0, 0, 1, 1], [], []>} : vector<8x64xbf16>, vector<64x128xbf16>, vector<8x128xf32> -> vector<8x128xf32>
    %21 = arith.addf %14, %20 : vector<8x128xf32>
    %c0_18 = arith.constant 0 : index
    %c0_19 = arith.constant 0 : index
    %22 = vector.load %arg3[%c0_18, %c0_19] : memref<1x128xf32, #tpu.memory_space<vmem>>, vector<1x128xf32>
    %23 = vector.broadcast %22 : vector<1x128xf32> to vector<8x128xf32>
    %24 = arith.addf %21, %23 : vector<8x128xf32>
    %cst_20 = arith.constant 0.000000e+00 : f32
    %25 = vector.broadcast %cst_20 : f32 to vector<8x128xf32>
    %26 = arith.maximumf %24, %25 : vector<8x128xf32>
    %cst_21 = arith.constant 0.000000e+00 : f32
    %27 = vector.broadcast %cst_21 : f32 to vector<10x128xf32>
    %c0_22 = arith.constant 0 : index
    %c0_23 = arith.constant 0 : index
    %28 = vector.load %arg7[%c0_22, %c0_23] : memref<10x128xf32, #tpu.memory_space<vmem>>, vector<10x128xf32>
    tpu.vector_store %arg7[%c0_22, %c0_23], %27 {strides = array<i32>} : memref<10x128xf32, #tpu.memory_space<vmem>>, vector<10x128xf32>,
    %c1_24 = arith.constant 1 : index
    %c0_25 = arith.constant 0 : index
    %29 = vector.load %arg7[%c1_24, %c0_25] : memref<10x128xf32, #tpu.memory_space<vmem>>, vector<8x128xf32>
    tpu.vector_store %arg7[%c1_24, %c0_25], %26 {strides = array<i32>} : memref<10x128xf32, #tpu.memory_space<vmem>>, vector<8x128xf32>,
    %cst_26 = arith.constant 0.000000e+00 : f32
    %30 = vector.broadcast %cst_26 : f32 to vector<8x128xf32>
    %c0_27 = arith.constant 0 : index
    %c0_28 = arith.constant 0 : index
    %31 = vector.load %arg7[%c0_27, %c0_28] : memref<10x128xf32, #tpu.memory_space<vmem>>, vector<8x128xf32>
    %32 = arith.truncf %31 : vector<8x128xf32> to vector<8x128xbf16>
    %c0_29 = arith.constant 0 : index
    %c0_30 = arith.constant 0 : index
    %c0_31 = arith.constant 0 : index
    %33 = vector.load %arg4[%c0_29, %c0_30, %c0_31] : memref<3x128x128xbf16, #tpu.memory_space<vmem>>, vector<1x128x128xbf16>
    %34 = vector.shape_cast %33 : vector<1x128x128xbf16> to vector<128x128xbf16>
    %cst_32 = arith.constant dense<0.000000e+00> : vector<8x128xf32>
    %35 = tpu.matmul %32, %34, %cst_32 {dimension_numbers = #tpu.dot_dimension_numbers<[1], [0], [0], [1], [0, 0, 1, 1], [], []>} : vector<8x128xbf16>, vector<128x128xbf16>, vector<8x128xf32> -> vector<8x128xf32>
    %36 = arith.addf %30, %35 : vector<8x128xf32>
    %c1_33 = arith.constant 1 : index
    %c0_34 = arith.constant 0 : index
    %37 = vector.load %arg7[%c1_33, %c0_34] : memref<10x128xf32, #tpu.memory_space<vmem>>, vector<8x128xf32>
    %38 = arith.truncf %37 : vector<8x128xf32> to vector<8x128xbf16>
    %c1_35 = arith.constant 1 : index
    %c0_36 = arith.constant 0 : index
    %c0_37 = arith.constant 0 : index
    %39 = vector.load %arg4[%c1_35, %c0_36, %c0_37] : memref<3x128x128xbf16, #tpu.memory_space<vmem>>, vector<1x128x128xbf16>
    %40 = vector.shape_cast %39 : vector<1x128x128xbf16> to vector<128x128xbf16>
    %cst_38 = arith.constant dense<0.000000e+00> : vector<8x128xf32>
    %41 = tpu.matmul %38, %40, %cst_38 {dimension_numbers = #tpu.dot_dimension_numbers<[1], [0], [0], [1], [0, 0, 1, 1], [], []>} : vector<8x128xbf16>, vector<128x128xbf16>, vector<8x128xf32> -> vector<8x128xf32>
    %42 = arith.addf %36, %41 : vector<8x128xf32>
    %c2_39 = arith.constant 2 : index
    %c0_40 = arith.constant 0 : index
    %43 = vector.load %arg7[%c2_39, %c0_40] : memref<10x128xf32, #tpu.memory_space<vmem>>, vector<8x128xf32>
    %44 = arith.truncf %43 : vector<8x128xf32> to vector<8x128xbf16>
    %c2_41 = arith.constant 2 : index
    %c0_42 = arith.constant 0 : index
    %c0_43 = arith.constant 0 : index
    %45 = vector.load %arg4[%c2_41, %c0_42, %c0_43] : memref<3x128x128xbf16, #tpu.memory_space<vmem>>, vector<1x128x128xbf16>
    %46 = vector.shape_cast %45 : vector<1x128x128xbf16> to vector<128x128xbf16>
    %cst_44 = arith.constant dense<0.000000e+00> : vector<8x128xf32>
    %47 = tpu.matmul %44, %46, %cst_44 {dimension_numbers = #tpu.dot_dimension_numbers<[1], [0], [0], [1], [0, 0, 1, 1], [], []>} : vector<8x128xbf16>, vector<128x128xbf16>, vector<8x128xf32> -> vector<8x128xf32>
    %48 = arith.addf %42, %47 : vector<8x128xf32>
    %c0_45 = arith.constant 0 : index
    %c0_46 = arith.constant 0 : index
    %49 = vector.load %arg5[%c0_45, %c0_46] : memref<1x128xf32, #tpu.memory_space<vmem>>, vector<1x128xf32>
    %50 = vector.broadcast %49 : vector<1x128xf32> to vector<8x128xf32>
    %51 = arith.addf %48, %50 : vector<8x128xf32>
    %cst_47 = arith.constant 0.000000e+00 : f32
    %52 = vector.broadcast %cst_47 : f32 to vector<8x128xf32>
    %53 = arith.maximumf %51, %52 : vector<8x128xf32>
    %c0_48 = arith.constant 0 : index
    %c0_49 = arith.constant 0 : index
    %c0_50 = arith.constant 0 : index
    %54 = vector.load %arg6[%c0_48, %c0_49, %c0_50] : memref<1x8x128xf32, #tpu.memory_space<vmem>>, vector<1x8x128xf32>
    %55 = vector.shape_cast %54 : vector<1x8x128xf32> to vector<8x128xf32>
    %56 = vector.shape_cast %53 : vector<8x128xf32> to vector<1x8x128xf32>
    tpu.vector_store %arg6[%c0_48, %c0_49, %c0_50], %56 {strides = array<i32>} : memref<1x8x128xf32, #tpu.memory_space<vmem>>, vector<1x8x128xf32>,
    return
  }
  func.func @transform_0(%arg0: i32) -> (i32, i32, i32) {
    %c0_i32 = arith.constant 0 : i32
    %c0_i32_0 = arith.constant 0 : i32
    %c0_i32_1 = arith.constant 0 : i32
    return %arg0, %c0_i32, %c0_i32_0 : i32, i32, i32
  }
  func.func @transform_1(%arg0: i32) -> (i32, i32, i32) {
    %c0_i32 = arith.constant 0 : i32
    %c0_i32_0 = arith.constant 0 : i32
    %c0_i32_1 = arith.constant 0 : i32
    %c0_i32_2 = arith.constant 0 : i32
    return %c0_i32, %c0_i32_0, %c0_i32_1 : i32, i32, i32
  }
  func.func @transform_2(%arg0: i32) -> (i32, i32) {
    %c0_i32 = arith.constant 0 : i32
    %c0_i32_0 = arith.constant 0 : i32
    %c0_i32_1 = arith.constant 0 : i32
    return %c0_i32, %c0_i32_0 : i32, i32
  }
  func.func @transform_3(%arg0: i32) -> (i32, i32, i32) {
    %c0_i32 = arith.constant 0 : i32
    %c0_i32_0 = arith.constant 0 : i32
    %c0_i32_1 = arith.constant 0 : i32
    %c0_i32_2 = arith.constant 0 : i32
    return %c0_i32, %c0_i32_0, %c0_i32_1 : i32, i32, i32
  }
  func.func @transform_4(%arg0: i32) -> (i32, i32) {
    %c0_i32 = arith.constant 0 : i32
    %c0_i32_0 = arith.constant 0 : i32
    %c0_i32_1 = arith.constant 0 : i32
    return %c0_i32, %c0_i32_0 : i32, i32
  }
  func.func @transform_5(%arg0: i32) -> (i32, i32, i32) {
    %c0_i32 = arith.constant 0 : i32
    %c0_i32_0 = arith.constant 0 : i32
    %c0_i32_1 = arith.constant 0 : i32
    return %arg0, %c0_i32, %c0_i32_0 : i32, i32, i32
  }
}

module attributes {stable_mosaic.version = 11 : i64} {
  func.func @_double_conv3x3_kernel(%arg0: i32, %arg1: memref<1x6x64xf32, #tpu.memory_space<vmem>>, %arg2: memref<3x64x128xbf16, #tpu.memory_space<vmem>>, %arg3: memref<1x128xf32, #tpu.memory_space<vmem>>, %arg4: memref<3x128x128xbf16, #tpu.memory_space<vmem>>, %arg5: memref<1x128xf32, #tpu.memory_space<vmem>>, %arg6: memref<1x4x128xf32, #tpu.memory_space<vmem>>, %arg7: memref<6x128xf32, #tpu.memory_space<vmem>>) attributes {dimension_semantics = [#tpu.dimension_semantics<parallel>], iteration_bounds = array<i64: 2>, scalar_prefetch = 0 : i64, scratch_operands = 1 : i64, tpu.core_type = #tpu.core_type<tc>, window_params = [{transform_indices = @transform_0, window_bounds = array<i64: 1, 6, 64>}, {pipeline_mode = #tpu.pipeline_mode<synchronous>, transform_indices = @transform_1, window_bounds = array<i64: 3, 64, 128>}, {pipeline_mode = #tpu.pipeline_mode<synchronous>, transform_indices = @transform_2, window_bounds = array<i64: 1, 128>}, {pipeline_mode = #tpu.pipeline_mode<synchronous>, transform_indices = @transform_3, window_bounds = array<i64: 3, 128, 128>}, {pipeline_mode = #tpu.pipeline_mode<synchronous>, transform_indices = @transform_4, window_bounds = array<i64: 1, 128>}, {transform_indices = @transform_5, window_bounds = array<i64: 1, 4, 128>}]} {
    %cst = arith.constant 0.000000e+00 : f32
    %0 = vector.broadcast %cst : f32 to vector<4x128xf32>
    %c0 = arith.constant 0 : index
    %c0_0 = arith.constant 0 : index
    %c0_1 = arith.constant 0 : index
    %1 = vector.load %arg1[%c0, %c0_0, %c0_1] : memref<1x6x64xf32, #tpu.memory_space<vmem>>, vector<1x4x64xf32>
    %2 = vector.shape_cast %1 : vector<1x4x64xf32> to vector<4x64xf32>
    %3 = arith.truncf %2 : vector<4x64xf32> to vector<4x64xbf16>
    %c0_2 = arith.constant 0 : index
    %c0_3 = arith.constant 0 : index
    %c0_4 = arith.constant 0 : index
    %4 = vector.load %arg2[%c0_2, %c0_3, %c0_4] : memref<3x64x128xbf16, #tpu.memory_space<vmem>>, vector<1x64x128xbf16>
    %5 = vector.shape_cast %4 : vector<1x64x128xbf16> to vector<64x128xbf16>
    %cst_5 = arith.constant dense<0.000000e+00> : vector<4x128xf32>
    %6 = tpu.matmul %3, %5, %cst_5 {dimension_numbers = #tpu.dot_dimension_numbers<[1], [0], [0], [1], [0, 0, 1, 1], [], []>} : vector<4x64xbf16>, vector<64x128xbf16>, vector<4x128xf32> -> vector<4x128xf32>
    %7 = arith.addf %0, %6 : vector<4x128xf32>
    %c0_6 = arith.constant 0 : index
    %c1 = arith.constant 1 : index
    %c0_7 = arith.constant 0 : index
    %8 = vector.load %arg1[%c0_6, %c1, %c0_7] : memref<1x6x64xf32, #tpu.memory_space<vmem>>, vector<1x4x64xf32>
    %9 = vector.shape_cast %8 : vector<1x4x64xf32> to vector<4x64xf32>
    %10 = arith.truncf %9 : vector<4x64xf32> to vector<4x64xbf16>
    %c1_8 = arith.constant 1 : index
    %c0_9 = arith.constant 0 : index
    %c0_10 = arith.constant 0 : index
    %11 = vector.load %arg2[%c1_8, %c0_9, %c0_10] : memref<3x64x128xbf16, #tpu.memory_space<vmem>>, vector<1x64x128xbf16>
    %12 = vector.shape_cast %11 : vector<1x64x128xbf16> to vector<64x128xbf16>
    %cst_11 = arith.constant dense<0.000000e+00> : vector<4x128xf32>
    %13 = tpu.matmul %10, %12, %cst_11 {dimension_numbers = #tpu.dot_dimension_numbers<[1], [0], [0], [1], [0, 0, 1, 1], [], []>} : vector<4x64xbf16>, vector<64x128xbf16>, vector<4x128xf32> -> vector<4x128xf32>
    %14 = arith.addf %7, %13 : vector<4x128xf32>
    %c0_12 = arith.constant 0 : index
    %c2 = arith.constant 2 : index
    %c0_13 = arith.constant 0 : index
    %15 = vector.load %arg1[%c0_12, %c2, %c0_13] : memref<1x6x64xf32, #tpu.memory_space<vmem>>, vector<1x4x64xf32>
    %16 = vector.shape_cast %15 : vector<1x4x64xf32> to vector<4x64xf32>
    %17 = arith.truncf %16 : vector<4x64xf32> to vector<4x64xbf16>
    %c2_14 = arith.constant 2 : index
    %c0_15 = arith.constant 0 : index
    %c0_16 = arith.constant 0 : index
    %18 = vector.load %arg2[%c2_14, %c0_15, %c0_16] : memref<3x64x128xbf16, #tpu.memory_space<vmem>>, vector<1x64x128xbf16>
    %19 = vector.shape_cast %18 : vector<1x64x128xbf16> to vector<64x128xbf16>
    %cst_17 = arith.constant dense<0.000000e+00> : vector<4x128xf32>
    %20 = tpu.matmul %17, %19, %cst_17 {dimension_numbers = #tpu.dot_dimension_numbers<[1], [0], [0], [1], [0, 0, 1, 1], [], []>} : vector<4x64xbf16>, vector<64x128xbf16>, vector<4x128xf32> -> vector<4x128xf32>
    %21 = arith.addf %14, %20 : vector<4x128xf32>
    %c0_18 = arith.constant 0 : index
    %c0_19 = arith.constant 0 : index
    %22 = vector.load %arg3[%c0_18, %c0_19] : memref<1x128xf32, #tpu.memory_space<vmem>>, vector<1x128xf32>
    %23 = vector.broadcast %22 : vector<1x128xf32> to vector<4x128xf32>
    %24 = arith.addf %21, %23 : vector<4x128xf32>
    %cst_20 = arith.constant 0.000000e+00 : f32
    %25 = vector.broadcast %cst_20 : f32 to vector<4x128xf32>
    %26 = arith.maximumf %24, %25 : vector<4x128xf32>
    %cst_21 = arith.constant 0.000000e+00 : f32
    %27 = vector.broadcast %cst_21 : f32 to vector<6x128xf32>
    %c0_22 = arith.constant 0 : index
    %c0_23 = arith.constant 0 : index
    %28 = vector.load %arg7[%c0_22, %c0_23] : memref<6x128xf32, #tpu.memory_space<vmem>>, vector<6x128xf32>
    tpu.vector_store %arg7[%c0_22, %c0_23], %27 {strides = array<i32>} : memref<6x128xf32, #tpu.memory_space<vmem>>, vector<6x128xf32>,
    %c1_24 = arith.constant 1 : index
    %c0_25 = arith.constant 0 : index
    %29 = vector.load %arg7[%c1_24, %c0_25] : memref<6x128xf32, #tpu.memory_space<vmem>>, vector<4x128xf32>
    tpu.vector_store %arg7[%c1_24, %c0_25], %26 {strides = array<i32>} : memref<6x128xf32, #tpu.memory_space<vmem>>, vector<4x128xf32>,
    %cst_26 = arith.constant 0.000000e+00 : f32
    %30 = vector.broadcast %cst_26 : f32 to vector<4x128xf32>
    %c0_27 = arith.constant 0 : index
    %c0_28 = arith.constant 0 : index
    %31 = vector.load %arg7[%c0_27, %c0_28] : memref<6x128xf32, #tpu.memory_space<vmem>>, vector<4x128xf32>
    %32 = arith.truncf %31 : vector<4x128xf32> to vector<4x128xbf16>
    %c0_29 = arith.constant 0 : index
    %c0_30 = arith.constant 0 : index
    %c0_31 = arith.constant 0 : index
    %33 = vector.load %arg4[%c0_29, %c0_30, %c0_31] : memref<3x128x128xbf16, #tpu.memory_space<vmem>>, vector<1x128x128xbf16>
    %34 = vector.shape_cast %33 : vector<1x128x128xbf16> to vector<128x128xbf16>
    %cst_32 = arith.constant dense<0.000000e+00> : vector<4x128xf32>
    %35 = tpu.matmul %32, %34, %cst_32 {dimension_numbers = #tpu.dot_dimension_numbers<[1], [0], [0], [1], [0, 0, 1, 1], [], []>} : vector<4x128xbf16>, vector<128x128xbf16>, vector<4x128xf32> -> vector<4x128xf32>
    %36 = arith.addf %30, %35 : vector<4x128xf32>
    %c1_33 = arith.constant 1 : index
    %c0_34 = arith.constant 0 : index
    %37 = vector.load %arg7[%c1_33, %c0_34] : memref<6x128xf32, #tpu.memory_space<vmem>>, vector<4x128xf32>
    %38 = arith.truncf %37 : vector<4x128xf32> to vector<4x128xbf16>
    %c1_35 = arith.constant 1 : index
    %c0_36 = arith.constant 0 : index
    %c0_37 = arith.constant 0 : index
    %39 = vector.load %arg4[%c1_35, %c0_36, %c0_37] : memref<3x128x128xbf16, #tpu.memory_space<vmem>>, vector<1x128x128xbf16>
    %40 = vector.shape_cast %39 : vector<1x128x128xbf16> to vector<128x128xbf16>
    %cst_38 = arith.constant dense<0.000000e+00> : vector<4x128xf32>
    %41 = tpu.matmul %38, %40, %cst_38 {dimension_numbers = #tpu.dot_dimension_numbers<[1], [0], [0], [1], [0, 0, 1, 1], [], []>} : vector<4x128xbf16>, vector<128x128xbf16>, vector<4x128xf32> -> vector<4x128xf32>
    %42 = arith.addf %36, %41 : vector<4x128xf32>
    %c2_39 = arith.constant 2 : index
    %c0_40 = arith.constant 0 : index
    %43 = vector.load %arg7[%c2_39, %c0_40] : memref<6x128xf32, #tpu.memory_space<vmem>>, vector<4x128xf32>
    %44 = arith.truncf %43 : vector<4x128xf32> to vector<4x128xbf16>
    %c2_41 = arith.constant 2 : index
    %c0_42 = arith.constant 0 : index
    %c0_43 = arith.constant 0 : index
    %45 = vector.load %arg4[%c2_41, %c0_42, %c0_43] : memref<3x128x128xbf16, #tpu.memory_space<vmem>>, vector<1x128x128xbf16>
    %46 = vector.shape_cast %45 : vector<1x128x128xbf16> to vector<128x128xbf16>
    %cst_44 = arith.constant dense<0.000000e+00> : vector<4x128xf32>
    %47 = tpu.matmul %44, %46, %cst_44 {dimension_numbers = #tpu.dot_dimension_numbers<[1], [0], [0], [1], [0, 0, 1, 1], [], []>} : vector<4x128xbf16>, vector<128x128xbf16>, vector<4x128xf32> -> vector<4x128xf32>
    %48 = arith.addf %42, %47 : vector<4x128xf32>
    %c0_45 = arith.constant 0 : index
    %c0_46 = arith.constant 0 : index
    %49 = vector.load %arg5[%c0_45, %c0_46] : memref<1x128xf32, #tpu.memory_space<vmem>>, vector<1x128xf32>
    %50 = vector.broadcast %49 : vector<1x128xf32> to vector<4x128xf32>
    %51 = arith.addf %48, %50 : vector<4x128xf32>
    %cst_47 = arith.constant 0.000000e+00 : f32
    %52 = vector.broadcast %cst_47 : f32 to vector<4x128xf32>
    %53 = arith.maximumf %51, %52 : vector<4x128xf32>
    %c0_48 = arith.constant 0 : index
    %c0_49 = arith.constant 0 : index
    %c0_50 = arith.constant 0 : index
    %54 = vector.load %arg6[%c0_48, %c0_49, %c0_50] : memref<1x4x128xf32, #tpu.memory_space<vmem>>, vector<1x4x128xf32>
    %55 = vector.shape_cast %54 : vector<1x4x128xf32> to vector<4x128xf32>
    %56 = vector.shape_cast %53 : vector<4x128xf32> to vector<1x4x128xf32>
    tpu.vector_store %arg6[%c0_48, %c0_49, %c0_50], %56 {strides = array<i32>} : memref<1x4x128xf32, #tpu.memory_space<vmem>>, vector<1x4x128xf32>,
    return
  }
  func.func @transform_0(%arg0: i32) -> (i32, i32, i32) {
    %c0_i32 = arith.constant 0 : i32
    %c0_i32_0 = arith.constant 0 : i32
    %c0_i32_1 = arith.constant 0 : i32
    return %arg0, %c0_i32, %c0_i32_0 : i32, i32, i32
  }
  func.func @transform_1(%arg0: i32) -> (i32, i32, i32) {
    %c0_i32 = arith.constant 0 : i32
    %c0_i32_0 = arith.constant 0 : i32
    %c0_i32_1 = arith.constant 0 : i32
    %c0_i32_2 = arith.constant 0 : i32
    return %c0_i32, %c0_i32_0, %c0_i32_1 : i32, i32, i32
  }
  func.func @transform_2(%arg0: i32) -> (i32, i32) {
    %c0_i32 = arith.constant 0 : i32
    %c0_i32_0 = arith.constant 0 : i32
    %c0_i32_1 = arith.constant 0 : i32
    return %c0_i32, %c0_i32_0 : i32, i32
  }
  func.func @transform_3(%arg0: i32) -> (i32, i32, i32) {
    %c0_i32 = arith.constant 0 : i32
    %c0_i32_0 = arith.constant 0 : i32
    %c0_i32_1 = arith.constant 0 : i32
    %c0_i32_2 = arith.constant 0 : i32
    return %c0_i32, %c0_i32_0, %c0_i32_1 : i32, i32, i32
  }
  func.func @transform_4(%arg0: i32) -> (i32, i32) {
    %c0_i32 = arith.constant 0 : i32
    %c0_i32_0 = arith.constant 0 : i32
    %c0_i32_1 = arith.constant 0 : i32
    return %c0_i32, %c0_i32_0 : i32, i32
  }
  func.func @transform_5(%arg0: i32) -> (i32, i32, i32) {
    %c0_i32 = arith.constant 0 : i32
    %c0_i32_0 = arith.constant 0 : i32
    %c0_i32_1 = arith.constant 0 : i32
    return %arg0, %c0_i32, %c0_i32_0 : i32, i32, i32
  }
}

module attributes {stable_mosaic.version = 11 : i64} {
  func.func @_double_conv3x3_kernel(%arg0: i32, %arg1: memref<1x4x64xf32, #tpu.memory_space<vmem>>, %arg2: memref<3x64x128xbf16, #tpu.memory_space<vmem>>, %arg3: memref<1x128xf32, #tpu.memory_space<vmem>>, %arg4: memref<3x128x128xbf16, #tpu.memory_space<vmem>>, %arg5: memref<1x128xf32, #tpu.memory_space<vmem>>, %arg6: memref<1x2x128xf32, #tpu.memory_space<vmem>>, %arg7: memref<4x128xf32, #tpu.memory_space<vmem>>) attributes {dimension_semantics = [#tpu.dimension_semantics<parallel>], iteration_bounds = array<i64: 2>, scalar_prefetch = 0 : i64, scratch_operands = 1 : i64, tpu.core_type = #tpu.core_type<tc>, window_params = [{transform_indices = @transform_0, window_bounds = array<i64: 1, 4, 64>}, {pipeline_mode = #tpu.pipeline_mode<synchronous>, transform_indices = @transform_1, window_bounds = array<i64: 3, 64, 128>}, {pipeline_mode = #tpu.pipeline_mode<synchronous>, transform_indices = @transform_2, window_bounds = array<i64: 1, 128>}, {pipeline_mode = #tpu.pipeline_mode<synchronous>, transform_indices = @transform_3, window_bounds = array<i64: 3, 128, 128>}, {pipeline_mode = #tpu.pipeline_mode<synchronous>, transform_indices = @transform_4, window_bounds = array<i64: 1, 128>}, {transform_indices = @transform_5, window_bounds = array<i64: 1, 2, 128>}]} {
    %cst = arith.constant 0.000000e+00 : f32
    %0 = vector.broadcast %cst : f32 to vector<2x128xf32>
    %c0 = arith.constant 0 : index
    %c0_0 = arith.constant 0 : index
    %c0_1 = arith.constant 0 : index
    %1 = vector.load %arg1[%c0, %c0_0, %c0_1] : memref<1x4x64xf32, #tpu.memory_space<vmem>>, vector<1x2x64xf32>
    %2 = vector.shape_cast %1 : vector<1x2x64xf32> to vector<2x64xf32>
    %3 = arith.truncf %2 : vector<2x64xf32> to vector<2x64xbf16>
    %c0_2 = arith.constant 0 : index
    %c0_3 = arith.constant 0 : index
    %c0_4 = arith.constant 0 : index
    %4 = vector.load %arg2[%c0_2, %c0_3, %c0_4] : memref<3x64x128xbf16, #tpu.memory_space<vmem>>, vector<1x64x128xbf16>
    %5 = vector.shape_cast %4 : vector<1x64x128xbf16> to vector<64x128xbf16>
    %cst_5 = arith.constant dense<0.000000e+00> : vector<2x128xf32>
    %6 = tpu.matmul %3, %5, %cst_5 {dimension_numbers = #tpu.dot_dimension_numbers<[1], [0], [0], [1], [0, 0, 1, 1], [], []>} : vector<2x64xbf16>, vector<64x128xbf16>, vector<2x128xf32> -> vector<2x128xf32>
    %7 = arith.addf %0, %6 : vector<2x128xf32>
    %c0_6 = arith.constant 0 : index
    %c1 = arith.constant 1 : index
    %c0_7 = arith.constant 0 : index
    %8 = vector.load %arg1[%c0_6, %c1, %c0_7] : memref<1x4x64xf32, #tpu.memory_space<vmem>>, vector<1x2x64xf32>
    %9 = vector.shape_cast %8 : vector<1x2x64xf32> to vector<2x64xf32>
    %10 = arith.truncf %9 : vector<2x64xf32> to vector<2x64xbf16>
    %c1_8 = arith.constant 1 : index
    %c0_9 = arith.constant 0 : index
    %c0_10 = arith.constant 0 : index
    %11 = vector.load %arg2[%c1_8, %c0_9, %c0_10] : memref<3x64x128xbf16, #tpu.memory_space<vmem>>, vector<1x64x128xbf16>
    %12 = vector.shape_cast %11 : vector<1x64x128xbf16> to vector<64x128xbf16>
    %cst_11 = arith.constant dense<0.000000e+00> : vector<2x128xf32>
    %13 = tpu.matmul %10, %12, %cst_11 {dimension_numbers = #tpu.dot_dimension_numbers<[1], [0], [0], [1], [0, 0, 1, 1], [], []>} : vector<2x64xbf16>, vector<64x128xbf16>, vector<2x128xf32> -> vector<2x128xf32>
    %14 = arith.addf %7, %13 : vector<2x128xf32>
    %c0_12 = arith.constant 0 : index
    %c2 = arith.constant 2 : index
    %c0_13 = arith.constant 0 : index
    %15 = vector.load %arg1[%c0_12, %c2, %c0_13] : memref<1x4x64xf32, #tpu.memory_space<vmem>>, vector<1x2x64xf32>
    %16 = vector.shape_cast %15 : vector<1x2x64xf32> to vector<2x64xf32>
    %17 = arith.truncf %16 : vector<2x64xf32> to vector<2x64xbf16>
    %c2_14 = arith.constant 2 : index
    %c0_15 = arith.constant 0 : index
    %c0_16 = arith.constant 0 : index
    %18 = vector.load %arg2[%c2_14, %c0_15, %c0_16] : memref<3x64x128xbf16, #tpu.memory_space<vmem>>, vector<1x64x128xbf16>
    %19 = vector.shape_cast %18 : vector<1x64x128xbf16> to vector<64x128xbf16>
    %cst_17 = arith.constant dense<0.000000e+00> : vector<2x128xf32>
    %20 = tpu.matmul %17, %19, %cst_17 {dimension_numbers = #tpu.dot_dimension_numbers<[1], [0], [0], [1], [0, 0, 1, 1], [], []>} : vector<2x64xbf16>, vector<64x128xbf16>, vector<2x128xf32> -> vector<2x128xf32>
    %21 = arith.addf %14, %20 : vector<2x128xf32>
    %c0_18 = arith.constant 0 : index
    %c0_19 = arith.constant 0 : index
    %22 = vector.load %arg3[%c0_18, %c0_19] : memref<1x128xf32, #tpu.memory_space<vmem>>, vector<1x128xf32>
    %23 = vector.broadcast %22 : vector<1x128xf32> to vector<2x128xf32>
    %24 = arith.addf %21, %23 : vector<2x128xf32>
    %cst_20 = arith.constant 0.000000e+00 : f32
    %25 = vector.broadcast %cst_20 : f32 to vector<2x128xf32>
    %26 = arith.maximumf %24, %25 : vector<2x128xf32>
    %cst_21 = arith.constant 0.000000e+00 : f32
    %27 = vector.broadcast %cst_21 : f32 to vector<4x128xf32>
    %c0_22 = arith.constant 0 : index
    %c0_23 = arith.constant 0 : index
    %28 = vector.load %arg7[%c0_22, %c0_23] : memref<4x128xf32, #tpu.memory_space<vmem>>, vector<4x128xf32>
    tpu.vector_store %arg7[%c0_22, %c0_23], %27 {strides = array<i32>} : memref<4x128xf32, #tpu.memory_space<vmem>>, vector<4x128xf32>,
    %c1_24 = arith.constant 1 : index
    %c0_25 = arith.constant 0 : index
    %29 = vector.load %arg7[%c1_24, %c0_25] : memref<4x128xf32, #tpu.memory_space<vmem>>, vector<2x128xf32>
    tpu.vector_store %arg7[%c1_24, %c0_25], %26 {strides = array<i32>} : memref<4x128xf32, #tpu.memory_space<vmem>>, vector<2x128xf32>,
    %cst_26 = arith.constant 0.000000e+00 : f32
    %30 = vector.broadcast %cst_26 : f32 to vector<2x128xf32>
    %c0_27 = arith.constant 0 : index
    %c0_28 = arith.constant 0 : index
    %31 = vector.load %arg7[%c0_27, %c0_28] : memref<4x128xf32, #tpu.memory_space<vmem>>, vector<2x128xf32>
    %32 = arith.truncf %31 : vector<2x128xf32> to vector<2x128xbf16>
    %c0_29 = arith.constant 0 : index
    %c0_30 = arith.constant 0 : index
    %c0_31 = arith.constant 0 : index
    %33 = vector.load %arg4[%c0_29, %c0_30, %c0_31] : memref<3x128x128xbf16, #tpu.memory_space<vmem>>, vector<1x128x128xbf16>
    %34 = vector.shape_cast %33 : vector<1x128x128xbf16> to vector<128x128xbf16>
    %cst_32 = arith.constant dense<0.000000e+00> : vector<2x128xf32>
    %35 = tpu.matmul %32, %34, %cst_32 {dimension_numbers = #tpu.dot_dimension_numbers<[1], [0], [0], [1], [0, 0, 1, 1], [], []>} : vector<2x128xbf16>, vector<128x128xbf16>, vector<2x128xf32> -> vector<2x128xf32>
    %36 = arith.addf %30, %35 : vector<2x128xf32>
    %c1_33 = arith.constant 1 : index
    %c0_34 = arith.constant 0 : index
    %37 = vector.load %arg7[%c1_33, %c0_34] : memref<4x128xf32, #tpu.memory_space<vmem>>, vector<2x128xf32>
    %38 = arith.truncf %37 : vector<2x128xf32> to vector<2x128xbf16>
    %c1_35 = arith.constant 1 : index
    %c0_36 = arith.constant 0 : index
    %c0_37 = arith.constant 0 : index
    %39 = vector.load %arg4[%c1_35, %c0_36, %c0_37] : memref<3x128x128xbf16, #tpu.memory_space<vmem>>, vector<1x128x128xbf16>
    %40 = vector.shape_cast %39 : vector<1x128x128xbf16> to vector<128x128xbf16>
    %cst_38 = arith.constant dense<0.000000e+00> : vector<2x128xf32>
    %41 = tpu.matmul %38, %40, %cst_38 {dimension_numbers = #tpu.dot_dimension_numbers<[1], [0], [0], [1], [0, 0, 1, 1], [], []>} : vector<2x128xbf16>, vector<128x128xbf16>, vector<2x128xf32> -> vector<2x128xf32>
    %42 = arith.addf %36, %41 : vector<2x128xf32>
    %c2_39 = arith.constant 2 : index
    %c0_40 = arith.constant 0 : index
    %43 = vector.load %arg7[%c2_39, %c0_40] : memref<4x128xf32, #tpu.memory_space<vmem>>, vector<2x128xf32>
    %44 = arith.truncf %43 : vector<2x128xf32> to vector<2x128xbf16>
    %c2_41 = arith.constant 2 : index
    %c0_42 = arith.constant 0 : index
    %c0_43 = arith.constant 0 : index
    %45 = vector.load %arg4[%c2_41, %c0_42, %c0_43] : memref<3x128x128xbf16, #tpu.memory_space<vmem>>, vector<1x128x128xbf16>
    %46 = vector.shape_cast %45 : vector<1x128x128xbf16> to vector<128x128xbf16>
    %cst_44 = arith.constant dense<0.000000e+00> : vector<2x128xf32>
    %47 = tpu.matmul %44, %46, %cst_44 {dimension_numbers = #tpu.dot_dimension_numbers<[1], [0], [0], [1], [0, 0, 1, 1], [], []>} : vector<2x128xbf16>, vector<128x128xbf16>, vector<2x128xf32> -> vector<2x128xf32>
    %48 = arith.addf %42, %47 : vector<2x128xf32>
    %c0_45 = arith.constant 0 : index
    %c0_46 = arith.constant 0 : index
    %49 = vector.load %arg5[%c0_45, %c0_46] : memref<1x128xf32, #tpu.memory_space<vmem>>, vector<1x128xf32>
    %50 = vector.broadcast %49 : vector<1x128xf32> to vector<2x128xf32>
    %51 = arith.addf %48, %50 : vector<2x128xf32>
    %cst_47 = arith.constant 0.000000e+00 : f32
    %52 = vector.broadcast %cst_47 : f32 to vector<2x128xf32>
    %53 = arith.maximumf %51, %52 : vector<2x128xf32>
    %c0_48 = arith.constant 0 : index
    %c0_49 = arith.constant 0 : index
    %c0_50 = arith.constant 0 : index
    %54 = vector.load %arg6[%c0_48, %c0_49, %c0_50] : memref<1x2x128xf32, #tpu.memory_space<vmem>>, vector<1x2x128xf32>
    %55 = vector.shape_cast %54 : vector<1x2x128xf32> to vector<2x128xf32>
    %56 = vector.shape_cast %53 : vector<2x128xf32> to vector<1x2x128xf32>
    tpu.vector_store %arg6[%c0_48, %c0_49, %c0_50], %56 {strides = array<i32>} : memref<1x2x128xf32, #tpu.memory_space<vmem>>, vector<1x2x128xf32>,
    return
  }
  func.func @transform_0(%arg0: i32) -> (i32, i32, i32) {
    %c0_i32 = arith.constant 0 : i32
    %c0_i32_0 = arith.constant 0 : i32
    %c0_i32_1 = arith.constant 0 : i32
    return %arg0, %c0_i32, %c0_i32_0 : i32, i32, i32
  }
  func.func @transform_1(%arg0: i32) -> (i32, i32, i32) {
    %c0_i32 = arith.constant 0 : i32
    %c0_i32_0 = arith.constant 0 : i32
    %c0_i32_1 = arith.constant 0 : i32
    %c0_i32_2 = arith.constant 0 : i32
    return %c0_i32, %c0_i32_0, %c0_i32_1 : i32, i32, i32
  }
  func.func @transform_2(%arg0: i32) -> (i32, i32) {
    %c0_i32 = arith.constant 0 : i32
    %c0_i32_0 = arith.constant 0 : i32
    %c0_i32_1 = arith.constant 0 : i32
    return %c0_i32, %c0_i32_0 : i32, i32
  }
  func.func @transform_3(%arg0: i32) -> (i32, i32, i32) {
    %c0_i32 = arith.constant 0 : i32
    %c0_i32_0 = arith.constant 0 : i32
    %c0_i32_1 = arith.constant 0 : i32
    %c0_i32_2 = arith.constant 0 : i32
    return %c0_i32, %c0_i32_0, %c0_i32_1 : i32, i32, i32
  }
  func.func @transform_4(%arg0: i32) -> (i32, i32) {
    %c0_i32 = arith.constant 0 : i32
    %c0_i32_0 = arith.constant 0 : i32
    %c0_i32_1 = arith.constant 0 : i32
    return %c0_i32, %c0_i32_0 : i32, i32
  }
  func.func @transform_5(%arg0: i32) -> (i32, i32, i32) {
    %c0_i32 = arith.constant 0 : i32
    %c0_i32_0 = arith.constant 0 : i32
    %c0_i32_1 = arith.constant 0 : i32
    return %arg0, %c0_i32, %c0_i32_0 : i32, i32, i32
  }
}

module attributes {stable_mosaic.version = 11 : i64} {
  func.func @_double_conv3x3_kernel(%arg0: i32, %arg1: memref<1x4x128xf32, #tpu.memory_space<vmem>>, %arg2: memref<3x128x128xbf16, #tpu.memory_space<vmem>>, %arg3: memref<1x128xf32, #tpu.memory_space<vmem>>, %arg4: memref<3x128x128xbf16, #tpu.memory_space<vmem>>, %arg5: memref<1x128xf32, #tpu.memory_space<vmem>>, %arg6: memref<1x2x128xf32, #tpu.memory_space<vmem>>, %arg7: memref<4x128xf32, #tpu.memory_space<vmem>>) attributes {dimension_semantics = [#tpu.dimension_semantics<parallel>], iteration_bounds = array<i64: 2>, scalar_prefetch = 0 : i64, scratch_operands = 1 : i64, tpu.core_type = #tpu.core_type<tc>, window_params = [{transform_indices = @transform_0, window_bounds = array<i64: 1, 4, 128>}, {pipeline_mode = #tpu.pipeline_mode<synchronous>, transform_indices = @transform_1, window_bounds = array<i64: 3, 128, 128>}, {pipeline_mode = #tpu.pipeline_mode<synchronous>, transform_indices = @transform_2, window_bounds = array<i64: 1, 128>}, {pipeline_mode = #tpu.pipeline_mode<synchronous>, transform_indices = @transform_3, window_bounds = array<i64: 3, 128, 128>}, {pipeline_mode = #tpu.pipeline_mode<synchronous>, transform_indices = @transform_4, window_bounds = array<i64: 1, 128>}, {transform_indices = @transform_5, window_bounds = array<i64: 1, 2, 128>}]} {
    %cst = arith.constant 0.000000e+00 : f32
    %0 = vector.broadcast %cst : f32 to vector<2x128xf32>
    %c0 = arith.constant 0 : index
    %c0_0 = arith.constant 0 : index
    %c0_1 = arith.constant 0 : index
    %1 = vector.load %arg1[%c0, %c0_0, %c0_1] : memref<1x4x128xf32, #tpu.memory_space<vmem>>, vector<1x2x128xf32>
    %2 = vector.shape_cast %1 : vector<1x2x128xf32> to vector<2x128xf32>
    %3 = arith.truncf %2 : vector<2x128xf32> to vector<2x128xbf16>
    %c0_2 = arith.constant 0 : index
    %c0_3 = arith.constant 0 : index
    %c0_4 = arith.constant 0 : index
    %4 = vector.load %arg2[%c0_2, %c0_3, %c0_4] : memref<3x128x128xbf16, #tpu.memory_space<vmem>>, vector<1x128x128xbf16>
    %5 = vector.shape_cast %4 : vector<1x128x128xbf16> to vector<128x128xbf16>
    %cst_5 = arith.constant dense<0.000000e+00> : vector<2x128xf32>
    %6 = tpu.matmul %3, %5, %cst_5 {dimension_numbers = #tpu.dot_dimension_numbers<[1], [0], [0], [1], [0, 0, 1, 1], [], []>} : vector<2x128xbf16>, vector<128x128xbf16>, vector<2x128xf32> -> vector<2x128xf32>
    %7 = arith.addf %0, %6 : vector<2x128xf32>
    %c0_6 = arith.constant 0 : index
    %c1 = arith.constant 1 : index
    %c0_7 = arith.constant 0 : index
    %8 = vector.load %arg1[%c0_6, %c1, %c0_7] : memref<1x4x128xf32, #tpu.memory_space<vmem>>, vector<1x2x128xf32>
    %9 = vector.shape_cast %8 : vector<1x2x128xf32> to vector<2x128xf32>
    %10 = arith.truncf %9 : vector<2x128xf32> to vector<2x128xbf16>
    %c1_8 = arith.constant 1 : index
    %c0_9 = arith.constant 0 : index
    %c0_10 = arith.constant 0 : index
    %11 = vector.load %arg2[%c1_8, %c0_9, %c0_10] : memref<3x128x128xbf16, #tpu.memory_space<vmem>>, vector<1x128x128xbf16>
    %12 = vector.shape_cast %11 : vector<1x128x128xbf16> to vector<128x128xbf16>
    %cst_11 = arith.constant dense<0.000000e+00> : vector<2x128xf32>
    %13 = tpu.matmul %10, %12, %cst_11 {dimension_numbers = #tpu.dot_dimension_numbers<[1], [0], [0], [1], [0, 0, 1, 1], [], []>} : vector<2x128xbf16>, vector<128x128xbf16>, vector<2x128xf32> -> vector<2x128xf32>
    %14 = arith.addf %7, %13 : vector<2x128xf32>
    %c0_12 = arith.constant 0 : index
    %c2 = arith.constant 2 : index
    %c0_13 = arith.constant 0 : index
    %15 = vector.load %arg1[%c0_12, %c2, %c0_13] : memref<1x4x128xf32, #tpu.memory_space<vmem>>, vector<1x2x128xf32>
    %16 = vector.shape_cast %15 : vector<1x2x128xf32> to vector<2x128xf32>
    %17 = arith.truncf %16 : vector<2x128xf32> to vector<2x128xbf16>
    %c2_14 = arith.constant 2 : index
    %c0_15 = arith.constant 0 : index
    %c0_16 = arith.constant 0 : index
    %18 = vector.load %arg2[%c2_14, %c0_15, %c0_16] : memref<3x128x128xbf16, #tpu.memory_space<vmem>>, vector<1x128x128xbf16>
    %19 = vector.shape_cast %18 : vector<1x128x128xbf16> to vector<128x128xbf16>
    %cst_17 = arith.constant dense<0.000000e+00> : vector<2x128xf32>
    %20 = tpu.matmul %17, %19, %cst_17 {dimension_numbers = #tpu.dot_dimension_numbers<[1], [0], [0], [1], [0, 0, 1, 1], [], []>} : vector<2x128xbf16>, vector<128x128xbf16>, vector<2x128xf32> -> vector<2x128xf32>
    %21 = arith.addf %14, %20 : vector<2x128xf32>
    %c0_18 = arith.constant 0 : index
    %c0_19 = arith.constant 0 : index
    %22 = vector.load %arg3[%c0_18, %c0_19] : memref<1x128xf32, #tpu.memory_space<vmem>>, vector<1x128xf32>
    %23 = vector.broadcast %22 : vector<1x128xf32> to vector<2x128xf32>
    %24 = arith.addf %21, %23 : vector<2x128xf32>
    %cst_20 = arith.constant 0.000000e+00 : f32
    %25 = vector.broadcast %cst_20 : f32 to vector<2x128xf32>
    %26 = arith.maximumf %24, %25 : vector<2x128xf32>
    %cst_21 = arith.constant 0.000000e+00 : f32
    %27 = vector.broadcast %cst_21 : f32 to vector<4x128xf32>
    %c0_22 = arith.constant 0 : index
    %c0_23 = arith.constant 0 : index
    %28 = vector.load %arg7[%c0_22, %c0_23] : memref<4x128xf32, #tpu.memory_space<vmem>>, vector<4x128xf32>
    tpu.vector_store %arg7[%c0_22, %c0_23], %27 {strides = array<i32>} : memref<4x128xf32, #tpu.memory_space<vmem>>, vector<4x128xf32>,
    %c1_24 = arith.constant 1 : index
    %c0_25 = arith.constant 0 : index
    %29 = vector.load %arg7[%c1_24, %c0_25] : memref<4x128xf32, #tpu.memory_space<vmem>>, vector<2x128xf32>
    tpu.vector_store %arg7[%c1_24, %c0_25], %26 {strides = array<i32>} : memref<4x128xf32, #tpu.memory_space<vmem>>, vector<2x128xf32>,
    %cst_26 = arith.constant 0.000000e+00 : f32
    %30 = vector.broadcast %cst_26 : f32 to vector<2x128xf32>
    %c0_27 = arith.constant 0 : index
    %c0_28 = arith.constant 0 : index
    %31 = vector.load %arg7[%c0_27, %c0_28] : memref<4x128xf32, #tpu.memory_space<vmem>>, vector<2x128xf32>
    %32 = arith.truncf %31 : vector<2x128xf32> to vector<2x128xbf16>
    %c0_29 = arith.constant 0 : index
    %c0_30 = arith.constant 0 : index
    %c0_31 = arith.constant 0 : index
    %33 = vector.load %arg4[%c0_29, %c0_30, %c0_31] : memref<3x128x128xbf16, #tpu.memory_space<vmem>>, vector<1x128x128xbf16>
    %34 = vector.shape_cast %33 : vector<1x128x128xbf16> to vector<128x128xbf16>
    %cst_32 = arith.constant dense<0.000000e+00> : vector<2x128xf32>
    %35 = tpu.matmul %32, %34, %cst_32 {dimension_numbers = #tpu.dot_dimension_numbers<[1], [0], [0], [1], [0, 0, 1, 1], [], []>} : vector<2x128xbf16>, vector<128x128xbf16>, vector<2x128xf32> -> vector<2x128xf32>
    %36 = arith.addf %30, %35 : vector<2x128xf32>
    %c1_33 = arith.constant 1 : index
    %c0_34 = arith.constant 0 : index
    %37 = vector.load %arg7[%c1_33, %c0_34] : memref<4x128xf32, #tpu.memory_space<vmem>>, vector<2x128xf32>
    %38 = arith.truncf %37 : vector<2x128xf32> to vector<2x128xbf16>
    %c1_35 = arith.constant 1 : index
    %c0_36 = arith.constant 0 : index
    %c0_37 = arith.constant 0 : index
    %39 = vector.load %arg4[%c1_35, %c0_36, %c0_37] : memref<3x128x128xbf16, #tpu.memory_space<vmem>>, vector<1x128x128xbf16>
    %40 = vector.shape_cast %39 : vector<1x128x128xbf16> to vector<128x128xbf16>
    %cst_38 = arith.constant dense<0.000000e+00> : vector<2x128xf32>
    %41 = tpu.matmul %38, %40, %cst_38 {dimension_numbers = #tpu.dot_dimension_numbers<[1], [0], [0], [1], [0, 0, 1, 1], [], []>} : vector<2x128xbf16>, vector<128x128xbf16>, vector<2x128xf32> -> vector<2x128xf32>
    %42 = arith.addf %36, %41 : vector<2x128xf32>
    %c2_39 = arith.constant 2 : index
    %c0_40 = arith.constant 0 : index
    %43 = vector.load %arg7[%c2_39, %c0_40] : memref<4x128xf32, #tpu.memory_space<vmem>>, vector<2x128xf32>
    %44 = arith.truncf %43 : vector<2x128xf32> to vector<2x128xbf16>
    %c2_41 = arith.constant 2 : index
    %c0_42 = arith.constant 0 : index
    %c0_43 = arith.constant 0 : index
    %45 = vector.load %arg4[%c2_41, %c0_42, %c0_43] : memref<3x128x128xbf16, #tpu.memory_space<vmem>>, vector<1x128x128xbf16>
    %46 = vector.shape_cast %45 : vector<1x128x128xbf16> to vector<128x128xbf16>
    %cst_44 = arith.constant dense<0.000000e+00> : vector<2x128xf32>
    %47 = tpu.matmul %44, %46, %cst_44 {dimension_numbers = #tpu.dot_dimension_numbers<[1], [0], [0], [1], [0, 0, 1, 1], [], []>} : vector<2x128xbf16>, vector<128x128xbf16>, vector<2x128xf32> -> vector<2x128xf32>
    %48 = arith.addf %42, %47 : vector<2x128xf32>
    %c0_45 = arith.constant 0 : index
    %c0_46 = arith.constant 0 : index
    %49 = vector.load %arg5[%c0_45, %c0_46] : memref<1x128xf32, #tpu.memory_space<vmem>>, vector<1x128xf32>
    %50 = vector.broadcast %49 : vector<1x128xf32> to vector<2x128xf32>
    %51 = arith.addf %48, %50 : vector<2x128xf32>
    %cst_47 = arith.constant 0.000000e+00 : f32
    %52 = vector.broadcast %cst_47 : f32 to vector<2x128xf32>
    %53 = arith.maximumf %51, %52 : vector<2x128xf32>
    %c0_48 = arith.constant 0 : index
    %c0_49 = arith.constant 0 : index
    %c0_50 = arith.constant 0 : index
    %54 = vector.load %arg6[%c0_48, %c0_49, %c0_50] : memref<1x2x128xf32, #tpu.memory_space<vmem>>, vector<1x2x128xf32>
    %55 = vector.shape_cast %54 : vector<1x2x128xf32> to vector<2x128xf32>
    %56 = vector.shape_cast %53 : vector<2x128xf32> to vector<1x2x128xf32>
    tpu.vector_store %arg6[%c0_48, %c0_49, %c0_50], %56 {strides = array<i32>} : memref<1x2x128xf32, #tpu.memory_space<vmem>>, vector<1x2x128xf32>,
    return
  }
  func.func @transform_0(%arg0: i32) -> (i32, i32, i32) {
    %c0_i32 = arith.constant 0 : i32
    %c0_i32_0 = arith.constant 0 : i32
    %c0_i32_1 = arith.constant 0 : i32
    return %arg0, %c0_i32, %c0_i32_0 : i32, i32, i32
  }
  func.func @transform_1(%arg0: i32) -> (i32, i32, i32) {
    %c0_i32 = arith.constant 0 : i32
    %c0_i32_0 = arith.constant 0 : i32
    %c0_i32_1 = arith.constant 0 : i32
    %c0_i32_2 = arith.constant 0 : i32
    return %c0_i32, %c0_i32_0, %c0_i32_1 : i32, i32, i32
  }
  func.func @transform_2(%arg0: i32) -> (i32, i32) {
    %c0_i32 = arith.constant 0 : i32
    %c0_i32_0 = arith.constant 0 : i32
    %c0_i32_1 = arith.constant 0 : i32
    return %c0_i32, %c0_i32_0 : i32, i32
  }
  func.func @transform_3(%arg0: i32) -> (i32, i32, i32) {
    %c0_i32 = arith.constant 0 : i32
    %c0_i32_0 = arith.constant 0 : i32
    %c0_i32_1 = arith.constant 0 : i32
    %c0_i32_2 = arith.constant 0 : i32
    return %c0_i32, %c0_i32_0, %c0_i32_1 : i32, i32, i32
  }
  func.func @transform_4(%arg0: i32) -> (i32, i32) {
    %c0_i32 = arith.constant 0 : i32
    %c0_i32_0 = arith.constant 0 : i32
    %c0_i32_1 = arith.constant 0 : i32
    return %c0_i32, %c0_i32_0 : i32, i32
  }
  func.func @transform_5(%arg0: i32) -> (i32, i32, i32) {
    %c0_i32 = arith.constant 0 : i32
    %c0_i32_0 = arith.constant 0 : i32
    %c0_i32_1 = arith.constant 0 : i32
    return %arg0, %c0_i32, %c0_i32_0 : i32, i32, i32
  }
}

module attributes {stable_mosaic.version = 11 : i64} {
  func.func @_double_conv3x3_kernel(%arg0: i32, %arg1: memref<1x4x256xf32, #tpu.memory_space<vmem>>, %arg2: memref<3x256x128xbf16, #tpu.memory_space<vmem>>, %arg3: memref<1x128xf32, #tpu.memory_space<vmem>>, %arg4: memref<3x128x128xbf16, #tpu.memory_space<vmem>>, %arg5: memref<1x128xf32, #tpu.memory_space<vmem>>, %arg6: memref<1x2x128xf32, #tpu.memory_space<vmem>>, %arg7: memref<4x128xf32, #tpu.memory_space<vmem>>) attributes {dimension_semantics = [#tpu.dimension_semantics<parallel>], iteration_bounds = array<i64: 2>, scalar_prefetch = 0 : i64, scratch_operands = 1 : i64, tpu.core_type = #tpu.core_type<tc>, window_params = [{transform_indices = @transform_0, window_bounds = array<i64: 1, 4, 256>}, {pipeline_mode = #tpu.pipeline_mode<synchronous>, transform_indices = @transform_1, window_bounds = array<i64: 3, 256, 128>}, {pipeline_mode = #tpu.pipeline_mode<synchronous>, transform_indices = @transform_2, window_bounds = array<i64: 1, 128>}, {pipeline_mode = #tpu.pipeline_mode<synchronous>, transform_indices = @transform_3, window_bounds = array<i64: 3, 128, 128>}, {pipeline_mode = #tpu.pipeline_mode<synchronous>, transform_indices = @transform_4, window_bounds = array<i64: 1, 128>}, {transform_indices = @transform_5, window_bounds = array<i64: 1, 2, 128>}]} {
    %cst = arith.constant 0.000000e+00 : f32
    %0 = vector.broadcast %cst : f32 to vector<2x128xf32>
    %c0 = arith.constant 0 : index
    %c0_0 = arith.constant 0 : index
    %c0_1 = arith.constant 0 : index
    %1 = vector.load %arg1[%c0, %c0_0, %c0_1] : memref<1x4x256xf32, #tpu.memory_space<vmem>>, vector<1x2x256xf32>
    %2 = vector.shape_cast %1 : vector<1x2x256xf32> to vector<2x256xf32>
    %3 = arith.truncf %2 : vector<2x256xf32> to vector<2x256xbf16>
    %c0_2 = arith.constant 0 : index
    %c0_3 = arith.constant 0 : index
    %c0_4 = arith.constant 0 : index
    %4 = vector.load %arg2[%c0_2, %c0_3, %c0_4] : memref<3x256x128xbf16, #tpu.memory_space<vmem>>, vector<1x256x128xbf16>
    %5 = vector.shape_cast %4 : vector<1x256x128xbf16> to vector<256x128xbf16>
    %cst_5 = arith.constant dense<0.000000e+00> : vector<2x128xf32>
    %6 = tpu.matmul %3, %5, %cst_5 {dimension_numbers = #tpu.dot_dimension_numbers<[1], [0], [0], [1], [0, 0, 1, 1], [], []>} : vector<2x256xbf16>, vector<256x128xbf16>, vector<2x128xf32> -> vector<2x128xf32>
    %7 = arith.addf %0, %6 : vector<2x128xf32>
    %c0_6 = arith.constant 0 : index
    %c1 = arith.constant 1 : index
    %c0_7 = arith.constant 0 : index
    %8 = vector.load %arg1[%c0_6, %c1, %c0_7] : memref<1x4x256xf32, #tpu.memory_space<vmem>>, vector<1x2x256xf32>
    %9 = vector.shape_cast %8 : vector<1x2x256xf32> to vector<2x256xf32>
    %10 = arith.truncf %9 : vector<2x256xf32> to vector<2x256xbf16>
    %c1_8 = arith.constant 1 : index
    %c0_9 = arith.constant 0 : index
    %c0_10 = arith.constant 0 : index
    %11 = vector.load %arg2[%c1_8, %c0_9, %c0_10] : memref<3x256x128xbf16, #tpu.memory_space<vmem>>, vector<1x256x128xbf16>
    %12 = vector.shape_cast %11 : vector<1x256x128xbf16> to vector<256x128xbf16>
    %cst_11 = arith.constant dense<0.000000e+00> : vector<2x128xf32>
    %13 = tpu.matmul %10, %12, %cst_11 {dimension_numbers = #tpu.dot_dimension_numbers<[1], [0], [0], [1], [0, 0, 1, 1], [], []>} : vector<2x256xbf16>, vector<256x128xbf16>, vector<2x128xf32> -> vector<2x128xf32>
    %14 = arith.addf %7, %13 : vector<2x128xf32>
    %c0_12 = arith.constant 0 : index
    %c2 = arith.constant 2 : index
    %c0_13 = arith.constant 0 : index
    %15 = vector.load %arg1[%c0_12, %c2, %c0_13] : memref<1x4x256xf32, #tpu.memory_space<vmem>>, vector<1x2x256xf32>
    %16 = vector.shape_cast %15 : vector<1x2x256xf32> to vector<2x256xf32>
    %17 = arith.truncf %16 : vector<2x256xf32> to vector<2x256xbf16>
    %c2_14 = arith.constant 2 : index
    %c0_15 = arith.constant 0 : index
    %c0_16 = arith.constant 0 : index
    %18 = vector.load %arg2[%c2_14, %c0_15, %c0_16] : memref<3x256x128xbf16, #tpu.memory_space<vmem>>, vector<1x256x128xbf16>
    %19 = vector.shape_cast %18 : vector<1x256x128xbf16> to vector<256x128xbf16>
    %cst_17 = arith.constant dense<0.000000e+00> : vector<2x128xf32>
    %20 = tpu.matmul %17, %19, %cst_17 {dimension_numbers = #tpu.dot_dimension_numbers<[1], [0], [0], [1], [0, 0, 1, 1], [], []>} : vector<2x256xbf16>, vector<256x128xbf16>, vector<2x128xf32> -> vector<2x128xf32>
    %21 = arith.addf %14, %20 : vector<2x128xf32>
    %c0_18 = arith.constant 0 : index
    %c0_19 = arith.constant 0 : index
    %22 = vector.load %arg3[%c0_18, %c0_19] : memref<1x128xf32, #tpu.memory_space<vmem>>, vector<1x128xf32>
    %23 = vector.broadcast %22 : vector<1x128xf32> to vector<2x128xf32>
    %24 = arith.addf %21, %23 : vector<2x128xf32>
    %cst_20 = arith.constant 0.000000e+00 : f32
    %25 = vector.broadcast %cst_20 : f32 to vector<2x128xf32>
    %26 = arith.maximumf %24, %25 : vector<2x128xf32>
    %cst_21 = arith.constant 0.000000e+00 : f32
    %27 = vector.broadcast %cst_21 : f32 to vector<4x128xf32>
    %c0_22 = arith.constant 0 : index
    %c0_23 = arith.constant 0 : index
    %28 = vector.load %arg7[%c0_22, %c0_23] : memref<4x128xf32, #tpu.memory_space<vmem>>, vector<4x128xf32>
    tpu.vector_store %arg7[%c0_22, %c0_23], %27 {strides = array<i32>} : memref<4x128xf32, #tpu.memory_space<vmem>>, vector<4x128xf32>,
    %c1_24 = arith.constant 1 : index
    %c0_25 = arith.constant 0 : index
    %29 = vector.load %arg7[%c1_24, %c0_25] : memref<4x128xf32, #tpu.memory_space<vmem>>, vector<2x128xf32>
    tpu.vector_store %arg7[%c1_24, %c0_25], %26 {strides = array<i32>} : memref<4x128xf32, #tpu.memory_space<vmem>>, vector<2x128xf32>,
    %cst_26 = arith.constant 0.000000e+00 : f32
    %30 = vector.broadcast %cst_26 : f32 to vector<2x128xf32>
    %c0_27 = arith.constant 0 : index
    %c0_28 = arith.constant 0 : index
    %31 = vector.load %arg7[%c0_27, %c0_28] : memref<4x128xf32, #tpu.memory_space<vmem>>, vector<2x128xf32>
    %32 = arith.truncf %31 : vector<2x128xf32> to vector<2x128xbf16>
    %c0_29 = arith.constant 0 : index
    %c0_30 = arith.constant 0 : index
    %c0_31 = arith.constant 0 : index
    %33 = vector.load %arg4[%c0_29, %c0_30, %c0_31] : memref<3x128x128xbf16, #tpu.memory_space<vmem>>, vector<1x128x128xbf16>
    %34 = vector.shape_cast %33 : vector<1x128x128xbf16> to vector<128x128xbf16>
    %cst_32 = arith.constant dense<0.000000e+00> : vector<2x128xf32>
    %35 = tpu.matmul %32, %34, %cst_32 {dimension_numbers = #tpu.dot_dimension_numbers<[1], [0], [0], [1], [0, 0, 1, 1], [], []>} : vector<2x128xbf16>, vector<128x128xbf16>, vector<2x128xf32> -> vector<2x128xf32>
    %36 = arith.addf %30, %35 : vector<2x128xf32>
    %c1_33 = arith.constant 1 : index
    %c0_34 = arith.constant 0 : index
    %37 = vector.load %arg7[%c1_33, %c0_34] : memref<4x128xf32, #tpu.memory_space<vmem>>, vector<2x128xf32>
    %38 = arith.truncf %37 : vector<2x128xf32> to vector<2x128xbf16>
    %c1_35 = arith.constant 1 : index
    %c0_36 = arith.constant 0 : index
    %c0_37 = arith.constant 0 : index
    %39 = vector.load %arg4[%c1_35, %c0_36, %c0_37] : memref<3x128x128xbf16, #tpu.memory_space<vmem>>, vector<1x128x128xbf16>
    %40 = vector.shape_cast %39 : vector<1x128x128xbf16> to vector<128x128xbf16>
    %cst_38 = arith.constant dense<0.000000e+00> : vector<2x128xf32>
    %41 = tpu.matmul %38, %40, %cst_38 {dimension_numbers = #tpu.dot_dimension_numbers<[1], [0], [0], [1], [0, 0, 1, 1], [], []>} : vector<2x128xbf16>, vector<128x128xbf16>, vector<2x128xf32> -> vector<2x128xf32>
    %42 = arith.addf %36, %41 : vector<2x128xf32>
    %c2_39 = arith.constant 2 : index
    %c0_40 = arith.constant 0 : index
    %43 = vector.load %arg7[%c2_39, %c0_40] : memref<4x128xf32, #tpu.memory_space<vmem>>, vector<2x128xf32>
    %44 = arith.truncf %43 : vector<2x128xf32> to vector<2x128xbf16>
    %c2_41 = arith.constant 2 : index
    %c0_42 = arith.constant 0 : index
    %c0_43 = arith.constant 0 : index
    %45 = vector.load %arg4[%c2_41, %c0_42, %c0_43] : memref<3x128x128xbf16, #tpu.memory_space<vmem>>, vector<1x128x128xbf16>
    %46 = vector.shape_cast %45 : vector<1x128x128xbf16> to vector<128x128xbf16>
    %cst_44 = arith.constant dense<0.000000e+00> : vector<2x128xf32>
    %47 = tpu.matmul %44, %46, %cst_44 {dimension_numbers = #tpu.dot_dimension_numbers<[1], [0], [0], [1], [0, 0, 1, 1], [], []>} : vector<2x128xbf16>, vector<128x128xbf16>, vector<2x128xf32> -> vector<2x128xf32>
    %48 = arith.addf %42, %47 : vector<2x128xf32>
    %c0_45 = arith.constant 0 : index
    %c0_46 = arith.constant 0 : index
    %49 = vector.load %arg5[%c0_45, %c0_46] : memref<1x128xf32, #tpu.memory_space<vmem>>, vector<1x128xf32>
    %50 = vector.broadcast %49 : vector<1x128xf32> to vector<2x128xf32>
    %51 = arith.addf %48, %50 : vector<2x128xf32>
    %cst_47 = arith.constant 0.000000e+00 : f32
    %52 = vector.broadcast %cst_47 : f32 to vector<2x128xf32>
    %53 = arith.maximumf %51, %52 : vector<2x128xf32>
    %c0_48 = arith.constant 0 : index
    %c0_49 = arith.constant 0 : index
    %c0_50 = arith.constant 0 : index
    %54 = vector.load %arg6[%c0_48, %c0_49, %c0_50] : memref<1x2x128xf32, #tpu.memory_space<vmem>>, vector<1x2x128xf32>
    %55 = vector.shape_cast %54 : vector<1x2x128xf32> to vector<2x128xf32>
    %56 = vector.shape_cast %53 : vector<2x128xf32> to vector<1x2x128xf32>
    tpu.vector_store %arg6[%c0_48, %c0_49, %c0_50], %56 {strides = array<i32>} : memref<1x2x128xf32, #tpu.memory_space<vmem>>, vector<1x2x128xf32>,
    return
  }
  func.func @transform_0(%arg0: i32) -> (i32, i32, i32) {
    %c0_i32 = arith.constant 0 : i32
    %c0_i32_0 = arith.constant 0 : i32
    %c0_i32_1 = arith.constant 0 : i32
    return %arg0, %c0_i32, %c0_i32_0 : i32, i32, i32
  }
  func.func @transform_1(%arg0: i32) -> (i32, i32, i32) {
    %c0_i32 = arith.constant 0 : i32
    %c0_i32_0 = arith.constant 0 : i32
    %c0_i32_1 = arith.constant 0 : i32
    %c0_i32_2 = arith.constant 0 : i32
    return %c0_i32, %c0_i32_0, %c0_i32_1 : i32, i32, i32
  }
  func.func @transform_2(%arg0: i32) -> (i32, i32) {
    %c0_i32 = arith.constant 0 : i32
    %c0_i32_0 = arith.constant 0 : i32
    %c0_i32_1 = arith.constant 0 : i32
    return %c0_i32, %c0_i32_0 : i32, i32
  }
  func.func @transform_3(%arg0: i32) -> (i32, i32, i32) {
    %c0_i32 = arith.constant 0 : i32
    %c0_i32_0 = arith.constant 0 : i32
    %c0_i32_1 = arith.constant 0 : i32
    %c0_i32_2 = arith.constant 0 : i32
    return %c0_i32, %c0_i32_0, %c0_i32_1 : i32, i32, i32
  }
  func.func @transform_4(%arg0: i32) -> (i32, i32) {
    %c0_i32 = arith.constant 0 : i32
    %c0_i32_0 = arith.constant 0 : i32
    %c0_i32_1 = arith.constant 0 : i32
    return %c0_i32, %c0_i32_0 : i32, i32
  }
  func.func @transform_5(%arg0: i32) -> (i32, i32, i32) {
    %c0_i32 = arith.constant 0 : i32
    %c0_i32_0 = arith.constant 0 : i32
    %c0_i32_1 = arith.constant 0 : i32
    return %arg0, %c0_i32, %c0_i32_0 : i32, i32, i32
  }
}

module attributes {stable_mosaic.version = 11 : i64} {
  func.func @_matmul_bias_act_kernel(%arg0: i32, %arg1: memref<8x64xbf16, #tpu.memory_space<vmem>>, %arg2: memref<64x128xbf16, #tpu.memory_space<vmem>>, %arg3: memref<1x128xf32, #tpu.memory_space<vmem>>, %arg4: memref<8x128xf32, #tpu.memory_space<vmem>>) attributes {dimension_semantics = [#tpu.dimension_semantics<parallel>], iteration_bounds = array<i64: 1>, scalar_prefetch = 0 : i64, scratch_operands = 0 : i64, tpu.core_type = #tpu.core_type<tc>, window_params = [{transform_indices = @transform_0, window_bounds = array<i64: 8, 64>}, {pipeline_mode = #tpu.pipeline_mode<synchronous>, transform_indices = @transform_1, window_bounds = array<i64: 64, 128>}, {pipeline_mode = #tpu.pipeline_mode<synchronous>, transform_indices = @transform_2, window_bounds = array<i64: 1, 128>}, {transform_indices = @transform_3, window_bounds = array<i64: 8, 128>}]} {
    %c0 = arith.constant 0 : index
    %c0_0 = arith.constant 0 : index
    %0 = vector.load %arg1[%c0, %c0_0] : memref<8x64xbf16, #tpu.memory_space<vmem>>, vector<8x64xbf16>
    %c0_1 = arith.constant 0 : index
    %c0_2 = arith.constant 0 : index
    %1 = vector.load %arg2[%c0_1, %c0_2] : memref<64x128xbf16, #tpu.memory_space<vmem>>, vector<64x128xbf16>
    %cst = arith.constant dense<0.000000e+00> : vector<8x128xf32>
    %2 = tpu.matmul %0, %1, %cst {dimension_numbers = #tpu.dot_dimension_numbers<[1], [0], [0], [1], [0, 0, 1, 1], [], []>} : vector<8x64xbf16>, vector<64x128xbf16>, vector<8x128xf32> -> vector<8x128xf32>
    %c0_3 = arith.constant 0 : index
    %c0_4 = arith.constant 0 : index
    %3 = vector.load %arg3[%c0_3, %c0_4] : memref<1x128xf32, #tpu.memory_space<vmem>>, vector<1x128xf32>
    %4 = vector.broadcast %3 : vector<1x128xf32> to vector<8x128xf32>
    %5 = arith.addf %2, %4 : vector<8x128xf32>
    %cst_5 = arith.constant 0.000000e+00 : f32
    %6 = vector.broadcast %cst_5 : f32 to vector<8x128xf32>
    %7 = arith.maximumf %5, %6 : vector<8x128xf32>
    %c0_6 = arith.constant 0 : index
    %c0_7 = arith.constant 0 : index
    %8 = vector.load %arg4[%c0_6, %c0_7] : memref<8x128xf32, #tpu.memory_space<vmem>>, vector<8x128xf32>
    tpu.vector_store %arg4[%c0_6, %c0_7], %7 {strides = array<i32>} : memref<8x128xf32, #tpu.memory_space<vmem>>, vector<8x128xf32>,
    return
  }
  func.func @transform_0(%arg0: i32) -> (i32, i32) {
    %c0_i32 = arith.constant 0 : i32
    %c0_i32_0 = arith.constant 0 : i32
    return %arg0, %c0_i32 : i32, i32
  }
  func.func @transform_1(%arg0: i32) -> (i32, i32) {
    %c0_i32 = arith.constant 0 : i32
    %c0_i32_0 = arith.constant 0 : i32
    %c0_i32_1 = arith.constant 0 : i32
    return %c0_i32, %c0_i32_0 : i32, i32
  }
  func.func @transform_2(%arg0: i32) -> (i32, i32) {
    %c0_i32 = arith.constant 0 : i32
    %c0_i32_0 = arith.constant 0 : i32
    %c0_i32_1 = arith.constant 0 : i32
    return %c0_i32, %c0_i32_0 : i32, i32
  }
  func.func @transform_3(%arg0: i32) -> (i32, i32) {
    %c0_i32 = arith.constant 0 : i32
    %c0_i32_0 = arith.constant 0 : i32
    return %arg0, %c0_i32 : i32, i32
  }
}

module attributes {stable_mosaic.version = 11 : i64} {
  func.func @_convlstm_kernel(%arg0: i32, %arg1: memref<1x6x256xf32, #tpu.memory_space<vmem>>, %arg2: memref<3x3x256x128xbf16, #tpu.memory_space<vmem>>, %arg3: memref<3x1x128xf32, #tpu.memory_space<vmem>>, %arg4: memref<1x4x128xf32, #tpu.memory_space<vmem>>) attributes {dimension_semantics = [#tpu.dimension_semantics<parallel>], iteration_bounds = array<i64: 2>, scalar_prefetch = 0 : i64, scratch_operands = 0 : i64, tpu.core_type = #tpu.core_type<tc>, window_params = [{transform_indices = @transform_0, window_bounds = array<i64: 1, 6, 256>}, {pipeline_mode = #tpu.pipeline_mode<synchronous>, transform_indices = @transform_1, window_bounds = array<i64: 3, 3, 256, 128>}, {pipeline_mode = #tpu.pipeline_mode<synchronous>, transform_indices = @transform_2, window_bounds = array<i64: 3, 1, 128>}, {transform_indices = @transform_3, window_bounds = array<i64: 1, 4, 128>}]} {
    %cst = arith.constant 0.000000e+00 : f32
    %0 = vector.broadcast %cst : f32 to vector<4x128xf32>
    %cst_0 = arith.constant 0.000000e+00 : f32
    %1 = vector.broadcast %cst_0 : f32 to vector<4x128xf32>
    %cst_1 = arith.constant 0.000000e+00 : f32
    %2 = vector.broadcast %cst_1 : f32 to vector<4x128xf32>
    %c0 = arith.constant 0 : index
    %c0_2 = arith.constant 0 : index
    %c0_3 = arith.constant 0 : index
    %3 = vector.load %arg1[%c0, %c0_2, %c0_3] : memref<1x6x256xf32, #tpu.memory_space<vmem>>, vector<1x4x256xf32>
    %4 = vector.shape_cast %3 : vector<1x4x256xf32> to vector<4x256xf32>
    %5 = arith.truncf %4 : vector<4x256xf32> to vector<4x256xbf16>
    %c0_4 = arith.constant 0 : index
    %c0_5 = arith.constant 0 : index
    %c0_6 = arith.constant 0 : index
    %c0_7 = arith.constant 0 : index
    %6 = vector.load %arg2[%c0_4, %c0_5, %c0_6, %c0_7] : memref<3x3x256x128xbf16, #tpu.memory_space<vmem>>, vector<1x1x256x128xbf16>
    %7 = vector.shape_cast %6 : vector<1x1x256x128xbf16> to vector<256x128xbf16>
    %cst_8 = arith.constant dense<0.000000e+00> : vector<4x128xf32>
    %8 = tpu.matmul %5, %7, %cst_8 {dimension_numbers = #tpu.dot_dimension_numbers<[1], [0], [0], [1], [0, 0, 1, 1], [], []>} : vector<4x256xbf16>, vector<256x128xbf16>, vector<4x128xf32> -> vector<4x128xf32>
    %9 = arith.addf %0, %8 : vector<4x128xf32>
    %c1 = arith.constant 1 : index
    %c0_9 = arith.constant 0 : index
    %c0_10 = arith.constant 0 : index
    %c0_11 = arith.constant 0 : index
    %10 = vector.load %arg2[%c1, %c0_9, %c0_10, %c0_11] : memref<3x3x256x128xbf16, #tpu.memory_space<vmem>>, vector<1x1x256x128xbf16>
    %11 = vector.shape_cast %10 : vector<1x1x256x128xbf16> to vector<256x128xbf16>
    %cst_12 = arith.constant dense<0.000000e+00> : vector<4x128xf32>
    %12 = tpu.matmul %5, %11, %cst_12 {dimension_numbers = #tpu.dot_dimension_numbers<[1], [0], [0], [1], [0, 0, 1, 1], [], []>} : vector<4x256xbf16>, vector<256x128xbf16>, vector<4x128xf32> -> vector<4x128xf32>
    %13 = arith.addf %1, %12 : vector<4x128xf32>
    %c2 = arith.constant 2 : index
    %c0_13 = arith.constant 0 : index
    %c0_14 = arith.constant 0 : index
    %c0_15 = arith.constant 0 : index
    %14 = vector.load %arg2[%c2, %c0_13, %c0_14, %c0_15] : memref<3x3x256x128xbf16, #tpu.memory_space<vmem>>, vector<1x1x256x128xbf16>
    %15 = vector.shape_cast %14 : vector<1x1x256x128xbf16> to vector<256x128xbf16>
    %cst_16 = arith.constant dense<0.000000e+00> : vector<4x128xf32>
    %16 = tpu.matmul %5, %15, %cst_16 {dimension_numbers = #tpu.dot_dimension_numbers<[1], [0], [0], [1], [0, 0, 1, 1], [], []>} : vector<4x256xbf16>, vector<256x128xbf16>, vector<4x128xf32> -> vector<4x128xf32>
    %17 = arith.addf %2, %16 : vector<4x128xf32>
    %c0_17 = arith.constant 0 : index
    %c1_18 = arith.constant 1 : index
    %c0_19 = arith.constant 0 : index
    %18 = vector.load %arg1[%c0_17, %c1_18, %c0_19] : memref<1x6x256xf32, #tpu.memory_space<vmem>>, vector<1x4x256xf32>
    %19 = vector.shape_cast %18 : vector<1x4x256xf32> to vector<4x256xf32>
    %20 = arith.truncf %19 : vector<4x256xf32> to vector<4x256xbf16>
    %c0_20 = arith.constant 0 : index
    %c1_21 = arith.constant 1 : index
    %c0_22 = arith.constant 0 : index
    %c0_23 = arith.constant 0 : index
    %21 = vector.load %arg2[%c0_20, %c1_21, %c0_22, %c0_23] : memref<3x3x256x128xbf16, #tpu.memory_space<vmem>>, vector<1x1x256x128xbf16>
    %22 = vector.shape_cast %21 : vector<1x1x256x128xbf16> to vector<256x128xbf16>
    %cst_24 = arith.constant dense<0.000000e+00> : vector<4x128xf32>
    %23 = tpu.matmul %20, %22, %cst_24 {dimension_numbers = #tpu.dot_dimension_numbers<[1], [0], [0], [1], [0, 0, 1, 1], [], []>} : vector<4x256xbf16>, vector<256x128xbf16>, vector<4x128xf32> -> vector<4x128xf32>
    %24 = arith.addf %9, %23 : vector<4x128xf32>
    %c1_25 = arith.constant 1 : index
    %c1_26 = arith.constant 1 : index
    %c0_27 = arith.constant 0 : index
    %c0_28 = arith.constant 0 : index
    %25 = vector.load %arg2[%c1_25, %c1_26, %c0_27, %c0_28] : memref<3x3x256x128xbf16, #tpu.memory_space<vmem>>, vector<1x1x256x128xbf16>
    %26 = vector.shape_cast %25 : vector<1x1x256x128xbf16> to vector<256x128xbf16>
    %cst_29 = arith.constant dense<0.000000e+00> : vector<4x128xf32>
    %27 = tpu.matmul %20, %26, %cst_29 {dimension_numbers = #tpu.dot_dimension_numbers<[1], [0], [0], [1], [0, 0, 1, 1], [], []>} : vector<4x256xbf16>, vector<256x128xbf16>, vector<4x128xf32> -> vector<4x128xf32>
    %28 = arith.addf %13, %27 : vector<4x128xf32>
    %c2_30 = arith.constant 2 : index
    %c1_31 = arith.constant 1 : index
    %c0_32 = arith.constant 0 : index
    %c0_33 = arith.constant 0 : index
    %29 = vector.load %arg2[%c2_30, %c1_31, %c0_32, %c0_33] : memref<3x3x256x128xbf16, #tpu.memory_space<vmem>>, vector<1x1x256x128xbf16>
    %30 = vector.shape_cast %29 : vector<1x1x256x128xbf16> to vector<256x128xbf16>
    %cst_34 = arith.constant dense<0.000000e+00> : vector<4x128xf32>
    %31 = tpu.matmul %20, %30, %cst_34 {dimension_numbers = #tpu.dot_dimension_numbers<[1], [0], [0], [1], [0, 0, 1, 1], [], []>} : vector<4x256xbf16>, vector<256x128xbf16>, vector<4x128xf32> -> vector<4x128xf32>
    %32 = arith.addf %17, %31 : vector<4x128xf32>
    %c0_35 = arith.constant 0 : index
    %c2_36 = arith.constant 2 : index
    %c0_37 = arith.constant 0 : index
    %33 = vector.load %arg1[%c0_35, %c2_36, %c0_37] : memref<1x6x256xf32, #tpu.memory_space<vmem>>, vector<1x4x256xf32>
    %34 = vector.shape_cast %33 : vector<1x4x256xf32> to vector<4x256xf32>
    %35 = arith.truncf %34 : vector<4x256xf32> to vector<4x256xbf16>
    %c0_38 = arith.constant 0 : index
    %c2_39 = arith.constant 2 : index
    %c0_40 = arith.constant 0 : index
    %c0_41 = arith.constant 0 : index
    %36 = vector.load %arg2[%c0_38, %c2_39, %c0_40, %c0_41] : memref<3x3x256x128xbf16, #tpu.memory_space<vmem>>, vector<1x1x256x128xbf16>
    %37 = vector.shape_cast %36 : vector<1x1x256x128xbf16> to vector<256x128xbf16>
    %cst_42 = arith.constant dense<0.000000e+00> : vector<4x128xf32>
    %38 = tpu.matmul %35, %37, %cst_42 {dimension_numbers = #tpu.dot_dimension_numbers<[1], [0], [0], [1], [0, 0, 1, 1], [], []>} : vector<4x256xbf16>, vector<256x128xbf16>, vector<4x128xf32> -> vector<4x128xf32>
    %39 = arith.addf %24, %38 : vector<4x128xf32>
    %c1_43 = arith.constant 1 : index
    %c2_44 = arith.constant 2 : index
    %c0_45 = arith.constant 0 : index
    %c0_46 = arith.constant 0 : index
    %40 = vector.load %arg2[%c1_43, %c2_44, %c0_45, %c0_46] : memref<3x3x256x128xbf16, #tpu.memory_space<vmem>>, vector<1x1x256x128xbf16>
    %41 = vector.shape_cast %40 : vector<1x1x256x128xbf16> to vector<256x128xbf16>
    %cst_47 = arith.constant dense<0.000000e+00> : vector<4x128xf32>
    %42 = tpu.matmul %35, %41, %cst_47 {dimension_numbers = #tpu.dot_dimension_numbers<[1], [0], [0], [1], [0, 0, 1, 1], [], []>} : vector<4x256xbf16>, vector<256x128xbf16>, vector<4x128xf32> -> vector<4x128xf32>
    %43 = arith.addf %28, %42 : vector<4x128xf32>
    %c2_48 = arith.constant 2 : index
    %c2_49 = arith.constant 2 : index
    %c0_50 = arith.constant 0 : index
    %c0_51 = arith.constant 0 : index
    %44 = vector.load %arg2[%c2_48, %c2_49, %c0_50, %c0_51] : memref<3x3x256x128xbf16, #tpu.memory_space<vmem>>, vector<1x1x256x128xbf16>
    %45 = vector.shape_cast %44 : vector<1x1x256x128xbf16> to vector<256x128xbf16>
    %cst_52 = arith.constant dense<0.000000e+00> : vector<4x128xf32>
    %46 = tpu.matmul %35, %45, %cst_52 {dimension_numbers = #tpu.dot_dimension_numbers<[1], [0], [0], [1], [0, 0, 1, 1], [], []>} : vector<4x256xbf16>, vector<256x128xbf16>, vector<4x128xf32> -> vector<4x128xf32>
    %47 = arith.addf %32, %46 : vector<4x128xf32>
    %c0_53 = arith.constant 0 : index
    %c0_54 = arith.constant 0 : index
    %c0_55 = arith.constant 0 : index
    %48 = vector.load %arg3[%c0_53, %c0_54, %c0_55] : memref<3x1x128xf32, #tpu.memory_space<vmem>>, vector<1x1x128xf32>
    %49 = vector.shape_cast %48 : vector<1x1x128xf32> to vector<1x128xf32>
    %50 = vector.broadcast %49 : vector<1x128xf32> to vector<4x128xf32>
    %51 = arith.addf %39, %50 : vector<4x128xf32>
    %52 = arith.negf %51 : vector<4x128xf32>
    %53 = math.exp %52 : vector<4x128xf32>
    %cst_56 = arith.constant 1.000000e+00 : f32
    %54 = vector.broadcast %cst_56 : f32 to vector<4x128xf32>
    %55 = arith.addf %54, %53 : vector<4x128xf32>
    %56 = arith.divf %54, %55 : vector<4x128xf32>
    %c1_57 = arith.constant 1 : index
    %c0_58 = arith.constant 0 : index
    %c0_59 = arith.constant 0 : index
    %57 = vector.load %arg3[%c1_57, %c0_58, %c0_59] : memref<3x1x128xf32, #tpu.memory_space<vmem>>, vector<1x1x128xf32>
    %58 = vector.shape_cast %57 : vector<1x1x128xf32> to vector<1x128xf32>
    %59 = vector.broadcast %58 : vector<1x128xf32> to vector<4x128xf32>
    %60 = arith.addf %43, %59 : vector<4x128xf32>
    %61 = math.tanh %60 : vector<4x128xf32>
    %c2_60 = arith.constant 2 : index
    %c0_61 = arith.constant 0 : index
    %c0_62 = arith.constant 0 : index
    %62 = vector.load %arg3[%c2_60, %c0_61, %c0_62] : memref<3x1x128xf32, #tpu.memory_space<vmem>>, vector<1x1x128xf32>
    %63 = vector.shape_cast %62 : vector<1x1x128xf32> to vector<1x128xf32>
    %64 = vector.broadcast %63 : vector<1x128xf32> to vector<4x128xf32>
    %65 = arith.addf %47, %64 : vector<4x128xf32>
    %66 = arith.negf %65 : vector<4x128xf32>
    %67 = math.exp %66 : vector<4x128xf32>
    %cst_63 = arith.constant 1.000000e+00 : f32
    %68 = vector.broadcast %cst_63 : f32 to vector<4x128xf32>
    %69 = arith.addf %68, %67 : vector<4x128xf32>
    %70 = arith.divf %68, %69 : vector<4x128xf32>
    %71 = arith.mulf %56, %61 : vector<4x128xf32>
    %72 = math.tanh %71 : vector<4x128xf32>
    %73 = arith.mulf %70, %72 : vector<4x128xf32>
    %c0_64 = arith.constant 0 : index
    %c0_65 = arith.constant 0 : index
    %c0_66 = arith.constant 0 : index
    %74 = vector.load %arg4[%c0_64, %c0_65, %c0_66] : memref<1x4x128xf32, #tpu.memory_space<vmem>>, vector<1x4x128xf32>
    %75 = vector.shape_cast %74 : vector<1x4x128xf32> to vector<4x128xf32>
    %76 = vector.shape_cast %73 : vector<4x128xf32> to vector<1x4x128xf32>
    tpu.vector_store %arg4[%c0_64, %c0_65, %c0_66], %76 {strides = array<i32>} : memref<1x4x128xf32, #tpu.memory_space<vmem>>, vector<1x4x128xf32>,
    return
  }
  func.func @transform_0(%arg0: i32) -> (i32, i32, i32) {
    %c0_i32 = arith.constant 0 : i32
    %c0_i32_0 = arith.constant 0 : i32
    %c0_i32_1 = arith.constant 0 : i32
    return %arg0, %c0_i32, %c0_i32_0 : i32, i32, i32
  }
  func.func @transform_1(%arg0: i32) -> (i32, i32, i32, i32) {
    %c0_i32 = arith.constant 0 : i32
    %c0_i32_0 = arith.constant 0 : i32
    %c0_i32_1 = arith.constant 0 : i32
    %c0_i32_2 = arith.constant 0 : i32
    %c0_i32_3 = arith.constant 0 : i32
    return %c0_i32, %c0_i32_0, %c0_i32_1, %c0_i32_2 : i32, i32, i32, i32
  }
  func.func @transform_2(%arg0: i32) -> (i32, i32, i32) {
    %c0_i32 = arith.constant 0 : i32
    %c0_i32_0 = arith.constant 0 : i32
    %c0_i32_1 = arith.constant 0 : i32
    %c0_i32_2 = arith.constant 0 : i32
    return %c0_i32, %c0_i32_0, %c0_i32_1 : i32, i32, i32
  }
  func.func @transform_3(%arg0: i32) -> (i32, i32, i32) {
    %c0_i32 = arith.constant 0 : i32
    %c0_i32_0 = arith.constant 0 : i32
    %c0_i32_1 = arith.constant 0 : i32
    return %arg0, %c0_i32, %c0_i32_0 : i32, i32, i32
  }
}

module attributes {stable_mosaic.version = 11 : i64} {
  func.func @_double_conv3x3_kernel(%arg0: i32, %arg1: memref<1x6x128xf32, #tpu.memory_space<vmem>>, %arg2: memref<3x128x128xbf16, #tpu.memory_space<vmem>>, %arg3: memref<1x128xf32, #tpu.memory_space<vmem>>, %arg4: memref<3x128x128xbf16, #tpu.memory_space<vmem>>, %arg5: memref<1x128xf32, #tpu.memory_space<vmem>>, %arg6: memref<1x4x128xf32, #tpu.memory_space<vmem>>, %arg7: memref<6x128xf32, #tpu.memory_space<vmem>>) attributes {dimension_semantics = [#tpu.dimension_semantics<parallel>], iteration_bounds = array<i64: 2>, scalar_prefetch = 0 : i64, scratch_operands = 1 : i64, tpu.core_type = #tpu.core_type<tc>, window_params = [{transform_indices = @transform_0, window_bounds = array<i64: 1, 6, 128>}, {pipeline_mode = #tpu.pipeline_mode<synchronous>, transform_indices = @transform_1, window_bounds = array<i64: 3, 128, 128>}, {pipeline_mode = #tpu.pipeline_mode<synchronous>, transform_indices = @transform_2, window_bounds = array<i64: 1, 128>}, {pipeline_mode = #tpu.pipeline_mode<synchronous>, transform_indices = @transform_3, window_bounds = array<i64: 3, 128, 128>}, {pipeline_mode = #tpu.pipeline_mode<synchronous>, transform_indices = @transform_4, window_bounds = array<i64: 1, 128>}, {transform_indices = @transform_5, window_bounds = array<i64: 1, 4, 128>}]} {
    %cst = arith.constant 0.000000e+00 : f32
    %0 = vector.broadcast %cst : f32 to vector<4x128xf32>
    %c0 = arith.constant 0 : index
    %c0_0 = arith.constant 0 : index
    %c0_1 = arith.constant 0 : index
    %1 = vector.load %arg1[%c0, %c0_0, %c0_1] : memref<1x6x128xf32, #tpu.memory_space<vmem>>, vector<1x4x128xf32>
    %2 = vector.shape_cast %1 : vector<1x4x128xf32> to vector<4x128xf32>
    %3 = arith.truncf %2 : vector<4x128xf32> to vector<4x128xbf16>
    %c0_2 = arith.constant 0 : index
    %c0_3 = arith.constant 0 : index
    %c0_4 = arith.constant 0 : index
    %4 = vector.load %arg2[%c0_2, %c0_3, %c0_4] : memref<3x128x128xbf16, #tpu.memory_space<vmem>>, vector<1x128x128xbf16>
    %5 = vector.shape_cast %4 : vector<1x128x128xbf16> to vector<128x128xbf16>
    %cst_5 = arith.constant dense<0.000000e+00> : vector<4x128xf32>
    %6 = tpu.matmul %3, %5, %cst_5 {dimension_numbers = #tpu.dot_dimension_numbers<[1], [0], [0], [1], [0, 0, 1, 1], [], []>} : vector<4x128xbf16>, vector<128x128xbf16>, vector<4x128xf32> -> vector<4x128xf32>
    %7 = arith.addf %0, %6 : vector<4x128xf32>
    %c0_6 = arith.constant 0 : index
    %c1 = arith.constant 1 : index
    %c0_7 = arith.constant 0 : index
    %8 = vector.load %arg1[%c0_6, %c1, %c0_7] : memref<1x6x128xf32, #tpu.memory_space<vmem>>, vector<1x4x128xf32>
    %9 = vector.shape_cast %8 : vector<1x4x128xf32> to vector<4x128xf32>
    %10 = arith.truncf %9 : vector<4x128xf32> to vector<4x128xbf16>
    %c1_8 = arith.constant 1 : index
    %c0_9 = arith.constant 0 : index
    %c0_10 = arith.constant 0 : index
    %11 = vector.load %arg2[%c1_8, %c0_9, %c0_10] : memref<3x128x128xbf16, #tpu.memory_space<vmem>>, vector<1x128x128xbf16>
    %12 = vector.shape_cast %11 : vector<1x128x128xbf16> to vector<128x128xbf16>
    %cst_11 = arith.constant dense<0.000000e+00> : vector<4x128xf32>
    %13 = tpu.matmul %10, %12, %cst_11 {dimension_numbers = #tpu.dot_dimension_numbers<[1], [0], [0], [1], [0, 0, 1, 1], [], []>} : vector<4x128xbf16>, vector<128x128xbf16>, vector<4x128xf32> -> vector<4x128xf32>
    %14 = arith.addf %7, %13 : vector<4x128xf32>
    %c0_12 = arith.constant 0 : index
    %c2 = arith.constant 2 : index
    %c0_13 = arith.constant 0 : index
    %15 = vector.load %arg1[%c0_12, %c2, %c0_13] : memref<1x6x128xf32, #tpu.memory_space<vmem>>, vector<1x4x128xf32>
    %16 = vector.shape_cast %15 : vector<1x4x128xf32> to vector<4x128xf32>
    %17 = arith.truncf %16 : vector<4x128xf32> to vector<4x128xbf16>
    %c2_14 = arith.constant 2 : index
    %c0_15 = arith.constant 0 : index
    %c0_16 = arith.constant 0 : index
    %18 = vector.load %arg2[%c2_14, %c0_15, %c0_16] : memref<3x128x128xbf16, #tpu.memory_space<vmem>>, vector<1x128x128xbf16>
    %19 = vector.shape_cast %18 : vector<1x128x128xbf16> to vector<128x128xbf16>
    %cst_17 = arith.constant dense<0.000000e+00> : vector<4x128xf32>
    %20 = tpu.matmul %17, %19, %cst_17 {dimension_numbers = #tpu.dot_dimension_numbers<[1], [0], [0], [1], [0, 0, 1, 1], [], []>} : vector<4x128xbf16>, vector<128x128xbf16>, vector<4x128xf32> -> vector<4x128xf32>
    %21 = arith.addf %14, %20 : vector<4x128xf32>
    %c0_18 = arith.constant 0 : index
    %c0_19 = arith.constant 0 : index
    %22 = vector.load %arg3[%c0_18, %c0_19] : memref<1x128xf32, #tpu.memory_space<vmem>>, vector<1x128xf32>
    %23 = vector.broadcast %22 : vector<1x128xf32> to vector<4x128xf32>
    %24 = arith.addf %21, %23 : vector<4x128xf32>
    %cst_20 = arith.constant 0.000000e+00 : f32
    %25 = vector.broadcast %cst_20 : f32 to vector<4x128xf32>
    %26 = arith.maximumf %24, %25 : vector<4x128xf32>
    %cst_21 = arith.constant 0.000000e+00 : f32
    %27 = vector.broadcast %cst_21 : f32 to vector<6x128xf32>
    %c0_22 = arith.constant 0 : index
    %c0_23 = arith.constant 0 : index
    %28 = vector.load %arg7[%c0_22, %c0_23] : memref<6x128xf32, #tpu.memory_space<vmem>>, vector<6x128xf32>
    tpu.vector_store %arg7[%c0_22, %c0_23], %27 {strides = array<i32>} : memref<6x128xf32, #tpu.memory_space<vmem>>, vector<6x128xf32>,
    %c1_24 = arith.constant 1 : index
    %c0_25 = arith.constant 0 : index
    %29 = vector.load %arg7[%c1_24, %c0_25] : memref<6x128xf32, #tpu.memory_space<vmem>>, vector<4x128xf32>
    tpu.vector_store %arg7[%c1_24, %c0_25], %26 {strides = array<i32>} : memref<6x128xf32, #tpu.memory_space<vmem>>, vector<4x128xf32>,
    %cst_26 = arith.constant 0.000000e+00 : f32
    %30 = vector.broadcast %cst_26 : f32 to vector<4x128xf32>
    %c0_27 = arith.constant 0 : index
    %c0_28 = arith.constant 0 : index
    %31 = vector.load %arg7[%c0_27, %c0_28] : memref<6x128xf32, #tpu.memory_space<vmem>>, vector<4x128xf32>
    %32 = arith.truncf %31 : vector<4x128xf32> to vector<4x128xbf16>
    %c0_29 = arith.constant 0 : index
    %c0_30 = arith.constant 0 : index
    %c0_31 = arith.constant 0 : index
    %33 = vector.load %arg4[%c0_29, %c0_30, %c0_31] : memref<3x128x128xbf16, #tpu.memory_space<vmem>>, vector<1x128x128xbf16>
    %34 = vector.shape_cast %33 : vector<1x128x128xbf16> to vector<128x128xbf16>
    %cst_32 = arith.constant dense<0.000000e+00> : vector<4x128xf32>
    %35 = tpu.matmul %32, %34, %cst_32 {dimension_numbers = #tpu.dot_dimension_numbers<[1], [0], [0], [1], [0, 0, 1, 1], [], []>} : vector<4x128xbf16>, vector<128x128xbf16>, vector<4x128xf32> -> vector<4x128xf32>
    %36 = arith.addf %30, %35 : vector<4x128xf32>
    %c1_33 = arith.constant 1 : index
    %c0_34 = arith.constant 0 : index
    %37 = vector.load %arg7[%c1_33, %c0_34] : memref<6x128xf32, #tpu.memory_space<vmem>>, vector<4x128xf32>
    %38 = arith.truncf %37 : vector<4x128xf32> to vector<4x128xbf16>
    %c1_35 = arith.constant 1 : index
    %c0_36 = arith.constant 0 : index
    %c0_37 = arith.constant 0 : index
    %39 = vector.load %arg4[%c1_35, %c0_36, %c0_37] : memref<3x128x128xbf16, #tpu.memory_space<vmem>>, vector<1x128x128xbf16>
    %40 = vector.shape_cast %39 : vector<1x128x128xbf16> to vector<128x128xbf16>
    %cst_38 = arith.constant dense<0.000000e+00> : vector<4x128xf32>
    %41 = tpu.matmul %38, %40, %cst_38 {dimension_numbers = #tpu.dot_dimension_numbers<[1], [0], [0], [1], [0, 0, 1, 1], [], []>} : vector<4x128xbf16>, vector<128x128xbf16>, vector<4x128xf32> -> vector<4x128xf32>
    %42 = arith.addf %36, %41 : vector<4x128xf32>
    %c2_39 = arith.constant 2 : index
    %c0_40 = arith.constant 0 : index
    %43 = vector.load %arg7[%c2_39, %c0_40] : memref<6x128xf32, #tpu.memory_space<vmem>>, vector<4x128xf32>
    %44 = arith.truncf %43 : vector<4x128xf32> to vector<4x128xbf16>
    %c2_41 = arith.constant 2 : index
    %c0_42 = arith.constant 0 : index
    %c0_43 = arith.constant 0 : index
    %45 = vector.load %arg4[%c2_41, %c0_42, %c0_43] : memref<3x128x128xbf16, #tpu.memory_space<vmem>>, vector<1x128x128xbf16>
    %46 = vector.shape_cast %45 : vector<1x128x128xbf16> to vector<128x128xbf16>
    %cst_44 = arith.constant dense<0.000000e+00> : vector<4x128xf32>
    %47 = tpu.matmul %44, %46, %cst_44 {dimension_numbers = #tpu.dot_dimension_numbers<[1], [0], [0], [1], [0, 0, 1, 1], [], []>} : vector<4x128xbf16>, vector<128x128xbf16>, vector<4x128xf32> -> vector<4x128xf32>
    %48 = arith.addf %42, %47 : vector<4x128xf32>
    %c0_45 = arith.constant 0 : index
    %c0_46 = arith.constant 0 : index
    %49 = vector.load %arg5[%c0_45, %c0_46] : memref<1x128xf32, #tpu.memory_space<vmem>>, vector<1x128xf32>
    %50 = vector.broadcast %49 : vector<1x128xf32> to vector<4x128xf32>
    %51 = arith.addf %48, %50 : vector<4x128xf32>
    %cst_47 = arith.constant 0.000000e+00 : f32
    %52 = vector.broadcast %cst_47 : f32 to vector<4x128xf32>
    %53 = arith.maximumf %51, %52 : vector<4x128xf32>
    %c0_48 = arith.constant 0 : index
    %c0_49 = arith.constant 0 : index
    %c0_50 = arith.constant 0 : index
    %54 = vector.load %arg6[%c0_48, %c0_49, %c0_50] : memref<1x4x128xf32, #tpu.memory_space<vmem>>, vector<1x4x128xf32>
    %55 = vector.shape_cast %54 : vector<1x4x128xf32> to vector<4x128xf32>
    %56 = vector.shape_cast %53 : vector<4x128xf32> to vector<1x4x128xf32>
    tpu.vector_store %arg6[%c0_48, %c0_49, %c0_50], %56 {strides = array<i32>} : memref<1x4x128xf32, #tpu.memory_space<vmem>>, vector<1x4x128xf32>,
    return
  }
  func.func @transform_0(%arg0: i32) -> (i32, i32, i32) {
    %c0_i32 = arith.constant 0 : i32
    %c0_i32_0 = arith.constant 0 : i32
    %c0_i32_1 = arith.constant 0 : i32
    return %arg0, %c0_i32, %c0_i32_0 : i32, i32, i32
  }
  func.func @transform_1(%arg0: i32) -> (i32, i32, i32) {
    %c0_i32 = arith.constant 0 : i32
    %c0_i32_0 = arith.constant 0 : i32
    %c0_i32_1 = arith.constant 0 : i32
    %c0_i32_2 = arith.constant 0 : i32
    return %c0_i32, %c0_i32_0, %c0_i32_1 : i32, i32, i32
  }
  func.func @transform_2(%arg0: i32) -> (i32, i32) {
    %c0_i32 = arith.constant 0 : i32
    %c0_i32_0 = arith.constant 0 : i32
    %c0_i32_1 = arith.constant 0 : i32
    return %c0_i32, %c0_i32_0 : i32, i32
  }
  func.func @transform_3(%arg0: i32) -> (i32, i32, i32) {
    %c0_i32 = arith.constant 0 : i32
    %c0_i32_0 = arith.constant 0 : i32
    %c0_i32_1 = arith.constant 0 : i32
    %c0_i32_2 = arith.constant 0 : i32
    return %c0_i32, %c0_i32_0, %c0_i32_1 : i32, i32, i32
  }
  func.func @transform_4(%arg0: i32) -> (i32, i32) {
    %c0_i32 = arith.constant 0 : i32
    %c0_i32_0 = arith.constant 0 : i32
    %c0_i32_1 = arith.constant 0 : i32
    return %c0_i32, %c0_i32_0 : i32, i32
  }
  func.func @transform_5(%arg0: i32) -> (i32, i32, i32) {
    %c0_i32 = arith.constant 0 : i32
    %c0_i32_0 = arith.constant 0 : i32
    %c0_i32_1 = arith.constant 0 : i32
    return %arg0, %c0_i32, %c0_i32_0 : i32, i32, i32
  }
}

module attributes {stable_mosaic.version = 11 : i64} {
  func.func @_matmul_bias_act_kernel(%arg0: i32, %arg1: memref<32x32xbf16, #tpu.memory_space<vmem>>, %arg2: memref<32x64xbf16, #tpu.memory_space<vmem>>, %arg3: memref<1x64xf32, #tpu.memory_space<vmem>>, %arg4: memref<32x64xf32, #tpu.memory_space<vmem>>) attributes {dimension_semantics = [#tpu.dimension_semantics<parallel>], iteration_bounds = array<i64: 1>, scalar_prefetch = 0 : i64, scratch_operands = 0 : i64, tpu.core_type = #tpu.core_type<tc>, window_params = [{transform_indices = @transform_0, window_bounds = array<i64: 32, 32>}, {pipeline_mode = #tpu.pipeline_mode<synchronous>, transform_indices = @transform_1, window_bounds = array<i64: 32, 64>}, {pipeline_mode = #tpu.pipeline_mode<synchronous>, transform_indices = @transform_2, window_bounds = array<i64: 1, 64>}, {transform_indices = @transform_3, window_bounds = array<i64: 32, 64>}]} {
    %c0 = arith.constant 0 : index
    %c0_0 = arith.constant 0 : index
    %0 = vector.load %arg1[%c0, %c0_0] : memref<32x32xbf16, #tpu.memory_space<vmem>>, vector<32x32xbf16>
    %c0_1 = arith.constant 0 : index
    %c0_2 = arith.constant 0 : index
    %1 = vector.load %arg2[%c0_1, %c0_2] : memref<32x64xbf16, #tpu.memory_space<vmem>>, vector<32x64xbf16>
    %cst = arith.constant dense<0.000000e+00> : vector<32x64xf32>
    %2 = tpu.matmul %0, %1, %cst {dimension_numbers = #tpu.dot_dimension_numbers<[1], [0], [0], [1], [0, 0, 1, 1], [], []>} : vector<32x32xbf16>, vector<32x64xbf16>, vector<32x64xf32> -> vector<32x64xf32>
    %c0_3 = arith.constant 0 : index
    %c0_4 = arith.constant 0 : index
    %3 = vector.load %arg3[%c0_3, %c0_4] : memref<1x64xf32, #tpu.memory_space<vmem>>, vector<1x64xf32>
    %4 = vector.broadcast %3 : vector<1x64xf32> to vector<32x64xf32>
    %5 = arith.addf %2, %4 : vector<32x64xf32>
    %cst_5 = arith.constant 0.000000e+00 : f32
    %6 = vector.broadcast %cst_5 : f32 to vector<32x64xf32>
    %7 = arith.maximumf %5, %6 : vector<32x64xf32>
    %c0_6 = arith.constant 0 : index
    %c0_7 = arith.constant 0 : index
    %8 = vector.load %arg4[%c0_6, %c0_7] : memref<32x64xf32, #tpu.memory_space<vmem>>, vector<32x64xf32>
    tpu.vector_store %arg4[%c0_6, %c0_7], %7 {strides = array<i32>} : memref<32x64xf32, #tpu.memory_space<vmem>>, vector<32x64xf32>,
    return
  }
  func.func @transform_0(%arg0: i32) -> (i32, i32) {
    %c0_i32 = arith.constant 0 : i32
    %c0_i32_0 = arith.constant 0 : i32
    return %arg0, %c0_i32 : i32, i32
  }
  func.func @transform_1(%arg0: i32) -> (i32, i32) {
    %c0_i32 = arith.constant 0 : i32
    %c0_i32_0 = arith.constant 0 : i32
    %c0_i32_1 = arith.constant 0 : i32
    return %c0_i32, %c0_i32_0 : i32, i32
  }
  func.func @transform_2(%arg0: i32) -> (i32, i32) {
    %c0_i32 = arith.constant 0 : i32
    %c0_i32_0 = arith.constant 0 : i32
    %c0_i32_1 = arith.constant 0 : i32
    return %c0_i32, %c0_i32_0 : i32, i32
  }
  func.func @transform_3(%arg0: i32) -> (i32, i32) {
    %c0_i32 = arith.constant 0 : i32
    %c0_i32_0 = arith.constant 0 : i32
    return %arg0, %c0_i32 : i32, i32
  }
}

module attributes {stable_mosaic.version = 11 : i64} {
  func.func @_convlstm_kernel(%arg0: i32, %arg1: memref<1x10x256xf32, #tpu.memory_space<vmem>>, %arg2: memref<3x3x256x128xbf16, #tpu.memory_space<vmem>>, %arg3: memref<3x1x128xf32, #tpu.memory_space<vmem>>, %arg4: memref<1x8x128xf32, #tpu.memory_space<vmem>>) attributes {dimension_semantics = [#tpu.dimension_semantics<parallel>], iteration_bounds = array<i64: 2>, scalar_prefetch = 0 : i64, scratch_operands = 0 : i64, tpu.core_type = #tpu.core_type<tc>, window_params = [{transform_indices = @transform_0, window_bounds = array<i64: 1, 10, 256>}, {pipeline_mode = #tpu.pipeline_mode<synchronous>, transform_indices = @transform_1, window_bounds = array<i64: 3, 3, 256, 128>}, {pipeline_mode = #tpu.pipeline_mode<synchronous>, transform_indices = @transform_2, window_bounds = array<i64: 3, 1, 128>}, {transform_indices = @transform_3, window_bounds = array<i64: 1, 8, 128>}]} {
    %cst = arith.constant 0.000000e+00 : f32
    %0 = vector.broadcast %cst : f32 to vector<8x128xf32>
    %cst_0 = arith.constant 0.000000e+00 : f32
    %1 = vector.broadcast %cst_0 : f32 to vector<8x128xf32>
    %cst_1 = arith.constant 0.000000e+00 : f32
    %2 = vector.broadcast %cst_1 : f32 to vector<8x128xf32>
    %c0 = arith.constant 0 : index
    %c0_2 = arith.constant 0 : index
    %c0_3 = arith.constant 0 : index
    %3 = vector.load %arg1[%c0, %c0_2, %c0_3] : memref<1x10x256xf32, #tpu.memory_space<vmem>>, vector<1x8x256xf32>
    %4 = vector.shape_cast %3 : vector<1x8x256xf32> to vector<8x256xf32>
    %5 = arith.truncf %4 : vector<8x256xf32> to vector<8x256xbf16>
    %c0_4 = arith.constant 0 : index
    %c0_5 = arith.constant 0 : index
    %c0_6 = arith.constant 0 : index
    %c0_7 = arith.constant 0 : index
    %6 = vector.load %arg2[%c0_4, %c0_5, %c0_6, %c0_7] : memref<3x3x256x128xbf16, #tpu.memory_space<vmem>>, vector<1x1x256x128xbf16>
    %7 = vector.shape_cast %6 : vector<1x1x256x128xbf16> to vector<256x128xbf16>
    %cst_8 = arith.constant dense<0.000000e+00> : vector<8x128xf32>
    %8 = tpu.matmul %5, %7, %cst_8 {dimension_numbers = #tpu.dot_dimension_numbers<[1], [0], [0], [1], [0, 0, 1, 1], [], []>} : vector<8x256xbf16>, vector<256x128xbf16>, vector<8x128xf32> -> vector<8x128xf32>
    %9 = arith.addf %0, %8 : vector<8x128xf32>
    %c1 = arith.constant 1 : index
    %c0_9 = arith.constant 0 : index
    %c0_10 = arith.constant 0 : index
    %c0_11 = arith.constant 0 : index
    %10 = vector.load %arg2[%c1, %c0_9, %c0_10, %c0_11] : memref<3x3x256x128xbf16, #tpu.memory_space<vmem>>, vector<1x1x256x128xbf16>
    %11 = vector.shape_cast %10 : vector<1x1x256x128xbf16> to vector<256x128xbf16>
    %cst_12 = arith.constant dense<0.000000e+00> : vector<8x128xf32>
    %12 = tpu.matmul %5, %11, %cst_12 {dimension_numbers = #tpu.dot_dimension_numbers<[1], [0], [0], [1], [0, 0, 1, 1], [], []>} : vector<8x256xbf16>, vector<256x128xbf16>, vector<8x128xf32> -> vector<8x128xf32>
    %13 = arith.addf %1, %12 : vector<8x128xf32>
    %c2 = arith.constant 2 : index
    %c0_13 = arith.constant 0 : index
    %c0_14 = arith.constant 0 : index
    %c0_15 = arith.constant 0 : index
    %14 = vector.load %arg2[%c2, %c0_13, %c0_14, %c0_15] : memref<3x3x256x128xbf16, #tpu.memory_space<vmem>>, vector<1x1x256x128xbf16>
    %15 = vector.shape_cast %14 : vector<1x1x256x128xbf16> to vector<256x128xbf16>
    %cst_16 = arith.constant dense<0.000000e+00> : vector<8x128xf32>
    %16 = tpu.matmul %5, %15, %cst_16 {dimension_numbers = #tpu.dot_dimension_numbers<[1], [0], [0], [1], [0, 0, 1, 1], [], []>} : vector<8x256xbf16>, vector<256x128xbf16>, vector<8x128xf32> -> vector<8x128xf32>
    %17 = arith.addf %2, %16 : vector<8x128xf32>
    %c0_17 = arith.constant 0 : index
    %c1_18 = arith.constant 1 : index
    %c0_19 = arith.constant 0 : index
    %18 = vector.load %arg1[%c0_17, %c1_18, %c0_19] : memref<1x10x256xf32, #tpu.memory_space<vmem>>, vector<1x8x256xf32>
    %19 = vector.shape_cast %18 : vector<1x8x256xf32> to vector<8x256xf32>
    %20 = arith.truncf %19 : vector<8x256xf32> to vector<8x256xbf16>
    %c0_20 = arith.constant 0 : index
    %c1_21 = arith.constant 1 : index
    %c0_22 = arith.constant 0 : index
    %c0_23 = arith.constant 0 : index
    %21 = vector.load %arg2[%c0_20, %c1_21, %c0_22, %c0_23] : memref<3x3x256x128xbf16, #tpu.memory_space<vmem>>, vector<1x1x256x128xbf16>
    %22 = vector.shape_cast %21 : vector<1x1x256x128xbf16> to vector<256x128xbf16>
    %cst_24 = arith.constant dense<0.000000e+00> : vector<8x128xf32>
    %23 = tpu.matmul %20, %22, %cst_24 {dimension_numbers = #tpu.dot_dimension_numbers<[1], [0], [0], [1], [0, 0, 1, 1], [], []>} : vector<8x256xbf16>, vector<256x128xbf16>, vector<8x128xf32> -> vector<8x128xf32>
    %24 = arith.addf %9, %23 : vector<8x128xf32>
    %c1_25 = arith.constant 1 : index
    %c1_26 = arith.constant 1 : index
    %c0_27 = arith.constant 0 : index
    %c0_28 = arith.constant 0 : index
    %25 = vector.load %arg2[%c1_25, %c1_26, %c0_27, %c0_28] : memref<3x3x256x128xbf16, #tpu.memory_space<vmem>>, vector<1x1x256x128xbf16>
    %26 = vector.shape_cast %25 : vector<1x1x256x128xbf16> to vector<256x128xbf16>
    %cst_29 = arith.constant dense<0.000000e+00> : vector<8x128xf32>
    %27 = tpu.matmul %20, %26, %cst_29 {dimension_numbers = #tpu.dot_dimension_numbers<[1], [0], [0], [1], [0, 0, 1, 1], [], []>} : vector<8x256xbf16>, vector<256x128xbf16>, vector<8x128xf32> -> vector<8x128xf32>
    %28 = arith.addf %13, %27 : vector<8x128xf32>
    %c2_30 = arith.constant 2 : index
    %c1_31 = arith.constant 1 : index
    %c0_32 = arith.constant 0 : index
    %c0_33 = arith.constant 0 : index
    %29 = vector.load %arg2[%c2_30, %c1_31, %c0_32, %c0_33] : memref<3x3x256x128xbf16, #tpu.memory_space<vmem>>, vector<1x1x256x128xbf16>
    %30 = vector.shape_cast %29 : vector<1x1x256x128xbf16> to vector<256x128xbf16>
    %cst_34 = arith.constant dense<0.000000e+00> : vector<8x128xf32>
    %31 = tpu.matmul %20, %30, %cst_34 {dimension_numbers = #tpu.dot_dimension_numbers<[1], [0], [0], [1], [0, 0, 1, 1], [], []>} : vector<8x256xbf16>, vector<256x128xbf16>, vector<8x128xf32> -> vector<8x128xf32>
    %32 = arith.addf %17, %31 : vector<8x128xf32>
    %c0_35 = arith.constant 0 : index
    %c2_36 = arith.constant 2 : index
    %c0_37 = arith.constant 0 : index
    %33 = vector.load %arg1[%c0_35, %c2_36, %c0_37] : memref<1x10x256xf32, #tpu.memory_space<vmem>>, vector<1x8x256xf32>
    %34 = vector.shape_cast %33 : vector<1x8x256xf32> to vector<8x256xf32>
    %35 = arith.truncf %34 : vector<8x256xf32> to vector<8x256xbf16>
    %c0_38 = arith.constant 0 : index
    %c2_39 = arith.constant 2 : index
    %c0_40 = arith.constant 0 : index
    %c0_41 = arith.constant 0 : index
    %36 = vector.load %arg2[%c0_38, %c2_39, %c0_40, %c0_41] : memref<3x3x256x128xbf16, #tpu.memory_space<vmem>>, vector<1x1x256x128xbf16>
    %37 = vector.shape_cast %36 : vector<1x1x256x128xbf16> to vector<256x128xbf16>
    %cst_42 = arith.constant dense<0.000000e+00> : vector<8x128xf32>
    %38 = tpu.matmul %35, %37, %cst_42 {dimension_numbers = #tpu.dot_dimension_numbers<[1], [0], [0], [1], [0, 0, 1, 1], [], []>} : vector<8x256xbf16>, vector<256x128xbf16>, vector<8x128xf32> -> vector<8x128xf32>
    %39 = arith.addf %24, %38 : vector<8x128xf32>
    %c1_43 = arith.constant 1 : index
    %c2_44 = arith.constant 2 : index
    %c0_45 = arith.constant 0 : index
    %c0_46 = arith.constant 0 : index
    %40 = vector.load %arg2[%c1_43, %c2_44, %c0_45, %c0_46] : memref<3x3x256x128xbf16, #tpu.memory_space<vmem>>, vector<1x1x256x128xbf16>
    %41 = vector.shape_cast %40 : vector<1x1x256x128xbf16> to vector<256x128xbf16>
    %cst_47 = arith.constant dense<0.000000e+00> : vector<8x128xf32>
    %42 = tpu.matmul %35, %41, %cst_47 {dimension_numbers = #tpu.dot_dimension_numbers<[1], [0], [0], [1], [0, 0, 1, 1], [], []>} : vector<8x256xbf16>, vector<256x128xbf16>, vector<8x128xf32> -> vector<8x128xf32>
    %43 = arith.addf %28, %42 : vector<8x128xf32>
    %c2_48 = arith.constant 2 : index
    %c2_49 = arith.constant 2 : index
    %c0_50 = arith.constant 0 : index
    %c0_51 = arith.constant 0 : index
    %44 = vector.load %arg2[%c2_48, %c2_49, %c0_50, %c0_51] : memref<3x3x256x128xbf16, #tpu.memory_space<vmem>>, vector<1x1x256x128xbf16>
    %45 = vector.shape_cast %44 : vector<1x1x256x128xbf16> to vector<256x128xbf16>
    %cst_52 = arith.constant dense<0.000000e+00> : vector<8x128xf32>
    %46 = tpu.matmul %35, %45, %cst_52 {dimension_numbers = #tpu.dot_dimension_numbers<[1], [0], [0], [1], [0, 0, 1, 1], [], []>} : vector<8x256xbf16>, vector<256x128xbf16>, vector<8x128xf32> -> vector<8x128xf32>
    %47 = arith.addf %32, %46 : vector<8x128xf32>
    %c0_53 = arith.constant 0 : index
    %c0_54 = arith.constant 0 : index
    %c0_55 = arith.constant 0 : index
    %48 = vector.load %arg3[%c0_53, %c0_54, %c0_55] : memref<3x1x128xf32, #tpu.memory_space<vmem>>, vector<1x1x128xf32>
    %49 = vector.shape_cast %48 : vector<1x1x128xf32> to vector<1x128xf32>
    %50 = vector.broadcast %49 : vector<1x128xf32> to vector<8x128xf32>
    %51 = arith.addf %39, %50 : vector<8x128xf32>
    %52 = arith.negf %51 : vector<8x128xf32>
    %53 = math.exp %52 : vector<8x128xf32>
    %cst_56 = arith.constant 1.000000e+00 : f32
    %54 = vector.broadcast %cst_56 : f32 to vector<8x128xf32>
    %55 = arith.addf %54, %53 : vector<8x128xf32>
    %56 = arith.divf %54, %55 : vector<8x128xf32>
    %c1_57 = arith.constant 1 : index
    %c0_58 = arith.constant 0 : index
    %c0_59 = arith.constant 0 : index
    %57 = vector.load %arg3[%c1_57, %c0_58, %c0_59] : memref<3x1x128xf32, #tpu.memory_space<vmem>>, vector<1x1x128xf32>
    %58 = vector.shape_cast %57 : vector<1x1x128xf32> to vector<1x128xf32>
    %59 = vector.broadcast %58 : vector<1x128xf32> to vector<8x128xf32>
    %60 = arith.addf %43, %59 : vector<8x128xf32>
    %61 = math.tanh %60 : vector<8x128xf32>
    %c2_60 = arith.constant 2 : index
    %c0_61 = arith.constant 0 : index
    %c0_62 = arith.constant 0 : index
    %62 = vector.load %arg3[%c2_60, %c0_61, %c0_62] : memref<3x1x128xf32, #tpu.memory_space<vmem>>, vector<1x1x128xf32>
    %63 = vector.shape_cast %62 : vector<1x1x128xf32> to vector<1x128xf32>
    %64 = vector.broadcast %63 : vector<1x128xf32> to vector<8x128xf32>
    %65 = arith.addf %47, %64 : vector<8x128xf32>
    %66 = arith.negf %65 : vector<8x128xf32>
    %67 = math.exp %66 : vector<8x128xf32>
    %cst_63 = arith.constant 1.000000e+00 : f32
    %68 = vector.broadcast %cst_63 : f32 to vector<8x128xf32>
    %69 = arith.addf %68, %67 : vector<8x128xf32>
    %70 = arith.divf %68, %69 : vector<8x128xf32>
    %71 = arith.mulf %56, %61 : vector<8x128xf32>
    %72 = math.tanh %71 : vector<8x128xf32>
    %73 = arith.mulf %70, %72 : vector<8x128xf32>
    %c0_64 = arith.constant 0 : index
    %c0_65 = arith.constant 0 : index
    %c0_66 = arith.constant 0 : index
    %74 = vector.load %arg4[%c0_64, %c0_65, %c0_66] : memref<1x8x128xf32, #tpu.memory_space<vmem>>, vector<1x8x128xf32>
    %75 = vector.shape_cast %74 : vector<1x8x128xf32> to vector<8x128xf32>
    %76 = vector.shape_cast %73 : vector<8x128xf32> to vector<1x8x128xf32>
    tpu.vector_store %arg4[%c0_64, %c0_65, %c0_66], %76 {strides = array<i32>} : memref<1x8x128xf32, #tpu.memory_space<vmem>>, vector<1x8x128xf32>,
    return
  }
  func.func @transform_0(%arg0: i32) -> (i32, i32, i32) {
    %c0_i32 = arith.constant 0 : i32
    %c0_i32_0 = arith.constant 0 : i32
    %c0_i32_1 = arith.constant 0 : i32
    return %arg0, %c0_i32, %c0_i32_0 : i32, i32, i32
  }
  func.func @transform_1(%arg0: i32) -> (i32, i32, i32, i32) {
    %c0_i32 = arith.constant 0 : i32
    %c0_i32_0 = arith.constant 0 : i32
    %c0_i32_1 = arith.constant 0 : i32
    %c0_i32_2 = arith.constant 0 : i32
    %c0_i32_3 = arith.constant 0 : i32
    return %c0_i32, %c0_i32_0, %c0_i32_1, %c0_i32_2 : i32, i32, i32, i32
  }
  func.func @transform_2(%arg0: i32) -> (i32, i32, i32) {
    %c0_i32 = arith.constant 0 : i32
    %c0_i32_0 = arith.constant 0 : i32
    %c0_i32_1 = arith.constant 0 : i32
    %c0_i32_2 = arith.constant 0 : i32
    return %c0_i32, %c0_i32_0, %c0_i32_1 : i32, i32, i32
  }
  func.func @transform_3(%arg0: i32) -> (i32, i32, i32) {
    %c0_i32 = arith.constant 0 : i32
    %c0_i32_0 = arith.constant 0 : i32
    %c0_i32_1 = arith.constant 0 : i32
    return %arg0, %c0_i32, %c0_i32_0 : i32, i32, i32
  }
}

module attributes {stable_mosaic.version = 11 : i64} {
  func.func @_double_conv3x3_kernel(%arg0: i32, %arg1: memref<1x10x128xf32, #tpu.memory_space<vmem>>, %arg2: memref<3x128x128xbf16, #tpu.memory_space<vmem>>, %arg3: memref<1x128xf32, #tpu.memory_space<vmem>>, %arg4: memref<3x128x128xbf16, #tpu.memory_space<vmem>>, %arg5: memref<1x128xf32, #tpu.memory_space<vmem>>, %arg6: memref<1x8x128xf32, #tpu.memory_space<vmem>>, %arg7: memref<10x128xf32, #tpu.memory_space<vmem>>) attributes {dimension_semantics = [#tpu.dimension_semantics<parallel>], iteration_bounds = array<i64: 2>, scalar_prefetch = 0 : i64, scratch_operands = 1 : i64, tpu.core_type = #tpu.core_type<tc>, window_params = [{transform_indices = @transform_0, window_bounds = array<i64: 1, 10, 128>}, {pipeline_mode = #tpu.pipeline_mode<synchronous>, transform_indices = @transform_1, window_bounds = array<i64: 3, 128, 128>}, {pipeline_mode = #tpu.pipeline_mode<synchronous>, transform_indices = @transform_2, window_bounds = array<i64: 1, 128>}, {pipeline_mode = #tpu.pipeline_mode<synchronous>, transform_indices = @transform_3, window_bounds = array<i64: 3, 128, 128>}, {pipeline_mode = #tpu.pipeline_mode<synchronous>, transform_indices = @transform_4, window_bounds = array<i64: 1, 128>}, {transform_indices = @transform_5, window_bounds = array<i64: 1, 8, 128>}]} {
    %cst = arith.constant 0.000000e+00 : f32
    %0 = vector.broadcast %cst : f32 to vector<8x128xf32>
    %c0 = arith.constant 0 : index
    %c0_0 = arith.constant 0 : index
    %c0_1 = arith.constant 0 : index
    %1 = vector.load %arg1[%c0, %c0_0, %c0_1] : memref<1x10x128xf32, #tpu.memory_space<vmem>>, vector<1x8x128xf32>
    %2 = vector.shape_cast %1 : vector<1x8x128xf32> to vector<8x128xf32>
    %3 = arith.truncf %2 : vector<8x128xf32> to vector<8x128xbf16>
    %c0_2 = arith.constant 0 : index
    %c0_3 = arith.constant 0 : index
    %c0_4 = arith.constant 0 : index
    %4 = vector.load %arg2[%c0_2, %c0_3, %c0_4] : memref<3x128x128xbf16, #tpu.memory_space<vmem>>, vector<1x128x128xbf16>
    %5 = vector.shape_cast %4 : vector<1x128x128xbf16> to vector<128x128xbf16>
    %cst_5 = arith.constant dense<0.000000e+00> : vector<8x128xf32>
    %6 = tpu.matmul %3, %5, %cst_5 {dimension_numbers = #tpu.dot_dimension_numbers<[1], [0], [0], [1], [0, 0, 1, 1], [], []>} : vector<8x128xbf16>, vector<128x128xbf16>, vector<8x128xf32> -> vector<8x128xf32>
    %7 = arith.addf %0, %6 : vector<8x128xf32>
    %c0_6 = arith.constant 0 : index
    %c1 = arith.constant 1 : index
    %c0_7 = arith.constant 0 : index
    %8 = vector.load %arg1[%c0_6, %c1, %c0_7] : memref<1x10x128xf32, #tpu.memory_space<vmem>>, vector<1x8x128xf32>
    %9 = vector.shape_cast %8 : vector<1x8x128xf32> to vector<8x128xf32>
    %10 = arith.truncf %9 : vector<8x128xf32> to vector<8x128xbf16>
    %c1_8 = arith.constant 1 : index
    %c0_9 = arith.constant 0 : index
    %c0_10 = arith.constant 0 : index
    %11 = vector.load %arg2[%c1_8, %c0_9, %c0_10] : memref<3x128x128xbf16, #tpu.memory_space<vmem>>, vector<1x128x128xbf16>
    %12 = vector.shape_cast %11 : vector<1x128x128xbf16> to vector<128x128xbf16>
    %cst_11 = arith.constant dense<0.000000e+00> : vector<8x128xf32>
    %13 = tpu.matmul %10, %12, %cst_11 {dimension_numbers = #tpu.dot_dimension_numbers<[1], [0], [0], [1], [0, 0, 1, 1], [], []>} : vector<8x128xbf16>, vector<128x128xbf16>, vector<8x128xf32> -> vector<8x128xf32>
    %14 = arith.addf %7, %13 : vector<8x128xf32>
    %c0_12 = arith.constant 0 : index
    %c2 = arith.constant 2 : index
    %c0_13 = arith.constant 0 : index
    %15 = vector.load %arg1[%c0_12, %c2, %c0_13] : memref<1x10x128xf32, #tpu.memory_space<vmem>>, vector<1x8x128xf32>
    %16 = vector.shape_cast %15 : vector<1x8x128xf32> to vector<8x128xf32>
    %17 = arith.truncf %16 : vector<8x128xf32> to vector<8x128xbf16>
    %c2_14 = arith.constant 2 : index
    %c0_15 = arith.constant 0 : index
    %c0_16 = arith.constant 0 : index
    %18 = vector.load %arg2[%c2_14, %c0_15, %c0_16] : memref<3x128x128xbf16, #tpu.memory_space<vmem>>, vector<1x128x128xbf16>
    %19 = vector.shape_cast %18 : vector<1x128x128xbf16> to vector<128x128xbf16>
    %cst_17 = arith.constant dense<0.000000e+00> : vector<8x128xf32>
    %20 = tpu.matmul %17, %19, %cst_17 {dimension_numbers = #tpu.dot_dimension_numbers<[1], [0], [0], [1], [0, 0, 1, 1], [], []>} : vector<8x128xbf16>, vector<128x128xbf16>, vector<8x128xf32> -> vector<8x128xf32>
    %21 = arith.addf %14, %20 : vector<8x128xf32>
    %c0_18 = arith.constant 0 : index
    %c0_19 = arith.constant 0 : index
    %22 = vector.load %arg3[%c0_18, %c0_19] : memref<1x128xf32, #tpu.memory_space<vmem>>, vector<1x128xf32>
    %23 = vector.broadcast %22 : vector<1x128xf32> to vector<8x128xf32>
    %24 = arith.addf %21, %23 : vector<8x128xf32>
    %cst_20 = arith.constant 0.000000e+00 : f32
    %25 = vector.broadcast %cst_20 : f32 to vector<8x128xf32>
    %26 = arith.maximumf %24, %25 : vector<8x128xf32>
    %cst_21 = arith.constant 0.000000e+00 : f32
    %27 = vector.broadcast %cst_21 : f32 to vector<10x128xf32>
    %c0_22 = arith.constant 0 : index
    %c0_23 = arith.constant 0 : index
    %28 = vector.load %arg7[%c0_22, %c0_23] : memref<10x128xf32, #tpu.memory_space<vmem>>, vector<10x128xf32>
    tpu.vector_store %arg7[%c0_22, %c0_23], %27 {strides = array<i32>} : memref<10x128xf32, #tpu.memory_space<vmem>>, vector<10x128xf32>,
    %c1_24 = arith.constant 1 : index
    %c0_25 = arith.constant 0 : index
    %29 = vector.load %arg7[%c1_24, %c0_25] : memref<10x128xf32, #tpu.memory_space<vmem>>, vector<8x128xf32>
    tpu.vector_store %arg7[%c1_24, %c0_25], %26 {strides = array<i32>} : memref<10x128xf32, #tpu.memory_space<vmem>>, vector<8x128xf32>,
    %cst_26 = arith.constant 0.000000e+00 : f32
    %30 = vector.broadcast %cst_26 : f32 to vector<8x128xf32>
    %c0_27 = arith.constant 0 : index
    %c0_28 = arith.constant 0 : index
    %31 = vector.load %arg7[%c0_27, %c0_28] : memref<10x128xf32, #tpu.memory_space<vmem>>, vector<8x128xf32>
    %32 = arith.truncf %31 : vector<8x128xf32> to vector<8x128xbf16>
    %c0_29 = arith.constant 0 : index
    %c0_30 = arith.constant 0 : index
    %c0_31 = arith.constant 0 : index
    %33 = vector.load %arg4[%c0_29, %c0_30, %c0_31] : memref<3x128x128xbf16, #tpu.memory_space<vmem>>, vector<1x128x128xbf16>
    %34 = vector.shape_cast %33 : vector<1x128x128xbf16> to vector<128x128xbf16>
    %cst_32 = arith.constant dense<0.000000e+00> : vector<8x128xf32>
    %35 = tpu.matmul %32, %34, %cst_32 {dimension_numbers = #tpu.dot_dimension_numbers<[1], [0], [0], [1], [0, 0, 1, 1], [], []>} : vector<8x128xbf16>, vector<128x128xbf16>, vector<8x128xf32> -> vector<8x128xf32>
    %36 = arith.addf %30, %35 : vector<8x128xf32>
    %c1_33 = arith.constant 1 : index
    %c0_34 = arith.constant 0 : index
    %37 = vector.load %arg7[%c1_33, %c0_34] : memref<10x128xf32, #tpu.memory_space<vmem>>, vector<8x128xf32>
    %38 = arith.truncf %37 : vector<8x128xf32> to vector<8x128xbf16>
    %c1_35 = arith.constant 1 : index
    %c0_36 = arith.constant 0 : index
    %c0_37 = arith.constant 0 : index
    %39 = vector.load %arg4[%c1_35, %c0_36, %c0_37] : memref<3x128x128xbf16, #tpu.memory_space<vmem>>, vector<1x128x128xbf16>
    %40 = vector.shape_cast %39 : vector<1x128x128xbf16> to vector<128x128xbf16>
    %cst_38 = arith.constant dense<0.000000e+00> : vector<8x128xf32>
    %41 = tpu.matmul %38, %40, %cst_38 {dimension_numbers = #tpu.dot_dimension_numbers<[1], [0], [0], [1], [0, 0, 1, 1], [], []>} : vector<8x128xbf16>, vector<128x128xbf16>, vector<8x128xf32> -> vector<8x128xf32>
    %42 = arith.addf %36, %41 : vector<8x128xf32>
    %c2_39 = arith.constant 2 : index
    %c0_40 = arith.constant 0 : index
    %43 = vector.load %arg7[%c2_39, %c0_40] : memref<10x128xf32, #tpu.memory_space<vmem>>, vector<8x128xf32>
    %44 = arith.truncf %43 : vector<8x128xf32> to vector<8x128xbf16>
    %c2_41 = arith.constant 2 : index
    %c0_42 = arith.constant 0 : index
    %c0_43 = arith.constant 0 : index
    %45 = vector.load %arg4[%c2_41, %c0_42, %c0_43] : memref<3x128x128xbf16, #tpu.memory_space<vmem>>, vector<1x128x128xbf16>
    %46 = vector.shape_cast %45 : vector<1x128x128xbf16> to vector<128x128xbf16>
    %cst_44 = arith.constant dense<0.000000e+00> : vector<8x128xf32>
    %47 = tpu.matmul %44, %46, %cst_44 {dimension_numbers = #tpu.dot_dimension_numbers<[1], [0], [0], [1], [0, 0, 1, 1], [], []>} : vector<8x128xbf16>, vector<128x128xbf16>, vector<8x128xf32> -> vector<8x128xf32>
    %48 = arith.addf %42, %47 : vector<8x128xf32>
    %c0_45 = arith.constant 0 : index
    %c0_46 = arith.constant 0 : index
    %49 = vector.load %arg5[%c0_45, %c0_46] : memref<1x128xf32, #tpu.memory_space<vmem>>, vector<1x128xf32>
    %50 = vector.broadcast %49 : vector<1x128xf32> to vector<8x128xf32>
    %51 = arith.addf %48, %50 : vector<8x128xf32>
    %cst_47 = arith.constant 0.000000e+00 : f32
    %52 = vector.broadcast %cst_47 : f32 to vector<8x128xf32>
    %53 = arith.maximumf %51, %52 : vector<8x128xf32>
    %c0_48 = arith.constant 0 : index
    %c0_49 = arith.constant 0 : index
    %c0_50 = arith.constant 0 : index
    %54 = vector.load %arg6[%c0_48, %c0_49, %c0_50] : memref<1x8x128xf32, #tpu.memory_space<vmem>>, vector<1x8x128xf32>
    %55 = vector.shape_cast %54 : vector<1x8x128xf32> to vector<8x128xf32>
    %56 = vector.shape_cast %53 : vector<8x128xf32> to vector<1x8x128xf32>
    tpu.vector_store %arg6[%c0_48, %c0_49, %c0_50], %56 {strides = array<i32>} : memref<1x8x128xf32, #tpu.memory_space<vmem>>, vector<1x8x128xf32>,
    return
  }
  func.func @transform_0(%arg0: i32) -> (i32, i32, i32) {
    %c0_i32 = arith.constant 0 : i32
    %c0_i32_0 = arith.constant 0 : i32
    %c0_i32_1 = arith.constant 0 : i32
    return %arg0, %c0_i32, %c0_i32_0 : i32, i32, i32
  }
  func.func @transform_1(%arg0: i32) -> (i32, i32, i32) {
    %c0_i32 = arith.constant 0 : i32
    %c0_i32_0 = arith.constant 0 : i32
    %c0_i32_1 = arith.constant 0 : i32
    %c0_i32_2 = arith.constant 0 : i32
    return %c0_i32, %c0_i32_0, %c0_i32_1 : i32, i32, i32
  }
  func.func @transform_2(%arg0: i32) -> (i32, i32) {
    %c0_i32 = arith.constant 0 : i32
    %c0_i32_0 = arith.constant 0 : i32
    %c0_i32_1 = arith.constant 0 : i32
    return %c0_i32, %c0_i32_0 : i32, i32
  }
  func.func @transform_3(%arg0: i32) -> (i32, i32, i32) {
    %c0_i32 = arith.constant 0 : i32
    %c0_i32_0 = arith.constant 0 : i32
    %c0_i32_1 = arith.constant 0 : i32
    %c0_i32_2 = arith.constant 0 : i32
    return %c0_i32, %c0_i32_0, %c0_i32_1 : i32, i32, i32
  }
  func.func @transform_4(%arg0: i32) -> (i32, i32) {
    %c0_i32 = arith.constant 0 : i32
    %c0_i32_0 = arith.constant 0 : i32
    %c0_i32_1 = arith.constant 0 : i32
    return %c0_i32, %c0_i32_0 : i32, i32
  }
  func.func @transform_5(%arg0: i32) -> (i32, i32, i32) {
    %c0_i32 = arith.constant 0 : i32
    %c0_i32_0 = arith.constant 0 : i32
    %c0_i32_1 = arith.constant 0 : i32
    return %arg0, %c0_i32, %c0_i32_0 : i32, i32, i32
  }
}

module attributes {stable_mosaic.version = 11 : i64} {
  func.func @_matmul_bias_act_kernel(%arg0: i32, %arg1: memref<128x16xbf16, #tpu.memory_space<vmem>>, %arg2: memref<16x32xbf16, #tpu.memory_space<vmem>>, %arg3: memref<1x32xf32, #tpu.memory_space<vmem>>, %arg4: memref<128x32xf32, #tpu.memory_space<vmem>>) attributes {dimension_semantics = [#tpu.dimension_semantics<parallel>], iteration_bounds = array<i64: 1>, scalar_prefetch = 0 : i64, scratch_operands = 0 : i64, tpu.core_type = #tpu.core_type<tc>, window_params = [{transform_indices = @transform_0, window_bounds = array<i64: 128, 16>}, {pipeline_mode = #tpu.pipeline_mode<synchronous>, transform_indices = @transform_1, window_bounds = array<i64: 16, 32>}, {pipeline_mode = #tpu.pipeline_mode<synchronous>, transform_indices = @transform_2, window_bounds = array<i64: 1, 32>}, {transform_indices = @transform_3, window_bounds = array<i64: 128, 32>}]} {
    %c0 = arith.constant 0 : index
    %c0_0 = arith.constant 0 : index
    %0 = vector.load %arg1[%c0, %c0_0] : memref<128x16xbf16, #tpu.memory_space<vmem>>, vector<128x16xbf16>
    %c0_1 = arith.constant 0 : index
    %c0_2 = arith.constant 0 : index
    %1 = vector.load %arg2[%c0_1, %c0_2] : memref<16x32xbf16, #tpu.memory_space<vmem>>, vector<16x32xbf16>
    %cst = arith.constant dense<0.000000e+00> : vector<128x32xf32>
    %2 = tpu.matmul %0, %1, %cst {dimension_numbers = #tpu.dot_dimension_numbers<[1], [0], [0], [1], [0, 0, 1, 1], [], []>} : vector<128x16xbf16>, vector<16x32xbf16>, vector<128x32xf32> -> vector<128x32xf32>
    %c0_3 = arith.constant 0 : index
    %c0_4 = arith.constant 0 : index
    %3 = vector.load %arg3[%c0_3, %c0_4] : memref<1x32xf32, #tpu.memory_space<vmem>>, vector<1x32xf32>
    %4 = vector.broadcast %3 : vector<1x32xf32> to vector<128x32xf32>
    %5 = arith.addf %2, %4 : vector<128x32xf32>
    %cst_5 = arith.constant 0.000000e+00 : f32
    %6 = vector.broadcast %cst_5 : f32 to vector<128x32xf32>
    %7 = arith.maximumf %5, %6 : vector<128x32xf32>
    %c0_6 = arith.constant 0 : index
    %c0_7 = arith.constant 0 : index
    %8 = vector.load %arg4[%c0_6, %c0_7] : memref<128x32xf32, #tpu.memory_space<vmem>>, vector<128x32xf32>
    tpu.vector_store %arg4[%c0_6, %c0_7], %7 {strides = array<i32>} : memref<128x32xf32, #tpu.memory_space<vmem>>, vector<128x32xf32>,
    return
  }
  func.func @transform_0(%arg0: i32) -> (i32, i32) {
    %c0_i32 = arith.constant 0 : i32
    %c0_i32_0 = arith.constant 0 : i32
    return %arg0, %c0_i32 : i32, i32
  }
  func.func @transform_1(%arg0: i32) -> (i32, i32) {
    %c0_i32 = arith.constant 0 : i32
    %c0_i32_0 = arith.constant 0 : i32
    %c0_i32_1 = arith.constant 0 : i32
    return %c0_i32, %c0_i32_0 : i32, i32
  }
  func.func @transform_2(%arg0: i32) -> (i32, i32) {
    %c0_i32 = arith.constant 0 : i32
    %c0_i32_0 = arith.constant 0 : i32
    %c0_i32_1 = arith.constant 0 : i32
    return %c0_i32, %c0_i32_0 : i32, i32
  }
  func.func @transform_3(%arg0: i32) -> (i32, i32) {
    %c0_i32 = arith.constant 0 : i32
    %c0_i32_0 = arith.constant 0 : i32
    return %arg0, %c0_i32 : i32, i32
  }
}

module attributes {stable_mosaic.version = 11 : i64} {
  func.func @_convlstm_kernel(%arg0: i32, %arg1: memref<1x18x256xf32, #tpu.memory_space<vmem>>, %arg2: memref<3x3x256x128xbf16, #tpu.memory_space<vmem>>, %arg3: memref<3x1x128xf32, #tpu.memory_space<vmem>>, %arg4: memref<1x16x128xf32, #tpu.memory_space<vmem>>) attributes {dimension_semantics = [#tpu.dimension_semantics<parallel>], iteration_bounds = array<i64: 2>, scalar_prefetch = 0 : i64, scratch_operands = 0 : i64, tpu.core_type = #tpu.core_type<tc>, window_params = [{transform_indices = @transform_0, window_bounds = array<i64: 1, 18, 256>}, {pipeline_mode = #tpu.pipeline_mode<synchronous>, transform_indices = @transform_1, window_bounds = array<i64: 3, 3, 256, 128>}, {pipeline_mode = #tpu.pipeline_mode<synchronous>, transform_indices = @transform_2, window_bounds = array<i64: 3, 1, 128>}, {transform_indices = @transform_3, window_bounds = array<i64: 1, 16, 128>}]} {
    %cst = arith.constant 0.000000e+00 : f32
    %0 = vector.broadcast %cst : f32 to vector<16x128xf32>
    %cst_0 = arith.constant 0.000000e+00 : f32
    %1 = vector.broadcast %cst_0 : f32 to vector<16x128xf32>
    %cst_1 = arith.constant 0.000000e+00 : f32
    %2 = vector.broadcast %cst_1 : f32 to vector<16x128xf32>
    %c0 = arith.constant 0 : index
    %c0_2 = arith.constant 0 : index
    %c0_3 = arith.constant 0 : index
    %3 = vector.load %arg1[%c0, %c0_2, %c0_3] : memref<1x18x256xf32, #tpu.memory_space<vmem>>, vector<1x16x256xf32>
    %4 = vector.shape_cast %3 : vector<1x16x256xf32> to vector<16x256xf32>
    %5 = arith.truncf %4 : vector<16x256xf32> to vector<16x256xbf16>
    %c0_4 = arith.constant 0 : index
    %c0_5 = arith.constant 0 : index
    %c0_6 = arith.constant 0 : index
    %c0_7 = arith.constant 0 : index
    %6 = vector.load %arg2[%c0_4, %c0_5, %c0_6, %c0_7] : memref<3x3x256x128xbf16, #tpu.memory_space<vmem>>, vector<1x1x256x128xbf16>
    %7 = vector.shape_cast %6 : vector<1x1x256x128xbf16> to vector<256x128xbf16>
    %cst_8 = arith.constant dense<0.000000e+00> : vector<16x128xf32>
    %8 = tpu.matmul %5, %7, %cst_8 {dimension_numbers = #tpu.dot_dimension_numbers<[1], [0], [0], [1], [0, 0, 1, 1], [], []>} : vector<16x256xbf16>, vector<256x128xbf16>, vector<16x128xf32> -> vector<16x128xf32>
    %9 = arith.addf %0, %8 : vector<16x128xf32>
    %c1 = arith.constant 1 : index
    %c0_9 = arith.constant 0 : index
    %c0_10 = arith.constant 0 : index
    %c0_11 = arith.constant 0 : index
    %10 = vector.load %arg2[%c1, %c0_9, %c0_10, %c0_11] : memref<3x3x256x128xbf16, #tpu.memory_space<vmem>>, vector<1x1x256x128xbf16>
    %11 = vector.shape_cast %10 : vector<1x1x256x128xbf16> to vector<256x128xbf16>
    %cst_12 = arith.constant dense<0.000000e+00> : vector<16x128xf32>
    %12 = tpu.matmul %5, %11, %cst_12 {dimension_numbers = #tpu.dot_dimension_numbers<[1], [0], [0], [1], [0, 0, 1, 1], [], []>} : vector<16x256xbf16>, vector<256x128xbf16>, vector<16x128xf32> -> vector<16x128xf32>
    %13 = arith.addf %1, %12 : vector<16x128xf32>
    %c2 = arith.constant 2 : index
    %c0_13 = arith.constant 0 : index
    %c0_14 = arith.constant 0 : index
    %c0_15 = arith.constant 0 : index
    %14 = vector.load %arg2[%c2, %c0_13, %c0_14, %c0_15] : memref<3x3x256x128xbf16, #tpu.memory_space<vmem>>, vector<1x1x256x128xbf16>
    %15 = vector.shape_cast %14 : vector<1x1x256x128xbf16> to vector<256x128xbf16>
    %cst_16 = arith.constant dense<0.000000e+00> : vector<16x128xf32>
    %16 = tpu.matmul %5, %15, %cst_16 {dimension_numbers = #tpu.dot_dimension_numbers<[1], [0], [0], [1], [0, 0, 1, 1], [], []>} : vector<16x256xbf16>, vector<256x128xbf16>, vector<16x128xf32> -> vector<16x128xf32>
    %17 = arith.addf %2, %16 : vector<16x128xf32>
    %c0_17 = arith.constant 0 : index
    %c1_18 = arith.constant 1 : index
    %c0_19 = arith.constant 0 : index
    %18 = vector.load %arg1[%c0_17, %c1_18, %c0_19] : memref<1x18x256xf32, #tpu.memory_space<vmem>>, vector<1x16x256xf32>
    %19 = vector.shape_cast %18 : vector<1x16x256xf32> to vector<16x256xf32>
    %20 = arith.truncf %19 : vector<16x256xf32> to vector<16x256xbf16>
    %c0_20 = arith.constant 0 : index
    %c1_21 = arith.constant 1 : index
    %c0_22 = arith.constant 0 : index
    %c0_23 = arith.constant 0 : index
    %21 = vector.load %arg2[%c0_20, %c1_21, %c0_22, %c0_23] : memref<3x3x256x128xbf16, #tpu.memory_space<vmem>>, vector<1x1x256x128xbf16>
    %22 = vector.shape_cast %21 : vector<1x1x256x128xbf16> to vector<256x128xbf16>
    %cst_24 = arith.constant dense<0.000000e+00> : vector<16x128xf32>
    %23 = tpu.matmul %20, %22, %cst_24 {dimension_numbers = #tpu.dot_dimension_numbers<[1], [0], [0], [1], [0, 0, 1, 1], [], []>} : vector<16x256xbf16>, vector<256x128xbf16>, vector<16x128xf32> -> vector<16x128xf32>
    %24 = arith.addf %9, %23 : vector<16x128xf32>
    %c1_25 = arith.constant 1 : index
    %c1_26 = arith.constant 1 : index
    %c0_27 = arith.constant 0 : index
    %c0_28 = arith.constant 0 : index
    %25 = vector.load %arg2[%c1_25, %c1_26, %c0_27, %c0_28] : memref<3x3x256x128xbf16, #tpu.memory_space<vmem>>, vector<1x1x256x128xbf16>
    %26 = vector.shape_cast %25 : vector<1x1x256x128xbf16> to vector<256x128xbf16>
    %cst_29 = arith.constant dense<0.000000e+00> : vector<16x128xf32>
    %27 = tpu.matmul %20, %26, %cst_29 {dimension_numbers = #tpu.dot_dimension_numbers<[1], [0], [0], [1], [0, 0, 1, 1], [], []>} : vector<16x256xbf16>, vector<256x128xbf16>, vector<16x128xf32> -> vector<16x128xf32>
    %28 = arith.addf %13, %27 : vector<16x128xf32>
    %c2_30 = arith.constant 2 : index
    %c1_31 = arith.constant 1 : index
    %c0_32 = arith.constant 0 : index
    %c0_33 = arith.constant 0 : index
    %29 = vector.load %arg2[%c2_30, %c1_31, %c0_32, %c0_33] : memref<3x3x256x128xbf16, #tpu.memory_space<vmem>>, vector<1x1x256x128xbf16>
    %30 = vector.shape_cast %29 : vector<1x1x256x128xbf16> to vector<256x128xbf16>
    %cst_34 = arith.constant dense<0.000000e+00> : vector<16x128xf32>
    %31 = tpu.matmul %20, %30, %cst_34 {dimension_numbers = #tpu.dot_dimension_numbers<[1], [0], [0], [1], [0, 0, 1, 1], [], []>} : vector<16x256xbf16>, vector<256x128xbf16>, vector<16x128xf32> -> vector<16x128xf32>
    %32 = arith.addf %17, %31 : vector<16x128xf32>
    %c0_35 = arith.constant 0 : index
    %c2_36 = arith.constant 2 : index
    %c0_37 = arith.constant 0 : index
    %33 = vector.load %arg1[%c0_35, %c2_36, %c0_37] : memref<1x18x256xf32, #tpu.memory_space<vmem>>, vector<1x16x256xf32>
    %34 = vector.shape_cast %33 : vector<1x16x256xf32> to vector<16x256xf32>
    %35 = arith.truncf %34 : vector<16x256xf32> to vector<16x256xbf16>
    %c0_38 = arith.constant 0 : index
    %c2_39 = arith.constant 2 : index
    %c0_40 = arith.constant 0 : index
    %c0_41 = arith.constant 0 : index
    %36 = vector.load %arg2[%c0_38, %c2_39, %c0_40, %c0_41] : memref<3x3x256x128xbf16, #tpu.memory_space<vmem>>, vector<1x1x256x128xbf16>
    %37 = vector.shape_cast %36 : vector<1x1x256x128xbf16> to vector<256x128xbf16>
    %cst_42 = arith.constant dense<0.000000e+00> : vector<16x128xf32>
    %38 = tpu.matmul %35, %37, %cst_42 {dimension_numbers = #tpu.dot_dimension_numbers<[1], [0], [0], [1], [0, 0, 1, 1], [], []>} : vector<16x256xbf16>, vector<256x128xbf16>, vector<16x128xf32> -> vector<16x128xf32>
    %39 = arith.addf %24, %38 : vector<16x128xf32>
    %c1_43 = arith.constant 1 : index
    %c2_44 = arith.constant 2 : index
    %c0_45 = arith.constant 0 : index
    %c0_46 = arith.constant 0 : index
    %40 = vector.load %arg2[%c1_43, %c2_44, %c0_45, %c0_46] : memref<3x3x256x128xbf16, #tpu.memory_space<vmem>>, vector<1x1x256x128xbf16>
    %41 = vector.shape_cast %40 : vector<1x1x256x128xbf16> to vector<256x128xbf16>
    %cst_47 = arith.constant dense<0.000000e+00> : vector<16x128xf32>
    %42 = tpu.matmul %35, %41, %cst_47 {dimension_numbers = #tpu.dot_dimension_numbers<[1], [0], [0], [1], [0, 0, 1, 1], [], []>} : vector<16x256xbf16>, vector<256x128xbf16>, vector<16x128xf32> -> vector<16x128xf32>
    %43 = arith.addf %28, %42 : vector<16x128xf32>
    %c2_48 = arith.constant 2 : index
    %c2_49 = arith.constant 2 : index
    %c0_50 = arith.constant 0 : index
    %c0_51 = arith.constant 0 : index
    %44 = vector.load %arg2[%c2_48, %c2_49, %c0_50, %c0_51] : memref<3x3x256x128xbf16, #tpu.memory_space<vmem>>, vector<1x1x256x128xbf16>
    %45 = vector.shape_cast %44 : vector<1x1x256x128xbf16> to vector<256x128xbf16>
    %cst_52 = arith.constant dense<0.000000e+00> : vector<16x128xf32>
    %46 = tpu.matmul %35, %45, %cst_52 {dimension_numbers = #tpu.dot_dimension_numbers<[1], [0], [0], [1], [0, 0, 1, 1], [], []>} : vector<16x256xbf16>, vector<256x128xbf16>, vector<16x128xf32> -> vector<16x128xf32>
    %47 = arith.addf %32, %46 : vector<16x128xf32>
    %c0_53 = arith.constant 0 : index
    %c0_54 = arith.constant 0 : index
    %c0_55 = arith.constant 0 : index
    %48 = vector.load %arg3[%c0_53, %c0_54, %c0_55] : memref<3x1x128xf32, #tpu.memory_space<vmem>>, vector<1x1x128xf32>
    %49 = vector.shape_cast %48 : vector<1x1x128xf32> to vector<1x128xf32>
    %50 = vector.broadcast %49 : vector<1x128xf32> to vector<16x128xf32>
    %51 = arith.addf %39, %50 : vector<16x128xf32>
    %52 = arith.negf %51 : vector<16x128xf32>
    %53 = math.exp %52 : vector<16x128xf32>
    %cst_56 = arith.constant 1.000000e+00 : f32
    %54 = vector.broadcast %cst_56 : f32 to vector<16x128xf32>
    %55 = arith.addf %54, %53 : vector<16x128xf32>
    %56 = arith.divf %54, %55 : vector<16x128xf32>
    %c1_57 = arith.constant 1 : index
    %c0_58 = arith.constant 0 : index
    %c0_59 = arith.constant 0 : index
    %57 = vector.load %arg3[%c1_57, %c0_58, %c0_59] : memref<3x1x128xf32, #tpu.memory_space<vmem>>, vector<1x1x128xf32>
    %58 = vector.shape_cast %57 : vector<1x1x128xf32> to vector<1x128xf32>
    %59 = vector.broadcast %58 : vector<1x128xf32> to vector<16x128xf32>
    %60 = arith.addf %43, %59 : vector<16x128xf32>
    %61 = math.tanh %60 : vector<16x128xf32>
    %c2_60 = arith.constant 2 : index
    %c0_61 = arith.constant 0 : index
    %c0_62 = arith.constant 0 : index
    %62 = vector.load %arg3[%c2_60, %c0_61, %c0_62] : memref<3x1x128xf32, #tpu.memory_space<vmem>>, vector<1x1x128xf32>
    %63 = vector.shape_cast %62 : vector<1x1x128xf32> to vector<1x128xf32>
    %64 = vector.broadcast %63 : vector<1x128xf32> to vector<16x128xf32>
    %65 = arith.addf %47, %64 : vector<16x128xf32>
    %66 = arith.negf %65 : vector<16x128xf32>
    %67 = math.exp %66 : vector<16x128xf32>
    %cst_63 = arith.constant 1.000000e+00 : f32
    %68 = vector.broadcast %cst_63 : f32 to vector<16x128xf32>
    %69 = arith.addf %68, %67 : vector<16x128xf32>
    %70 = arith.divf %68, %69 : vector<16x128xf32>
    %71 = arith.mulf %56, %61 : vector<16x128xf32>
    %72 = math.tanh %71 : vector<16x128xf32>
    %73 = arith.mulf %70, %72 : vector<16x128xf32>
    %c0_64 = arith.constant 0 : index
    %c0_65 = arith.constant 0 : index
    %c0_66 = arith.constant 0 : index
    %74 = vector.load %arg4[%c0_64, %c0_65, %c0_66] : memref<1x16x128xf32, #tpu.memory_space<vmem>>, vector<1x16x128xf32>
    %75 = vector.shape_cast %74 : vector<1x16x128xf32> to vector<16x128xf32>
    %76 = vector.shape_cast %73 : vector<16x128xf32> to vector<1x16x128xf32>
    tpu.vector_store %arg4[%c0_64, %c0_65, %c0_66], %76 {strides = array<i32>} : memref<1x16x128xf32, #tpu.memory_space<vmem>>, vector<1x16x128xf32>,
    return
  }
  func.func @transform_0(%arg0: i32) -> (i32, i32, i32) {
    %c0_i32 = arith.constant 0 : i32
    %c0_i32_0 = arith.constant 0 : i32
    %c0_i32_1 = arith.constant 0 : i32
    return %arg0, %c0_i32, %c0_i32_0 : i32, i32, i32
  }
  func.func @transform_1(%arg0: i32) -> (i32, i32, i32, i32) {
    %c0_i32 = arith.constant 0 : i32
    %c0_i32_0 = arith.constant 0 : i32
    %c0_i32_1 = arith.constant 0 : i32
    %c0_i32_2 = arith.constant 0 : i32
    %c0_i32_3 = arith.constant 0 : i32
    return %c0_i32, %c0_i32_0, %c0_i32_1, %c0_i32_2 : i32, i32, i32, i32
  }
  func.func @transform_2(%arg0: i32) -> (i32, i32, i32) {
    %c0_i32 = arith.constant 0 : i32
    %c0_i32_0 = arith.constant 0 : i32
    %c0_i32_1 = arith.constant 0 : i32
    %c0_i32_2 = arith.constant 0 : i32
    return %c0_i32, %c0_i32_0, %c0_i32_1 : i32, i32, i32
  }
  func.func @transform_3(%arg0: i32) -> (i32, i32, i32) {
    %c0_i32 = arith.constant 0 : i32
    %c0_i32_0 = arith.constant 0 : i32
    %c0_i32_1 = arith.constant 0 : i32
    return %arg0, %c0_i32, %c0_i32_0 : i32, i32, i32
  }
}

module attributes {stable_mosaic.version = 11 : i64} {
  func.func @_double_conv3x3_kernel(%arg0: i32, %arg1: memref<1x18x128xf32, #tpu.memory_space<vmem>>, %arg2: memref<3x128x128xbf16, #tpu.memory_space<vmem>>, %arg3: memref<1x128xf32, #tpu.memory_space<vmem>>, %arg4: memref<3x128x128xbf16, #tpu.memory_space<vmem>>, %arg5: memref<1x128xf32, #tpu.memory_space<vmem>>, %arg6: memref<1x16x128xf32, #tpu.memory_space<vmem>>, %arg7: memref<18x128xf32, #tpu.memory_space<vmem>>) attributes {dimension_semantics = [#tpu.dimension_semantics<parallel>], iteration_bounds = array<i64: 2>, scalar_prefetch = 0 : i64, scratch_operands = 1 : i64, tpu.core_type = #tpu.core_type<tc>, window_params = [{transform_indices = @transform_0, window_bounds = array<i64: 1, 18, 128>}, {pipeline_mode = #tpu.pipeline_mode<synchronous>, transform_indices = @transform_1, window_bounds = array<i64: 3, 128, 128>}, {pipeline_mode = #tpu.pipeline_mode<synchronous>, transform_indices = @transform_2, window_bounds = array<i64: 1, 128>}, {pipeline_mode = #tpu.pipeline_mode<synchronous>, transform_indices = @transform_3, window_bounds = array<i64: 3, 128, 128>}, {pipeline_mode = #tpu.pipeline_mode<synchronous>, transform_indices = @transform_4, window_bounds = array<i64: 1, 128>}, {transform_indices = @transform_5, window_bounds = array<i64: 1, 16, 128>}]} {
    %cst = arith.constant 0.000000e+00 : f32
    %0 = vector.broadcast %cst : f32 to vector<16x128xf32>
    %c0 = arith.constant 0 : index
    %c0_0 = arith.constant 0 : index
    %c0_1 = arith.constant 0 : index
    %1 = vector.load %arg1[%c0, %c0_0, %c0_1] : memref<1x18x128xf32, #tpu.memory_space<vmem>>, vector<1x16x128xf32>
    %2 = vector.shape_cast %1 : vector<1x16x128xf32> to vector<16x128xf32>
    %3 = arith.truncf %2 : vector<16x128xf32> to vector<16x128xbf16>
    %c0_2 = arith.constant 0 : index
    %c0_3 = arith.constant 0 : index
    %c0_4 = arith.constant 0 : index
    %4 = vector.load %arg2[%c0_2, %c0_3, %c0_4] : memref<3x128x128xbf16, #tpu.memory_space<vmem>>, vector<1x128x128xbf16>
    %5 = vector.shape_cast %4 : vector<1x128x128xbf16> to vector<128x128xbf16>
    %cst_5 = arith.constant dense<0.000000e+00> : vector<16x128xf32>
    %6 = tpu.matmul %3, %5, %cst_5 {dimension_numbers = #tpu.dot_dimension_numbers<[1], [0], [0], [1], [0, 0, 1, 1], [], []>} : vector<16x128xbf16>, vector<128x128xbf16>, vector<16x128xf32> -> vector<16x128xf32>
    %7 = arith.addf %0, %6 : vector<16x128xf32>
    %c0_6 = arith.constant 0 : index
    %c1 = arith.constant 1 : index
    %c0_7 = arith.constant 0 : index
    %8 = vector.load %arg1[%c0_6, %c1, %c0_7] : memref<1x18x128xf32, #tpu.memory_space<vmem>>, vector<1x16x128xf32>
    %9 = vector.shape_cast %8 : vector<1x16x128xf32> to vector<16x128xf32>
    %10 = arith.truncf %9 : vector<16x128xf32> to vector<16x128xbf16>
    %c1_8 = arith.constant 1 : index
    %c0_9 = arith.constant 0 : index
    %c0_10 = arith.constant 0 : index
    %11 = vector.load %arg2[%c1_8, %c0_9, %c0_10] : memref<3x128x128xbf16, #tpu.memory_space<vmem>>, vector<1x128x128xbf16>
    %12 = vector.shape_cast %11 : vector<1x128x128xbf16> to vector<128x128xbf16>
    %cst_11 = arith.constant dense<0.000000e+00> : vector<16x128xf32>
    %13 = tpu.matmul %10, %12, %cst_11 {dimension_numbers = #tpu.dot_dimension_numbers<[1], [0], [0], [1], [0, 0, 1, 1], [], []>} : vector<16x128xbf16>, vector<128x128xbf16>, vector<16x128xf32> -> vector<16x128xf32>
    %14 = arith.addf %7, %13 : vector<16x128xf32>
    %c0_12 = arith.constant 0 : index
    %c2 = arith.constant 2 : index
    %c0_13 = arith.constant 0 : index
    %15 = vector.load %arg1[%c0_12, %c2, %c0_13] : memref<1x18x128xf32, #tpu.memory_space<vmem>>, vector<1x16x128xf32>
    %16 = vector.shape_cast %15 : vector<1x16x128xf32> to vector<16x128xf32>
    %17 = arith.truncf %16 : vector<16x128xf32> to vector<16x128xbf16>
    %c2_14 = arith.constant 2 : index
    %c0_15 = arith.constant 0 : index
    %c0_16 = arith.constant 0 : index
    %18 = vector.load %arg2[%c2_14, %c0_15, %c0_16] : memref<3x128x128xbf16, #tpu.memory_space<vmem>>, vector<1x128x128xbf16>
    %19 = vector.shape_cast %18 : vector<1x128x128xbf16> to vector<128x128xbf16>
    %cst_17 = arith.constant dense<0.000000e+00> : vector<16x128xf32>
    %20 = tpu.matmul %17, %19, %cst_17 {dimension_numbers = #tpu.dot_dimension_numbers<[1], [0], [0], [1], [0, 0, 1, 1], [], []>} : vector<16x128xbf16>, vector<128x128xbf16>, vector<16x128xf32> -> vector<16x128xf32>
    %21 = arith.addf %14, %20 : vector<16x128xf32>
    %c0_18 = arith.constant 0 : index
    %c0_19 = arith.constant 0 : index
    %22 = vector.load %arg3[%c0_18, %c0_19] : memref<1x128xf32, #tpu.memory_space<vmem>>, vector<1x128xf32>
    %23 = vector.broadcast %22 : vector<1x128xf32> to vector<16x128xf32>
    %24 = arith.addf %21, %23 : vector<16x128xf32>
    %cst_20 = arith.constant 0.000000e+00 : f32
    %25 = vector.broadcast %cst_20 : f32 to vector<16x128xf32>
    %26 = arith.maximumf %24, %25 : vector<16x128xf32>
    %cst_21 = arith.constant 0.000000e+00 : f32
    %27 = vector.broadcast %cst_21 : f32 to vector<18x128xf32>
    %c0_22 = arith.constant 0 : index
    %c0_23 = arith.constant 0 : index
    %28 = vector.load %arg7[%c0_22, %c0_23] : memref<18x128xf32, #tpu.memory_space<vmem>>, vector<18x128xf32>
    tpu.vector_store %arg7[%c0_22, %c0_23], %27 {strides = array<i32>} : memref<18x128xf32, #tpu.memory_space<vmem>>, vector<18x128xf32>,
    %c1_24 = arith.constant 1 : index
    %c0_25 = arith.constant 0 : index
    %29 = vector.load %arg7[%c1_24, %c0_25] : memref<18x128xf32, #tpu.memory_space<vmem>>, vector<16x128xf32>
    tpu.vector_store %arg7[%c1_24, %c0_25], %26 {strides = array<i32>} : memref<18x128xf32, #tpu.memory_space<vmem>>, vector<16x128xf32>,
    %cst_26 = arith.constant 0.000000e+00 : f32
    %30 = vector.broadcast %cst_26 : f32 to vector<16x128xf32>
    %c0_27 = arith.constant 0 : index
    %c0_28 = arith.constant 0 : index
    %31 = vector.load %arg7[%c0_27, %c0_28] : memref<18x128xf32, #tpu.memory_space<vmem>>, vector<16x128xf32>
    %32 = arith.truncf %31 : vector<16x128xf32> to vector<16x128xbf16>
    %c0_29 = arith.constant 0 : index
    %c0_30 = arith.constant 0 : index
    %c0_31 = arith.constant 0 : index
    %33 = vector.load %arg4[%c0_29, %c0_30, %c0_31] : memref<3x128x128xbf16, #tpu.memory_space<vmem>>, vector<1x128x128xbf16>
    %34 = vector.shape_cast %33 : vector<1x128x128xbf16> to vector<128x128xbf16>
    %cst_32 = arith.constant dense<0.000000e+00> : vector<16x128xf32>
    %35 = tpu.matmul %32, %34, %cst_32 {dimension_numbers = #tpu.dot_dimension_numbers<[1], [0], [0], [1], [0, 0, 1, 1], [], []>} : vector<16x128xbf16>, vector<128x128xbf16>, vector<16x128xf32> -> vector<16x128xf32>
    %36 = arith.addf %30, %35 : vector<16x128xf32>
    %c1_33 = arith.constant 1 : index
    %c0_34 = arith.constant 0 : index
    %37 = vector.load %arg7[%c1_33, %c0_34] : memref<18x128xf32, #tpu.memory_space<vmem>>, vector<16x128xf32>
    %38 = arith.truncf %37 : vector<16x128xf32> to vector<16x128xbf16>
    %c1_35 = arith.constant 1 : index
    %c0_36 = arith.constant 0 : index
    %c0_37 = arith.constant 0 : index
    %39 = vector.load %arg4[%c1_35, %c0_36, %c0_37] : memref<3x128x128xbf16, #tpu.memory_space<vmem>>, vector<1x128x128xbf16>
    %40 = vector.shape_cast %39 : vector<1x128x128xbf16> to vector<128x128xbf16>
    %cst_38 = arith.constant dense<0.000000e+00> : vector<16x128xf32>
    %41 = tpu.matmul %38, %40, %cst_38 {dimension_numbers = #tpu.dot_dimension_numbers<[1], [0], [0], [1], [0, 0, 1, 1], [], []>} : vector<16x128xbf16>, vector<128x128xbf16>, vector<16x128xf32> -> vector<16x128xf32>
    %42 = arith.addf %36, %41 : vector<16x128xf32>
    %c2_39 = arith.constant 2 : index
    %c0_40 = arith.constant 0 : index
    %43 = vector.load %arg7[%c2_39, %c0_40] : memref<18x128xf32, #tpu.memory_space<vmem>>, vector<16x128xf32>
    %44 = arith.truncf %43 : vector<16x128xf32> to vector<16x128xbf16>
    %c2_41 = arith.constant 2 : index
    %c0_42 = arith.constant 0 : index
    %c0_43 = arith.constant 0 : index
    %45 = vector.load %arg4[%c2_41, %c0_42, %c0_43] : memref<3x128x128xbf16, #tpu.memory_space<vmem>>, vector<1x128x128xbf16>
    %46 = vector.shape_cast %45 : vector<1x128x128xbf16> to vector<128x128xbf16>
    %cst_44 = arith.constant dense<0.000000e+00> : vector<16x128xf32>
    %47 = tpu.matmul %44, %46, %cst_44 {dimension_numbers = #tpu.dot_dimension_numbers<[1], [0], [0], [1], [0, 0, 1, 1], [], []>} : vector<16x128xbf16>, vector<128x128xbf16>, vector<16x128xf32> -> vector<16x128xf32>
    %48 = arith.addf %42, %47 : vector<16x128xf32>
    %c0_45 = arith.constant 0 : index
    %c0_46 = arith.constant 0 : index
    %49 = vector.load %arg5[%c0_45, %c0_46] : memref<1x128xf32, #tpu.memory_space<vmem>>, vector<1x128xf32>
    %50 = vector.broadcast %49 : vector<1x128xf32> to vector<16x128xf32>
    %51 = arith.addf %48, %50 : vector<16x128xf32>
    %cst_47 = arith.constant 0.000000e+00 : f32
    %52 = vector.broadcast %cst_47 : f32 to vector<16x128xf32>
    %53 = arith.maximumf %51, %52 : vector<16x128xf32>
    %c0_48 = arith.constant 0 : index
    %c0_49 = arith.constant 0 : index
    %c0_50 = arith.constant 0 : index
    %54 = vector.load %arg6[%c0_48, %c0_49, %c0_50] : memref<1x16x128xf32, #tpu.memory_space<vmem>>, vector<1x16x128xf32>
    %55 = vector.shape_cast %54 : vector<1x16x128xf32> to vector<16x128xf32>
    %56 = vector.shape_cast %53 : vector<16x128xf32> to vector<1x16x128xf32>
    tpu.vector_store %arg6[%c0_48, %c0_49, %c0_50], %56 {strides = array<i32>} : memref<1x16x128xf32, #tpu.memory_space<vmem>>, vector<1x16x128xf32>,
    return
  }
  func.func @transform_0(%arg0: i32) -> (i32, i32, i32) {
    %c0_i32 = arith.constant 0 : i32
    %c0_i32_0 = arith.constant 0 : i32
    %c0_i32_1 = arith.constant 0 : i32
    return %arg0, %c0_i32, %c0_i32_0 : i32, i32, i32
  }
  func.func @transform_1(%arg0: i32) -> (i32, i32, i32) {
    %c0_i32 = arith.constant 0 : i32
    %c0_i32_0 = arith.constant 0 : i32
    %c0_i32_1 = arith.constant 0 : i32
    %c0_i32_2 = arith.constant 0 : i32
    return %c0_i32, %c0_i32_0, %c0_i32_1 : i32, i32, i32
  }
  func.func @transform_2(%arg0: i32) -> (i32, i32) {
    %c0_i32 = arith.constant 0 : i32
    %c0_i32_0 = arith.constant 0 : i32
    %c0_i32_1 = arith.constant 0 : i32
    return %c0_i32, %c0_i32_0 : i32, i32
  }
  func.func @transform_3(%arg0: i32) -> (i32, i32, i32) {
    %c0_i32 = arith.constant 0 : i32
    %c0_i32_0 = arith.constant 0 : i32
    %c0_i32_1 = arith.constant 0 : i32
    %c0_i32_2 = arith.constant 0 : i32
    return %c0_i32, %c0_i32_0, %c0_i32_1 : i32, i32, i32
  }
  func.func @transform_4(%arg0: i32) -> (i32, i32) {
    %c0_i32 = arith.constant 0 : i32
    %c0_i32_0 = arith.constant 0 : i32
    %c0_i32_1 = arith.constant 0 : i32
    return %c0_i32, %c0_i32_0 : i32, i32
  }
  func.func @transform_5(%arg0: i32) -> (i32, i32, i32) {
    %c0_i32 = arith.constant 0 : i32
    %c0_i32_0 = arith.constant 0 : i32
    %c0_i32_1 = arith.constant 0 : i32
    return %arg0, %c0_i32, %c0_i32_0 : i32, i32, i32
  }
}

module attributes {stable_mosaic.version = 11 : i64} {
  func.func @_head_kernel(%arg0: i32, %arg1: memref<1x18x128xf32, #tpu.memory_space<vmem>>, %arg2: memref<3x128x32xbf16, #tpu.memory_space<vmem>>, %arg3: memref<1x32xf32, #tpu.memory_space<vmem>>, %arg4: memref<32x16xbf16, #tpu.memory_space<vmem>>, %arg5: memref<1x16xf32, #tpu.memory_space<vmem>>, %arg6: memref<1x16x16xf32, #tpu.memory_space<vmem>>) attributes {dimension_semantics = [#tpu.dimension_semantics<parallel>], iteration_bounds = array<i64: 2>, scalar_prefetch = 0 : i64, scratch_operands = 0 : i64, tpu.core_type = #tpu.core_type<tc>, window_params = [{transform_indices = @transform_0, window_bounds = array<i64: 1, 18, 128>}, {pipeline_mode = #tpu.pipeline_mode<synchronous>, transform_indices = @transform_1, window_bounds = array<i64: 3, 128, 32>}, {pipeline_mode = #tpu.pipeline_mode<synchronous>, transform_indices = @transform_2, window_bounds = array<i64: 1, 32>}, {pipeline_mode = #tpu.pipeline_mode<synchronous>, transform_indices = @transform_3, window_bounds = array<i64: 32, 16>}, {pipeline_mode = #tpu.pipeline_mode<synchronous>, transform_indices = @transform_4, window_bounds = array<i64: 1, 16>}, {transform_indices = @transform_5, window_bounds = array<i64: 1, 16, 16>}]} {
    %cst = arith.constant 0.000000e+00 : f32
    %0 = vector.broadcast %cst : f32 to vector<16x32xf32>
    %c0 = arith.constant 0 : index
    %c0_0 = arith.constant 0 : index
    %c0_1 = arith.constant 0 : index
    %1 = vector.load %arg1[%c0, %c0_0, %c0_1] : memref<1x18x128xf32, #tpu.memory_space<vmem>>, vector<1x16x128xf32>
    %2 = vector.shape_cast %1 : vector<1x16x128xf32> to vector<16x128xf32>
    %3 = arith.truncf %2 : vector<16x128xf32> to vector<16x128xbf16>
    %c0_2 = arith.constant 0 : index
    %c0_3 = arith.constant 0 : index
    %c0_4 = arith.constant 0 : index
    %4 = vector.load %arg2[%c0_2, %c0_3, %c0_4] : memref<3x128x32xbf16, #tpu.memory_space<vmem>>, vector<1x128x32xbf16>
    %5 = vector.shape_cast %4 : vector<1x128x32xbf16> to vector<128x32xbf16>
    %cst_5 = arith.constant dense<0.000000e+00> : vector<16x32xf32>
    %6 = tpu.matmul %3, %5, %cst_5 {dimension_numbers = #tpu.dot_dimension_numbers<[1], [0], [0], [1], [0, 0, 1, 1], [], []>} : vector<16x128xbf16>, vector<128x32xbf16>, vector<16x32xf32> -> vector<16x32xf32>
    %7 = arith.addf %0, %6 : vector<16x32xf32>
    %c0_6 = arith.constant 0 : index
    %c1 = arith.constant 1 : index
    %c0_7 = arith.constant 0 : index
    %8 = vector.load %arg1[%c0_6, %c1, %c0_7] : memref<1x18x128xf32, #tpu.memory_space<vmem>>, vector<1x16x128xf32>
    %9 = vector.shape_cast %8 : vector<1x16x128xf32> to vector<16x128xf32>
    %10 = arith.truncf %9 : vector<16x128xf32> to vector<16x128xbf16>
    %c1_8 = arith.constant 1 : index
    %c0_9 = arith.constant 0 : index
    %c0_10 = arith.constant 0 : index
    %11 = vector.load %arg2[%c1_8, %c0_9, %c0_10] : memref<3x128x32xbf16, #tpu.memory_space<vmem>>, vector<1x128x32xbf16>
    %12 = vector.shape_cast %11 : vector<1x128x32xbf16> to vector<128x32xbf16>
    %cst_11 = arith.constant dense<0.000000e+00> : vector<16x32xf32>
    %13 = tpu.matmul %10, %12, %cst_11 {dimension_numbers = #tpu.dot_dimension_numbers<[1], [0], [0], [1], [0, 0, 1, 1], [], []>} : vector<16x128xbf16>, vector<128x32xbf16>, vector<16x32xf32> -> vector<16x32xf32>
    %14 = arith.addf %7, %13 : vector<16x32xf32>
    %c0_12 = arith.constant 0 : index
    %c2 = arith.constant 2 : index
    %c0_13 = arith.constant 0 : index
    %15 = vector.load %arg1[%c0_12, %c2, %c0_13] : memref<1x18x128xf32, #tpu.memory_space<vmem>>, vector<1x16x128xf32>
    %16 = vector.shape_cast %15 : vector<1x16x128xf32> to vector<16x128xf32>
    %17 = arith.truncf %16 : vector<16x128xf32> to vector<16x128xbf16>
    %c2_14 = arith.constant 2 : index
    %c0_15 = arith.constant 0 : index
    %c0_16 = arith.constant 0 : index
    %18 = vector.load %arg2[%c2_14, %c0_15, %c0_16] : memref<3x128x32xbf16, #tpu.memory_space<vmem>>, vector<1x128x32xbf16>
    %19 = vector.shape_cast %18 : vector<1x128x32xbf16> to vector<128x32xbf16>
    %cst_17 = arith.constant dense<0.000000e+00> : vector<16x32xf32>
    %20 = tpu.matmul %17, %19, %cst_17 {dimension_numbers = #tpu.dot_dimension_numbers<[1], [0], [0], [1], [0, 0, 1, 1], [], []>} : vector<16x128xbf16>, vector<128x32xbf16>, vector<16x32xf32> -> vector<16x32xf32>
    %21 = arith.addf %14, %20 : vector<16x32xf32>
    %c0_18 = arith.constant 0 : index
    %c0_19 = arith.constant 0 : index
    %22 = vector.load %arg3[%c0_18, %c0_19] : memref<1x32xf32, #tpu.memory_space<vmem>>, vector<1x32xf32>
    %23 = vector.broadcast %22 : vector<1x32xf32> to vector<16x32xf32>
    %24 = arith.addf %21, %23 : vector<16x32xf32>
    %cst_20 = arith.constant 0.000000e+00 : f32
    %25 = vector.broadcast %cst_20 : f32 to vector<16x32xf32>
    %26 = arith.maximumf %24, %25 : vector<16x32xf32>
    %27 = arith.truncf %26 : vector<16x32xf32> to vector<16x32xbf16>
    %c0_21 = arith.constant 0 : index
    %c0_22 = arith.constant 0 : index
    %28 = vector.load %arg4[%c0_21, %c0_22] : memref<32x16xbf16, #tpu.memory_space<vmem>>, vector<32x16xbf16>
    %cst_23 = arith.constant dense<0.000000e+00> : vector<16x16xf32>
    %29 = tpu.matmul %27, %28, %cst_23 {dimension_numbers = #tpu.dot_dimension_numbers<[1], [0], [0], [1], [0, 0, 1, 1], [], []>} : vector<16x32xbf16>, vector<32x16xbf16>, vector<16x16xf32> -> vector<16x16xf32>
    %c0_24 = arith.constant 0 : index
    %c0_25 = arith.constant 0 : index
    %30 = vector.load %arg5[%c0_24, %c0_25] : memref<1x16xf32, #tpu.memory_space<vmem>>, vector<1x16xf32>
    %31 = vector.broadcast %30 : vector<1x16xf32> to vector<16x16xf32>
    %32 = arith.addf %29, %31 : vector<16x16xf32>
    %33 = arith.negf %32 : vector<16x16xf32>
    %34 = math.exp %33 : vector<16x16xf32>
    %cst_26 = arith.constant 1.000000e+00 : f32
    %35 = vector.broadcast %cst_26 : f32 to vector<16x16xf32>
    %36 = arith.addf %35, %34 : vector<16x16xf32>
    %37 = arith.divf %35, %36 : vector<16x16xf32>
    %c0_27 = arith.constant 0 : index
    %c0_28 = arith.constant 0 : index
    %c0_29 = arith.constant 0 : index
    %38 = vector.load %arg6[%c0_27, %c0_28, %c0_29] : memref<1x16x16xf32, #tpu.memory_space<vmem>>, vector<1x16x16xf32>
    %39 = vector.shape_cast %38 : vector<1x16x16xf32> to vector<16x16xf32>
    %40 = vector.shape_cast %37 : vector<16x16xf32> to vector<1x16x16xf32>
    tpu.vector_store %arg6[%c0_27, %c0_28, %c0_29], %40 {strides = array<i32>} : memref<1x16x16xf32, #tpu.memory_space<vmem>>, vector<1x16x16xf32>,
    return
  }
  func.func @transform_0(%arg0: i32) -> (i32, i32, i32) {
    %c0_i32 = arith.constant 0 : i32
    %c0_i32_0 = arith.constant 0 : i32
    %c0_i32_1 = arith.constant 0 : i32
    return %arg0, %c0_i32, %c0_i32_0 : i32, i32, i32
  }
  func.func @transform_1(%arg0: i32) -> (i32, i32, i32) {
    %c0_i32 = arith.constant 0 : i32
    %c0_i32_0 = arith.constant 0 : i32
    %c0_i32_1 = arith.constant 0 : i32
    %c0_i32_2 = arith.constant 0 : i32
    return %c0_i32, %c0_i32_0, %c0_i32_1 : i32, i32, i32
  }
  func.func @transform_2(%arg0: i32) -> (i32, i32) {
    %c0_i32 = arith.constant 0 : i32
    %c0_i32_0 = arith.constant 0 : i32
    %c0_i32_1 = arith.constant 0 : i32
    return %c0_i32, %c0_i32_0 : i32, i32
  }
  func.func @transform_3(%arg0: i32) -> (i32, i32) {
    %c0_i32 = arith.constant 0 : i32
    %c0_i32_0 = arith.constant 0 : i32
    %c0_i32_1 = arith.constant 0 : i32
    return %c0_i32, %c0_i32_0 : i32, i32
  }
  func.func @transform_4(%arg0: i32) -> (i32, i32) {
    %c0_i32 = arith.constant 0 : i32
    %c0_i32_0 = arith.constant 0 : i32
    %c0_i32_1 = arith.constant 0 : i32
    return %c0_i32, %c0_i32_0 : i32, i32
  }
  func.func @transform_5(%arg0: i32) -> (i32, i32, i32) {
    %c0_i32 = arith.constant 0 : i32
    %c0_i32_0 = arith.constant 0 : i32
    %c0_i32_1 = arith.constant 0 : i32
    return %arg0, %c0_i32, %c0_i32_0 : i32, i32, i32
  }
}

</mosaic_0001>

<bundles_post_ra>
// kernel: tile.163
= control target key start
LH: loop header
LB: loop body
LE: loop exit
PB: predicated region body
PF: predicated region fallthrough
CT: control target
= control target key end

     0   :  { %s28_s0 = inlined_call_operand.vmem [shape: f32[8], index: 0, kind: input, shape index: {}]   ;;  %s29_s1 = inlined_call_operand.vmem [shape: f32[16,8], index: 1, kind: output, shape index: {}]  }
   0x1   :  { %v4_v0 = vld [vmem:[%s28_s0] ss:$0 sm:$0xff] }
   0x2   :  { %5 = vst [vmem:[%s29_s1] sm:$0xff] %v4_v0  ;;  %8 = vst [vmem:[%s29_s1 + $0x8] sm:$0xff] %v4_v0 }

// kernel: tile.164
= control target key start
LH: loop header
LB: loop body
LE: loop exit
PB: predicated region body
PF: predicated region fallthrough
CT: control target
= control target key end

     0   :  { %s131_s10 = smov 120   ;;  %s132_s11 = smov 104   ;;  %vm3_vm0 = vcmask 64512   ;;  %vm9_vm1 = vcmask 1048512   ;;  %vm15_vm2 = vcmask 982912   ;;  %vm21_vm3 = vcmask 917312   ;;  %s207_s0 = inlined_call_operand.vmem [shape: f32[16,8], index: 0, kind: input, shape index: {}]   ;;  %s208_s1 = inlined_call_operand.vmem [shape: f32[1,128], index: 1, kind: output, shape index: {}]  }
   0x1   :  { %v101_v0 = vld [vmem:[%s207_s0 + $0xf] sm:$0x1]   ;;  %v103_v1 = vld [vmem:[%s207_s0 + $0xd] sm:$0x1]   ;;  %v102_v2 = vld [vmem:[%s207_s0 + $0xe] sm:$0x1]  }
   0x2   :  { %7 = vrot.lane.b32.xlu0 %v101_v0, %s131_s10  ;;  %19 = vrot.lane.b32.xlu1 %v103_v1, %s132_s11  ;;  %v104_v3 = vld [vmem:[%s207_s0 + $0xc] sm:$0x1]   ;;  %s133_s16 = smov 112   ;;  %s134_s17 = smov 96   ;;  %v105_v4 = vld [vmem:[%s207_s0 + $0xb] sm:$0x1]  }
   0x3   :  { %v106_v5 = vld [vmem:[%s207_s0 + $0xa] sm:$0x1]   ;;  %v2_v6 = vld [vmem:[%s207_s0] sm:$0x1]   ;;  %s135_s24 = smov 88   ;;  %s136_s25 = smov 80  }
   0x4   :  { %4 = vst.msk [vmem:[#allocation0] sm:$0x1] %vm3_vm0, %v2_v6   ;;  %v107_v7 = vld [vmem:[%s207_s0 + $0x9] sm:$0x1]   ;;  %v108_v8 = vld [vmem:[%s207_s0 + $0x8] sm:$0x1]  }
   0x5   :  { %s137_s30 = smov 72   ;;  %s138_s2 = smov 64   ;;  %v109_v9 = vld [vmem:[%s207_s0 + $0x7] sm:$0x1]   ;;  %v110_v10 = vld [vmem:[%s207_s0 + $0x6] sm:$0x1]  }
   0x6   :  { %13 = vrot.lane.b32.xlu0 %v102_v2, %s133_s16  ;;  %25 = vrot.lane.b32.xlu1 %v104_v3, %s134_s17  ;;  %s139_s7 = smov 56   ;;  %s140_s8 = smov 48   ;;  %v111_v11 = vld [vmem:[%s207_s0 + $0x5] sm:$0x1]   ;;  %v112_v12 = vld [vmem:[%s207_s0 + $0x4] sm:$0x1]  }
   0x7   :  { %s141_s13 = smov 40   ;;  %s142_s14 = smov 32   ;;  %v113_v13 = vld [vmem:[%s207_s0 + $0x3] sm:$0x1]   ;;  %v114_v14 = vld [vmem:[%s207_s0 + $0x2] sm:$0x1]  }
   0x8   :  { %s143_s19 = smov 24   ;;  %s144_s20 = smov 16   ;;  %v115_v15 = vld [vmem:[%s207_s0 + $0x1] sm:$0x1]   ;;  %vm27_vm4 = vcmask 851712   ;;  %vm33_vm5 = vcmask 786112  }
   0x9   :  { %s145_s0 = smov 8   ;;  %vm39_vm6 = vcmask 720512   ;;  %vm45_vm7 = vcmask 654912   ;;  %vm51_vm8 = vcmask 589312   ;;  %vm57_vm9 = vcmask 523712  }
   0xa   :  { %31 = vrot.lane.b32.xlu0 %v105_v4, %s135_s24  ;;  %37 = vrot.lane.b32.xlu1 %v106_v5, %s136_s25  ;;  %vm63_vm10 = vcmask 458112   ;;  %vm69_vm11 = vcmask 392512   ;;  %vm75_vm12 = vcmask 326912   ;;  %vm81_vm13 = vcmask 261312  }
   0xb   :  { %vm87_vm14 = vcmask 195712   ;;  %vm93_vm15 = vcmask 130112  }
   0xe   :  { %43 = vrot.lane.b32.xlu0 %v107_v7, %s137_s30  ;;  %49 = vrot.lane.b32.xlu1 %v108_v8, %s138_s2 }
  0x12   :  { %55 = vrot.lane.b32.xlu0 %v109_v9, %s139_s7  ;;  %61 = vrot.lane.b32.xlu1 %v110_v10, %s140_s8 }
  0x16   :  { %67 = vrot.lane.b32.xlu0 %v111_v11, %s141_s13  ;;  %73 = vrot.lane.b32.xlu1 %v112_v12, %s142_s14 }
  0x1a   :  { %79 = vrot.lane.b32.xlu0 %v113_v13, %s143_s19  ;;  %85 = vrot.lane.b32.xlu1 %v114_v14, %s144_s20 }
  0x1e   :  { %91 = vrot.lane.b32.xlu0 %v115_v15, %s145_s0 }
  0x74   :  { %v8_v16 = vpop.permute.xlu0 %7   ;;  %v20_v17 = vpop.permute.xlu1 %19  }
  0x75   :  { %10 = vst.msk [vmem:[#allocation0] sm:$0x1] %vm9_vm1, %v8_v16  }
  0x78   :  { %v14_v18 = vpop.permute.xlu0 %13   ;;  %v26_v19 = vpop.permute.xlu1 %25  }
  0x79   :  { %16 = vst.msk [vmem:[#allocation0] sm:$0x1] %vm15_vm2, %v14_v18  }
  0x7a   :  { %22 = vst.msk [vmem:[#allocation0] sm:$0x1] %vm21_vm3, %v20_v17  }
  0x7b   :  { %28 = vst.msk [vmem:[#allocation0] sm:$0x1] %vm27_vm4, %v26_v19  }
  0x7c   :  { %v32_v20 = vpop.permute.xlu0 %31   ;;  %v38_v21 = vpop.permute.xlu1 %37  }
  0x7d   :  { %34 = vst.msk [vmem:[#allocation0] sm:$0x1] %vm33_vm5, %v32_v20  }
  0x7e   :  { %40 = vst.msk [vmem:[#allocation0] sm:$0x1] %vm39_vm6, %v38_v21  }
  0x80   :  { %v44_v22 = vpop.permute.xlu0 %43   ;;  %v50_v23 = vpop.permute.xlu1 %49  }
  0x81   :  { %46 = vst.msk [vmem:[#allocation0] sm:$0x1] %vm45_vm7, %v44_v22  }
  0x82   :  { %52 = vst.msk [vmem:[#allocation0] sm:$0x1] %vm51_vm8, %v50_v23  }
  0x84   :  { %v56_v24 = vpop.permute.xlu0 %55   ;;  %v62_v25 = vpop.permute.xlu1 %61  }
  0x85   :  { %58 = vst.msk [vmem:[#allocation0] sm:$0x1] %vm57_vm9, %v56_v24  }
  0x86   :  { %64 = vst.msk [vmem:[#allocation0] sm:$0x1] %vm63_vm10, %v62_v25  }
  0x88   :  { %v68_v26 = vpop.permute.xlu0 %67   ;;  %v74_v27 = vpop.permute.xlu1 %73  }
  0x89   :  { %70 = vst.msk [vmem:[#allocation0] sm:$0x1] %vm69_vm11, %v68_v26  }
  0x8a   :  { %76 = vst.msk [vmem:[#allocation0] sm:$0x1] %vm75_vm12, %v74_v27  }
  0x8c   :  { %v80_v28 = vpop.permute.xlu0 %79   ;;  %v86_v29 = vpop.permute.xlu1 %85  }
  0x8d   :  { %82 = vst.msk [vmem:[#allocation0] sm:$0x1] %vm81_vm13, %v80_v28  }
  0x8e   :  { %88 = vst.msk [vmem:[#allocation0] sm:$0x1] %vm87_vm14, %v86_v29  }
  0x90   :  { %v92_v30 = vpop.permute.xlu0 %91  }
  0x91   :  { %94 = vst.msk [vmem:[#allocation0] sm:$0x1] %vm93_vm15, %v92_v30  }
  0x98   :  { %v98_v31 = vld [vmem:[#allocation0] sm:$0x1] }
  0x99   :  { %100 = vst [vmem:[%s208_s1] sm:$0x1] %v98_v31 }

// kernel: bcdunet_forward.19
= control target key start
LH: loop header
LB: loop body
LE: loop exit
PB: predicated region body
PF: predicated region fallthrough
CT: control target
= control target key end

     0   :  { %s1162_s18 = smov 0   ;;  %s1339_s0 = inlined_call_operand.vmem [shape: f32[2,18,48], index: 0, kind: input, shape index: {}]   ;;  %s1340_s1 = inlined_call_operand.vmem [shape: bf16[3,48,128], index: 1, kind: input, shape index: {}]   ;;  %s1341_s2 = inlined_call_operand.vmem [shape: f32[1,128], index: 2, kind: input, shape index: {}]   ;;  %s1342_s3 = inlined_call_operand.vmem [shape: bf16[3,128,128], index: 3, kind: input, shape index: {}]   ;;  %s1343_s4 = inlined_call_operand.vmem [shape: f32[1,128], index: 4, kind: input, shape index: {}]   ;;  %s1344_s5 = inlined_call_operand.vmem [shape: f32[2,16,128], index: 5, kind: output, shape index: {}]  }
   0x1 LB: > { %s856_s19 = sadd.s32 4294967295, %s1128_s18   ;;  %p860_p0 = scmp.ge.s32.totalorder %s1128_s18, 1  ;;  %s1128_s18 = sphi %s1162_s18, %s15_s18  }
   0x2   : > { %p187_p1 = scmp.lt.s32.totalorder %s1128_s18, 3 }
   0x4   : > { %p188_p2 = pnand %p860_p0, %p187_p1 }
   0x5   : > { %v1089_v0 = vld [vmem:[%s1340_s1 + $0x18] sm:$0xff] (!%p188_p2)   ;;  %v1130_v1 = vmov (!%p188_p2), 0.0   ;;  %v1090_v2 = vld [vmem:[%s1340_s1 + $0x20] sm:$0xff] (!%p188_p2)   ;;  %vm1131_vm0 = vmmov (!%p188_p2), 0   ;;  %p215_p3 = scmp.lt.s32.totalorder (!%p188_p2), %s856_s19, 1  ;;  %v1091_v3 = vld [vmem:[%s1340_s1 + $0x28] sm:$0xff] (!%p188_p2)  }
   0x6   : > { %191 = sbr.rel (%p188_p2) target bundleno = 519 (0x207), region = 40  ;;  %988 = vmatprep.subr.bf16.mxu0 (!%p188_p2), %v1130_v1  ;;  %455 = vst [vmem:[#allocation2] sm:$0xff] (!%p188_p2), %v1130_v1  ;;  %456 = vst [vmem:[#allocation2 + $0x8] sm:$0xff] (!%p188_p2), %v1130_v1  ;;  %1018 = vmatprep.subr.bf16.mxu1 (!%p188_p2), %v1130_v1  ;;  %vm263_vm1 = vcmask (!%p188_p2), 392192   ;;  %v1092_v7 = vld [vmem:[%s1340_s1] sm:$0xff] (!%p188_p2)   ;;  %v1093_v8 = vld [vmem:[%s1340_s1 + $0x8] sm:$0xff] (!%p188_p2)  }
   0x7   : > { %457 = vst [vmem:[#allocation2 + $0x10] sm:$0x3] (!%p188_p2), %v1130_v1  ;;  %989 = vmatpush3.bf16.msra.mxu0 (!%p188_p2), %v1089_v0  ;;  %994 = vmatprep.mubr.msk.bf16.mxu0 (!%p188_p2), %vm1131_vm0, %v1130_v1  ;;  %v1094_v9 = vld [vmem:[%s1340_s1 + $0x10] sm:$0xff] (!%p188_p2)   ;;  %v1096_v14 = vld [vmem:[%s1340_s1 + $0x38] sm:$0xff] (!%p188_p2)   ;;  %v1097_v15 = vld [vmem:[%s1340_s1 + $0x40] sm:$0xff] (!%p188_p2)  }
   0x8   : > { %990 = vmatprep.subr.bf16.mxu0 (!%p188_p2), %v1130_v1  ;;  %1034 = vmatprep.mubr.msk.bf16.mxu1 (!%p188_p2), %vm1131_vm0, %v1130_v1  ;;  %v1095_v12 = vld [vmem:[%s1340_s1 + $0x30] sm:$0xff] (!%p188_p2)   ;;  %v1098_v19 = vld [vmem:[%s1342_s3 + $0x40] sm:$0xff] (!%p188_p2)   ;;  %v1100_v20 = vld [vmem:[%s1342_s3 + $0x48] sm:$0xff] (!%p188_p2)  }
   0x9   : > { %1019 = vmatpush3.bf16.msra.mxu1 (!%p188_p2), %v1098_v19  ;;  %v1102_v21 = vld [vmem:[%s1342_s3 + $0x50] sm:$0xff] (!%p188_p2)   ;;  %v1099_v22 = vld [vmem:[%s1342_s3] sm:$0xff] (!%p188_p2)   ;;  %v1104_v23 = vld [vmem:[%s1342_s3 + $0x58] sm:$0xff] (!%p188_p2)  }
   0xa   : > { %1020 = vmatprep.subr.bf16.mxu1 (!%p188_p2), %v1130_v1  ;;  %v1101_v24 = vld [vmem:[%s1342_s3 + $0x8] sm:$0xff] (!%p188_p2)   ;;  %v1103_v25 = vld [vmem:[%s1342_s3 + $0x10] sm:$0xff] (!%p188_p2)   ;;  %v1106_v26 = vld [vmem:[%s1342_s3 + $0x60] sm:$0xff] (!%p188_p2)  }
   0xb   : > { %991 = vmatpush3.bf16.msra.mxu0 (!%p188_p2), %v1090_v2  ;;  %v1108_v27 = vld [vmem:[%s1342_s3 + $0x68] sm:$0xff] (!%p188_p2)   ;;  %v1105_v28 = vld [vmem:[%s1342_s3 + $0x18] sm:$0xff] (!%p188_p2)   ;;  %v1110_v29 = vld [vmem:[%s1342_s3 + $0x70] sm:$0xff] (!%p188_p2)  }
   0xc   : > { %992 = vmatprep.subr.bf16.mxu0 (!%p188_p2), %v1130_v1  ;;  %v1107_v30 = vld [vmem:[%s1342_s3 + $0x20] sm:$0xff] (!%p188_p2)   ;;  %v1112_v31 = vld [vmem:[%s1342_s3 + $0x78] sm:$0xff] (!%p188_p2)   ;;  %v1109_v32 = vld [vmem:[%s1342_s3 + $0x28] sm:$0xff] (!%p188_p2)  }
   0xd   : > { %s1346_s19 = smov (!%p215_p3, %s856_s19), 1  ;;  %1021 = vmatpush3.bf16.msra.mxu1 %v1100_v20  ;;  %v1111_v33 = vld [vmem:[%s1342_s3 + $0x30] sm:$0xff]   ;;  %v1113_v34 = vld [vmem:[%s1342_s3 + $0x38] sm:$0xff]   ;;  %v888_v46 = vld [vmem:[%s1341_s2] ss:$0 sm:$0xff] }
   0xe   : > { %s1078_s26 = smul.u32 24, %s1346_s19  ;;  %1022 = vmatprep.subr.bf16.mxu1 %v1130_v1  ;;  %v1114_v56 = vld [vmem:[%s1342_s3 + $0x80] sm:$0xff]   ;;  %v1115_v58 = vld [vmem:[%s1342_s3 + $0x88] sm:$0xff]   ;;  %v1116_v61 = vld [vmem:[%s1342_s3 + $0x90] sm:$0xff]   ;;  %s948_s25 = sshll.u32 %s1346_s19, 4 }
   0xf   : > { %993 = vmatpush3.bf16.msra.mxu0 %v1091_v3  ;;  %v1117_v63 = vld [vmem:[%s1342_s3 + $0x98] sm:$0xff]   ;;  %v1118_v0 = vld [vmem:[%s1342_s3 + $0xa0] sm:$0xff]   ;;  %v1119_v2 = vld [vmem:[%s1342_s3 + $0xa8] sm:$0xff]   ;;  %s224_s28 = scalar_lea.vmem %s1344_s5, %s948_s25 }
  0x10   : > { %s219_s29 = scalar_lea.vmem %s1339_s0, %s1078_s26  ;;  %998 = vmatprep.subr.bf16.mxu0 %v1130_v1  ;;  %v1120_v3 = vld [vmem:[%s1342_s3 + $0xb0] sm:$0xff]  }
  0x11   : > { %v235_v4 = vld [vmem:[%s219_s29 + $0x1] sm:$0xff]  ;;  %v236_v5 = vld [vmem:[%s219_s29 + $0x9] sm:$0xff]  ;;  %1023 = vmatpush3.bf16.msra.mxu1 %v1102_v21 }
  0x12   : > { %v237_v6 = vpack.c.bf16 %v236_v5, %v235_v4  ;;  %v226_v10 = vld [vmem:[%s219_s29] sm:$0xff]  ;;  %v227_v11 = vld [vmem:[%s219_s29 + $0x8] sm:$0xff]  ;;  %1024 = vmatprep.subr.bf16.mxu1 %v1130_v1  ;;  %v1121_v4 = vld [vmem:[%s1342_s3 + $0xb8] sm:$0xff]  }
  0x13   : > { %v228_v13 = vpack.c.bf16 %v227_v11, %v226_v10  ;;  %v370_v16 = vld [vmem:[%s219_s29 + $0x2] sm:$0xff]  ;;  %v371_v17 = vld [vmem:[%s219_s29 + $0xa] sm:$0xff] }
  0x14   : > { %995 = vmatmul.mubr.msk.bf16.vlgmr.msra.gmra.mrb[0].mxu0 %vm263_vm1, %v237_v6  ;;  %v372_v18 = vpack.c.bf16 %v371_v17, %v370_v16 }
  0x15   : > { %999 = vmatpush3.bf16.msra.mxu0 %v1092_v7  ;;  %1004 = vmatprep.mubr.msk.bf16.mxu0 %vm1131_vm0, %v1130_v1 }
  0x16   : > { %1000 = vmatprep.subr.bf16.mxu0 %v1130_v1  ;;  %1025 = vmatpush3.bf16.msra.mxu1 %v1104_v23 }
  0x17   : > { %1026 = vmatprep.subr.bf16.mxu1 %v1130_v1 }
  0x19   : > { %1001 = vmatpush3.bf16.msra.mxu0 %v1093_v8 }
  0x1a   : > { %1002 = vmatprep.subr.bf16.mxu0 %v1130_v1  ;;  %1027 = vmatpush3.bf16.msra.mxu1 %v1106_v26 }
  0x1b   : > { %1028 = vmatprep.subr.bf16.mxu1 %v1130_v1 }
  0x1d   : > { %1003 = vmatpush3.bf16.msra.mxu0 %v1094_v9 }
  0x1e   : > { %1008 = vmatprep.subr.bf16.mxu0 %v1130_v1  ;;  %1029 = vmatpush3.bf16.msra.mxu1 %v1108_v27 }
  0x1f   : > { %1030 = vmatprep.subr.bf16.mxu1 %v1130_v1 }
  0x20   : > { %1005 = vmatmul.mubr.msk.bf16.vlgmr.msra.gmra.mrb[4].mxu0 %vm263_vm1, %v228_v13 }
  0x21   : > { %1009 = vmatpush3.bf16.msra.mxu0 %v1095_v12  ;;  %1014 = vmatprep.mubr.msk.bf16.mxu0 %vm1131_vm0, %v1130_v1 }
  0x22   : > { %1010 = vmatprep.subr.bf16.mxu0 %v1130_v1  ;;  %1031 = vmatpush3.bf16.msra.mxu1 %v1110_v29 }
  0x23   : > { %1032 = vmatprep.subr.bf16.mxu1 %v1130_v1 }
  0x25   : > { %1011 = vmatpush3.bf16.msra.mxu0 %v1096_v14 }
  0x26   : > { %1012 = vmatprep.subr.bf16.mxu0 %v1130_v1  ;;  %1033 = vmatpush3.bf16.msra.mxu1 %v1112_v31 }
  0x27   : > { %1058 = vmatprep.subr.bf16.mxu1 %v1130_v1 }
  0x29   : > { %1013 = vmatpush3.bf16.msra.mxu0 %v1097_v15 }
  0x2a   : > { %1038 = vmatprep.subr.bf16.mxu0 %v1130_v1 }
  0x2c   : > { %1015 = vmatmul.mubr.msk.bf16.vlgmr.msra.gmra.mrb[8].mxu0 %vm263_vm1, %v372_v18 }
  0x2d   : > { %1054 = vmatprep.mubr.msk.bf16.mxu0 %vm1131_vm0, %v1130_v1  ;;  %1039 = vmatpush3.bf16.msra.mxu0 %v1099_v22 }
  0x2e   : > { %1040 = vmatprep.subr.bf16.mxu0 %v1130_v1 }
  0x31   : > { %1041 = vmatpush3.bf16.msra.mxu0 %v1101_v24 }
  0x32   : > { %1042 = vmatprep.subr.bf16.mxu0 %v1130_v1 }
  0x35   : > { %1043 = vmatpush3.bf16.msra.mxu0 %v1103_v25 }
  0x36   : > { %1044 = vmatprep.subr.bf16.mxu0 %v1130_v1 }
  0x39   : > { %1045 = vmatpush3.bf16.msra.mxu0 %v1105_v28 }
  0x3a   : > { %1046 = vmatprep.subr.bf16.mxu0 %v1130_v1 }
  0x3d   : > { %1047 = vmatpush3.bf16.msra.mxu0 %v1107_v30 }
  0x3e   : > { %1048 = vmatprep.subr.bf16.mxu0 %v1130_v1 }
  0x41   : > { %1049 = vmatpush3.bf16.msra.mxu0 %v1109_v32 }
  0x42   : > { %1050 = vmatprep.subr.bf16.mxu0 %v1130_v1 }
  0x45   : > { %1051 = vmatpush3.bf16.msra.mxu0 %v1111_v33 }
  0x46   : > { %1052 = vmatprep.subr.bf16.mxu0 %v1130_v1 }
  0x49   : > { %1053 = vmatpush3.bf16.msra.mxu0 %v1113_v34 }
  0xe7   : > { %v301_v35 = vpop.f32.mrb[0].mxu0 }
  0xe8   : > { %v996_v36 = vpop.f32.mrb[1].mxu0 }
  0xe9   : > { %v304_v37 = vpop.f32.mrb[2].mxu0 }
  0xea   : > { %v997_v38 = vpop.f32.mrb[3].mxu0 }
  0xf3   : > { %v363_v39 = vpop.f32.mrb[4].mxu0 }
  0xf4   : > { %v364_v40 = vadd.f32 %v363_v39, %v301_v35  ;;  %v1006_v41 = vpop.f32.mrb[5].mxu0 }
  0xf5   : > { %v366_v42 = vpop.f32.mrb[6].mxu0 }
  0xf6   : > { %v367_v43 = vadd.f32 %v366_v42, %v304_v37  ;;  %v1007_v44 = vpop.f32.mrb[7].mxu0 }
  0xff   : > { %v435_v45 = vpop.f32.mrb[8].mxu0 }
 0x100   : > { %v442_v47 = vadd.f32 %v435_v45, %v364_v40  ;;  %v1016_v48 = vpop.f32.mrb[9].mxu0 }
 0x101   : > { %v438_v49 = vpop.f32.mrb[10].mxu0 }
 0x102   : > { %v451_v50 = vadd.f32 %v888_v46, %v442_v47  ;;  %v443_v51 = vadd.f32 %v438_v49, %v367_v43  ;;  %v1017_v52 = vpop.f32.mrb[11].mxu0 }
 0x104   : > { %v453_v53 = vmax.f32 %v451_v50, 0.0  ;;  %v452_v54 = vadd.f32 %v888_v46, %v443_v51 }
 0x106   : > { %458 = vst [vmem:[#allocation2 + $0x1] sm:$0xff] %v453_v53  ;;  %v454_v55 = vmax.f32 %v452_v54, 0.0 }
 0x108   : > { %459 = vst [vmem:[#allocation2 + $0x9] sm:$0xff] %v454_v55  ;;  %v481_v57 = vpack.c.bf16 %v454_v55, %v453_v53 }
 0x10a   : > { %1035 = vmatmul.mubr.bf16.vlgmr.msra.gmra.mrb[0].mxu1 %v481_v57 }
 0x10b   : > { %1059 = vmatpush3.bf16.msra.mxu1 %v1114_v56  ;;  %1074 = vmatprep.mubr.msk.bf16.mxu1 %vm1131_vm0, %v1130_v1 }
 0x10c   : > { %1060 = vmatprep.subr.bf16.mxu1 %v1130_v1 }
 0x10d   : > { %v460_v59 = vld [vmem:[#allocation2] sm:$0xff] }
 0x10f   : > { %v461_v60 = vld [vmem:[#allocation2 + $0x8] sm:$0xff]  ;;  %1061 = vmatpush3.bf16.msra.mxu1 %v1115_v58 }
 0x110   : > { %v462_v62 = vpack.c.bf16 %v461_v60, %v460_v59  ;;  %1062 = vmatprep.subr.bf16.mxu1 %v1130_v1  ;;  %v677_v5 = vld [vmem:[#allocation2 + $0x2] sm:$0xff]  ;;  %v678_v6 = vld [vmem:[#allocation2 + $0xa] sm:$0xff] }
 0x111   : > { %v679_v7 = vpack.c.bf16 %v678_v6, %v677_v5 }
 0x112   : > { %1055 = vmatmul.mubr.bf16.vlgmr.msra.gmra.mrb[12].mxu0 %v462_v62 }
 0x113   : > { %1063 = vmatpush3.bf16.msra.mxu1 %v1116_v61 }
 0x114   : > { %1064 = vmatprep.subr.bf16.mxu1 %v1130_v1 }
 0x117   : > { %1065 = vmatpush3.bf16.msra.mxu1 %v1117_v63 }
 0x118   : > { %1066 = vmatprep.subr.bf16.mxu1 %v1130_v1 }
 0x11b   : > { %1067 = vmatpush3.bf16.msra.mxu1 %v1118_v0 }
 0x11c   : > { %1068 = vmatprep.subr.bf16.mxu1 %v1130_v1 }
 0x11f   : > { %1069 = vmatpush3.bf16.msra.mxu1 %v1119_v2 }
 0x120   : > { %1070 = vmatprep.subr.bf16.mxu1 %v1130_v1 }
 0x123   : > { %1071 = vmatpush3.bf16.msra.mxu1 %v1120_v3 }
 0x124   : > { %1072 = vmatprep.subr.bf16.mxu1 %v1130_v1  ;;  %v945_v1 = vld [vmem:[%s1343_s4] ss:$0 sm:$0xff] }
 0x127   : > { %1073 = vmatpush3.bf16.msra.mxu1 %v1121_v4 }
 0x12a   : > { %1075 = vmatmul.mubr.bf16.vlgmr.msra.gmra.mrb[4].mxu1 %v679_v7 }
 0x1dd   : > { %v581_v8 = vpop.f32.mrb[0].mxu1 }
 0x1de   : > { %v1036_v9 = vpop.f32.mrb[1].mxu1 }
 0x1df   : > { %v584_v10 = vpop.f32.mrb[2].mxu1 }
 0x1e0   : > { %v1037_v11 = vpop.f32.mrb[3].mxu1 }
 0x1e5   : > { %v670_v12 = vpop.f32.mrb[12].mxu0 }
 0x1e6   : > { %v671_v13 = vadd.f32 %v670_v12, %v581_v8  ;;  %v1056_v14 = vpop.f32.mrb[13].mxu0 }
 0x1e7   : > { %v673_v15 = vpop.f32.mrb[14].mxu0 }
 0x1e8   : > { %v674_v16 = vadd.f32 %v673_v15, %v584_v10  ;;  %v1057_v17 = vpop.f32.mrb[15].mxu0 }
 0x1fd   : > { %v779_v18 = vpop.f32.mrb[4].mxu1 }
 0x1fe   : > { %v786_v19 = vadd.f32 %v779_v18, %v671_v13  ;;  %v1076_v20 = vpop.f32.mrb[5].mxu1 }
 0x1ff   : > { %v782_v21 = vpop.f32.mrb[6].mxu1 }
 0x200   : > { %v795_v22 = vadd.f32 %v945_v1, %v786_v19  ;;  %v787_v23 = vadd.f32 %v782_v21, %v674_v16  ;;  %v1077_v24 = vpop.f32.mrb[7].mxu1 }
 0x202   : > { %v797_v25 = vmax.f32 %v795_v22, 0.0  ;;  %v796_v26 = vadd.f32 %v945_v1, %v787_v23 }
 0x204   : > { %799 = vst [vmem:[%s224_s28] sm:$0xff] %v797_v25  ;;  %v798_v27 = vmax.f32 %v796_v26, 0.0 }
 0x206   : > { %800 = vst [vmem:[%s224_s28 + $0x8] sm:$0xff] %v798_v27 }
 0x207 PF: > { %s15_s18 = sadd.s32 1, %s1128_s18  }
 0x208   : > { %p12_p4 = scmp.ge.s32.totalorder %s15_s18, 4  }
 0x20a   :  { %14 = sbr.rel (!%p12_p4) target bundleno = 1 (0x1), region = 74 }

// kernel: bcdunet_forward.20
= control target key start
LH: loop header
LB: loop body
LE: loop exit
PB: predicated region body
PF: predicated region fallthrough
CT: control target
= control target key end

     0   :  { %s69_s0 = inlined_call_operand.vmem [shape: f32[8,128], index: 0, kind: input, shape index: {}]   ;;  %s70_s1 = inlined_call_operand.vmem [shape: f32[8,128], index: 1, kind: input, shape index: {}]   ;;  %s71_s2 = inlined_call_operand.vmem [shape: f32[8,128], index: 2, kind: input, shape index: {}]   ;;  %s72_s3 = inlined_call_operand.vmem [shape: f32[8,128], index: 3, kind: input, shape index: {}]   ;;  %s73_s4 = inlined_call_operand.vmem [shape: f32[8,128], index: 4, kind: output, shape index: {}]  }
   0x1   :  { %v17_v0 = vld [vmem:[%s69_s0] sm:$0xff] }
   0x2   :  { %v18_v1 = vld [vmem:[%s70_s1] sm:$0xff] }
   0x3   :  { %v20_v2 = vld [vmem:[%s71_s2] sm:$0xff]  ;;  %v19_v3 = vmax.f32 %v17_v0, %v18_v1 }
   0x4   :  { %v21_v4 = vld [vmem:[%s72_s3] sm:$0xff] }
   0x5   :  { %v22_v5 = vmax.f32 %v20_v2, %v21_v4 }
   0x7   :  { %v23_v6 = vmax.f32 %v19_v3, %v22_v5 }
   0x9   :  { %24 = vst [vmem:[%s73_s4] sm:$0xff] %v23_v6 }

// kernel: tile.173
= control target key start
LH: loop header
LB: loop body
LE: loop exit
PB: predicated region body
PF: predicated region fallthrough
CT: control target
= control target key end

     0   :  { %s22_s0 = inlined_call_operand.vmem [shape: f32[16], index: 0, kind: input, shape index: {}]   ;;  %s23_s1 = inlined_call_operand.vmem [shape: f32[8,16], index: 1, kind: output, shape index: {}]  }
   0x1   :  { %v4_v0 = vld [vmem:[%s22_s0] ss:$0 sm:$0xff] }
   0x2   :  { %5 = vst [vmem:[%s23_s1] sm:$0xff] %v4_v0 }

// kernel: tile.174
= control target key start
LH: loop header
LB: loop body
LE: loop exit
PB: predicated region body
PF: predicated region fallthrough
CT: control target
= control target key end

     0   :  { %s67_s10 = smov 112   ;;  %s68_s11 = smov 80   ;;  %vm3_vm0 = vcmask 130048   ;;  %vm9_vm1 = vcmask 1048448   ;;  %vm15_vm2 = vcmask 917248   ;;  %vm21_vm3 = vcmask 786048   ;;  %s111_s0 = inlined_call_operand.vmem [shape: f32[8,16], index: 0, kind: input, shape index: {}]   ;;  %s112_s1 = inlined_call_operand.vmem [shape: f32[1,128], index: 1, kind: output, shape index: {}]  }
   0x1   :  { %v53_v0 = vld [vmem:[%s111_s0 + $0x7] sm:$0x1]   ;;  %v55_v1 = vld [vmem:[%s111_s0 + $0x5] sm:$0x1]   ;;  %v54_v2 = vld [vmem:[%s111_s0 + $0x6] sm:$0x1]  }
   0x2   :  { %7 = vrot.lane.b32.xlu0 %v53_v0, %s67_s10  ;;  %19 = vrot.lane.b32.xlu1 %v55_v1, %s68_s11  ;;  %v56_v3 = vld [vmem:[%s111_s0 + $0x4] sm:$0x1]   ;;  %v2_v4 = vld [vmem:[%s111_s0] sm:$0x1]   ;;  %s69_s18 = smov 96   ;;  %s70_s19 = smov 64  }
   0x3   :  { %4 = vst.msk [vmem:[#allocation0] sm:$0x1] %vm3_vm0, %v2_v4   ;;  %v57_v5 = vld [vmem:[%s111_s0 + $0x3] sm:$0x1]   ;;  %v58_v6 = vld [vmem:[%s111_s0 + $0x2] sm:$0x1]  }
   0x4   :  { %s71_s24 = smov 48   ;;  %s72_s25 = smov 32   ;;  %v59_v7 = vld [vmem:[%s111_s0 + $0x1] sm:$0x1]   ;;  %vm27_vm4 = vcmask 654848   ;;  %vm33_vm5 = vcmask 523648  }
   0x5   :  { %s73_s0 = smov 16   ;;  %vm39_vm6 = vcmask 392448   ;;  %vm45_vm7 = vcmask 261248  }
   0x6   :  { %13 = vrot.lane.b32.xlu0 %v54_v2, %s69_s18  ;;  %25 = vrot.lane.b32.xlu1 %v56_v3, %s70_s19 }
   0xa   :  { %31 = vrot.lane.b32.xlu0 %v57_v5, %s71_s24  ;;  %37 = vrot.lane.b32.xlu1 %v58_v6, %s72_s25 }
   0xe   :  { %43 = vrot.lane.b32.xlu0 %v59_v7, %s73_s0 }
  0x74   :  { %v8_v8 = vpop.permute.xlu0 %7   ;;  %v20_v9 = vpop.permute.xlu1 %19  }
  0x75   :  { %10 = vst.msk [vmem:[#allocation0] sm:$0x1] %vm9_vm1, %v8_v8  }
  0x78   :  { %v14_v10 = vpop.permute.xlu0 %13   ;;  %v26_v11 = vpop.permute.xlu1 %25  }
  0x79   :  { %16 = vst.msk [vmem:[#allocation0] sm:$0x1] %vm15_vm2, %v14_v10  }
  0x7a   :  { %22 = vst.msk [vmem:[#allocation0] sm:$0x1] %vm21_vm3, %v20_v9  }
  0x7b   :  { %28 = vst.msk [vmem:[#allocation0] sm:$0x1] %vm27_vm4, %v26_v11  }
  0x7c   :  { %v32_v12 = vpop.permute.xlu0 %31   ;;  %v38_v13 = vpop.permute.xlu1 %37  }
  0x7d   :  { %34 = vst.msk [vmem:[#allocation0] sm:$0x1] %vm33_vm5, %v32_v12  }
  0x7e   :  { %40 = vst.msk [vmem:[#allocation0] sm:$0x1] %vm39_vm6, %v38_v13  }
  0x80   :  { %v44_v14 = vpop.permute.xlu0 %43  }
  0x81   :  { %46 = vst.msk [vmem:[#allocation0] sm:$0x1] %vm45_vm7, %v44_v14  }
  0x88   :  { %v50_v15 = vld [vmem:[#allocation0] sm:$0x1] }
  0x89   :  { %52 = vst [vmem:[%s112_s1] sm:$0x1] %v50_v15 }

// kernel: bcdunet_forward.21
= control target key start
LH: loop header
LB: loop body
LE: loop exit
PB: predicated region body
PF: predicated region fallthrough
CT: control target
= control target key end

     0   :  { %s1179_s18 = smov 0   ;;  %s1367_s0 = inlined_call_operand.vmem [shape: f32[2,10,64], index: 0, kind: input, shape index: {}]   ;;  %s1368_s1 = inlined_call_operand.vmem [shape: bf16[3,64,128], index: 1, kind: input, shape index: {}]   ;;  %s1369_s2 = inlined_call_operand.vmem [shape: f32[1,128], index: 2, kind: input, shape index: {}]   ;;  %s1370_s3 = inlined_call_operand.vmem [shape: bf16[3,128,128], index: 3, kind: input, shape index: {}]   ;;  %s1371_s4 = inlined_call_operand.vmem [shape: f32[1,128], index: 4, kind: input, shape index: {}]   ;;  %s1372_s5 = inlined_call_operand.vmem [shape: f32[2,8,128], index: 5, kind: output, shape index: {}]  }
   0x1 LB: > { %s855_s19 = sadd.s32 4294967295, %s1145_s18   ;;  %p859_p0 = scmp.ge.s32.totalorder %s1145_s18, 1  ;;  %s1145_s18 = sphi %s1179_s18, %s15_s18  }
   0x2   : > { %p187_p1 = scmp.lt.s32.totalorder %s1145_s18, 3 }
   0x4   : > { %p188_p2 = pnand %p859_p0, %p187_p1 }
   0x5   : > { %v1103_v0 = vld [vmem:[%s1368_s1 + $0x20] sm:$0xff] (!%p188_p2)   ;;  %v1147_v1 = vmov (!%p188_p2), 0.0   ;;  %v1105_v3 = vld [vmem:[%s1368_s1 + $0x28] sm:$0xff] (!%p188_p2)   ;;  %vm1148_vm0 = vmmov (!%p188_p2), 0   ;;  %p214_p3 = scmp.lt.s32.totalorder (!%p188_p2), %s855_s19, 1  ;;  %v1107_v5 = vld [vmem:[%s1368_s1 + $0x30] sm:$0xff] (!%p188_p2)  }
   0x6   : > { %191 = sbr.rel (%p188_p2) target bundleno = 509 (0x1fd), region = 40  ;;  %997 = vmatprep.subr.bf16.mxu0 (!%p188_p2), %v1147_v1  ;;  %468 = vst [vmem:[#allocation2] sm:$0xff] (!%p188_p2), %v1147_v1  ;;  %469 = vst [vmem:[#allocation2 + $0x8] sm:$0x3] (!%p188_p2), %v1147_v1  ;;  %1009 = vmatprep.subr.bf16.mxu1 (!%p188_p2), %v1147_v1  ;;  %v1104_v2 = vld [vmem:[%s1368_s1] sm:$0xff] (!%p188_p2)   ;;  %v1106_v4 = vld [vmem:[%s1368_s1 + $0x8] sm:$0xff] (!%p188_p2)  }
   0x7   : > { %998 = vmatpush3.bf16.msra.mxu0 (!%p188_p2), %v1103_v0  ;;  %1005 = vmatprep.mubr.msk.bf16.mxu0 (!%p188_p2), %vm1148_vm0, %v1147_v1  ;;  %v1108_v6 = vld [vmem:[%s1368_s1 + $0x10] sm:$0xff] (!%p188_p2)   ;;  %v1109_v7 = vld [vmem:[%s1368_s1 + $0x38] sm:$0xff] (!%p188_p2)   ;;  %vm269_vm1 = vcmask (!%p188_p2), 523264   ;;  %v1111_v11 = vld [vmem:[%s1368_s1 + $0x40] sm:$0xff] (!%p188_p2)  }
   0x8   : > { %1010 = vmatpush3.bf16.msra.mxu1 (!%p188_p2), %v1104_v2  ;;  %999 = vmatprep.subr.bf16.mxu0 (!%p188_p2), %v1147_v1  ;;  %v1110_v8 = vld [vmem:[%s1368_s1 + $0x18] sm:$0xff] (!%p188_p2)   ;;  %v1112_v14 = vld [vmem:[%s1368_s1 + $0x48] sm:$0xff] (!%p188_p2)   ;;  %v1113_v15 = vld [vmem:[%s1368_s1 + $0x50] sm:$0xff] (!%p188_p2)  }
   0x9   : > { %1011 = vmatprep.subr.bf16.mxu1 (!%p188_p2), %v1147_v1  ;;  %1017 = vmatprep.mubr.msk.bf16.mxu1 (!%p188_p2), %vm1148_vm0, %v1147_v1  ;;  %v1114_v16 = vld [vmem:[%s1368_s1 + $0x58] sm:$0xff] (!%p188_p2)   ;;  %v1115_v19 = vld [vmem:[%s1370_s3 + $0x40] sm:$0xff] (!%p188_p2)   ;;  %v1117_v20 = vld [vmem:[%s1370_s3 + $0x48] sm:$0xff] (!%p188_p2)  }
   0xa   : > { %v1119_v21 = vld [vmem:[%s1370_s3 + $0x50] sm:$0xff] (!%p188_p2)   ;;  %v1116_v22 = vld [vmem:[%s1370_s3] sm:$0xff] (!%p188_p2)   ;;  %v1118_v23 = vld [vmem:[%s1370_s3 + $0x8] sm:$0xff] (!%p188_p2)  }
   0xb   : > { %1000 = vmatpush3.bf16.msra.mxu0 (!%p188_p2), %v1105_v3  ;;  %v1121_v24 = vld [vmem:[%s1370_s3 + $0x58] sm:$0xff] (!%p188_p2)   ;;  %v1120_v25 = vld [vmem:[%s1370_s3 + $0x10] sm:$0xff] (!%p188_p2)   ;;  %v1123_v26 = vld [vmem:[%s1370_s3 + $0x60] sm:$0xff] (!%p188_p2)  }
   0xc   : > { %1012 = vmatpush3.bf16.msra.mxu1 (!%p188_p2), %v1106_v4  ;;  %1001 = vmatprep.subr.bf16.mxu0 (!%p188_p2), %v1147_v1  ;;  %v1122_v27 = vld [vmem:[%s1370_s3 + $0x18] sm:$0xff] (!%p188_p2)   ;;  %v1125_v28 = vld [vmem:[%s1370_s3 + $0x68] sm:$0xff] (!%p188_p2)   ;;  %v1127_v29 = vld [vmem:[%s1370_s3 + $0x70] sm:$0xff] (!%p188_p2)  }
   0xd   : > { %s1374_s19 = smov (!%p214_p3, %s855_s19), 1  ;;  %1013 = vmatprep.subr.bf16.mxu1 %v1147_v1  ;;  %v1124_v30 = vld [vmem:[%s1370_s3 + $0x20] sm:$0xff]   ;;  %v1129_v31 = vld [vmem:[%s1370_s3 + $0x78] sm:$0xff]   ;;  %v1126_v32 = vld [vmem:[%s1370_s3 + $0x28] sm:$0xff]  }
   0xe   : > { %s954_s30 = sshll.u32 %s1374_s19, 4  ;;  %v1128_v33 = vld [vmem:[%s1370_s3 + $0x30] sm:$0xff]   ;;  %v1130_v34 = vld [vmem:[%s1370_s3 + $0x38] sm:$0xff]   ;;  %v894_v45 = vld [vmem:[%s1369_s2] ss:$0 sm:$0xff]  ;;  %s862_s6 = sshll.u32 %s1374_s19, 3 }
   0xf   : > { %s218_s10 = scalar_lea.vmem %s1367_s0, %s954_s30  ;;  %1002 = vmatpush3.bf16.msra.mxu0 %v1107_v5  ;;  %v1131_v52 = vld [vmem:[%s1370_s3 + $0x80] sm:$0xff]   ;;  %v1132_v54 = vld [vmem:[%s1370_s3 + $0x88] sm:$0xff]   ;;  %v1133_v56 = vld [vmem:[%s1370_s3 + $0x90] sm:$0xff]   ;;  %s222_s9 = scalar_lea.vmem %s1372_s5, %s862_s6 }
  0x10   : > { %v234_v9 = vld [vmem:[%s218_s10 + $0x1] sm:$0xff]  ;;  %1014 = vmatpush3.bf16.msra.mxu1 %v1108_v6  ;;  %1003 = vmatprep.subr.bf16.mxu0 %v1147_v1  ;;  %v1134_v58 = vld [vmem:[%s1370_s3 + $0x98] sm:$0xff]   ;;  %v1137_v61 = vld [vmem:[%s1370_s3 + $0xb0] sm:$0xff]  }
  0x11   : > { %v224_v10 = vld [vmem:[%s218_s10] sm:$0xff]  ;;  %1015 = vmatprep.subr.bf16.mxu1 %v1147_v1  ;;  %v235_v12 = vpack.c.bf16 %v234_v9, %v234_v9  ;;  %v1136_v60 = vld [vmem:[%s1370_s3 + $0xa8] sm:$0xff]   ;;  %v1138_v62 = vld [vmem:[%s1370_s3 + $0xb8] sm:$0xff]  }
  0x12   : > { %v225_v13 = vpack.c.bf16 %v224_v10, %v224_v10  ;;  %v380_v17 = vld [vmem:[%s218_s10 + $0x2] sm:$0xff] }
  0x13   : > { %1004 = vmatpush3.bf16.msra.mxu0 %v1109_v7  ;;  %v381_v18 = vpack.c.bf16 %v380_v17, %v380_v17  ;;  %v1135_v59 = vld [vmem:[%s1370_s3 + $0xa0] sm:$0xff]  }
  0x14   : > { %1016 = vmatpush3.bf16.msra.mxu1 %v1110_v8  ;;  %1021 = vmatprep.subr.bf16.mxu0 %v1147_v1 }
  0x15   : > { %1033 = vmatprep.subr.bf16.mxu1 %v1147_v1 }
  0x16   : > { %1006 = vmatmul.mubr.msk.bf16.vlgmr.msra.gmra.mrb[0].mxu0 %vm269_vm1, %v235_v12  ;;  %v951_v12 = vld [vmem:[%s1371_s4] ss:$0 sm:$0xff] }
  0x17   : > { %1018 = vmatmul.mubr.msk.bf16.vlgmr.msra.gmra.mrb[0].mxu1 %vm269_vm1, %v225_v13  ;;  %1022 = vmatpush3.bf16.msra.mxu0 %v1111_v11 }
  0x18   : > { %1023 = vmatprep.subr.bf16.mxu0 %v1147_v1  ;;  %1029 = vmatprep.mubr.msk.bf16.mxu0 %vm1148_vm0, %v1147_v1 }
  0x19   : > { %1049 = vmatprep.mubr.msk.bf16.mxu1 %vm1148_vm0, %v1147_v1  ;;  %1034 = vmatpush3.bf16.msra.mxu1 %v1115_v19 }
  0x1a   : > { %1035 = vmatprep.subr.bf16.mxu1 %v1147_v1 }
  0x1b   : > { %1024 = vmatpush3.bf16.msra.mxu0 %v1112_v14 }
  0x1c   : > { %1025 = vmatprep.subr.bf16.mxu0 %v1147_v1 }
  0x1d   : > { %1036 = vmatpush3.bf16.msra.mxu1 %v1117_v20 }
  0x1e   : > { %1037 = vmatprep.subr.bf16.mxu1 %v1147_v1 }
  0x1f   : > { %1026 = vmatpush3.bf16.msra.mxu0 %v1113_v15 }
  0x20   : > { %1027 = vmatprep.subr.bf16.mxu0 %v1147_v1 }
  0x21   : > { %1038 = vmatpush3.bf16.msra.mxu1 %v1119_v21 }
  0x22   : > { %1039 = vmatprep.subr.bf16.mxu1 %v1147_v1 }
  0x23   : > { %1028 = vmatpush3.bf16.msra.mxu0 %v1114_v16 }
  0x24   : > { %1053 = vmatprep.subr.bf16.mxu0 %v1147_v1 }
  0x25   : > { %1040 = vmatpush3.bf16.msra.mxu1 %v1121_v24 }
  0x26   : > { %1030 = vmatmul.mubr.msk.bf16.vlgmr.msra.gmra.mrb[4].mxu0 %vm269_vm1, %v381_v18  ;;  %1041 = vmatprep.subr.bf16.mxu1 %v1147_v1 }
  0x27   : > { %1069 = vmatprep.mubr.msk.bf16.mxu0 %vm1148_vm0, %v1147_v1  ;;  %1054 = vmatpush3.bf16.msra.mxu0 %v1116_v22 }
  0x28   : > { %1055 = vmatprep.subr.bf16.mxu0 %v1147_v1 }
  0x29   : > { %1042 = vmatpush3.bf16.msra.mxu1 %v1123_v26 }
  0x2a   : > { %1043 = vmatprep.subr.bf16.mxu1 %v1147_v1 }
  0x2b   : > { %1056 = vmatpush3.bf16.msra.mxu0 %v1118_v23 }
  0x2c   : > { %1057 = vmatprep.subr.bf16.mxu0 %v1147_v1 }
  0x2d   : > { %1044 = vmatpush3.bf16.msra.mxu1 %v1125_v28 }
  0x2e   : > { %1045 = vmatprep.subr.bf16.mxu1 %v1147_v1 }
  0x2f   : > { %1058 = vmatpush3.bf16.msra.mxu0 %v1120_v25 }
  0x30   : > { %1059 = vmatprep.subr.bf16.mxu0 %v1147_v1 }
  0x31   : > { %1046 = vmatpush3.bf16.msra.mxu1 %v1127_v29 }
  0x32   : > { %1047 = vmatprep.subr.bf16.mxu1 %v1147_v1 }
  0x33   : > { %1060 = vmatpush3.bf16.msra.mxu0 %v1122_v27 }
  0x34   : > { %1061 = vmatprep.subr.bf16.mxu0 %v1147_v1 }
  0x35   : > { %1048 = vmatpush3.bf16.msra.mxu1 %v1129_v31 }
  0x36   : > { %1073 = vmatprep.subr.bf16.mxu1 %v1147_v1 }
  0x37   : > { %1062 = vmatpush3.bf16.msra.mxu0 %v1124_v30 }
  0x38   : > { %1063 = vmatprep.subr.bf16.mxu0 %v1147_v1 }
  0x3b   : > { %1064 = vmatpush3.bf16.msra.mxu0 %v1126_v32 }
  0x3c   : > { %1065 = vmatprep.subr.bf16.mxu0 %v1147_v1 }
  0x3f   : > { %1066 = vmatpush3.bf16.msra.mxu0 %v1128_v33 }
  0x40   : > { %1067 = vmatprep.subr.bf16.mxu0 %v1147_v1 }
  0x43   : > { %1068 = vmatpush3.bf16.msra.mxu0 %v1130_v34 }
  0xe9   : > { %v307_v35 = vpop.f32.mrb[0].mxu0 }
  0xea   : > { %v1007_v36 = vpop.f32.mrb[1].mxu0  ;;  %v374_v37 = vpop.f32.mrb[0].mxu1 }
  0xeb   : > { %v375_v38 = vadd.f32 %v374_v37, %v307_v35  ;;  %v310_v39 = vpop.f32.mrb[2].mxu0  ;;  %v1019_v40 = vpop.f32.mrb[1].mxu1 }
  0xec   : > { %v1008_v41 = vpop.f32.mrb[3].mxu0  ;;  %v377_v42 = vpop.f32.mrb[2].mxu1 }
  0xed   : > { %v1020_v43 = vpop.f32.mrb[3].mxu1 }
  0xf9   : > { %v452_v44 = vpop.f32.mrb[4].mxu0 }
  0xfa   : > { %v458_v46 = vadd.f32 %v452_v44, %v375_v38  ;;  %v1031_v47 = vpop.f32.mrb[5].mxu0 }
  0xfb   : > { %v455_v48 = vpop.f32.mrb[6].mxu0 }
  0xfc   : > { %v466_v49 = vadd.f32 %v894_v45, %v458_v46  ;;  %v1032_v50 = vpop.f32.mrb[7].mxu0 }
  0xfe   : > { %v467_v51 = vmax.f32 %v466_v49, 0.0 }
 0x100   : > { %470 = vst [vmem:[#allocation2 + $0x1] sm:$0xff] %v467_v51  ;;  %v490_v53 = vpack.c.bf16 %v467_v51, %v467_v51 }
 0x102   : > { %1050 = vmatmul.mubr.bf16.vlgmr.msra.gmra.mrb[4].mxu1 %v490_v53 }
 0x103   : > { %1074 = vmatpush3.bf16.msra.mxu1 %v1131_v52  ;;  %1089 = vmatprep.mubr.msk.bf16.mxu1 %vm1148_vm0, %v1147_v1 }
 0x104   : > { %1075 = vmatprep.subr.bf16.mxu1 %v1147_v1 }
 0x107   : > { %v471_v55 = vld [vmem:[#allocation2] sm:$0xff]  ;;  %1076 = vmatpush3.bf16.msra.mxu1 %v1132_v54 }
 0x108   : > { %v472_v57 = vpack.c.bf16 %v471_v55, %v471_v55  ;;  %1077 = vmatprep.subr.bf16.mxu1 %v1147_v1  ;;  %v684_v63 = vld [vmem:[#allocation2 + $0x2] sm:$0xff] }
 0x109   : > { %v685_v0 = vpack.c.bf16 %v684_v63, %v684_v63 }
 0x10a   : > { %1070 = vmatmul.mubr.bf16.vlgmr.msra.gmra.mrb[8].mxu0 %v472_v57 }
 0x10b   : > { %1078 = vmatpush3.bf16.msra.mxu1 %v1133_v56 }
 0x10c   : > { %1079 = vmatprep.subr.bf16.mxu1 %v1147_v1 }
 0x10f   : > { %1080 = vmatpush3.bf16.msra.mxu1 %v1134_v58 }
 0x110   : > { %1081 = vmatprep.subr.bf16.mxu1 %v1147_v1 }
 0x113   : > { %1082 = vmatpush3.bf16.msra.mxu1 %v1135_v59 }
 0x114   : > { %1083 = vmatprep.subr.bf16.mxu1 %v1147_v1 }
 0x117   : > { %1084 = vmatpush3.bf16.msra.mxu1 %v1136_v60 }
 0x118   : > { %1085 = vmatprep.subr.bf16.mxu1 %v1147_v1 }
 0x11b   : > { %1086 = vmatpush3.bf16.msra.mxu1 %v1137_v61 }
 0x11c   : > { %1087 = vmatprep.subr.bf16.mxu1 %v1147_v1 }
 0x11f   : > { %1088 = vmatpush3.bf16.msra.mxu1 %v1138_v62 }
 0x122   : > { %1090 = vmatmul.mubr.bf16.vlgmr.msra.gmra.mrb[8].mxu1 %v685_v0 }
 0x1d5   : > { %v590_v2 = vpop.f32.mrb[4].mxu1 }
 0x1d6   : > { %v1051_v3 = vpop.f32.mrb[5].mxu1 }
 0x1d7   : > { %v593_v4 = vpop.f32.mrb[6].mxu1 }
 0x1d8   : > { %v1052_v5 = vpop.f32.mrb[7].mxu1 }
 0x1dd   : > { %v678_v6 = vpop.f32.mrb[8].mxu0 }
 0x1de   : > { %v679_v7 = vadd.f32 %v678_v6, %v590_v2  ;;  %v1071_v8 = vpop.f32.mrb[9].mxu0 }
 0x1df   : > { %v681_v9 = vpop.f32.mrb[10].mxu0 }
 0x1e0   : > { %v1072_v10 = vpop.f32.mrb[11].mxu0 }
 0x1f5   : > { %v785_v11 = vpop.f32.mrb[8].mxu1 }
 0x1f6   : > { %v791_v1 = vadd.f32 %v785_v11, %v679_v7  ;;  %v1091_v13 = vpop.f32.mrb[9].mxu1 }
 0x1f7   : > { %v788_v14 = vpop.f32.mrb[10].mxu1 }
 0x1f8   : > { %v799_v15 = vadd.f32 %v951_v12, %v791_v1  ;;  %v1092_v16 = vpop.f32.mrb[11].mxu1 }
 0x1fa   : > { %v800_v17 = vmax.f32 %v799_v15, 0.0 }
 0x1fc   : > { %801 = vst [vmem:[%s222_s9] sm:$0xff] %v800_v17 }
 0x1fd PF: > { %s15_s18 = sadd.s32 1, %s1145_s18  }
 0x1fe   : > { %p12_p4 = scmp.ge.s32.totalorder %s15_s18, 4  }
 0x200   :  { %14 = sbr.rel (!%p12_p4) target bundleno = 1 (0x1), region = 74 }

// kernel: tile.183
= control target key start
LH: loop header
LB: loop body
LE: loop exit
PB: predicated region body
PF: predicated region fallthrough
CT: control target
= control target key end

     0   :  { %s22_s0 = inlined_call_operand.vmem [shape: f32[32], index: 0, kind: input, shape index: {}]   ;;  %s23_s1 = inlined_call_operand.vmem [shape: f32[4,32], index: 1, kind: output, shape index: {}]  }
   0x1   :  { %v4_v0 = vld [vmem:[%s22_s0] ss:$0 sm:$0xff] }
   0x2   :  { %5 = vst [vmem:[%s23_s1] sm:$0xf] %v4_v0 }

// kernel: tile.184
= control target key start
LH: loop header
LB: loop body
LE: loop exit
PB: predicated region body
PF: predicated region fallthrough
CT: control target
= control target key end

     0   :  { %vm7_vm0 = vcmask 261120   ;;  %s37_s8 = smov 32   ;;  %s38_s9 = smov 64   ;;  %vm13_vm1 = vcmask 1048320   ;;  %vm19_vm2 = vcmask 785920   ;;  %vm25_vm3 = vcmask 523520   ;;  %s55_s0 = inlined_call_operand.vmem [shape: f32[4,32], index: 0, kind: input, shape index: {}]   ;;  %s56_s1 = inlined_call_operand.vmem [shape: f32[1,128], index: 1, kind: output, shape index: {}]  }
   0x1   :  { %v4_v0 = vld [vmem:[%s55_s0] sm:$0xf]  ;;  %s36_s0 = smov 96  }
   0x2   :  { %5 = vst [vmem:[#allocation1] sm:$0xf] %v4_v0 }
   0x9   :  { %v10_v1 = vld [vmem:[#allocation1 + $0x3] sm:$0x1]   ;;  %v22_v2 = vld [vmem:[#allocation1 + $0x1] sm:$0x1]   ;;  %v6_v3 = vld [vmem:[#allocation1] sm:$0x1]  }
   0xa   :  { %11 = vrot.lane.b32.xlu0 %v10_v1, %s36_s0  ;;  %23 = vrot.lane.b32.xlu1 %v22_v2, %s37_s8  ;;  %v16_v4 = vld [vmem:[#allocation1 + $0x2] sm:$0x1]   ;;  %8 = vst.msk [vmem:[#allocation0] sm:$0x1] %vm7_vm0, %v6_v3  }
   0xe   :  { %17 = vrot.lane.b32.xlu0 %v16_v4, %s38_s9 }
  0x7c   :  { %v12_v5 = vpop.permute.xlu0 %11   ;;  %v24_v6 = vpop.permute.xlu1 %23  }
  0x7d   :  { %14 = vst.msk [vmem:[#allocation0] sm:$0x1] %vm13_vm1, %v12_v5  }
  0x80   :  { %v18_v7 = vpop.permute.xlu0 %17  }
  0x81   :  { %20 = vst.msk [vmem:[#allocation0] sm:$0x1] %vm19_vm2, %v18_v7  }
  0x82   :  { %26 = vst.msk [vmem:[#allocation0] sm:$0x1] %vm25_vm3, %v24_v6  }
  0x89   :  { %v30_v8 = vld [vmem:[#allocation0] sm:$0x1] }
  0x8a   :  { %32 = vst [vmem:[%s56_s1] sm:$0x1] %v30_v8 }

// kernel: bcdunet_forward.23
= control target key start
LH: loop header
LB: loop body
LE: loop exit
PB: predicated region body
PF: predicated region fallthrough
CT: control target
= control target key end

     0   :  { %s1173_s18 = smov 0   ;;  %s1360_s0 = inlined_call_operand.vmem [shape: f32[2,6,64], index: 0, kind: input, shape index: {}]   ;;  %s1361_s1 = inlined_call_operand.vmem [shape: bf16[3,64,128], index: 1, kind: input, shape index: {}]   ;;  %s1362_s2 = inlined_call_operand.vmem [shape: f32[1,128], index: 2, kind: input, shape index: {}]   ;;  %s1363_s3 = inlined_call_operand.vmem [shape: bf16[3,128,128], index: 3, kind: input, shape index: {}]   ;;  %s1364_s4 = inlined_call_operand.vmem [shape: f32[1,128], index: 4, kind: input, shape index: {}]   ;;  %s1365_s5 = inlined_call_operand.vmem [shape: f32[2,4,128], index: 5, kind: output, shape index: {}]  }
   0x1 LB: > { %s851_s19 = sadd.s32 4294967295, %s1139_s18   ;;  %p855_p0 = scmp.ge.s32.totalorder %s1139_s18, 1  ;;  %s1139_s18 = sphi %s1173_s18, %s15_s18  }
   0x2   : > { %p186_p1 = scmp.lt.s32.totalorder %s1139_s18, 3 }
   0x4   : > { %p187_p2 = pnand %p855_p0, %p186_p1 }
   0x5   : > { %v1097_v0 = vld [vmem:[%s1361_s1 + $0x20] sm:$0xff] (!%p187_p2)   ;;  %v1141_v1 = vmov (!%p187_p2), 0.0   ;;  %v1099_v3 = vld [vmem:[%s1361_s1 + $0x28] sm:$0xff] (!%p187_p2)   ;;  %vm1142_vm0 = vmmov (!%p187_p2), 0   ;;  %p212_p3 = scmp.lt.s32.totalorder (!%p187_p2), %s851_s19, 1  ;;  %v1101_v5 = vld [vmem:[%s1361_s1 + $0x30] sm:$0xff] (!%p187_p2)  }
   0x6   : > { %190 = sbr.rel (%p187_p2) target bundleno = 517 (0x205), region = 40  ;;  %991 = vmatprep.subr.bf16.mxu0 (!%p187_p2), %v1141_v1  ;;  %465 = vst [vmem:[#allocation2] sm:$0x3f] (!%p187_p2), %v1141_v1  ;;  %1003 = vmatprep.subr.bf16.mxu1 (!%p187_p2), %v1141_v1  ;;  %v1098_v2 = vld [vmem:[%s1361_s1] sm:$0xff] (!%p187_p2)   ;;  %v1100_v4 = vld [vmem:[%s1361_s1 + $0x8] sm:$0xff] (!%p187_p2)   ;;  %v1102_v6 = vld [vmem:[%s1361_s1 + $0x10] sm:$0xff] (!%p187_p2)  }
   0x7   : > { %992 = vmatpush3.bf16.msra.mxu0 (!%p187_p2), %v1097_v0  ;;  %999 = vmatprep.mubr.msk.bf16.mxu0 (!%p187_p2), %vm1142_vm0, %v1141_v1  ;;  %v1103_v7 = vld [vmem:[%s1361_s1 + $0x38] sm:$0xff] (!%p187_p2)   ;;  %vm266_vm1 = vcmask (!%p187_p2), 523264   ;;  %v1105_v11 = vld [vmem:[%s1361_s1 + $0x40] sm:$0xff] (!%p187_p2)   ;;  %v1106_v14 = vld [vmem:[%s1361_s1 + $0x48] sm:$0xff] (!%p187_p2)  }
   0x8   : > { %1004 = vmatpush3.bf16.msra.mxu1 (!%p187_p2), %v1098_v2  ;;  %993 = vmatprep.subr.bf16.mxu0 (!%p187_p2), %v1141_v1  ;;  %v1104_v8 = vld [vmem:[%s1361_s1 + $0x18] sm:$0xff] (!%p187_p2)   ;;  %v1107_v15 = vld [vmem:[%s1361_s1 + $0x50] sm:$0xff] (!%p187_p2)   ;;  %v1109_v19 = vld [vmem:[%s1363_s3 + $0x40] sm:$0xff] (!%p187_p2)  }
   0x9   : > { %1005 = vmatprep.subr.bf16.mxu1 (!%p187_p2), %v1141_v1  ;;  %1011 = vmatprep.mubr.msk.bf16.mxu1 (!%p187_p2), %vm1142_vm0, %v1141_v1  ;;  %v1108_v16 = vld [vmem:[%s1361_s1 + $0x58] sm:$0xff] (!%p187_p2)   ;;  %v1110_v20 = vld [vmem:[%s1363_s3] sm:$0xff] (!%p187_p2)   ;;  %v1111_v21 = vld [vmem:[%s1363_s3 + $0x48] sm:$0xff] (!%p187_p2)  }
   0xa   : > { %v1112_v22 = vld [vmem:[%s1363_s3 + $0x8] sm:$0xff] (!%p187_p2)   ;;  %v1113_v23 = vld [vmem:[%s1363_s3 + $0x50] sm:$0xff] (!%p187_p2)   ;;  %v1115_v25 = vld [vmem:[%s1363_s3 + $0x58] sm:$0xff] (!%p187_p2)  }
   0xb   : > { %994 = vmatpush3.bf16.msra.mxu0 (!%p187_p2), %v1099_v3  ;;  %v1114_v24 = vld [vmem:[%s1363_s3 + $0x10] sm:$0xff] (!%p187_p2)   ;;  %v1116_v26 = vld [vmem:[%s1363_s3 + $0x18] sm:$0xff] (!%p187_p2)   ;;  %v1117_v27 = vld [vmem:[%s1363_s3 + $0x60] sm:$0xff] (!%p187_p2)  }
   0xc   : > { %1006 = vmatpush3.bf16.msra.mxu1 (!%p187_p2), %v1100_v4  ;;  %995 = vmatprep.subr.bf16.mxu0 (!%p187_p2), %v1141_v1  ;;  %v1118_v28 = vld [vmem:[%s1363_s3 + $0x20] sm:$0xff] (!%p187_p2)   ;;  %v1119_v29 = vld [vmem:[%s1363_s3 + $0x68] sm:$0xff] (!%p187_p2)   ;;  %v1121_v31 = vld [vmem:[%s1363_s3 + $0x70] sm:$0xff] (!%p187_p2)  }
   0xd   : > { %s1367_s19 = smov (!%p212_p3, %s851_s19), 1  ;;  %1007 = vmatprep.subr.bf16.mxu1 %v1141_v1  ;;  %v1120_v30 = vld [vmem:[%s1363_s3 + $0x28] sm:$0xff]   ;;  %v1122_v32 = vld [vmem:[%s1363_s3 + $0x30] sm:$0xff]   ;;  %v1123_v33 = vld [vmem:[%s1363_s3 + $0x78] sm:$0xff]  }
   0xe   : > { %s856_s30 = sshll.u32 %s1367_s19, 3  ;;  %v1124_v34 = vld [vmem:[%s1363_s3 + $0x38] sm:$0xff]   ;;  %v889_v45 = vld [vmem:[%s1362_s2] ss:$0 sm:$0xff]  ;;  %v1126_v57 = vld [vmem:[%s1363_s3 + $0x88] sm:$0xff]   ;;  %s857_s6 = sshll.u32 %s1367_s19, 2 }
   0xf   : > { %s215_s10 = scalar_lea.vmem %s1360_s0, %s856_s30  ;;  %996 = vmatpush3.bf16.msra.mxu0 %v1101_v5  ;;  %v1125_v54 = vld [vmem:[%s1363_s3 + $0x80] sm:$0xff]   ;;  %v1127_v58 = vld [vmem:[%s1363_s3 + $0x90] sm:$0xff]   ;;  %v1128_v59 = vld [vmem:[%s1363_s3 + $0x98] sm:$0xff]   ;;  %s219_s9 = scalar_lea.vmem %s1365_s5, %s857_s6 }
  0x10   : > { %v231_v9 = vld [vmem:[%s215_s10 + $0x1] sm:$0xf]  ;;  %1008 = vmatpush3.bf16.msra.mxu1 %v1102_v6  ;;  %997 = vmatprep.subr.bf16.mxu0 %v1141_v1  ;;  %v1130_v61 = vld [vmem:[%s1363_s3 + $0xa8] sm:$0xff]   ;;  %v1131_v62 = vld [vmem:[%s1363_s3 + $0xb0] sm:$0xff]  }
  0x11   : > { %v221_v10 = vld [vmem:[%s215_s10] sm:$0xf]  ;;  %1009 = vmatprep.subr.bf16.mxu1 %v1141_v1  ;;  %v232_v12 = vpack.c.bf16 %v231_v9, %v231_v9  ;;  %v1132_v63 = vld [vmem:[%s1363_s3 + $0xb8] sm:$0xff]  }
  0x12   : > { %v222_v13 = vpack.c.bf16 %v221_v10, %v221_v10  ;;  %v377_v17 = vld [vmem:[%s215_s10 + $0x2] sm:$0xf] }
  0x13   : > { %998 = vmatpush3.bf16.msra.mxu0 %v1103_v7  ;;  %v378_v18 = vpack.c.bf16 %v377_v17, %v377_v17  ;;  %v1129_v60 = vld [vmem:[%s1363_s3 + $0xa0] sm:$0xff]  }
  0x14   : > { %1010 = vmatpush3.bf16.msra.mxu1 %v1104_v8  ;;  %1015 = vmatprep.subr.bf16.mxu0 %v1141_v1 }
  0x15   : > { %1027 = vmatprep.subr.bf16.mxu1 %v1141_v1 }
  0x16   : > { %1000 = vmatmul.mubr.msk.bf16.vlgmr.msra.gmra.mrb[0].mxu0 %vm266_vm1, %v232_v12 }
  0x17   : > { %1012 = vmatmul.mubr.msk.bf16.vlgmr.msra.gmra.mrb[0].mxu1 %vm266_vm1, %v222_v13  ;;  %1016 = vmatpush3.bf16.msra.mxu0 %v1105_v11  ;;  %v946_v13 = vld [vmem:[%s1364_s4] ss:$0 sm:$0xff] }
  0x18   : > { %1017 = vmatprep.subr.bf16.mxu0 %v1141_v1  ;;  %1023 = vmatprep.mubr.msk.bf16.mxu0 %vm1142_vm0, %v1141_v1 }
  0x19   : > { %1043 = vmatprep.mubr.msk.bf16.mxu1 %vm1142_vm0, %v1141_v1  ;;  %1028 = vmatpush3.bf16.msra.mxu1 %v1109_v19 }
  0x1a   : > { %1029 = vmatprep.subr.bf16.mxu1 %v1141_v1 }
  0x1b   : > { %1018 = vmatpush3.bf16.msra.mxu0 %v1106_v14 }
  0x1c   : > { %1019 = vmatprep.subr.bf16.mxu0 %v1141_v1 }
  0x1d   : > { %1030 = vmatpush3.bf16.msra.mxu1 %v1111_v21 }
  0x1e   : > { %1031 = vmatprep.subr.bf16.mxu1 %v1141_v1 }
  0x1f   : > { %1020 = vmatpush3.bf16.msra.mxu0 %v1107_v15 }
  0x20   : > { %1021 = vmatprep.subr.bf16.mxu0 %v1141_v1 }
  0x21   : > { %1032 = vmatpush3.bf16.msra.mxu1 %v1113_v23 }
  0x22   : > { %1033 = vmatprep.subr.bf16.mxu1 %v1141_v1 }
  0x23   : > { %1022 = vmatpush3.bf16.msra.mxu0 %v1108_v16 }
  0x24   : > { %1047 = vmatprep.subr.bf16.mxu0 %v1141_v1 }
  0x25   : > { %1034 = vmatpush3.bf16.msra.mxu1 %v1115_v25 }
  0x26   : > { %1024 = vmatmul.mubr.msk.bf16.vlgmr.msra.gmra.mrb[4].mxu0 %vm266_vm1, %v378_v18  ;;  %1035 = vmatprep.subr.bf16.mxu1 %v1141_v1 }
  0x27   : > { %1063 = vmatprep.mubr.msk.bf16.mxu0 %vm1142_vm0, %v1141_v1  ;;  %1048 = vmatpush3.bf16.msra.mxu0 %v1110_v20 }
  0x28   : > { %1049 = vmatprep.subr.bf16.mxu0 %v1141_v1 }
  0x29   : > { %1036 = vmatpush3.bf16.msra.mxu1 %v1117_v27 }
  0x2a   : > { %1037 = vmatprep.subr.bf16.mxu1 %v1141_v1 }
  0x2b   : > { %1050 = vmatpush3.bf16.msra.mxu0 %v1112_v22 }
  0x2c   : > { %1051 = vmatprep.subr.bf16.mxu0 %v1141_v1 }
  0x2d   : > { %1038 = vmatpush3.bf16.msra.mxu1 %v1119_v29 }
  0x2e   : > { %1039 = vmatprep.subr.bf16.mxu1 %v1141_v1 }
  0x2f   : > { %1052 = vmatpush3.bf16.msra.mxu0 %v1114_v24 }
  0x30   : > { %1053 = vmatprep.subr.bf16.mxu0 %v1141_v1 }
  0x31   : > { %1040 = vmatpush3.bf16.msra.mxu1 %v1121_v31 }
  0x32   : > { %1041 = vmatprep.subr.bf16.mxu1 %v1141_v1 }
  0x33   : > { %1054 = vmatpush3.bf16.msra.mxu0 %v1116_v26 }
  0x34   : > { %1055 = vmatprep.subr.bf16.mxu0 %v1141_v1 }
  0x35   : > { %1042 = vmatpush3.bf16.msra.mxu1 %v1123_v33 }
  0x36   : > { %1067 = vmatprep.subr.bf16.mxu1 %v1141_v1 }
  0x37   : > { %1056 = vmatpush3.bf16.msra.mxu0 %v1118_v28 }
  0x38   : > { %1057 = vmatprep.subr.bf16.mxu0 %v1141_v1 }
  0x3b   : > { %1058 = vmatpush3.bf16.msra.mxu0 %v1120_v30 }
  0x3c   : > { %1059 = vmatprep.subr.bf16.mxu0 %v1141_v1 }
  0x3f   : > { %1060 = vmatpush3.bf16.msra.mxu0 %v1122_v32 }
  0x40   : > { %1061 = vmatprep.subr.bf16.mxu0 %v1141_v1 }
  0x43   : > { %1062 = vmatpush3.bf16.msra.mxu0 %v1124_v34 }
  0xe9   : > { %v304_v35 = vpop.f32.mrb[0].mxu0 }
  0xea   : > { %v1001_v36 = vpop.f32.mrb[1].mxu0  ;;  %v371_v37 = vpop.f32.mrb[0].mxu1 }
  0xeb   : > { %v372_v38 = vadd.f32 %v371_v37, %v304_v35  ;;  %v307_v39 = vpop.f32.mrb[2].mxu0  ;;  %v1013_v40 = vpop.f32.mrb[1].mxu1 }
  0xec   : > { %v1002_v41 = vpop.f32.mrb[3].mxu0  ;;  %v374_v42 = vpop.f32.mrb[2].mxu1 }
  0xed   : > { %v1014_v43 = vpop.f32.mrb[3].mxu1 }
  0xf9   : > { %v449_v44 = vpop.f32.mrb[4].mxu0 }
  0xfa   : > { %v455_v46 = vadd.f32 %v449_v44, %v372_v38  ;;  %v1025_v47 = vpop.f32.mrb[5].mxu0 }
  0xfb   : > { %v452_v48 = vpop.f32.mrb[6].mxu0 }
  0xfc   : > { %v463_v49 = vadd.f32 %v889_v45, %v455_v46  ;;  %v1026_v50 = vpop.f32.mrb[7].mxu0 }
  0xfe   : > { %v464_v51 = vmax.f32 %v463_v49, 0.0 }
 0x100   : > { %466 = vst [vmem:[#allocation2 + $0x1] sm:$0xf] %v464_v51 }
 0x107   : > { %v485_v52 = vld [vmem:[#allocation2 + $0x1] sm:$0xf] }
 0x108   : > { %v467_v53 = vld [vmem:[#allocation2] sm:$0xf]  ;;  %v486_v55 = vpack.c.bf16 %v485_v52, %v485_v52 }
 0x109   : > { %v468_v56 = vpack.c.bf16 %v467_v53, %v467_v53  ;;  %v680_v0 = vld [vmem:[#allocation2 + $0x2] sm:$0xf] }
 0x10a   : > { %1044 = vmatmul.mubr.bf16.vlgmr.msra.gmra.mrb[4].mxu1 %v486_v55  ;;  %v681_v2 = vpack.c.bf16 %v680_v0, %v680_v0 }
 0x10b   : > { %1064 = vmatmul.mubr.bf16.vlgmr.msra.gmra.mrb[8].mxu0 %v468_v56  ;;  %1068 = vmatpush3.bf16.msra.mxu1 %v1125_v54 }
 0x10c   : > { %1083 = vmatprep.mubr.msk.bf16.mxu1 %vm1142_vm0, %v1141_v1  ;;  %1069 = vmatprep.subr.bf16.mxu1 %v1141_v1 }
 0x10f   : > { %1070 = vmatpush3.bf16.msra.mxu1 %v1126_v57 }
 0x110   : > { %1071 = vmatprep.subr.bf16.mxu1 %v1141_v1 }
 0x113   : > { %1072 = vmatpush3.bf16.msra.mxu1 %v1127_v58 }
 0x114   : > { %1073 = vmatprep.subr.bf16.mxu1 %v1141_v1 }
 0x117   : > { %1074 = vmatpush3.bf16.msra.mxu1 %v1128_v59 }
 0x118   : > { %1075 = vmatprep.subr.bf16.mxu1 %v1141_v1 }
 0x11b   : > { %1076 = vmatpush3.bf16.msra.mxu1 %v1129_v60 }
 0x11c   : > { %1077 = vmatprep.subr.bf16.mxu1 %v1141_v1 }
 0x11f   : > { %1078 = vmatpush3.bf16.msra.mxu1 %v1130_v61 }
 0x120   : > { %1079 = vmatprep.subr.bf16.mxu1 %v1141_v1 }
 0x123   : > { %1080 = vmatpush3.bf16.msra.mxu1 %v1131_v62 }
 0x124   : > { %1081 = vmatprep.subr.bf16.mxu1 %v1141_v1 }
 0x127   : > { %1082 = vmatpush3.bf16.msra.mxu1 %v1132_v63 }
 0x12a   : > { %1084 = vmatmul.mubr.bf16.vlgmr.msra.gmra.mrb[8].mxu1 %v681_v2 }
 0x1dd   : > { %v586_v3 = vpop.f32.mrb[4].mxu1 }
 0x1de   : > { %v674_v4 = vpop.f32.mrb[8].mxu0  ;;  %v1045_v6 = vpop.f32.mrb[5].mxu1 }
 0x1df   : > { %v675_v5 = vadd.f32 %v674_v4, %v586_v3  ;;  %v1065_v7 = vpop.f32.mrb[9].mxu0  ;;  %v589_v8 = vpop.f32.mrb[6].mxu1 }
 0x1e0   : > { %v677_v9 = vpop.f32.mrb[10].mxu0  ;;  %v1046_v10 = vpop.f32.mrb[7].mxu1 }
 0x1e1   : > { %v1066_v11 = vpop.f32.mrb[11].mxu0 }
 0x1fd   : > { %v781_v12 = vpop.f32.mrb[8].mxu1 }
 0x1fe   : > { %v787_v1 = vadd.f32 %v781_v12, %v675_v5  ;;  %v1085_v14 = vpop.f32.mrb[9].mxu1 }
 0x1ff   : > { %v784_v15 = vpop.f32.mrb[10].mxu1 }
 0x200   : > { %v795_v16 = vadd.f32 %v946_v13, %v787_v1  ;;  %v1086_v17 = vpop.f32.mrb[11].mxu1 }
 0x202   : > { %v796_v18 = vmax.f32 %v795_v16, 0.0 }
 0x204   : > { %797 = vst [vmem:[%s219_s9] sm:$0xf] %v796_v18 }
 0x205 PF: > { %s15_s18 = sadd.s32 1, %s1139_s18  }
 0x206   : > { %p12_p4 = scmp.ge.s32.totalorder %s15_s18, 4  }
 0x208   :  { %14 = sbr.rel (!%p12_p4) target bundleno = 1 (0x1), region = 74 }

// kernel: tile.193
= control target key start
LH: loop header
LB: loop body
LE: loop exit
PB: predicated region body
PF: predicated region fallthrough
CT: control target
= control target key end

     0   :  { %s22_s0 = inlined_call_operand.vmem [shape: f32[64], index: 0, kind: input, shape index: {}]   ;;  %s23_s1 = inlined_call_operand.vmem [shape: f32[2,64], index: 1, kind: output, shape index: {}]  }
   0x1   :  { %v4_v0 = vld [vmem:[%s22_s0] ss:$0 sm:$0xff] }
   0x2   :  { %5 = vst [vmem:[%s23_s1] sm:$0x3] %v4_v0 }

// kernel: tile.194
= control target key start
LH: loop header
LB: loop body
LE: loop exit
PB: predicated region body
PF: predicated region fallthrough
CT: control target
= control target key end

     0   :  { %vm7_vm0 = vcmask 523264   ;;  %vm13_vm1 = vcmask 1048064   ;;  %s39_s0 = inlined_call_operand.vmem [shape: f32[2,64], index: 0, kind: input, shape index: {}]   ;;  %s40_s1 = inlined_call_operand.vmem [shape: f32[1,128], index: 1, kind: output, shape index: {}]  }
   0x1   :  { %v4_v0 = vld [vmem:[%s39_s0] sm:$0x3]  ;;  %s22_s0 = smov 64  }
   0x2   :  { %5 = vst [vmem:[#allocation1] sm:$0x3] %v4_v0 }
   0x9   :  { %v10_v1 = vld [vmem:[#allocation1 + $0x1] sm:$0x1]   ;;  %v6_v2 = vld [vmem:[#allocation1] sm:$0x1]  }
   0xa   :  { %11 = vrot.lane.b32.xlu0 %v10_v1, %s22_s0  ;;  %8 = vst.msk [vmem:[#allocation0] sm:$0x1] %vm7_vm0, %v6_v2  }
  0x7c   :  { %v12_v3 = vpop.permute.xlu0 %11  }
  0x7d   :  { %14 = vst.msk [vmem:[#allocation0] sm:$0x1] %vm13_vm1, %v12_v3  }
  0x84   :  { %v18_v4 = vld [vmem:[#allocation0] sm:$0x1] }
  0x85   :  { %20 = vst [vmem:[%s40_s1] sm:$0x1] %v18_v4 }

// kernel: bcdunet_forward.25
= control target key start
LH: loop header
LB: loop body
LE: loop exit
PB: predicated region body
PF: predicated region fallthrough
CT: control target
= control target key end

     0   :  { %s1173_s18 = smov 0   ;;  %s1360_s0 = inlined_call_operand.vmem [shape: f32[2,4,64], index: 0, kind: input, shape index: {}]   ;;  %s1361_s1 = inlined_call_operand.vmem [shape: bf16[3,64,128], index: 1, kind: input, shape index: {}]   ;;  %s1362_s2 = inlined_call_operand.vmem [shape: f32[1,128], index: 2, kind: input, shape index: {}]   ;;  %s1363_s3 = inlined_call_operand.vmem [shape: bf16[3,128,128], index: 3, kind: input, shape index: {}]   ;;  %s1364_s4 = inlined_call_operand.vmem [shape: f32[1,128], index: 4, kind: input, shape index: {}]   ;;  %s1365_s5 = inlined_call_operand.vmem [shape: f32[2,2,128], index: 5, kind: output, shape index: {}]  }
   0x1 LB: > { %s851_s19 = sadd.s32 4294967295, %s1139_s18   ;;  %p855_p0 = scmp.ge.s32.totalorder %s1139_s18, 1  ;;  %s1139_s18 = sphi %s1173_s18, %s15_s18  }
   0x2   : > { %p186_p1 = scmp.lt.s32.totalorder %s1139_s18, 3 }
   0x4   : > { %p187_p2 = pnand %p855_p0, %p186_p1 }
   0x5   : > { %v1097_v0 = vld [vmem:[%s1361_s1 + $0x20] sm:$0xff] (!%p187_p2)   ;;  %v1141_v1 = vmov (!%p187_p2), 0.0   ;;  %v1099_v3 = vld [vmem:[%s1361_s1 + $0x28] sm:$0xff] (!%p187_p2)   ;;  %vm1142_vm0 = vmmov (!%p187_p2), 0   ;;  %p212_p3 = scmp.lt.s32.totalorder (!%p187_p2), %s851_s19, 1  ;;  %v1101_v5 = vld [vmem:[%s1361_s1 + $0x30] sm:$0xff] (!%p187_p2)  }
   0x6   : > { %190 = sbr.rel (%p187_p2) target bundleno = 517 (0x205), region = 40  ;;  %991 = vmatprep.subr.bf16.mxu0 (!%p187_p2), %v1141_v1  ;;  %465 = vst [vmem:[#allocation2] sm:$0xf] (!%p187_p2), %v1141_v1  ;;  %1003 = vmatprep.subr.bf16.mxu1 (!%p187_p2), %v1141_v1  ;;  %v1098_v2 = vld [vmem:[%s1361_s1] sm:$0xff] (!%p187_p2)   ;;  %v1100_v4 = vld [vmem:[%s1361_s1 + $0x8] sm:$0xff] (!%p187_p2)   ;;  %v1102_v6 = vld [vmem:[%s1361_s1 + $0x10] sm:$0xff] (!%p187_p2)  }
   0x7   : > { %992 = vmatpush3.bf16.msra.mxu0 (!%p187_p2), %v1097_v0  ;;  %999 = vmatprep.mubr.msk.bf16.mxu0 (!%p187_p2), %vm1142_vm0, %v1141_v1  ;;  %v1103_v7 = vld [vmem:[%s1361_s1 + $0x38] sm:$0xff] (!%p187_p2)   ;;  %vm266_vm1 = vcmask (!%p187_p2), 523264   ;;  %v1105_v11 = vld [vmem:[%s1361_s1 + $0x40] sm:$0xff] (!%p187_p2)   ;;  %v1106_v14 = vld [vmem:[%s1361_s1 + $0x48] sm:$0xff] (!%p187_p2)  }
   0x8   : > { %1004 = vmatpush3.bf16.msra.mxu1 (!%p187_p2), %v1098_v2  ;;  %993 = vmatprep.subr.bf16.mxu0 (!%p187_p2), %v1141_v1  ;;  %v1104_v8 = vld [vmem:[%s1361_s1 + $0x18] sm:$0xff] (!%p187_p2)   ;;  %v1107_v15 = vld [vmem:[%s1361_s1 + $0x50] sm:$0xff] (!%p187_p2)   ;;  %v1109_v19 = vld [vmem:[%s1363_s3 + $0x40] sm:$0xff] (!%p187_p2)  }
   0x9   : > { %1005 = vmatprep.subr.bf16.mxu1 (!%p187_p2), %v1141_v1  ;;  %1011 = vmatprep.mubr.msk.bf16.mxu1 (!%p187_p2), %vm1142_vm0, %v1141_v1  ;;  %v1108_v16 = vld [vmem:[%s1361_s1 + $0x58] sm:$0xff] (!%p187_p2)   ;;  %v1110_v20 = vld [vmem:[%s1363_s3] sm:$0xff] (!%p187_p2)   ;;  %v1111_v21 = vld [vmem:[%s1363_s3 + $0x48] sm:$0xff] (!%p187_p2)  }
   0xa   : > { %v1112_v22 = vld [vmem:[%s1363_s3 + $0x8] sm:$0xff] (!%p187_p2)   ;;  %v1113_v23 = vld [vmem:[%s1363_s3 + $0x50] sm:$0xff] (!%p187_p2)   ;;  %v1115_v25 = vld [vmem:[%s1363_s3 + $0x58] sm:$0xff] (!%p187_p2)  }
   0xb   : > { %994 = vmatpush3.bf16.msra.mxu0 (!%p187_p2), %v1099_v3  ;;  %v1114_v24 = vld [vmem:[%s1363_s3 + $0x10] sm:$0xff] (!%p187_p2)   ;;  %v1116_v26 = vld [vmem:[%s1363_s3 + $0x18] sm:$0xff] (!%p187_p2)   ;;  %v1117_v27 = vld [vmem:[%s1363_s3 + $0x60] sm:$0xff] (!%p187_p2)  }
   0xc   : > { %1006 = vmatpush3.bf16.msra.mxu1 (!%p187_p2), %v1100_v4  ;;  %995 = vmatprep.subr.bf16.mxu0 (!%p187_p2), %v1141_v1  ;;  %v1118_v28 = vld [vmem:[%s1363_s3 + $0x20] sm:$0xff] (!%p187_p2)   ;;  %v1119_v29 = vld [vmem:[%s1363_s3 + $0x68] sm:$0xff] (!%p187_p2)   ;;  %v1121_v31 = vld [vmem:[%s1363_s3 + $0x70] sm:$0xff] (!%p187_p2)  }
   0xd   : > { %s1367_s19 = smov (!%p212_p3, %s851_s19), 1  ;;  %1007 = vmatprep.subr.bf16.mxu1 %v1141_v1  ;;  %v1120_v30 = vld [vmem:[%s1363_s3 + $0x28] sm:$0xff]   ;;  %v1122_v32 = vld [vmem:[%s1363_s3 + $0x30] sm:$0xff]   ;;  %v1123_v33 = vld [vmem:[%s1363_s3 + $0x78] sm:$0xff]  }
   0xe   : > { %s856_s30 = sshll.u32 %s1367_s19, 2  ;;  %v1124_v34 = vld [vmem:[%s1363_s3 + $0x38] sm:$0xff]   ;;  %v889_v45 = vld [vmem:[%s1362_s2] ss:$0 sm:$0xff]  ;;  %v1126_v57 = vld [vmem:[%s1363_s3 + $0x88] sm:$0xff]   ;;  %s857_s6 = sshll.u32 %s1367_s19, 1 }
   0xf   : > { %s215_s10 = scalar_lea.vmem %s1360_s0, %s856_s30  ;;  %996 = vmatpush3.bf16.msra.mxu0 %v1101_v5  ;;  %v1125_v54 = vld [vmem:[%s1363_s3 + $0x80] sm:$0xff]   ;;  %v1127_v58 = vld [vmem:[%s1363_s3 + $0x90] sm:$0xff]   ;;  %v1128_v59 = vld [vmem:[%s1363_s3 + $0x98] sm:$0xff]   ;;  %s219_s9 = scalar_lea.vmem %s1365_s5, %s857_s6 }
  0x10   : > { %v231_v9 = vld [vmem:[%s215_s10 + $0x1] sm:$0x3]  ;;  %1008 = vmatpush3.bf16.msra.mxu1 %v1102_v6  ;;  %997 = vmatprep.subr.bf16.mxu0 %v1141_v1  ;;  %v1130_v61 = vld [vmem:[%s1363_s3 + $0xa8] sm:$0xff]   ;;  %v1131_v62 = vld [vmem:[%s1363_s3 + $0xb0] sm:$0xff]  }
  0x11   : > { %v221_v10 = vld [vmem:[%s215_s10] sm:$0x3]  ;;  %1009 = vmatprep.subr.bf16.mxu1 %v1141_v1  ;;  %v232_v12 = vpack.c.bf16 %v231_v9, %v231_v9  ;;  %v377_v17 = vld [vmem:[%s215_s10 + $0x2] sm:$0x3]  ;;  %v1132_v63 = vld [vmem:[%s1363_s3 + $0xb8] sm:$0xff]  }
  0x12   : > { %v222_v13 = vpack.c.bf16 %v221_v10, %v221_v10  ;;  %v378_v18 = vpack.c.bf16 %v377_v17, %v377_v17  ;;  %v1129_v60 = vld [vmem:[%s1363_s3 + $0xa0] sm:$0xff]  }
  0x13   : > { %998 = vmatpush3.bf16.msra.mxu0 %v1103_v7 }
  0x14   : > { %1010 = vmatpush3.bf16.msra.mxu1 %v1104_v8  ;;  %1015 = vmatprep.subr.bf16.mxu0 %v1141_v1 }
  0x15   : > { %1027 = vmatprep.subr.bf16.mxu1 %v1141_v1 }
  0x16   : > { %1000 = vmatmul.mubr.msk.bf16.vlgmr.msra.gmra.mrb[0].mxu0 %vm266_vm1, %v232_v12 }
  0x17   : > { %1012 = vmatmul.mubr.msk.bf16.vlgmr.msra.gmra.mrb[0].mxu1 %vm266_vm1, %v222_v13  ;;  %1016 = vmatpush3.bf16.msra.mxu0 %v1105_v11  ;;  %v946_v13 = vld [vmem:[%s1364_s4] ss:$0 sm:$0xff] }
  0x18   : > { %1017 = vmatprep.subr.bf16.mxu0 %v1141_v1  ;;  %1023 = vmatprep.mubr.msk.bf16.mxu0 %vm1142_vm0, %v1141_v1 }
  0x19   : > { %1043 = vmatprep.mubr.msk.bf16.mxu1 %vm1142_vm0, %v1141_v1  ;;  %1028 = vmatpush3.bf16.msra.mxu1 %v1109_v19 }
  0x1a   : > { %1029 = vmatprep.subr.bf16.mxu1 %v1141_v1 }
  0x1b   : > { %1018 = vmatpush3.bf16.msra.mxu0 %v1106_v14 }
  0x1c   : > { %1019 = vmatprep.subr.bf16.mxu0 %v1141_v1 }
  0x1d   : > { %1030 = vmatpush3.bf16.msra.mxu1 %v1111_v21 }
  0x1e   : > { %1031 = vmatprep.subr.bf16.mxu1 %v1141_v1 }
  0x1f   : > { %1020 = vmatpush3.bf16.msra.mxu0 %v1107_v15 }
  0x20   : > { %1021 = vmatprep.subr.bf16.mxu0 %v1141_v1 }
  0x21   : > { %1032 = vmatpush3.bf16.msra.mxu1 %v1113_v23 }
  0x22   : > { %1033 = vmatprep.subr.bf16.mxu1 %v1141_v1 }
  0x23   : > { %1022 = vmatpush3.bf16.msra.mxu0 %v1108_v16 }
  0x24   : > { %1047 = vmatprep.subr.bf16.mxu0 %v1141_v1 }
  0x25   : > { %1034 = vmatpush3.bf16.msra.mxu1 %v1115_v25 }
  0x26   : > { %1024 = vmatmul.mubr.msk.bf16.vlgmr.msra.gmra.mrb[4].mxu0 %vm266_vm1, %v378_v18  ;;  %1035 = vmatprep.subr.bf16.mxu1 %v1141_v1 }
  0x27   : > { %1063 = vmatprep.mubr.msk.bf16.mxu0 %vm1142_vm0, %v1141_v1  ;;  %1048 = vmatpush3.bf16.msra.mxu0 %v1110_v20 }
  0x28   : > { %1049 = vmatprep.subr.bf16.mxu0 %v1141_v1 }
  0x29   : > { %1036 = vmatpush3.bf16.msra.mxu1 %v1117_v27 }
  0x2a   : > { %1037 = vmatprep.subr.bf16.mxu1 %v1141_v1 }
  0x2b   : > { %1050 = vmatpush3.bf16.msra.mxu0 %v1112_v22 }
  0x2c   : > { %1051 = vmatprep.subr.bf16.mxu0 %v1141_v1 }
  0x2d   : > { %1038 = vmatpush3.bf16.msra.mxu1 %v1119_v29 }
  0x2e   : > { %1039 = vmatprep.subr.bf16.mxu1 %v1141_v1 }
  0x2f   : > { %1052 = vmatpush3.bf16.msra.mxu0 %v1114_v24 }
  0x30   : > { %1053 = vmatprep.subr.bf16.mxu0 %v1141_v1 }
  0x31   : > { %1040 = vmatpush3.bf16.msra.mxu1 %v1121_v31 }
  0x32   : > { %1041 = vmatprep.subr.bf16.mxu1 %v1141_v1 }
  0x33   : > { %1054 = vmatpush3.bf16.msra.mxu0 %v1116_v26 }
  0x34   : > { %1055 = vmatprep.subr.bf16.mxu0 %v1141_v1 }
  0x35   : > { %1042 = vmatpush3.bf16.msra.mxu1 %v1123_v33 }
  0x36   : > { %1067 = vmatprep.subr.bf16.mxu1 %v1141_v1 }
  0x37   : > { %1056 = vmatpush3.bf16.msra.mxu0 %v1118_v28 }
  0x38   : > { %1057 = vmatprep.subr.bf16.mxu0 %v1141_v1 }
  0x3b   : > { %1058 = vmatpush3.bf16.msra.mxu0 %v1120_v30 }
  0x3c   : > { %1059 = vmatprep.subr.bf16.mxu0 %v1141_v1 }
  0x3f   : > { %1060 = vmatpush3.bf16.msra.mxu0 %v1122_v32 }
  0x40   : > { %1061 = vmatprep.subr.bf16.mxu0 %v1141_v1 }
  0x43   : > { %1062 = vmatpush3.bf16.msra.mxu0 %v1124_v34 }
  0xe9   : > { %v304_v35 = vpop.f32.mrb[0].mxu0 }
  0xea   : > { %v1001_v36 = vpop.f32.mrb[1].mxu0  ;;  %v371_v37 = vpop.f32.mrb[0].mxu1 }
  0xeb   : > { %v372_v38 = vadd.f32 %v371_v37, %v304_v35  ;;  %v307_v39 = vpop.f32.mrb[2].mxu0  ;;  %v1013_v40 = vpop.f32.mrb[1].mxu1 }
  0xec   : > { %v1002_v41 = vpop.f32.mrb[3].mxu0  ;;  %v374_v42 = vpop.f32.mrb[2].mxu1 }
  0xed   : > { %v1014_v43 = vpop.f32.mrb[3].mxu1 }
  0xf9   : > { %v449_v44 = vpop.f32.mrb[4].mxu0 }
  0xfa   : > { %v455_v46 = vadd.f32 %v449_v44, %v372_v38  ;;  %v1025_v47 = vpop.f32.mrb[5].mxu0 }
  0xfb   : > { %v452_v48 = vpop.f32.mrb[6].mxu0 }
  0xfc   : > { %v463_v49 = vadd.f32 %v889_v45, %v455_v46  ;;  %v1026_v50 = vpop.f32.mrb[7].mxu0 }
  0xfe   : > { %v464_v51 = vmax.f32 %v463_v49, 0.0 }
 0x100   : > { %466 = vst [vmem:[#allocation2 + $0x1] sm:$0x3] %v464_v51 }
 0x107   : > { %v485_v52 = vld [vmem:[#allocation2 + $0x1] sm:$0x3] }
 0x108   : > { %v467_v53 = vld [vmem:[#allocation2] sm:$0x3]  ;;  %v486_v55 = vpack.c.bf16 %v485_v52, %v485_v52  ;;  %v680_v0 = vld [vmem:[#allocation2 + $0x2] sm:$0x3] }
 0x109   : > { %v468_v56 = vpack.c.bf16 %v467_v53, %v467_v53  ;;  %v681_v2 = vpack.c.bf16 %v680_v0, %v680_v0 }
 0x10a   : > { %1044 = vmatmul.mubr.bf16.vlgmr.msra.gmra.mrb[4].mxu1 %v486_v55 }
 0x10b   : > { %1064 = vmatmul.mubr.bf16.vlgmr.msra.gmra.mrb[8].mxu0 %v468_v56  ;;  %1068 = vmatpush3.bf16.msra.mxu1 %v1125_v54 }
 0x10c   : > { %1083 = vmatprep.mubr.msk.bf16.mxu1 %vm1142_vm0, %v1141_v1  ;;  %1069 = vmatprep.subr.bf16.mxu1 %v1141_v1 }
 0x10f   : > { %1070 = vmatpush3.bf16.msra.mxu1 %v1126_v57 }
 0x110   : > { %1071 = vmatprep.subr.bf16.mxu1 %v1141_v1 }
 0x113   : > { %1072 = vmatpush3.bf16.msra.mxu1 %v1127_v58 }
 0x114   : > { %1073 = vmatprep.subr.bf16.mxu1 %v1141_v1 }
 0x117   : > { %1074 = vmatpush3.bf16.msra.mxu1 %v1128_v59 }
 0x118   : > { %1075 = vmatprep.subr.bf16.mxu1 %v1141_v1 }
 0x11b   : > { %1076 = vmatpush3.bf16.msra.mxu1 %v1129_v60 }
 0x11c   : > { %1077 = vmatprep.subr.bf16.mxu1 %v1141_v1 }
 0x11f   : > { %1078 = vmatpush3.bf16.msra.mxu1 %v1130_v61 }
 0x120   : > { %1079 = vmatprep.subr.bf16.mxu1 %v1141_v1 }
 0x123   : > { %1080 = vmatpush3.bf16.msra.mxu1 %v1131_v62 }
 0x124   : > { %1081 = vmatprep.subr.bf16.mxu1 %v1141_v1 }
 0x127   : > { %1082 = vmatpush3.bf16.msra.mxu1 %v1132_v63 }
 0x12a   : > { %1084 = vmatmul.mubr.bf16.vlgmr.msra.gmra.mrb[8].mxu1 %v681_v2 }
 0x1dd   : > { %v586_v3 = vpop.f32.mrb[4].mxu1 }
 0x1de   : > { %v674_v4 = vpop.f32.mrb[8].mxu0  ;;  %v1045_v6 = vpop.f32.mrb[5].mxu1 }
 0x1df   : > { %v675_v5 = vadd.f32 %v674_v4, %v586_v3  ;;  %v1065_v7 = vpop.f32.mrb[9].mxu0  ;;  %v589_v8 = vpop.f32.mrb[6].mxu1 }
 0x1e0   : > { %v677_v9 = vpop.f32.mrb[10].mxu0  ;;  %v1046_v10 = vpop.f32.mrb[7].mxu1 }
 0x1e1   : > { %v1066_v11 = vpop.f32.mrb[11].mxu0 }
 0x1fd   : > { %v781_v12 = vpop.f32.mrb[8].mxu1 }
 0x1fe   : > { %v787_v1 = vadd.f32 %v781_v12, %v675_v5  ;;  %v1085_v14 = vpop.f32.mrb[9].mxu1 }
 0x1ff   : > { %v784_v15 = vpop.f32.mrb[10].mxu1 }
 0x200   : > { %v795_v16 = vadd.f32 %v946_v13, %v787_v1  ;;  %v1086_v17 = vpop.f32.mrb[11].mxu1 }
 0x202   : > { %v796_v18 = vmax.f32 %v795_v16, 0.0 }
 0x204   : > { %797 = vst [vmem:[%s219_s9] sm:$0x3] %v796_v18 }
 0x205 PF: > { %s15_s18 = sadd.s32 1, %s1139_s18  }
 0x206   : > { %p12_p4 = scmp.ge.s32.totalorder %s15_s18, 4  }
 0x208   :  { %14 = sbr.rel (!%p12_p4) target bundleno = 1 (0x1), region = 74 }

// kernel: bcdunet_forward.26
= control target key start
LH: loop header
LB: loop body
LE: loop exit
PB: predicated region body
PF: predicated region fallthrough
CT: control target
= control target key end

     0   :  { %s1332_s18 = smov 0   ;;  %s1573_s0 = inlined_call_operand.vmem [shape: f32[2,4,128], index: 0, kind: input, shape index: {}]   ;;  %s1574_s1 = inlined_call_operand.vmem [shape: bf16[3,128,128], index: 1, kind: input, shape index: {}]   ;;  %s1575_s2 = inlined_call_operand.vmem [shape: f32[1,128], index: 2, kind: input, shape index: {}]   ;;  %s1576_s3 = inlined_call_operand.vmem [shape: bf16[3,128,128], index: 3, kind: input, shape index: {}]   ;;  %s1577_s4 = inlined_call_operand.vmem [shape: f32[1,128], index: 4, kind: input, shape index: {}]   ;;  %s1578_s5 = inlined_call_operand.vmem [shape: f32[2,2,128], index: 5, kind: output, shape index: {}]  }
   0x1 LB: > { %s937_s19 = sadd.s32 4294967295, %s1298_s18   ;;  %p941_p0 = scmp.ge.s32.totalorder %s1298_s18, 1  ;;  %s1298_s18 = sphi %s1332_s18, %s15_s18  }
   0x2   : > { %p186_p1 = scmp.lt.s32.totalorder %s1298_s18, 3 }
   0x4   : > { %p187_p2 = pnand %p941_p0, %p186_p1 }
   0x5   : > { %v1244_v0 = vld [vmem:[%s1574_s1 + $0x40] sm:$0xff] (!%p187_p2)   ;;  %v1300_v1 = vmov (!%p187_p2), 0.0   ;;  %v1246_v3 = vld [vmem:[%s1574_s1 + $0x48] sm:$0xff] (!%p187_p2)   ;;  %vm1301_vm0 = vmmov (!%p187_p2), 0   ;;  %v1248_v5 = vld [vmem:[%s1574_s1 + $0x50] sm:$0xff] (!%p187_p2)   ;;  %p212_p3 = scmp.lt.s32.totalorder (!%p187_p2), %s937_s19, 1 }
   0x6   : > { %190 = sbr.rel (%p187_p2) target bundleno = 549 (0x225), region = 40  ;;  %1114 = vmatprep.subr.bf16.mxu0 (!%p187_p2), %v1300_v1  ;;  %551 = vst [vmem:[#allocation2] sm:$0xf] (!%p187_p2), %v1300_v1  ;;  %1134 = vmatprep.subr.bf16.mxu1 (!%p187_p2), %v1300_v1  ;;  %v1245_v2 = vld [vmem:[%s1574_s1] sm:$0xff] (!%p187_p2)   ;;  %v1247_v4 = vld [vmem:[%s1574_s1 + $0x8] sm:$0xff] (!%p187_p2)   ;;  %v1249_v6 = vld [vmem:[%s1574_s1 + $0x10] sm:$0xff] (!%p187_p2)  }
   0x7   : > { %1115 = vmatpush3.bf16.msra.mxu0 (!%p187_p2), %v1244_v0  ;;  %1130 = vmatprep.mubr.msk.bf16.mxu0 (!%p187_p2), %vm1301_vm0, %v1300_v1  ;;  %v1250_v7 = vld [vmem:[%s1574_s1 + $0x58] sm:$0xff] (!%p187_p2)   ;;  %v1252_v9 = vld [vmem:[%s1574_s1 + $0x60] sm:$0xff] (!%p187_p2)   ;;  %v1254_v11 = vld [vmem:[%s1574_s1 + $0x68] sm:$0xff] (!%p187_p2)  }
   0x8   : > { %1135 = vmatpush3.bf16.msra.mxu1 (!%p187_p2), %v1245_v2  ;;  %1116 = vmatprep.subr.bf16.mxu0 (!%p187_p2), %v1300_v1  ;;  %v1251_v8 = vld [vmem:[%s1574_s1 + $0x18] sm:$0xff] (!%p187_p2)   ;;  %v1253_v10 = vld [vmem:[%s1574_s1 + $0x20] sm:$0xff] (!%p187_p2)   ;;  %v1255_v12 = vld [vmem:[%s1574_s1 + $0x28] sm:$0xff] (!%p187_p2)  }
   0x9   : > { %1136 = vmatprep.subr.bf16.mxu1 (!%p187_p2), %v1300_v1  ;;  %1150 = vmatprep.mubr.msk.bf16.mxu1 (!%p187_p2), %vm1301_vm0, %v1300_v1  ;;  %v1256_v13 = vld [vmem:[%s1574_s1 + $0x70] sm:$0xff] (!%p187_p2)   ;;  %v1258_v15 = vld [vmem:[%s1574_s1 + $0x78] sm:$0xff] (!%p187_p2)   ;;  %v1260_v19 = vld [vmem:[%s1574_s1 + $0x80] sm:$0xff] (!%p187_p2)  }
   0xa   : > { %v1257_v14 = vld [vmem:[%s1574_s1 + $0x30] sm:$0xff] (!%p187_p2)   ;;  %v1259_v17 = vld [vmem:[%s1574_s1 + $0x38] sm:$0xff] (!%p187_p2)   ;;  %v1261_v22 = vld [vmem:[%s1574_s1 + $0x88] sm:$0xff] (!%p187_p2)  }
   0xb   : > { %1117 = vmatpush3.bf16.msra.mxu0 (!%p187_p2), %v1246_v3  ;;  %v1262_v23 = vld [vmem:[%s1574_s1 + $0x90] sm:$0xff] (!%p187_p2)   ;;  %v1263_v24 = vld [vmem:[%s1574_s1 + $0x98] sm:$0xff] (!%p187_p2)   ;;  %v1264_v25 = vld [vmem:[%s1574_s1 + $0xa0] sm:$0xff] (!%p187_p2)  }
   0xc   : > { %1137 = vmatpush3.bf16.msra.mxu1 (!%p187_p2), %v1247_v4  ;;  %1118 = vmatprep.subr.bf16.mxu0 (!%p187_p2), %v1300_v1  ;;  %v1265_v26 = vld [vmem:[%s1574_s1 + $0xa8] sm:$0xff] (!%p187_p2)   ;;  %v1266_v27 = vld [vmem:[%s1574_s1 + $0xb0] sm:$0xff] (!%p187_p2)   ;;  %v1267_v28 = vld [vmem:[%s1574_s1 + $0xb8] sm:$0xff] (!%p187_p2)  }
   0xd   : > { %1138 = vmatprep.subr.bf16.mxu1 %v1300_v1  ;;  %s1580_s19 = smov (!%p212_p3, %s937_s19), 1  ;;  %v1268_v31 = vld [vmem:[%s1576_s3 + $0x40] sm:$0xff]   ;;  %v1270_v33 = vld [vmem:[%s1576_s3 + $0x48] sm:$0xff]   ;;  %v1272_v35 = vld [vmem:[%s1576_s3 + $0x50] sm:$0xff]  }
   0xe   : > { %s942_s17 = sshll.u32 %s1580_s19, 2  ;;  %v1269_v32 = vld [vmem:[%s1576_s3] sm:$0xff]   ;;  %v1271_v34 = vld [vmem:[%s1576_s3 + $0x8] sm:$0xff]   ;;  %v1273_v36 = vld [vmem:[%s1576_s3 + $0x10] sm:$0xff]   ;;  %s943_s7 = sshll.u32 %s1580_s19, 1 }
   0xf   : > { %1119 = vmatpush3.bf16.msra.mxu0 %v1248_v5  ;;  %s1403_s24 = scalar_lea.vmem %s1573_s0, %s942_s17  ;;  %v1274_v37 = vld [vmem:[%s1576_s3 + $0x58] sm:$0xff]   ;;  %v1276_v39 = vld [vmem:[%s1576_s3 + $0x60] sm:$0xff]   ;;  %v1278_v41 = vld [vmem:[%s1576_s3 + $0x68] sm:$0xff]   ;;  %s219_s10 = scalar_lea.vmem %s1578_s5, %s943_s7 }
  0x10   : > { %1139 = vmatpush3.bf16.msra.mxu1 %v1249_v6  ;;  %1120 = vmatprep.subr.bf16.mxu0 %v1300_v1  ;;  %v239_v16 = vld [vmem:[%s1403_s24 + $0x1] sm:$0x3]  ;;  %v1275_v38 = vld [vmem:[%s1576_s3 + $0x18] sm:$0xff]   ;;  %v1279_v42 = vld [vmem:[%s1576_s3 + $0x28] sm:$0xff]  }
  0x11   : > { %1140 = vmatprep.subr.bf16.mxu1 %v1300_v1  ;;  %v221_v18 = vld [vmem:[%s1403_s24] sm:$0x3]  ;;  %v240_v20 = vpack.c.bf16 %v239_v16, %v239_v16  ;;  %v434_v29 = vld [vmem:[%s1403_s24 + $0x2] sm:$0x3]  ;;  %v1280_v43 = vld [vmem:[%s1576_s3 + $0x70] sm:$0xff]  }
  0x12   : > { %v222_v21 = vpack.c.bf16 %v221_v18, %v221_v18  ;;  %v435_v30 = vpack.c.bf16 %v434_v29, %v434_v29  ;;  %v1277_v40 = vld [vmem:[%s1576_s3 + $0x20] sm:$0xff]   ;;  %v1281_v44 = vld [vmem:[%s1576_s3 + $0x30] sm:$0xff]   ;;  %v1282_v45 = vld [vmem:[%s1576_s3 + $0x78] sm:$0xff]  }
  0x13   : > { %1121 = vmatpush3.bf16.msra.mxu0 %v1250_v7  ;;  %v1283_v46 = vld [vmem:[%s1576_s3 + $0x38] sm:$0xff]   ;;  %v1000_v57 = vld [vmem:[%s1575_s2] ss:$0 sm:$0xff]  ;;  %v1285_v6 = vld [vmem:[%s1576_s3 + $0x88] sm:$0xff]  }
  0x14   : > { %1141 = vmatpush3.bf16.msra.mxu1 %v1251_v8  ;;  %1122 = vmatprep.subr.bf16.mxu0 %v1300_v1  ;;  %v1284_v3 = vld [vmem:[%s1576_s3 + $0x80] sm:$0xff]   ;;  %v1286_v7 = vld [vmem:[%s1576_s3 + $0x90] sm:$0xff]   ;;  %v1287_v8 = vld [vmem:[%s1576_s3 + $0x98] sm:$0xff]  }
  0x15   : > { %1142 = vmatprep.subr.bf16.mxu1 %v1300_v1 }
  0x17   : > { %1123 = vmatpush3.bf16.msra.mxu0 %v1252_v9  ;;  %v1288_v9 = vld [vmem:[%s1576_s3 + $0xa0] sm:$0xff]  }
  0x18   : > { %1143 = vmatpush3.bf16.msra.mxu1 %v1253_v10  ;;  %1124 = vmatprep.subr.bf16.mxu0 %v1300_v1  ;;  %v1289_v10 = vld [vmem:[%s1576_s3 + $0xa8] sm:$0xff]  }
  0x19   : > { %1144 = vmatprep.subr.bf16.mxu1 %v1300_v1 }
  0x1b   : > { %1125 = vmatpush3.bf16.msra.mxu0 %v1254_v11  ;;  %v1290_v11 = vld [vmem:[%s1576_s3 + $0xb0] sm:$0xff]  }
  0x1c   : > { %1145 = vmatpush3.bf16.msra.mxu1 %v1255_v12  ;;  %1126 = vmatprep.subr.bf16.mxu0 %v1300_v1  ;;  %v1291_v12 = vld [vmem:[%s1576_s3 + $0xb8] sm:$0xff]  }
  0x1d   : > { %1146 = vmatprep.subr.bf16.mxu1 %v1300_v1 }
  0x1f   : > { %1127 = vmatpush3.bf16.msra.mxu0 %v1256_v13 }
  0x20   : > { %1147 = vmatpush3.bf16.msra.mxu1 %v1257_v14  ;;  %1128 = vmatprep.subr.bf16.mxu0 %v1300_v1 }
  0x21   : > { %1148 = vmatprep.subr.bf16.mxu1 %v1300_v1 }
  0x23   : > { %1129 = vmatpush3.bf16.msra.mxu0 %v1258_v15 }
  0x24   : > { %1149 = vmatpush3.bf16.msra.mxu1 %v1259_v17  ;;  %1154 = vmatprep.subr.bf16.mxu0 %v1300_v1 }
  0x25   : > { %1174 = vmatprep.subr.bf16.mxu1 %v1300_v1 }
  0x26   : > { %1131 = vmatmul.mubr.bf16.vlgmr.msra.gmra.mrb[0].mxu0 %v240_v20 }
  0x27   : > { %1151 = vmatmul.mubr.bf16.vlgmr.msra.gmra.mrb[0].mxu1 %v222_v21  ;;  %1155 = vmatpush3.bf16.msra.mxu0 %v1260_v19 }
  0x28   : > { %1156 = vmatprep.subr.bf16.mxu0 %v1300_v1  ;;  %1170 = vmatprep.mubr.msk.bf16.mxu0 %vm1301_vm0, %v1300_v1 }
  0x29   : > { %1190 = vmatprep.mubr.msk.bf16.mxu1 %vm1301_vm0, %v1300_v1  ;;  %1175 = vmatpush3.bf16.msra.mxu1 %v1268_v31 }
  0x2a   : > { %1176 = vmatprep.subr.bf16.mxu1 %v1300_v1 }
  0x2b   : > { %1157 = vmatpush3.bf16.msra.mxu0 %v1261_v22 }
  0x2c   : > { %1158 = vmatprep.subr.bf16.mxu0 %v1300_v1 }
  0x2d   : > { %1177 = vmatpush3.bf16.msra.mxu1 %v1270_v33 }
  0x2e   : > { %1178 = vmatprep.subr.bf16.mxu1 %v1300_v1 }
  0x2f   : > { %1159 = vmatpush3.bf16.msra.mxu0 %v1262_v23 }
  0x30   : > { %1160 = vmatprep.subr.bf16.mxu0 %v1300_v1 }
  0x31   : > { %1179 = vmatpush3.bf16.msra.mxu1 %v1272_v35 }
  0x32   : > { %1180 = vmatprep.subr.bf16.mxu1 %v1300_v1 }
  0x33   : > { %1161 = vmatpush3.bf16.msra.mxu0 %v1263_v24 }
  0x34   : > { %1162 = vmatprep.subr.bf16.mxu0 %v1300_v1 }
  0x35   : > { %1181 = vmatpush3.bf16.msra.mxu1 %v1274_v37 }
  0x36   : > { %1182 = vmatprep.subr.bf16.mxu1 %v1300_v1 }
  0x37   : > { %1163 = vmatpush3.bf16.msra.mxu0 %v1264_v25  ;;  %v1057_v25 = vld [vmem:[%s1577_s4] ss:$0 sm:$0xff] }
  0x38   : > { %1164 = vmatprep.subr.bf16.mxu0 %v1300_v1 }
  0x39   : > { %1183 = vmatpush3.bf16.msra.mxu1 %v1276_v39 }
  0x3a   : > { %1184 = vmatprep.subr.bf16.mxu1 %v1300_v1 }
  0x3b   : > { %1165 = vmatpush3.bf16.msra.mxu0 %v1265_v26 }
  0x3c   : > { %1166 = vmatprep.subr.bf16.mxu0 %v1300_v1 }
  0x3d   : > { %1185 = vmatpush3.bf16.msra.mxu1 %v1278_v41 }
  0x3e   : > { %1186 = vmatprep.subr.bf16.mxu1 %v1300_v1 }
  0x3f   : > { %1167 = vmatpush3.bf16.msra.mxu0 %v1266_v27 }
  0x40   : > { %1168 = vmatprep.subr.bf16.mxu0 %v1300_v1 }
  0x41   : > { %1187 = vmatpush3.bf16.msra.mxu1 %v1280_v43 }
  0x42   : > { %1188 = vmatprep.subr.bf16.mxu1 %v1300_v1 }
  0x43   : > { %1169 = vmatpush3.bf16.msra.mxu0 %v1267_v28 }
  0x44   : > { %1194 = vmatprep.subr.bf16.mxu0 %v1300_v1 }
  0x45   : > { %1189 = vmatpush3.bf16.msra.mxu1 %v1282_v45 }
  0x46   : > { %1171 = vmatmul.mubr.bf16.vlgmr.msra.gmra.mrb[4].mxu0 %v435_v30  ;;  %1214 = vmatprep.subr.bf16.mxu1 %v1300_v1 }
  0x47   : > { %1210 = vmatprep.mubr.msk.bf16.mxu0 %vm1301_vm0, %v1300_v1  ;;  %1195 = vmatpush3.bf16.msra.mxu0 %v1269_v32 }
  0x48   : > { %1196 = vmatprep.subr.bf16.mxu0 %v1300_v1 }
  0x4b   : > { %1197 = vmatpush3.bf16.msra.mxu0 %v1271_v34 }
  0x4c   : > { %1198 = vmatprep.subr.bf16.mxu0 %v1300_v1 }
  0x4f   : > { %1199 = vmatpush3.bf16.msra.mxu0 %v1273_v36 }
  0x50   : > { %1200 = vmatprep.subr.bf16.mxu0 %v1300_v1 }
  0x53   : > { %1201 = vmatpush3.bf16.msra.mxu0 %v1275_v38 }
  0x54   : > { %1202 = vmatprep.subr.bf16.mxu0 %v1300_v1 }
  0x57   : > { %1203 = vmatpush3.bf16.msra.mxu0 %v1277_v40 }
  0x58   : > { %1204 = vmatprep.subr.bf16.mxu0 %v1300_v1 }
  0x5b   : > { %1205 = vmatpush3.bf16.msra.mxu0 %v1279_v42 }
  0x5c   : > { %1206 = vmatprep.subr.bf16.mxu0 %v1300_v1 }
  0x5f   : > { %1207 = vmatpush3.bf16.msra.mxu0 %v1281_v44 }
  0x60   : > { %1208 = vmatprep.subr.bf16.mxu0 %v1300_v1 }
  0x63   : > { %1209 = vmatpush3.bf16.msra.mxu0 %v1283_v46 }
  0xf9   : > { %v340_v47 = vpop.f32.mrb[0].mxu0 }
  0xfa   : > { %v1132_v48 = vpop.f32.mrb[1].mxu0  ;;  %v428_v49 = vpop.f32.mrb[0].mxu1 }
  0xfb   : > { %v429_v50 = vadd.f32 %v428_v49, %v340_v47  ;;  %v343_v51 = vpop.f32.mrb[2].mxu0  ;;  %v1152_v52 = vpop.f32.mrb[1].mxu1 }
  0xfc   : > { %v1133_v53 = vpop.f32.mrb[3].mxu0  ;;  %v431_v54 = vpop.f32.mrb[2].mxu1 }
  0xfd   : > { %v1153_v55 = vpop.f32.mrb[3].mxu1 }
 0x119   : > { %v535_v56 = vpop.f32.mrb[4].mxu0 }
 0x11a   : > { %v541_v58 = vadd.f32 %v535_v56, %v429_v50  ;;  %v1172_v59 = vpop.f32.mrb[5].mxu0 }
 0x11b   : > { %v538_v60 = vpop.f32.mrb[6].mxu0 }
 0x11c   : > { %v549_v61 = vadd.f32 %v1000_v57, %v541_v58  ;;  %v1173_v62 = vpop.f32.mrb[7].mxu0 }
 0x11e   : > { %v550_v63 = vmax.f32 %v549_v61, 0.0 }
 0x120   : > { %552 = vst [vmem:[#allocation2 + $0x1] sm:$0x3] %v550_v63 }
 0x127   : > { %v571_v0 = vld [vmem:[#allocation2 + $0x1] sm:$0x3] }
 0x128   : > { %v553_v2 = vld [vmem:[#allocation2] sm:$0x3]  ;;  %v572_v4 = vpack.c.bf16 %v571_v0, %v571_v0  ;;  %v766_v13 = vld [vmem:[#allocation2 + $0x2] sm:$0x3] }
 0x129   : > { %v554_v5 = vpack.c.bf16 %v553_v2, %v553_v2  ;;  %v767_v14 = vpack.c.bf16 %v766_v13, %v766_v13 }
 0x12a   : > { %1191 = vmatmul.mubr.bf16.vlgmr.msra.gmra.mrb[4].mxu1 %v572_v4 }
 0x12b   : > { %1211 = vmatmul.mubr.bf16.vlgmr.msra.gmra.mrb[8].mxu0 %v554_v5  ;;  %1215 = vmatpush3.bf16.msra.mxu1 %v1284_v3 }
 0x12c   : > { %1230 = vmatprep.mubr.msk.bf16.mxu1 %vm1301_vm0, %v1300_v1  ;;  %1216 = vmatprep.subr.bf16.mxu1 %v1300_v1 }
 0x12f   : > { %1217 = vmatpush3.bf16.msra.mxu1 %v1285_v6 }
 0x130   : > { %1218 = vmatprep.subr.bf16.mxu1 %v1300_v1 }
 0x133   : > { %1219 = vmatpush3.bf16.msra.mxu1 %v1286_v7 }
 0x134   : > { %1220 = vmatprep.subr.bf16.mxu1 %v1300_v1 }
 0x137   : > { %1221 = vmatpush3.bf16.msra.mxu1 %v1287_v8 }
 0x138   : > { %1222 = vmatprep.subr.bf16.mxu1 %v1300_v1 }
 0x13b   : > { %1223 = vmatpush3.bf16.msra.mxu1 %v1288_v9 }
 0x13c   : > { %1224 = vmatprep.subr.bf16.mxu1 %v1300_v1 }
 0x13f   : > { %1225 = vmatpush3.bf16.msra.mxu1 %v1289_v10 }
 0x140   : > { %1226 = vmatprep.subr.bf16.mxu1 %v1300_v1 }
 0x143   : > { %1227 = vmatpush3.bf16.msra.mxu1 %v1290_v11 }
 0x144   : > { %1228 = vmatprep.subr.bf16.mxu1 %v1300_v1 }
 0x147   : > { %1229 = vmatpush3.bf16.msra.mxu1 %v1291_v12 }
 0x14a   : > { %1231 = vmatmul.mubr.bf16.vlgmr.msra.gmra.mrb[8].mxu1 %v767_v14 }
 0x1fd   : > { %v672_v15 = vpop.f32.mrb[4].mxu1 }
 0x1fe   : > { %v760_v16 = vpop.f32.mrb[8].mxu0  ;;  %v1192_v18 = vpop.f32.mrb[5].mxu1 }
 0x1ff   : > { %v761_v17 = vadd.f32 %v760_v16, %v672_v15  ;;  %v1212_v19 = vpop.f32.mrb[9].mxu0  ;;  %v675_v20 = vpop.f32.mrb[6].mxu1 }
 0x200   : > { %v763_v21 = vpop.f32.mrb[10].mxu0  ;;  %v1193_v22 = vpop.f32.mrb[7].mxu1 }
 0x201   : > { %v1213_v23 = vpop.f32.mrb[11].mxu0 }
 0x21d   : > { %v867_v24 = vpop.f32.mrb[8].mxu1 }
 0x21e   : > { %v873_v1 = vadd.f32 %v867_v24, %v761_v17  ;;  %v1232_v26 = vpop.f32.mrb[9].mxu1 }
 0x21f   : > { %v870_v27 = vpop.f32.mrb[10].mxu1 }
 0x220   : > { %v881_v28 = vadd.f32 %v1057_v25, %v873_v1  ;;  %v1233_v29 = vpop.f32.mrb[11].mxu1 }
 0x222   : > { %v882_v30 = vmax.f32 %v881_v28, 0.0 }
 0x224   : > { %883 = vst [vmem:[%s219_s10] sm:$0x3] %v882_v30 }
 0x225 PF: > { %s15_s18 = sadd.s32 1, %s1298_s18  }
 0x226   : > { %p12_p4 = scmp.ge.s32.totalorder %s15_s18, 4  }
 0x228   :  { %14 = sbr.rel (!%p12_p4) target bundleno = 1 (0x1), region = 74 }

// kernel: bcdunet_forward.27
= control target key start
LH: loop header
LB: loop body
LE: loop exit
PB: predicated region body
PF: predicated region fallthrough
CT: control target
= control target key end

     0   :  { %s1625_s18 = smov 0   ;;  %s1908_s0 = inlined_call_operand.vmem [shape: f32[2,4,256], index: 0, kind: input, shape index: {}]   ;;  %s1909_s1 = inlined_call_operand.vmem [shape: bf16[3,256,128], index: 1, kind: input, shape index: {}]   ;;  %s1910_s2 = inlined_call_operand.vmem [shape: f32[1,128], index: 2, kind: input, shape index: {}]   ;;  %s1911_s3 = inlined_call_operand.vmem [shape: bf16[3,128,128], index: 3, kind: input, shape index: {}]   ;;  %s1912_s4 = inlined_call_operand.vmem [shape: f32[1,128], index: 4, kind: input, shape index: {}]   ;;  %s1913_s5 = inlined_call_operand.vmem [shape: f32[2,2,128], index: 5, kind: output, shape index: {}]  }
   0x1 LB: > { %s1166_s19 = sadd.s32 4294967295, %s1591_s18   ;;  %p1170_p0 = scmp.ge.s32.totalorder %s1591_s18, 1  ;;  %s1591_s18 = sphi %s1625_s18, %s15_s18  }
   0x2   : > { %p187_p1 = scmp.lt.s32.totalorder %s1591_s18, 3 }
   0x4   : > { %p188_p2 = pnand %p1170_p0, %p187_p1 }
   0x5   : > { %v1510_v0 = vld [vmem:[%s1909_s1 + $0xc0] sm:$0xff] (!%p188_p2)   ;;  %v1514_v4 = vld [vmem:[%s1909_s1 + $0xc8] sm:$0xff] (!%p188_p2)   ;;  %v1518_v8 = vld [vmem:[%s1909_s1 + $0xd0] sm:$0xff] (!%p188_p2)   ;;  %p214_p3 = scmp.lt.s32.totalorder (!%p188_p2), %s1166_s19, 1  ;;  %vm1594_vm0 = vmmov (!%p188_p2), 0  }
   0x6   : > { %191 = sbr.rel (%p188_p2) target bundleno = 553 (0x229), region = 40  ;;  %v1511_v1 = vld [vmem:[%s1909_s1 + $0x40] sm:$0xff] (!%p188_p2)   ;;  %1347 = vmatprep.subr.bf16.mxu0 (!%p188_p2), %v1510_v0  ;;  %v1515_v5 = vld [vmem:[%s1909_s1 + $0x48] sm:$0xff] (!%p188_p2)   ;;  %v1519_v9 = vld [vmem:[%s1909_s1 + $0x50] sm:$0xff] (!%p188_p2)  }
   0x7   : > { %v1512_v2 = vld [vmem:[%s1909_s1 + $0x80] sm:$0xff] (!%p188_p2)   ;;  %1369 = vmatprep.subr.bf16.mxu1 (!%p188_p2), %v1511_v1  ;;  %v1516_v6 = vld [vmem:[%s1909_s1 + $0x88] sm:$0xff] (!%p188_p2)   ;;  %v1520_v10 = vld [vmem:[%s1909_s1 + $0x90] sm:$0xff] (!%p188_p2)  }
   0x8   : > { %v1513_v3 = vld [vmem:[%s1909_s1] sm:$0xff] (!%p188_p2)   ;;  %1348 = vmatpush3.bf16.msra.mxu0 (!%p188_p2), %v1512_v2  ;;  %v1517_v7 = vld [vmem:[%s1909_s1 + $0x8] sm:$0xff] (!%p188_p2)   ;;  %v1521_v11 = vld [vmem:[%s1909_s1 + $0x10] sm:$0xff] (!%p188_p2)  }
   0x9   : > { %1370 = vmatpush3.bf16.msra.mxu1 (!%p188_p2), %v1513_v3  ;;  %1349 = vmatprep.subr.bf16.mxu0 (!%p188_p2), %v1514_v4  ;;  %v1522_v12 = vld [vmem:[%s1909_s1 + $0xd8] sm:$0xff] (!%p188_p2)   ;;  %v1526_v16 = vld [vmem:[%s1909_s1 + $0xe0] sm:$0xff] (!%p188_p2)   ;;  %v1530_v20 = vld [vmem:[%s1909_s1 + $0xe8] sm:$0xff] (!%p188_p2)  }
   0xa   : > { %1371 = vmatprep.subr.bf16.mxu1 (!%p188_p2), %v1515_v5  ;;  %v1523_v13 = vld [vmem:[%s1909_s1 + $0x58] sm:$0xff] (!%p188_p2)   ;;  %v1527_v17 = vld [vmem:[%s1909_s1 + $0x60] sm:$0xff] (!%p188_p2)   ;;  %v1531_v21 = vld [vmem:[%s1909_s1 + $0x68] sm:$0xff] (!%p188_p2)  }
   0xb   : > { %v1524_v14 = vld [vmem:[%s1909_s1 + $0x98] sm:$0xff] (!%p188_p2)   ;;  %v1528_v18 = vld [vmem:[%s1909_s1 + $0xa0] sm:$0xff] (!%p188_p2)   ;;  %v1532_v22 = vld [vmem:[%s1909_s1 + $0xa8] sm:$0xff] (!%p188_p2)  }
   0xc   : > { %1350 = vmatpush3.bf16.msra.mxu0 (!%p188_p2), %v1516_v6  ;;  %v1525_v15 = vld [vmem:[%s1909_s1 + $0x18] sm:$0xff] (!%p188_p2)   ;;  %v1529_v19 = vld [vmem:[%s1909_s1 + $0x20] sm:$0xff] (!%p188_p2)   ;;  %v1533_v23 = vld [vmem:[%s1909_s1 + $0x28] sm:$0xff] (!%p188_p2)  }
   0xd   : > { %1372 = vmatpush3.bf16.msra.mxu1 %v1517_v7  ;;  %1351 = vmatprep.subr.bf16.mxu0 %v1518_v8  ;;  %s1915_s19 = smov (!%p214_p3, %s1166_s19), 1  ;;  %v1534_v24 = vld [vmem:[%s1909_s1 + $0xf0] sm:$0xff]   ;;  %v1538_v28 = vld [vmem:[%s1909_s1 + $0xf8] sm:$0xff]   ;;  %v1544_v37 = vld [vmem:[%s1909_s1 + $0x140] sm:$0xff]   ;;  %v1593_v8 = vmov 0.0  }
   0xe   : > { %1373 = vmatprep.subr.bf16.mxu1 %v1519_v9  ;;  %v1535_v25 = vld [vmem:[%s1909_s1 + $0x70] sm:$0xff]   ;;  %s1346_s28 = sshll.u32 %s1915_s19, 3  ;;  %v1539_v29 = vld [vmem:[%s1909_s1 + $0x78] sm:$0xff]   ;;  %v1545_v49 = vld [vmem:[%s1909_s1 + $0x100] sm:$0xff]   ;;  %780 = vst [vmem:[#allocation2] sm:$0xf] %v1593_v8 }
   0xf   : > { %v1536_v26 = vld [vmem:[%s1909_s1 + $0xb0] sm:$0xff]   ;;  %s1733_s12 = scalar_lea.vmem %s1908_s0, %s1346_s28  ;;  %v1540_v30 = vld [vmem:[%s1909_s1 + $0xb8] sm:$0xff]   ;;  %v1546_v50 = vld [vmem:[%s1909_s1 + $0x148] sm:$0xff]   ;;  %s1173_s9 = sshll.u32 %s1915_s19, 1 }
  0x10   : > { %1352 = vmatpush3.bf16.msra.mxu0 %v1520_v10  ;;  %v1537_v27 = vld [vmem:[%s1909_s1 + $0x30] sm:$0xff]   ;;  %v1541_v31 = vld [vmem:[%s1909_s1 + $0x38] sm:$0xff]   ;;  %v262_v32 = vld [vmem:[%s1733_s12] sm:$0x66]  ;;  %s222_s13 = scalar_lea.vmem %s1913_s5, %s1173_s9 }
  0x11   : > { %1374 = vmatpush3.bf16.msra.mxu1 %v1521_v11  ;;  %1353 = vmatprep.subr.bf16.mxu0 %v1522_v12  ;;  %v224_v33 = vld [vmem:[%s1733_s12] sm:$0x33]  ;;  %v264_v34 = vcombine.high %v262_v32, %v262_v32  ;;  %v266_v35 = vpack.c.bf16 %v262_v32, %v262_v32  ;;  %v1547_v51 = vld [vmem:[%s1909_s1 + $0x108] sm:$0xff]   ;;  %v1548_v52 = vld [vmem:[%s1909_s1 + $0x150] sm:$0xff]  }
  0x12   : > { %1375 = vmatprep.subr.bf16.mxu1 %v1523_v13  ;;  %v226_v36 = vcombine.high %v224_v33, %v224_v33  ;;  %v228_v38 = vpack.c.bf16 %v224_v33, %v224_v33  ;;  %v1549_v53 = vld [vmem:[%s1909_s1 + $0x110] sm:$0xff]   ;;  %v1550_v54 = vld [vmem:[%s1909_s1 + $0x158] sm:$0xff]   ;;  %v589_v55 = vld [vmem:[%s1733_s12] sm:$0xcc] }
  0x13   : > { %v267_v39 = vpack.c.bf16 %v264_v34, %v264_v34  ;;  %v302_v41 = vshrl.u32 %v266_v35, 16  ;;  %v304_v42 = vshll.u32 %v266_v35, 16  ;;  %v591_v56 = vcombine.high %v589_v55, %v589_v55  ;;  %v1551_v57 = vld [vmem:[%s1909_s1 + $0x118] sm:$0xff]   ;;  %v1552_v59 = vld [vmem:[%s1909_s1 + $0x160] sm:$0xff]   ;;  %v1554_v62 = vld [vmem:[%s1909_s1 + $0x168] sm:$0xff]  }
  0x14   : > { %1354 = vmatpush3.bf16.msra.mxu0 %v1524_v14  ;;  %v229_v40 = vpack.c.bf16 %v226_v36, %v226_v36  ;;  %v1553_v61 = vld [vmem:[%s1909_s1 + $0x120] sm:$0xff]   ;;  %v1555_v63 = vld [vmem:[%s1909_s1 + $0x128] sm:$0xff]   ;;  %v1556_v0 = vld [vmem:[%s1909_s1 + $0x170] sm:$0xff]   ;;  %v593_v3 = vpack.c.bf16 %v589_v55, %v589_v55 }
  0x15   : > { %1376 = vmatpush3.bf16.msra.mxu1 %v1525_v15  ;;  %1355 = vmatprep.subr.bf16.mxu0 %v1526_v16  ;;  %v309_v43 = vshrl.u32 %v267_v39, 16  ;;  %v311_v44 = vshll.u32 %v267_v39, 16  ;;  %v306_v45 = vrot.slane %v304_v42, 1  ;;  %v594_v58 = vpack.c.bf16 %v591_v56, %v591_v56  ;;  %v1557_v1 = vld [vmem:[%s1909_s1 + $0x130] sm:$0xff]   ;;  %v1558_v2 = vld [vmem:[%s1909_s1 + $0x178] sm:$0xff]   ;;  %v1561_v6 = vld [vmem:[%s1911_s3 + $0x40] sm:$0xff]  }
  0x16   : > { %1377 = vmatprep.subr.bf16.mxu1 %v1527_v17  ;;  %581 = vmatprep.mubr.bf16.mxu1 %v229_v40  ;;  %v1559_v4 = vld [vmem:[%s1909_s1 + $0x138] sm:$0xff]   ;;  %v630_v5 = vrot.slane %v593_v3, 1  ;;  %v1562_v7 = vld [vmem:[%s1911_s3] sm:$0xff]   ;;  %v1563_v9 = vld [vmem:[%s1911_s3 + $0x48] sm:$0xff]  }
  0x17   : > { %v313_v46 = vrot.slane %v311_v44, 1  ;;  %v307_v47 = vor.u32 %v306_v45, %v302_v41  ;;  %v631_v60 = vrot.slane %v594_v58, 1  ;;  %v1564_v10 = vld [vmem:[%s1911_s3 + $0x8] sm:$0xff]   ;;  %v1565_v11 = vld [vmem:[%s1911_s3 + $0x50] sm:$0xff]   ;;  %v1567_v13 = vld [vmem:[%s1911_s3 + $0x58] sm:$0xff]  }
  0x18   : > { %1356 = vmatpush3.bf16.msra.mxu0 %v1528_v18  ;;  %v1566_v12 = vld [vmem:[%s1911_s3 + $0x10] sm:$0xff]   ;;  %v1568_v14 = vld [vmem:[%s1911_s3 + $0x18] sm:$0xff]   ;;  %v1569_v15 = vld [vmem:[%s1911_s3 + $0x60] sm:$0xff]  }
  0x19   : > { %1378 = vmatpush3.bf16.msra.mxu1 %v1529_v19  ;;  %1357 = vmatprep.subr.bf16.mxu0 %v1530_v20  ;;  %v314_v48 = vor.u32 %v313_v46, %v309_v43  ;;  %v1570_v16 = vld [vmem:[%s1911_s3 + $0x20] sm:$0xff]   ;;  %v1571_v17 = vld [vmem:[%s1911_s3 + $0x68] sm:$0xff]   ;;  %v1573_v19 = vld [vmem:[%s1911_s3 + $0x70] sm:$0xff]  }
  0x1a   : > { %1379 = vmatprep.subr.bf16.mxu1 %v1531_v21  ;;  %v1572_v18 = vld [vmem:[%s1911_s3 + $0x28] sm:$0xff]   ;;  %v1574_v20 = vld [vmem:[%s1911_s3 + $0x30] sm:$0xff]   ;;  %v1575_v21 = vld [vmem:[%s1911_s3 + $0x78] sm:$0xff]  }
  0x1b   : > { %445 = vmatprep.mubr.bf16.mxu0 %v314_v48  ;;  %v1577_v45 = vld [vmem:[%s1911_s3 + $0x80] sm:$0xff]   ;;  %v1578_v48 = vld [vmem:[%s1911_s3 + $0x88] sm:$0xff]  }
  0x1c   : > { %1358 = vmatpush3.bf16.msra.mxu0 %v1532_v22  ;;  %v1576_v22 = vld [vmem:[%s1911_s3 + $0x38] sm:$0xff]   ;;  %v1343_v3 = vld [vmem:[%s1912_s4] ss:$0 sm:$0xff] }
  0x1d   : > { %1380 = vmatpush3.bf16.msra.mxu1 %v1533_v23  ;;  %1359 = vmatprep.subr.bf16.mxu0 %v1534_v24 }
  0x1e   : > { %1381 = vmatprep.subr.bf16.mxu1 %v1535_v25 }
  0x20   : > { %1360 = vmatpush3.bf16.msra.mxu0 %v1536_v26 }
  0x21   : > { %1382 = vmatpush3.bf16.msra.mxu1 %v1537_v27  ;;  %1361 = vmatprep.subr.bf16.mxu0 %v1538_v28 }
  0x22   : > { %1383 = vmatprep.subr.bf16.mxu1 %v1539_v29 }
  0x24   : > { %1362 = vmatpush3.bf16.msra.mxu0 %v1540_v30 }
  0x25   : > { %1384 = vmatpush3.bf16.msra.mxu1 %v1541_v31  ;;  %1391 = vmatprep.subr.bf16.mxu0 %v1544_v37 }
  0x26   : > { %1440 = vmatprep.subr.bf16.mxu1 %v1593_v8 }
  0x27   : > { %446 = vmatmul.mubr.bf16.vlgmr.msra.gmra.mrb[0].mxu0 %v307_v47 }
  0x28   : > { %582 = vmatmul.mubr.bf16.vlgmr.msra.gmra.mrb[0].mxu1 %v228_v38  ;;  %1392 = vmatpush3.bf16.msra.mxu0 %v1545_v49  ;;  %v1286_v38 = vld [vmem:[%s1910_s2] ss:$0 sm:$0xff]  ;;  %v1579_v49 = vld [vmem:[%s1911_s3 + $0x90] sm:$0xff]  }
  0x29   : > { %1393 = vmatprep.subr.bf16.mxu0 %v1546_v50  ;;  %762 = vmatprep.mubr.bf16.mxu0 %v631_v60  ;;  %v1580_v50 = vld [vmem:[%s1911_s3 + $0x98] sm:$0xff]  }
  0x2a   : > { %1441 = vmatpush3.bf16.msra.mxu1 %v1561_v6  ;;  %1456 = vmatprep.mubr.msk.bf16.mxu1 %vm1594_vm0, %v1593_v8 }
  0x2b   : > { %1442 = vmatprep.subr.bf16.mxu1 %v1593_v8 }
  0x2c   : > { %1394 = vmatpush3.bf16.msra.mxu0 %v1547_v51  ;;  %v1581_v51 = vld [vmem:[%s1911_s3 + $0xa0] sm:$0xff]  }
  0x2d   : > { %1395 = vmatprep.subr.bf16.mxu0 %v1548_v52  ;;  %v1582_v52 = vld [vmem:[%s1911_s3 + $0xa8] sm:$0xff]  }
  0x2e   : > { %1443 = vmatpush3.bf16.msra.mxu1 %v1563_v9 }
  0x2f   : > { %1444 = vmatprep.subr.bf16.mxu1 %v1593_v8 }
  0x30   : > { %1396 = vmatpush3.bf16.msra.mxu0 %v1549_v53  ;;  %v1583_v53 = vld [vmem:[%s1911_s3 + $0xb0] sm:$0xff]  }
  0x31   : > { %1397 = vmatprep.subr.bf16.mxu0 %v1550_v54  ;;  %v1584_v54 = vld [vmem:[%s1911_s3 + $0xb8] sm:$0xff]  }
  0x32   : > { %1445 = vmatpush3.bf16.msra.mxu1 %v1565_v11 }
  0x33   : > { %1446 = vmatprep.subr.bf16.mxu1 %v1593_v8 }
  0x34   : > { %1398 = vmatpush3.bf16.msra.mxu0 %v1551_v57 }
  0x35   : > { %1399 = vmatprep.subr.bf16.mxu0 %v1552_v59 }
  0x36   : > { %1447 = vmatpush3.bf16.msra.mxu1 %v1567_v13 }
  0x37   : > { %1448 = vmatprep.subr.bf16.mxu1 %v1593_v8 }
  0x38   : > { %1400 = vmatpush3.bf16.msra.mxu0 %v1553_v61 }
  0x39   : > { %1401 = vmatprep.subr.bf16.mxu0 %v1554_v62 }
  0x3a   : > { %1449 = vmatpush3.bf16.msra.mxu1 %v1569_v15 }
  0x3b   : > { %1450 = vmatprep.subr.bf16.mxu1 %v1593_v8 }
  0x3c   : > { %1402 = vmatpush3.bf16.msra.mxu0 %v1555_v63 }
  0x3d   : > { %1403 = vmatprep.subr.bf16.mxu0 %v1556_v0 }
  0x3e   : > { %1451 = vmatpush3.bf16.msra.mxu1 %v1571_v17 }
  0x3f   : > { %1452 = vmatprep.subr.bf16.mxu1 %v1593_v8 }
  0x40   : > { %1404 = vmatpush3.bf16.msra.mxu0 %v1557_v1 }
  0x41   : > { %1405 = vmatprep.subr.bf16.mxu0 %v1558_v2 }
  0x42   : > { %1453 = vmatpush3.bf16.msra.mxu1 %v1573_v19 }
  0x43   : > { %1454 = vmatprep.subr.bf16.mxu1 %v1593_v8 }
  0x44   : > { %1406 = vmatpush3.bf16.msra.mxu0 %v1559_v4 }
  0x45   : > { %1460 = vmatprep.subr.bf16.mxu0 %v1593_v8 }
  0x46   : > { %1455 = vmatpush3.bf16.msra.mxu1 %v1575_v21 }
  0x47   : > { %763 = vmatmul.mubr.bf16.vlgmr.msra.gmra.mrb[4].mxu0 %v630_v5  ;;  %1480 = vmatprep.subr.bf16.mxu1 %v1593_v8 }
  0x48   : > { %1461 = vmatpush3.bf16.msra.mxu0 %v1562_v7  ;;  %1476 = vmatprep.mubr.msk.bf16.mxu0 %vm1594_vm0, %v1593_v8 }
  0x49   : > { %1462 = vmatprep.subr.bf16.mxu0 %v1593_v8 }
  0x4c   : > { %1463 = vmatpush3.bf16.msra.mxu0 %v1564_v10 }
  0x4d   : > { %1464 = vmatprep.subr.bf16.mxu0 %v1593_v8 }
  0x50   : > { %1465 = vmatpush3.bf16.msra.mxu0 %v1566_v12 }
  0x51   : > { %1466 = vmatprep.subr.bf16.mxu0 %v1593_v8 }
  0x54   : > { %1467 = vmatpush3.bf16.msra.mxu0 %v1568_v14 }
  0x55   : > { %1468 = vmatprep.subr.bf16.mxu0 %v1593_v8 }
  0x58   : > { %1469 = vmatpush3.bf16.msra.mxu0 %v1570_v16 }
  0x59   : > { %1470 = vmatprep.subr.bf16.mxu0 %v1593_v8 }
  0x5c   : > { %1471 = vmatpush3.bf16.msra.mxu0 %v1572_v18 }
  0x5d   : > { %1472 = vmatprep.subr.bf16.mxu0 %v1593_v8 }
  0x60   : > { %1473 = vmatpush3.bf16.msra.mxu0 %v1574_v20 }
  0x61   : > { %1474 = vmatprep.subr.bf16.mxu0 %v1593_v8 }
  0x64   : > { %1475 = vmatpush3.bf16.msra.mxu0 %v1576_v22 }
  0xfa   : > { %v1363_v28 = vpop.f32.mrb[0].mxu0 }
  0xfb   : > { %v1385_v23 = vpop.f32.mrb[0].mxu1  ;;  %v1364_v29 = vpop.f32.mrb[1].mxu0 }
  0xfc   : > { %v1386_v24 = vpop.f32.mrb[1].mxu1  ;;  %v1365_v30 = vadd.f32 %v1364_v29, %v1363_v28  ;;  %v1366_v31 = vpop.f32.mrb[2].mxu0 }
  0xfd   : > { %v1387_v25 = vadd.f32 %v1386_v24, %v1385_v23  ;;  %v1388_v26 = vpop.f32.mrb[2].mxu1  ;;  %v1367_v32 = vpop.f32.mrb[3].mxu0 }
  0xfe   : > { %v1389_v27 = vpop.f32.mrb[3].mxu1 }
  0xff   : > { %v584_v33 = vadd.f32 %v1387_v25, %v1365_v30 }
 0x11a   : > { %v1407_v34 = vpop.f32.mrb[4].mxu0 }
 0x11b   : > { %v1408_v35 = vpop.f32.mrb[5].mxu0 }
 0x11c   : > { %v1409_v36 = vadd.f32 %v1408_v35, %v1407_v34  ;;  %v1410_v37 = vpop.f32.mrb[6].mxu0 }
 0x11d   : > { %v1411_v39 = vpop.f32.mrb[7].mxu0 }
 0x11e   : > { %v770_v40 = vadd.f32 %v1409_v36, %v584_v33 }
 0x120   : > { %v778_v41 = vadd.f32 %v1286_v38, %v770_v40 }
 0x122   : > { %v779_v42 = vmax.f32 %v778_v41, 0.0 }
 0x124   : > { %781 = vst [vmem:[#allocation2 + $0x1] sm:$0x3] %v779_v42 }
 0x12b   : > { %v800_v43 = vld [vmem:[#allocation2 + $0x1] sm:$0x3] }
 0x12c   : > { %v782_v44 = vld [vmem:[#allocation2] sm:$0x3]  ;;  %v801_v46 = vpack.c.bf16 %v800_v43, %v800_v43  ;;  %v995_v55 = vld [vmem:[#allocation2 + $0x2] sm:$0x3] }
 0x12d   : > { %v783_v47 = vpack.c.bf16 %v782_v44, %v782_v44  ;;  %v996_v56 = vpack.c.bf16 %v995_v55, %v995_v55 }
 0x12e   : > { %1457 = vmatmul.mubr.bf16.vlgmr.msra.gmra.mrb[4].mxu1 %v801_v46 }
 0x12f   : > { %1477 = vmatmul.mubr.bf16.vlgmr.msra.gmra.mrb[8].mxu0 %v783_v47  ;;  %1481 = vmatpush3.bf16.msra.mxu1 %v1577_v45 }
 0x130   : > { %1496 = vmatprep.mubr.msk.bf16.mxu1 %vm1594_vm0, %v1593_v8  ;;  %1482 = vmatprep.subr.bf16.mxu1 %v1593_v8 }
 0x133   : > { %1483 = vmatpush3.bf16.msra.mxu1 %v1578_v48 }
 0x134   : > { %1484 = vmatprep.subr.bf16.mxu1 %v1593_v8 }
 0x137   : > { %1485 = vmatpush3.bf16.msra.mxu1 %v1579_v49 }
 0x138   : > { %1486 = vmatprep.subr.bf16.mxu1 %v1593_v8 }
 0x13b   : > { %1487 = vmatpush3.bf16.msra.mxu1 %v1580_v50 }
 0x13c   : > { %1488 = vmatprep.subr.bf16.mxu1 %v1593_v8 }
 0x13f   : > { %1489 = vmatpush3.bf16.msra.mxu1 %v1581_v51 }
 0x140   : > { %1490 = vmatprep.subr.bf16.mxu1 %v1593_v8 }
 0x143   : > { %1491 = vmatpush3.bf16.msra.mxu1 %v1582_v52 }
 0x144   : > { %1492 = vmatprep.subr.bf16.mxu1 %v1593_v8 }
 0x147   : > { %1493 = vmatpush3.bf16.msra.mxu1 %v1583_v53 }
 0x148   : > { %1494 = vmatprep.subr.bf16.mxu1 %v1593_v8 }
 0x14b   : > { %1495 = vmatpush3.bf16.msra.mxu1 %v1584_v54 }
 0x14e   : > { %1497 = vmatmul.mubr.bf16.vlgmr.msra.gmra.mrb[8].mxu1 %v996_v56 }
 0x201   : > { %v901_v57 = vpop.f32.mrb[4].mxu1 }
 0x202   : > { %v989_v58 = vpop.f32.mrb[8].mxu0  ;;  %v1458_v60 = vpop.f32.mrb[5].mxu1 }
 0x203   : > { %v990_v59 = vadd.f32 %v989_v58, %v901_v57  ;;  %v1478_v61 = vpop.f32.mrb[9].mxu0  ;;  %v904_v62 = vpop.f32.mrb[6].mxu1 }
 0x204   : > { %v992_v63 = vpop.f32.mrb[10].mxu0  ;;  %v1459_v0 = vpop.f32.mrb[7].mxu1 }
 0x205   : > { %v1479_v1 = vpop.f32.mrb[11].mxu0 }
 0x221   : > { %v1096_v2 = vpop.f32.mrb[8].mxu1 }
 0x222   : > { %v1102_v4 = vadd.f32 %v1096_v2, %v990_v59  ;;  %v1498_v5 = vpop.f32.mrb[9].mxu1 }
 0x223   : > { %v1099_v6 = vpop.f32.mrb[10].mxu1 }
 0x224   : > { %v1110_v7 = vadd.f32 %v1343_v3, %v1102_v4  ;;  %v1499_v8 = vpop.f32.mrb[11].mxu1 }
 0x226   : > { %v1111_v9 = vmax.f32 %v1110_v7, 0.0 }
 0x228   : > { %1112 = vst [vmem:[%s222_s13] sm:$0x3] %v1111_v9 }
 0x229 PF: > { %s15_s18 = sadd.s32 1, %s1591_s18  }
 0x22a   : > { %p12_p4 = scmp.ge.s32.totalorder %s15_s18, 4  }
 0x22c   :  { %14 = sbr.rel (!%p12_p4) target bundleno = 1 (0x1), region = 74 }

// kernel: bcdunet_forward.28
= control target key start
LH: loop header
LB: loop body
LE: loop exit
PB: predicated region body
PF: predicated region fallthrough
CT: control target
= control target key end

     0   :  { %v134_v0 = vmov 0.0   ;;  %vm135_vm0 = vmmov 0   ;;  %vm55_vm1 = vcmask 523264   ;;  %s177_s1 = inlined_call_operand.vmem [shape: bf16[64,128], index: 1, kind: input, shape index: {}]   ;;  %s178_s0 = inlined_call_operand.vmem [shape: bf16[8,64], index: 0, kind: input, shape index: {}]   ;;  %s179_s2 = inlined_call_operand.vmem [shape: f32[1,128], index: 2, kind: input, shape index: {}]   ;;  %s180_s3 = inlined_call_operand.vmem [shape: f32[8,128], index: 3, kind: output, shape index: {}]  }
   0x1   :  { %116 = vmatprep.subr.bf16.mxu0 %v134_v0  ;;  %v130_v1 = vld [vmem:[%s177_s1] sm:$0xff]   ;;  %124 = vmatprep.mubr.msk.bf16.mxu0 %vm135_vm0, %v134_v0  ;;  %v131_v2 = vld [vmem:[%s177_s1 + $0x8] sm:$0xff]   ;;  %v132_v3 = vld [vmem:[%s177_s1 + $0x10] sm:$0xff]  }
   0x2   :  { %117 = vmatpush3.bf16.msra.mxu0 %v130_v1  ;;  %v133_v4 = vld [vmem:[%s177_s1 + $0x18] sm:$0xff]   ;;  %v15_v5 = vld [vmem:[%s178_s0] sm:$0xf] }
   0x3   :  { %118 = vmatprep.subr.bf16.mxu0 %v134_v0  ;;  %v105_v6 = vld [vmem:[%s179_s2] ss:$0 sm:$0xff] }
   0x6   :  { %119 = vmatpush3.bf16.msra.mxu0 %v131_v2 }
   0x7   :  { %120 = vmatprep.subr.bf16.mxu0 %v134_v0 }
   0xa   :  { %121 = vmatpush3.bf16.msra.mxu0 %v132_v3 }
   0xb   :  { %122 = vmatprep.subr.bf16.mxu0 %v134_v0 }
   0xe   :  { %123 = vmatpush3.bf16.msra.mxu0 %v133_v4 }
  0x11   :  { %125 = vmatmul.mubr.msk.bf16.vlgmr.msra.gmra.mrb[0].mxu0 %vm55_vm1, %v15_v5 }
  0xe4   :  { %v93_v7 = vpop.f32.mrb[0].mxu0 }
  0xe5   :  { %v94_v8 = vadd.f32 %v105_v6, %v93_v7  ;;  %v126_v9 = vpop.f32.mrb[1].mxu0 }
  0xe6   :  { %v96_v10 = vpop.f32.mrb[2].mxu0 }
  0xe7   :  { %v99_v11 = vmax.f32 %v94_v8, 0.0  ;;  %v127_v12 = vpop.f32.mrb[3].mxu0 }
  0xe9   :  { %100 = vst [vmem:[%s180_s3] sm:$0xff] %v99_v11 }

// kernel: tile.237
= control target key start
LH: loop header
LB: loop body
LE: loop exit
PB: predicated region body
PF: predicated region fallthrough
CT: control target
= control target key end

     0   :  { %vm7_vm0 = vcmask 261120   ;;  %s37_s8 = smov 32   ;;  %s38_s9 = smov 64   ;;  %vm13_vm1 = vcmask 1048320   ;;  %vm19_vm2 = vcmask 785920   ;;  %vm25_vm3 = vcmask 523520   ;;  %s55_s0 = inlined_call_operand.vmem [shape: f32[4,32], index: 0, kind: input, shape index: {}]   ;;  %s56_s1 = inlined_call_operand.vmem [shape: f32[1,1,128], index: 1, kind: output, shape index: {}]  }
   0x1   :  { %v4_v0 = vld [vmem:[%s55_s0] sm:$0xf]  ;;  %s36_s0 = smov 96  }
   0x2   :  { %5 = vst [vmem:[#allocation1] sm:$0xf] %v4_v0 }
   0x9   :  { %v10_v1 = vld [vmem:[#allocation1 + $0x3] sm:$0x1]   ;;  %v22_v2 = vld [vmem:[#allocation1 + $0x1] sm:$0x1]   ;;  %v6_v3 = vld [vmem:[#allocation1] sm:$0x1]  }
   0xa   :  { %11 = vrot.lane.b32.xlu0 %v10_v1, %s36_s0  ;;  %23 = vrot.lane.b32.xlu1 %v22_v2, %s37_s8  ;;  %v16_v4 = vld [vmem:[#allocation1 + $0x2] sm:$0x1]   ;;  %8 = vst.msk [vmem:[#allocation0] sm:$0x1] %vm7_vm0, %v6_v3  }
   0xe   :  { %17 = vrot.lane.b32.xlu0 %v16_v4, %s38_s9 }
  0x7c   :  { %v12_v5 = vpop.permute.xlu0 %11   ;;  %v24_v6 = vpop.permute.xlu1 %23  }
  0x7d   :  { %14 = vst.msk [vmem:[#allocation0] sm:$0x1] %vm13_vm1, %v12_v5  }
  0x80   :  { %v18_v7 = vpop.permute.xlu0 %17  }
  0x81   :  { %20 = vst.msk [vmem:[#allocation0] sm:$0x1] %vm19_vm2, %v18_v7  }
  0x82   :  { %26 = vst.msk [vmem:[#allocation0] sm:$0x1] %vm25_vm3, %v24_v6  }
  0x89   :  { %v30_v8 = vld [vmem:[#allocation0] sm:$0x1] }
  0x8a   :  { %32 = vst [vmem:[%s56_s1] sm:$0x1] %v30_v8 }

// kernel: tile.253
= control target key start
LH: loop header
LB: loop body
LE: loop exit
PB: predicated region body
PF: predicated region fallthrough
CT: control target
= control target key end

     0   :  { %s22_s0 = inlined_call_operand.vmem [shape: f32[16], index: 0, kind: input, shape index: {}]   ;;  %s23_s1 = inlined_call_operand.vmem [shape: f32[4,16], index: 1, kind: output, shape index: {}]  }
   0x1   :  { %v4_v0 = vld [vmem:[%s22_s0] ss:$0 sm:$0xff] }
   0x2   :  { %5 = vst [vmem:[%s23_s1] sm:$0xf] %v4_v0 }

// kernel: tile.254
= control target key start
LH: loop header
LB: loop body
LE: loop exit
PB: predicated region body
PF: predicated region fallthrough
CT: control target
= control target key end

     0   :  { %vm7_vm0 = vcmask 130048   ;;  %s37_s8 = smov 16   ;;  %s38_s9 = smov 32   ;;  %vm13_vm1 = vcmask 523648   ;;  %vm19_vm2 = vcmask 392448   ;;  %vm25_vm3 = vcmask 261248   ;;  %s55_s0 = inlined_call_operand.vmem [shape: f32[4,16], index: 0, kind: input, shape index: {}]   ;;  %s56_s1 = inlined_call_operand.vmem [shape: f32[1,64], index: 1, kind: output, shape index: {}]  }
   0x1   :  { %v4_v0 = vld [vmem:[%s55_s0] sm:$0xf]  ;;  %s36_s0 = smov 48  }
   0x2   :  { %5 = vst [vmem:[#allocation1] sm:$0xf] %v4_v0 }
   0x9   :  { %v10_v1 = vld [vmem:[#allocation1 + $0x3] sm:$0x1]   ;;  %v22_v2 = vld [vmem:[#allocation1 + $0x1] sm:$0x1]   ;;  %v6_v3 = vld [vmem:[#allocation1] sm:$0x1]  }
   0xa   :  { %11 = vrot.lane.b32.xlu0 %v10_v1, %s36_s0  ;;  %23 = vrot.lane.b32.xlu1 %v22_v2, %s37_s8  ;;  %v16_v4 = vld [vmem:[#allocation1 + $0x2] sm:$0x1]   ;;  %8 = vst.msk [vmem:[#allocation0] sm:$0x1] %vm7_vm0, %v6_v3  }
   0xe   :  { %17 = vrot.lane.b32.xlu0 %v16_v4, %s38_s9 }
  0x7c   :  { %v12_v5 = vpop.permute.xlu0 %11   ;;  %v24_v6 = vpop.permute.xlu1 %23  }
  0x7d   :  { %14 = vst.msk [vmem:[#allocation0] sm:$0x1] %vm13_vm1, %v12_v5  }
  0x80   :  { %v18_v7 = vpop.permute.xlu0 %17  }
  0x81   :  { %20 = vst.msk [vmem:[#allocation0] sm:$0x1] %vm19_vm2, %v18_v7  }
  0x82   :  { %26 = vst.msk [vmem:[#allocation0] sm:$0x1] %vm25_vm3, %v24_v6  }
  0x89   :  { %v30_v8 = vld [vmem:[#allocation0] sm:$0x1] }
  0x8a   :  { %32 = vst [vmem:[%s56_s1] sm:$0x1] %v30_v8 }

// kernel: bcdunet_forward.29
= control target key start
LH: loop header
LB: loop body
LE: loop exit
PB: predicated region body
PF: predicated region fallthrough
CT: control target
= control target key end

     0   :  { %s2631_s12 = smov 0   ;;  %s3125_s0 = inlined_call_operand.vmem [shape: f32[2,6,256], index: 0, kind: input, shape index: {}]   ;;  %s3126_s1 = inlined_call_operand.vmem [shape: bf16[3,3,256,128], index: 1, kind: input, shape index: {}]   ;;  %s3127_s2 = inlined_call_operand.vmem [shape: f32[3,1,128], index: 2, kind: input, shape index: {}]   ;;  %s3128_s3 = inlined_call_operand.vmem [shape: f32[2,4,128], index: 3, kind: output, shape index: {}]  }
   0x1 LB: > { %s1823_s13 = sadd.s32 4294967295, %s2609_s12   ;;  %p1827_p0 = scmp.ge.s32.totalorder %s2609_s12, 1  ;;  %s2609_s12 = sphi %s2631_s12, %s13_s12  }
   0x2   : > { %p137_p1 = scmp.lt.s32.totalorder %s2609_s12, 3 }
   0x4   : > { %p138_p2 = pnand %p1827_p0, %p137_p1 }
   0x5   : > { %v2447_v0 = vld [vmem:[%s3126_s1 + $0xc0] sm:$0xff] (!%p138_p2)   ;;  %v2451_v4 = vld [vmem:[%s3126_s1 + $0xc8] sm:$0xff] (!%p138_p2)   ;;  %v2455_v8 = vld [vmem:[%s3126_s1 + $0xd0] sm:$0xff] (!%p138_p2)   ;;  %p160_p3 = scmp.lt.s32.totalorder (!%p138_p2), %s1823_s13, 1 }
   0x6   : > { %141 = sbr.rel (%p138_p2) target bundleno = 415 (0x19f), region = 32  ;;  %v2448_v1 = vld [vmem:[%s3126_s1 + $0x40] sm:$0xff] (!%p138_p2)   ;;  %2241 = vmatprep.subr.bf16.mxu0 (!%p138_p2), %v2447_v0  ;;  %v2452_v5 = vld [vmem:[%s3126_s1 + $0x48] sm:$0xff] (!%p138_p2)   ;;  %v2456_v9 = vld [vmem:[%s3126_s1 + $0x50] sm:$0xff] (!%p138_p2)  }
   0x7   : > { %v2449_v2 = vld [vmem:[%s3126_s1 + $0x80] sm:$0xff] (!%p138_p2)   ;;  %2263 = vmatprep.subr.bf16.mxu1 (!%p138_p2), %v2448_v1  ;;  %v2453_v6 = vld [vmem:[%s3126_s1 + $0x88] sm:$0xff] (!%p138_p2)   ;;  %v2457_v10 = vld [vmem:[%s3126_s1 + $0x90] sm:$0xff] (!%p138_p2)  }
   0x8   : > { %v2450_v3 = vld [vmem:[%s3126_s1] sm:$0xff] (!%p138_p2)   ;;  %2242 = vmatpush3.bf16.msra.mxu0 (!%p138_p2), %v2449_v2  ;;  %v2454_v7 = vld [vmem:[%s3126_s1 + $0x8] sm:$0xff] (!%p138_p2)   ;;  %v2458_v11 = vld [vmem:[%s3126_s1 + $0x10] sm:$0xff] (!%p138_p2)  }
   0x9   : > { %2264 = vmatpush3.bf16.msra.mxu1 (!%p138_p2), %v2450_v3  ;;  %2243 = vmatprep.subr.bf16.mxu0 (!%p138_p2), %v2451_v4  ;;  %v2459_v12 = vld [vmem:[%s3126_s1 + $0xd8] sm:$0xff] (!%p138_p2)   ;;  %v2463_v16 = vld [vmem:[%s3126_s1 + $0xe0] sm:$0xff] (!%p138_p2)   ;;  %v2467_v20 = vld [vmem:[%s3126_s1 + $0xe8] sm:$0xff] (!%p138_p2)  }
   0xa   : > { %2265 = vmatprep.subr.bf16.mxu1 (!%p138_p2), %v2452_v5  ;;  %v2460_v13 = vld [vmem:[%s3126_s1 + $0x58] sm:$0xff] (!%p138_p2)   ;;  %v2464_v17 = vld [vmem:[%s3126_s1 + $0x60] sm:$0xff] (!%p138_p2)   ;;  %v2468_v21 = vld [vmem:[%s3126_s1 + $0x68] sm:$0xff] (!%p138_p2)  }
   0xb   : > { %v2461_v14 = vld [vmem:[%s3126_s1 + $0x98] sm:$0xff] (!%p138_p2)   ;;  %v2465_v18 = vld [vmem:[%s3126_s1 + $0xa0] sm:$0xff] (!%p138_p2)   ;;  %v2469_v22 = vld [vmem:[%s3126_s1 + $0xa8] sm:$0xff] (!%p138_p2)  }
   0xc   : > { %2244 = vmatpush3.bf16.msra.mxu0 (!%p138_p2), %v2453_v6  ;;  %v2462_v15 = vld [vmem:[%s3126_s1 + $0x18] sm:$0xff] (!%p138_p2)   ;;  %v2466_v19 = vld [vmem:[%s3126_s1 + $0x20] sm:$0xff] (!%p138_p2)   ;;  %v2470_v23 = vld [vmem:[%s3126_s1 + $0x28] sm:$0xff] (!%p138_p2)  }
   0xd   : > { %2266 = vmatpush3.bf16.msra.mxu1 %v2454_v7  ;;  %2245 = vmatprep.subr.bf16.mxu0 %v2455_v8  ;;  %s3130_s13 = smov (!%p160_p3, %s1823_s13), 1  ;;  %v2471_v24 = vld [vmem:[%s3126_s1 + $0xf0] sm:$0xff]   ;;  %v2475_v28 = vld [vmem:[%s3126_s1 + $0xf8] sm:$0xff]   ;;  %v2479_v40 = vld [vmem:[%s3126_s1 + $0x240] sm:$0xff]  }
   0xe   : > { %2267 = vmatprep.subr.bf16.mxu1 %v2456_v9  ;;  %v2472_v25 = vld [vmem:[%s3126_s1 + $0x70] sm:$0xff]   ;;  %s2240_s18 = sshll.u32 %s3130_s13, 4  ;;  %v2476_v29 = vld [vmem:[%s3126_s1 + $0x78] sm:$0xff]   ;;  %v2480_v45 = vld [vmem:[%s3126_s1 + $0x1c0] sm:$0xff]   ;;  %s1830_s19 = sshll.u32 %s3130_s13, 2 }
   0xf   : > { %v2473_v26 = vld [vmem:[%s3126_s1 + $0xb0] sm:$0xff]   ;;  %s2739_s27 = scalar_lea.vmem %s3125_s0, %s2240_s18  ;;  %v2477_v30 = vld [vmem:[%s3126_s1 + $0xb8] sm:$0xff]   ;;  %v2481_v48 = vld [vmem:[%s3126_s1 + $0x200] sm:$0xff]   ;;  %s168_s22 = scalar_lea.vmem %s3128_s3, %s1830_s19 }
  0x10   : > { %2246 = vmatpush3.bf16.msra.mxu0 %v2457_v10  ;;  %v2474_v27 = vld [vmem:[%s3126_s1 + $0x30] sm:$0xff]   ;;  %v2478_v31 = vld [vmem:[%s3126_s1 + $0x38] sm:$0xff]   ;;  %v273_v32 = vld [vmem:[%s2739_s27 + $0x8] sm:$0x1e] }
  0x11   : > { %2268 = vmatpush3.bf16.msra.mxu1 %v2458_v11  ;;  %2247 = vmatprep.subr.bf16.mxu0 %v2459_v12  ;;  %v171_v33 = vld [vmem:[%s2739_s27 + $0x8] sm:$0xf]  ;;  %v272_v34 = vld [vmem:[%s2739_s27] sm:$0x1e]  ;;  %v275_v35 = vpack.c.bf16 %v273_v32, %v273_v32  ;;  %v2488_v56 = vld [vmem:[%s3126_s1 + $0x1d0] sm:$0xff]  }
  0x12   : > { %2269 = vmatprep.subr.bf16.mxu1 %v2460_v13  ;;  %v2750_v36 = vpack.c.bf16 %v171_v33, %v171_v33  ;;  %v274_v37 = vpack.c.bf16 %v272_v34, %v272_v34  ;;  %v170_v38 = vld [vmem:[%s2739_s27] sm:$0xf]  ;;  %v2484_v52 = vld [vmem:[%s3126_s1 + $0x1c8] sm:$0xff]   ;;  %v2487_v57 = vld [vmem:[%s3126_s1 + $0x250] sm:$0xff]  }
  0x13   : > { %v2753_v39 = vpack.c.bf16 %v170_v38, %v170_v38  ;;  %v317_v41 = vshrl.u32 %v275_v35, 16  ;;  %v319_v42 = vshll.u32 %v275_v35, 16  ;;  %v2482_v49 = vld [vmem:[%s3126_s1 + $0x180] sm:$0xff]   ;;  %v2483_v53 = vld [vmem:[%s3126_s1 + $0x248] sm:$0xff]   ;;  %v2490_v58 = vld [vmem:[%s3126_s1 + $0x190] sm:$0xff]  }
  0x14   : > { %2248 = vmatpush3.bf16.msra.mxu0 %v2461_v14  ;;  %589 = vmatprep.mubr.bf16.mxu1 %v2750_v36  ;;  %v310_v43 = vshrl.u32 %v274_v37, 16  ;;  %v312_v44 = vshll.u32 %v274_v37, 16  ;;  %v2486_v54 = vld [vmem:[%s3126_s1 + $0x188] sm:$0xff]   ;;  %v2489_v59 = vld [vmem:[%s3126_s1 + $0x210] sm:$0xff]   ;;  %v2492_v60 = vld [vmem:[%s3126_s1 + $0x1d8] sm:$0xff]  }
  0x15   : > { %2270 = vmatpush3.bf16.msra.mxu1 %v2462_v15  ;;  %2249 = vmatprep.subr.bf16.mxu0 %v2463_v16  ;;  %v321_v46 = vrot.slane %v319_v42, 1  ;;  %v2485_v55 = vld [vmem:[%s3126_s1 + $0x208] sm:$0xff]   ;;  %v2491_v61 = vld [vmem:[%s3126_s1 + $0x258] sm:$0xff]   ;;  %v2496_v0 = vld [vmem:[%s3126_s1 + $0x1e0] sm:$0xff]  }
  0x16   : > { %2271 = vmatprep.subr.bf16.mxu1 %v2464_v17  ;;  %v314_v47 = vrot.slane %v312_v44, 1  ;;  %v2494_v62 = vld [vmem:[%s3126_s1 + $0x198] sm:$0xff]   ;;  %v2495_v1 = vld [vmem:[%s3126_s1 + $0x260] sm:$0xff]   ;;  %v2500_v4 = vld [vmem:[%s3126_s1 + $0x1e8] sm:$0xff]  }
  0x17   : > { %v2770_v50 = vor.u32 %v321_v46, %v317_v41  ;;  %v2493_v63 = vld [vmem:[%s3126_s1 + $0x218] sm:$0xff]   ;;  %v2498_v2 = vld [vmem:[%s3126_s1 + $0x1a0] sm:$0xff]   ;;  %v2499_v5 = vld [vmem:[%s3126_s1 + $0x268] sm:$0xff]  }
  0x18   : > { %2250 = vmatpush3.bf16.msra.mxu0 %v2465_v18  ;;  %v2772_v51 = vor.u32 %v314_v47, %v310_v43  ;;  %v2497_v3 = vld [vmem:[%s3126_s1 + $0x220] sm:$0xff]   ;;  %v2502_v6 = vld [vmem:[%s3126_s1 + $0x1a8] sm:$0xff]   ;;  %v2504_v8 = vld [vmem:[%s3126_s1 + $0x1f0] sm:$0xff]  }
  0x19   : > { %2272 = vmatpush3.bf16.msra.mxu1 %v2466_v19  ;;  %2251 = vmatprep.subr.bf16.mxu0 %v2467_v20  ;;  %v2501_v7 = vld [vmem:[%s3126_s1 + $0x228] sm:$0xff]   ;;  %v2503_v9 = vld [vmem:[%s3126_s1 + $0x270] sm:$0xff]   ;;  %v2508_v12 = vld [vmem:[%s3126_s1 + $0x1f8] sm:$0xff]  }
  0x1a   : > { %2273 = vmatprep.subr.bf16.mxu1 %v2468_v21  ;;  %453 = vmatprep.mubr.bf16.mxu0 %v2770_v50  ;;  %v2506_v10 = vld [vmem:[%s3126_s1 + $0x1b0] sm:$0xff]   ;;  %v2507_v13 = vld [vmem:[%s3126_s1 + $0x278] sm:$0xff]   ;;  %v2512_v16 = vld [vmem:[%s3126_s1 + $0x340] sm:$0xff]  }
  0x1b   : > { %v2505_v11 = vld [vmem:[%s3126_s1 + $0x230] sm:$0xff]   ;;  %v2510_v14 = vld [vmem:[%s3126_s1 + $0x1b8] sm:$0xff]   ;;  %v2511_v17 = vld [vmem:[%s3126_s1 + $0x3c0] sm:$0xff]  }
  0x1c   : > { %2252 = vmatpush3.bf16.msra.mxu0 %v2469_v22  ;;  %v2509_v15 = vld [vmem:[%s3126_s1 + $0x238] sm:$0xff]   ;;  %v2514_v18 = vld [vmem:[%s3126_s1 + $0x300] sm:$0xff]   ;;  %v2516_v20 = vld [vmem:[%s3126_s1 + $0x348] sm:$0xff]  }
  0x1d   : > { %2274 = vmatpush3.bf16.msra.mxu1 %v2470_v23  ;;  %2253 = vmatprep.subr.bf16.mxu0 %v2471_v24  ;;  %v2513_v19 = vld [vmem:[%s3126_s1 + $0x380] sm:$0xff]   ;;  %v2515_v21 = vld [vmem:[%s3126_s1 + $0x3c8] sm:$0xff]   ;;  %v2520_v24 = vld [vmem:[%s3126_s1 + $0x350] sm:$0xff]  }
  0x1e   : > { %2275 = vmatprep.subr.bf16.mxu1 %v2472_v25  ;;  %v2518_v22 = vld [vmem:[%s3126_s1 + $0x308] sm:$0xff]   ;;  %v2519_v25 = vld [vmem:[%s3126_s1 + $0x3d0] sm:$0xff]   ;;  %v2528_v32 = vld [vmem:[%s3126_s1 + $0x360] sm:$0xff]  }
  0x1f   : > { %v2517_v23 = vld [vmem:[%s3126_s1 + $0x388] sm:$0xff]   ;;  %v2527_v33 = vld [vmem:[%s3126_s1 + $0x3e0] sm:$0xff]   ;;  %v2536_v41 = vld [vmem:[%s3126_s1 + $0x370] sm:$0xff]  }
  0x20   : > { %2254 = vmatpush3.bf16.msra.mxu0 %v2473_v26  ;;  %v2522_v26 = vld [vmem:[%s3126_s1 + $0x310] sm:$0xff]   ;;  %v2530_v34 = vld [vmem:[%s3126_s1 + $0x320] sm:$0xff]   ;;  %v2531_v37 = vld [vmem:[%s3126_s1 + $0x3e8] sm:$0xff]  }
  0x21   : > { %2276 = vmatpush3.bf16.msra.mxu1 %v2474_v27  ;;  %2255 = vmatprep.subr.bf16.mxu0 %v2475_v28  ;;  %v2521_v27 = vld [vmem:[%s3126_s1 + $0x390] sm:$0xff]   ;;  %v2524_v28 = vld [vmem:[%s3126_s1 + $0x358] sm:$0xff]   ;;  %v2529_v35 = vld [vmem:[%s3126_s1 + $0x3a0] sm:$0xff]  }
  0x22   : > { %2277 = vmatprep.subr.bf16.mxu1 %v2476_v29  ;;  %v2523_v29 = vld [vmem:[%s3126_s1 + $0x3d8] sm:$0xff]   ;;  %v2534_v38 = vld [vmem:[%s3126_s1 + $0x328] sm:$0xff]   ;;  %v2535_v42 = vld [vmem:[%s3126_s1 + $0x3f0] sm:$0xff]  }
  0x23   : > { %v2538_v43 = vld [vmem:[%s3126_s1 + $0x330] sm:$0xff]   ;;  %v2539_v46 = vld [vmem:[%s3126_s1 + $0x3f8] sm:$0xff]  }
  0x24   : > { %2256 = vmatpush3.bf16.msra.mxu0 %v2477_v30  ;;  %v2526_v30 = vld [vmem:[%s3126_s1 + $0x318] sm:$0xff]   ;;  %v2537_v44 = vld [vmem:[%s3126_s1 + $0x3b0] sm:$0xff]  }
  0x25   : > { %2278 = vmatpush3.bf16.msra.mxu1 %v2478_v31  ;;  %2285 = vmatprep.subr.bf16.mxu0 %v2479_v40  ;;  %v2525_v31 = vld [vmem:[%s3126_s1 + $0x398] sm:$0xff]   ;;  %v2533_v40 = vld [vmem:[%s3126_s1 + $0x3a8] sm:$0xff]  }
  0x26   : > { %2307 = vmatprep.subr.bf16.mxu1 %v2480_v45  ;;  %v2540_v45 = vld [vmem:[%s3126_s1 + $0x378] sm:$0xff]  }
  0x27   : > { %454 = vmatmul.mubr.bf16.vlgmr.msra.gmra.mrb[0].mxu0 %v2772_v51  ;;  %v2542_v47 = vld [vmem:[%s3126_s1 + $0x338] sm:$0xff]  }
  0x28   : > { %590 = vmatmul.mubr.bf16.vlgmr.msra.gmra.mrb[0].mxu1 %v2753_v39  ;;  %2286 = vmatpush3.bf16.msra.mxu0 %v2481_v48  ;;  %v2541_v48 = vld [vmem:[%s3126_s1 + $0x3b8] sm:$0xff]  }
  0x29   : > { %894 = vmatprep.mubr.bf16.mxu1 %v2750_v36  ;;  %2308 = vmatpush3.bf16.msra.mxu1 %v2482_v49  ;;  %v2544_v49 = vld [vmem:[%s3126_s1 + $0x2c0] sm:$0xff]  }
  0x2a   : > { %2309 = vmatprep.subr.bf16.mxu1 %v2484_v52  ;;  %2287 = vmatprep.subr.bf16.mxu0 %v2483_v53  ;;  %v2546_v52 = vld [vmem:[%s3126_s1 + $0x280] sm:$0xff]  }
  0x2b   : > { %758 = vmatprep.mubr.bf16.mxu0 %v2770_v50  ;;  %v2545_v53 = vld [vmem:[%s3126_s1 + $0x100] sm:$0xff]  }
  0x2c   : > { %2288 = vmatpush3.bf16.msra.mxu0 %v2485_v55  ;;  %v2547_v55 = vld [vmem:[%s3126_s1 + $0x148] sm:$0xff]  }
  0x2d   : > { %2310 = vmatpush3.bf16.msra.mxu1 %v2486_v54  ;;  %2289 = vmatprep.subr.bf16.mxu0 %v2487_v57  ;;  %v2548_v54 = vld [vmem:[%s3126_s1 + $0x2c8] sm:$0xff]   ;;  %v2552_v57 = vld [vmem:[%s3126_s1 + $0x2d0] sm:$0xff]  }
  0x2e   : > { %2311 = vmatprep.subr.bf16.mxu1 %v2488_v56  ;;  %v2549_v56 = vld [vmem:[%s3126_s1 + $0x108] sm:$0xff]  }
  0x30   : > { %2290 = vmatpush3.bf16.msra.mxu0 %v2489_v59  ;;  %v2553_v59 = vld [vmem:[%s3126_s1 + $0x110] sm:$0xff]  }
  0x31   : > { %2312 = vmatpush3.bf16.msra.mxu1 %v2490_v58  ;;  %2291 = vmatprep.subr.bf16.mxu0 %v2491_v61  ;;  %v2551_v58 = vld [vmem:[%s3126_s1 + $0x150] sm:$0xff]   ;;  %v2555_v61 = vld [vmem:[%s3126_s1 + $0x158] sm:$0xff]  }
  0x32   : > { %2313 = vmatprep.subr.bf16.mxu1 %v2492_v60  ;;  %v2556_v60 = vld [vmem:[%s3126_s1 + $0x2d8] sm:$0xff]  }
  0x34   : > { %2292 = vmatpush3.bf16.msra.mxu0 %v2493_v63  ;;  %v2557_v63 = vld [vmem:[%s3126_s1 + $0x118] sm:$0xff]  }
  0x35   : > { %2314 = vmatpush3.bf16.msra.mxu1 %v2494_v62  ;;  %2293 = vmatprep.subr.bf16.mxu0 %v2495_v1  ;;  %v2558_v62 = vld [vmem:[%s3126_s1 + $0x298] sm:$0xff]   ;;  %v2559_v1 = vld [vmem:[%s3126_s1 + $0x160] sm:$0xff]  }
  0x36   : > { %2315 = vmatprep.subr.bf16.mxu1 %v2496_v0  ;;  %v2560_v0 = vld [vmem:[%s3126_s1 + $0x2e0] sm:$0xff]  }
  0x38   : > { %2294 = vmatpush3.bf16.msra.mxu0 %v2497_v3  ;;  %v2561_v3 = vld [vmem:[%s3126_s1 + $0x120] sm:$0xff]  }
  0x39   : > { %2316 = vmatpush3.bf16.msra.mxu1 %v2498_v2  ;;  %2295 = vmatprep.subr.bf16.mxu0 %v2499_v5  ;;  %v2562_v2 = vld [vmem:[%s3126_s1 + $0x2a0] sm:$0xff]   ;;  %v2563_v5 = vld [vmem:[%s3126_s1 + $0x168] sm:$0xff]  }
  0x3a   : > { %2317 = vmatprep.subr.bf16.mxu1 %v2500_v4  ;;  %v2564_v4 = vld [vmem:[%s3126_s1 + $0x2e8] sm:$0xff]  }
  0x3c   : > { %2296 = vmatpush3.bf16.msra.mxu0 %v2501_v7  ;;  %v2565_v7 = vld [vmem:[%s3126_s1 + $0x128] sm:$0xff]  }
  0x3d   : > { %2318 = vmatpush3.bf16.msra.mxu1 %v2502_v6  ;;  %2297 = vmatprep.subr.bf16.mxu0 %v2503_v9  ;;  %v2566_v6 = vld [vmem:[%s3126_s1 + $0x2a8] sm:$0xff]   ;;  %v2567_v9 = vld [vmem:[%s3126_s1 + $0x170] sm:$0xff]  }
  0x3e   : > { %2319 = vmatprep.subr.bf16.mxu1 %v2504_v8  ;;  %v2568_v8 = vld [vmem:[%s3126_s1 + $0x2f0] sm:$0xff]  }
  0x40   : > { %2298 = vmatpush3.bf16.msra.mxu0 %v2505_v11  ;;  %v2569_v11 = vld [vmem:[%s3126_s1 + $0x130] sm:$0xff]  }
  0x41   : > { %2320 = vmatpush3.bf16.msra.mxu1 %v2506_v10  ;;  %2299 = vmatprep.subr.bf16.mxu0 %v2507_v13  ;;  %v2570_v10 = vld [vmem:[%s3126_s1 + $0x2b0] sm:$0xff]   ;;  %v2571_v13 = vld [vmem:[%s3126_s1 + $0x178] sm:$0xff]  }
  0x42   : > { %2321 = vmatprep.subr.bf16.mxu1 %v2508_v12  ;;  %v2572_v12 = vld [vmem:[%s3126_s1 + $0x2f8] sm:$0xff]  }
  0x44   : > { %2300 = vmatpush3.bf16.msra.mxu0 %v2509_v15  ;;  %v1208_v15 = vld [vmem:[%s2739_s27 + $0x8] sm:$0x3c] }
  0x45   : > { %2322 = vmatpush3.bf16.msra.mxu1 %v2510_v14  ;;  %2329 = vmatprep.subr.bf16.mxu0 %v2511_v17  ;;  %v2574_v14 = vld [vmem:[%s3126_s1 + $0x2b8] sm:$0xff]   ;;  %v1207_v17 = vld [vmem:[%s2739_s27] sm:$0x3c] }
  0x46   : > { %2351 = vmatprep.subr.bf16.mxu1 %v2512_v16  ;;  %v1210_v16 = vpack.c.bf16 %v1208_v15, %v1208_v15 }
  0x47   : > { %759 = vmatmul.mubr.bf16.vlgmr.msra.gmra.mrb[4].mxu0 %v2772_v51 }
  0x48   : > { %895 = vmatmul.mubr.bf16.vlgmr.msra.gmra.mrb[4].mxu1 %v2753_v39  ;;  %2330 = vmatpush3.bf16.msra.mxu0 %v2513_v19  ;;  %v1209_v19 = vpack.c.bf16 %v1207_v17, %v1207_v17  ;;  %v2231_v17 = vld [vmem:[%s3127_s2] ss:$0 sm:$0xff] }
  0x49   : > { %2352 = vmatpush3.bf16.msra.mxu1 %v2514_v18  ;;  %1199 = vmatprep.mubr.bf16.mxu1 %v2750_v36  ;;  %v2532_v36 = vld [vmem:[%s3126_s1 + $0x368] sm:$0xff]   ;;  %v2573_v18 = vld [vmem:[%s3126_s1 + $0x138] sm:$0xff]  }
  0x4a   : > { %2353 = vmatprep.subr.bf16.mxu1 %v2516_v20  ;;  %2331 = vmatprep.subr.bf16.mxu0 %v2515_v21  ;;  %v1247_v20 = vrot.slane %v1210_v16, 1  ;;  %v2575_v21 = vld [vmem:[%s3126_s1 + $0x440] sm:$0xff]  }
  0x4b   : > { %1063 = vmatprep.mubr.bf16.mxu0 %v2770_v50  ;;  %v2543_v50 = vld [vmem:[%s3126_s1 + $0x140] sm:$0xff]  }
  0x4c   : > { %2332 = vmatpush3.bf16.msra.mxu0 %v2517_v23  ;;  %v2576_v23 = vld [vmem:[%s3126_s1 + $0x400] sm:$0xff]  }
  0x4d   : > { %2354 = vmatpush3.bf16.msra.mxu1 %v2518_v22  ;;  %2333 = vmatprep.subr.bf16.mxu0 %v2519_v25  ;;  %v1246_v22 = vrot.slane %v1209_v19, 1  ;;  %v2578_v25 = vld [vmem:[%s3126_s1 + $0x408] sm:$0xff]  }
  0x4e   : > { %2355 = vmatprep.subr.bf16.mxu1 %v2520_v24  ;;  %v2577_v24 = vld [vmem:[%s3126_s1 + $0x448] sm:$0xff]  }
  0x50   : > { %2334 = vmatpush3.bf16.msra.mxu0 %v2521_v27  ;;  %v2580_v27 = vld [vmem:[%s3126_s1 + $0x410] sm:$0xff]  }
  0x51   : > { %2356 = vmatpush3.bf16.msra.mxu1 %v2522_v26  ;;  %2335 = vmatprep.subr.bf16.mxu0 %v2523_v29  ;;  %v2579_v26 = vld [vmem:[%s3126_s1 + $0x450] sm:$0xff]   ;;  %v2582_v29 = vld [vmem:[%s3126_s1 + $0x418] sm:$0xff]  }
  0x52   : > { %2357 = vmatprep.subr.bf16.mxu1 %v2524_v28  ;;  %v2581_v28 = vld [vmem:[%s3126_s1 + $0x458] sm:$0xff]  }
  0x54   : > { %2336 = vmatpush3.bf16.msra.mxu0 %v2525_v31  ;;  %v2584_v31 = vld [vmem:[%s3126_s1 + $0x420] sm:$0xff]  }
  0x55   : > { %2358 = vmatpush3.bf16.msra.mxu1 %v2526_v30  ;;  %2337 = vmatprep.subr.bf16.mxu0 %v2527_v33  ;;  %v2583_v30 = vld [vmem:[%s3126_s1 + $0x460] sm:$0xff]   ;;  %v2586_v33 = vld [vmem:[%s3126_s1 + $0x428] sm:$0xff]  }
  0x56   : > { %2359 = vmatprep.subr.bf16.mxu1 %v2528_v32  ;;  %v2585_v32 = vld [vmem:[%s3126_s1 + $0x468] sm:$0xff]  }
  0x58   : > { %2338 = vmatpush3.bf16.msra.mxu0 %v2529_v35  ;;  %v2588_v35 = vld [vmem:[%s3126_s1 + $0x430] sm:$0xff]  }
  0x59   : > { %2360 = vmatpush3.bf16.msra.mxu1 %v2530_v34  ;;  %2339 = vmatprep.subr.bf16.mxu0 %v2531_v37  ;;  %v2587_v34 = vld [vmem:[%s3126_s1 + $0x470] sm:$0xff]   ;;  %v2590_v37 = vld [vmem:[%s3126_s1 + $0x438] sm:$0xff]  }
  0x5a   : > { %2361 = vmatprep.subr.bf16.mxu1 %v2532_v36  ;;  %v2589_v36 = vld [vmem:[%s3126_s1 + $0x478] sm:$0xff]  }
  0x5c   : > { %2340 = vmatpush3.bf16.msra.mxu0 %v2533_v40 }
  0x5d   : > { %2362 = vmatpush3.bf16.msra.mxu1 %v2534_v38  ;;  %2341 = vmatprep.subr.bf16.mxu0 %v2535_v42 }
  0x5e   : > { %2363 = vmatprep.subr.bf16.mxu1 %v2536_v41 }
  0x60   : > { %2342 = vmatpush3.bf16.msra.mxu0 %v2537_v44 }
  0x61   : > { %2364 = vmatpush3.bf16.msra.mxu1 %v2538_v43  ;;  %2343 = vmatprep.subr.bf16.mxu0 %v2539_v46 }
  0x62   : > { %2365 = vmatprep.subr.bf16.mxu1 %v2540_v45 }
  0x64   : > { %2344 = vmatpush3.bf16.msra.mxu0 %v2541_v48 }
  0x65   : > { %2366 = vmatpush3.bf16.msra.mxu1 %v2542_v47  ;;  %2373 = vmatprep.subr.bf16.mxu0 %v2543_v50 }
  0x66   : > { %2395 = vmatprep.subr.bf16.mxu1 %v2544_v49 }
  0x67   : > { %1064 = vmatmul.mubr.bf16.vlgmr.msra.gmra.mrb[8].mxu0 %v2772_v51  ;;  %v2554_v51 = vld [vmem:[%s3126_s1 + $0x290] sm:$0xff]  }
  0x68   : > { %1200 = vmatmul.mubr.bf16.vlgmr.msra.gmra.mrb[8].mxu1 %v2753_v39  ;;  %v2550_v39 = vld [vmem:[%s3126_s1 + $0x288] sm:$0xff]   ;;  %2374 = vmatpush3.bf16.msra.mxu0 %v2545_v53 }
  0x69   : > { %2396 = vmatpush3.bf16.msra.mxu1 %v2546_v52  ;;  %2375 = vmatprep.subr.bf16.mxu0 %v2547_v55 }
  0x6a   : > { %2397 = vmatprep.subr.bf16.mxu1 %v2548_v54  ;;  %1378 = vmatprep.mubr.bf16.mxu0 %v1247_v20 }
  0x6b   : > { %1548 = vmatprep.mubr.bf16.mxu1 %v1247_v20 }
  0x6c   : > { %2376 = vmatpush3.bf16.msra.mxu0 %v2549_v56 }
  0x6d   : > { %2398 = vmatpush3.bf16.msra.mxu1 %v2550_v39  ;;  %2377 = vmatprep.subr.bf16.mxu0 %v2551_v58 }
  0x6e   : > { %2399 = vmatprep.subr.bf16.mxu1 %v2552_v57 }
  0x70   : > { %2378 = vmatpush3.bf16.msra.mxu0 %v2553_v59 }
  0x71   : > { %2400 = vmatpush3.bf16.msra.mxu1 %v2554_v51  ;;  %2379 = vmatprep.subr.bf16.mxu0 %v2555_v61 }
  0x72   : > { %2401 = vmatprep.subr.bf16.mxu1 %v2556_v60 }
  0x74   : > { %2380 = vmatpush3.bf16.msra.mxu0 %v2557_v63 }
  0x75   : > { %2402 = vmatpush3.bf16.msra.mxu1 %v2558_v62  ;;  %2381 = vmatprep.subr.bf16.mxu0 %v2559_v1 }
  0x76   : > { %2403 = vmatprep.subr.bf16.mxu1 %v2560_v0 }
  0x78   : > { %2382 = vmatpush3.bf16.msra.mxu0 %v2561_v3 }
  0x79   : > { %2404 = vmatpush3.bf16.msra.mxu1 %v2562_v2  ;;  %2383 = vmatprep.subr.bf16.mxu0 %v2563_v5 }
  0x7a   : > { %2405 = vmatprep.subr.bf16.mxu1 %v2564_v4 }
  0x7c   : > { %2384 = vmatpush3.bf16.msra.mxu0 %v2565_v7 }
  0x7d   : > { %2406 = vmatpush3.bf16.msra.mxu1 %v2566_v6  ;;  %2385 = vmatprep.subr.bf16.mxu0 %v2567_v9 }
  0x7e   : > { %2407 = vmatprep.subr.bf16.mxu1 %v2568_v8 }
  0x80   : > { %2386 = vmatpush3.bf16.msra.mxu0 %v2569_v11 }
  0x81   : > { %2408 = vmatpush3.bf16.msra.mxu1 %v2570_v10  ;;  %2387 = vmatprep.subr.bf16.mxu0 %v2571_v13 }
  0x82   : > { %2409 = vmatprep.subr.bf16.mxu1 %v2572_v12 }
  0x84   : > { %2388 = vmatpush3.bf16.msra.mxu0 %v2573_v18 }
  0x85   : > { %2410 = vmatpush3.bf16.msra.mxu1 %v2574_v14  ;;  %2417 = vmatprep.subr.bf16.mxu0 %v2575_v21 }
  0x87   : > { %1379 = vmatmul.mubr.bf16.vlgmr.msra.gmra.mrb[12].mxu0 %v1246_v22 }
  0x88   : > { %1549 = vmatmul.mubr.bf16.vlgmr.msra.gmra.mrb[12].mxu1 %v1246_v22  ;;  %2418 = vmatpush3.bf16.msra.mxu0 %v2576_v23 }
  0x89   : > { %1718 = vmatprep.mubr.bf16.mxu0 %v1247_v20  ;;  %2419 = vmatprep.subr.bf16.mxu0 %v2577_v24 }
  0x8c   : > { %2420 = vmatpush3.bf16.msra.mxu0 %v2578_v25 }
  0x8d   : > { %2421 = vmatprep.subr.bf16.mxu0 %v2579_v26 }
  0x90   : > { %2422 = vmatpush3.bf16.msra.mxu0 %v2580_v27 }
  0x91   : > { %2423 = vmatprep.subr.bf16.mxu0 %v2581_v28 }
  0x94   : > { %2424 = vmatpush3.bf16.msra.mxu0 %v2582_v29 }
  0x95   : > { %2425 = vmatprep.subr.bf16.mxu0 %v2583_v30 }
  0x98   : > { %2426 = vmatpush3.bf16.msra.mxu0 %v2584_v31 }
  0x99   : > { %2427 = vmatprep.subr.bf16.mxu0 %v2585_v32 }
  0x9c   : > { %2428 = vmatpush3.bf16.msra.mxu0 %v2586_v33  ;;  %v2236_v33 = vld [vmem:[%s3127_s2 + $0x2] ss:$0 sm:$0xff] }
  0x9d   : > { %2429 = vmatprep.subr.bf16.mxu0 %v2587_v34 }
  0xa0   : > { %2430 = vmatpush3.bf16.msra.mxu0 %v2588_v35 }
  0xa1   : > { %2431 = vmatprep.subr.bf16.mxu0 %v2589_v36 }
  0xa4   : > { %2432 = vmatpush3.bf16.msra.mxu0 %v2590_v37 }
  0xa7   : > { %1719 = vmatmul.mubr.bf16.vlgmr.msra.gmra.mrb[16].mxu0 %v1246_v22  ;;  %v2234_v22 = vld [vmem:[%s3127_s2 + $0x1] ss:$0 sm:$0xff] }
  0xfa   : > { %v2257_v44 = vpop.f32.mrb[0].mxu0 }
  0xfb   : > { %v2279_v38 = vpop.f32.mrb[0].mxu1  ;;  %v2258_v45 = vpop.f32.mrb[1].mxu0 }
  0xfc   : > { %v2280_v40 = vpop.f32.mrb[1].mxu1  ;;  %v2259_v46 = vadd.f32 %v2258_v45, %v2257_v44  ;;  %v2260_v47 = vpop.f32.mrb[2].mxu0 }
  0xfd   : > { %v2281_v41 = vadd.f32 %v2280_v40, %v2279_v38  ;;  %v2282_v42 = vpop.f32.mrb[2].mxu1  ;;  %v2261_v48 = vpop.f32.mrb[3].mxu0 }
  0xfe   : > { %v2283_v43 = vpop.f32.mrb[3].mxu1 }
  0xff   : > { %v592_v49 = vadd.f32 %v2281_v41, %v2259_v46 }
 0x11a   : > { %v2301_v39 = vpop.f32.mrb[4].mxu0 }
 0x11b   : > { %v2323_v50 = vpop.f32.mrb[4].mxu1  ;;  %v2302_v56 = vpop.f32.mrb[5].mxu0 }
 0x11c   : > { %v2324_v52 = vpop.f32.mrb[5].mxu1  ;;  %v2303_v57 = vadd.f32 %v2302_v56, %v2301_v39  ;;  %v2304_v58 = vpop.f32.mrb[6].mxu0 }
 0x11d   : > { %v2325_v53 = vadd.f32 %v2324_v52, %v2323_v50  ;;  %v2326_v54 = vpop.f32.mrb[6].mxu1  ;;  %v2305_v51 = vpop.f32.mrb[7].mxu0 }
 0x11e   : > { %v2327_v55 = vpop.f32.mrb[7].mxu1 }
 0x11f   : > { %v897_v59 = vadd.f32 %v2325_v53, %v2303_v57 }
 0x13a   : > { %v2345_v1 = vpop.f32.mrb[8].mxu0 }
 0x13b   : > { %v2367_v60 = vpop.f32.mrb[8].mxu1  ;;  %v2346_v2 = vpop.f32.mrb[9].mxu0 }
 0x13c   : > { %v2368_v61 = vpop.f32.mrb[9].mxu1  ;;  %v2347_v3 = vadd.f32 %v2346_v2, %v2345_v1  ;;  %v2348_v4 = vpop.f32.mrb[10].mxu0 }
 0x13d   : > { %v2369_v62 = vadd.f32 %v2368_v61, %v2367_v60  ;;  %v2370_v63 = vpop.f32.mrb[10].mxu1  ;;  %v2349_v5 = vpop.f32.mrb[11].mxu0 }
 0x13e   : > { %v2371_v0 = vpop.f32.mrb[11].mxu1 }
 0x13f   : > { %v1202_v6 = vadd.f32 %v2369_v62, %v2347_v3 }
 0x15a   : > { %v2389_v11 = vpop.f32.mrb[12].mxu0 }
 0x15b   : > { %v2411_v7 = vpop.f32.mrb[12].mxu1  ;;  %v2390_v13 = vpop.f32.mrb[13].mxu0 }
 0x15c   : > { %v2412_v8 = vpop.f32.mrb[13].mxu1  ;;  %v2391_v15 = vadd.f32 %v2390_v13, %v2389_v11  ;;  %v2392_v16 = vpop.f32.mrb[14].mxu0 }
 0x15d   : > { %v2413_v9 = vadd.f32 %v2412_v8, %v2411_v7  ;;  %v2414_v10 = vpop.f32.mrb[14].mxu1  ;;  %v2393_v18 = vpop.f32.mrb[15].mxu0 }
 0x15e   : > { %v2415_v12 = vpop.f32.mrb[15].mxu1  ;;  %v1386_v19 = vadd.f32 %v2391_v15, %v592_v49 }
 0x15f   : > { %v1556_v14 = vadd.f32 %v2413_v9, %v897_v59 }
 0x160   : > { %v1734_v20 = vadd.f32 %v2231_v17, %v1386_v19 }
 0x161   : > { %v1749_v23 = vadd.f32 %v2234_v22, %v1556_v14 }
 0x162   : > { %v2232_v21 = vmul.f32 -1.442695, %v1734_v20 }
 0x164   : > { %2591 = vpow2.f32 %v2232_v21 }
 0x165   : > { %2593 = vtanh.f32 %v1749_v23 }
 0x16e   : > { %v2592_v24 = vpop.eup %2591 }
 0x16f   : > { %v1738_v25 = vadd.f32 1.0, %v2592_v24  ;;  %v2594_v26 = vpop.eup %2593 }
 0x171   : > { %2595 = vrcp.f32 %v1738_v25 }
 0x17a   : > { %v2433_v27 = vpop.f32.mrb[16].mxu0 }
 0x17b   : > { %v2596_v28 = vpop.eup %2595  ;;  %v2434_v29 = vpop.f32.mrb[17].mxu0 }
 0x17c   : > { %v1766_v30 = vmul.f32 %v2596_v28, %v2594_v26  ;;  %v2435_v31 = vadd.f32 %v2434_v29, %v2433_v27  ;;  %v2436_v32 = vpop.f32.mrb[18].mxu0 }
 0x17d   : > { %v2437_v34 = vpop.f32.mrb[19].mxu0 }
 0x17e   : > { %v1726_v35 = vadd.f32 %v2435_v31, %v1202_v6 }
 0x180   : > { %v1759_v36 = vadd.f32 %v2236_v33, %v1726_v35 }
 0x182   : > { %v2237_v37 = vmul.f32 -1.442695, %v1759_v36 }
 0x184   : > { %2597 = vpow2.f32 %v2237_v37 }
 0x185   : > { %2599 = vtanh.f32 %v1766_v30 }
 0x18e   : > { %v2598_v38 = vpop.eup %2597 }
 0x18f   : > { %v1763_v40 = vadd.f32 1.0, %v2598_v38  ;;  %v2600_v41 = vpop.eup %2599 }
 0x191   : > { %2601 = vrcp.f32 %v1763_v40 }
 0x19b   : > { %v2602_v42 = vpop.eup %2601 }
 0x19c   : > { %v1768_v43 = vmul.f32 %v2602_v42, %v2600_v41 }
 0x19e   : > { %1769 = vst [vmem:[%s168_s22] sm:$0xf] %v1768_v43 }
 0x19f PF: > { %s13_s12 = sadd.s32 1, %s2609_s12  }
 0x1a0   : > { %p10_p4 = scmp.ge.s32.totalorder %s13_s12, 4  }
 0x1a2   :  { %12 = sbr.rel (!%p10_p4) target bundleno = 1 (0x1), region = 72 }

// kernel: bcdunet_forward.30
= control target key start
LH: loop header
LB: loop body
LE: loop exit
PB: predicated region body
PF: predicated region fallthrough
CT: control target
= control target key end

     0   :  { %s1332_s18 = smov 0   ;;  %s1573_s0 = inlined_call_operand.vmem [shape: f32[2,6,128], index: 0, kind: input, shape index: {}]   ;;  %s1574_s1 = inlined_call_operand.vmem [shape: bf16[3,128,128], index: 1, kind: input, shape index: {}]   ;;  %s1575_s2 = inlined_call_operand.vmem [shape: f32[1,128], index: 2, kind: input, shape index: {}]   ;;  %s1576_s3 = inlined_call_operand.vmem [shape: bf16[3,128,128], index: 3, kind: input, shape index: {}]   ;;  %s1577_s4 = inlined_call_operand.vmem [shape: f32[1,128], index: 4, kind: input, shape index: {}]   ;;  %s1578_s5 = inlined_call_operand.vmem [shape: f32[2,4,128], index: 5, kind: output, shape index: {}]  }
   0x1 LB: > { %s937_s19 = sadd.s32 4294967295, %s1298_s18   ;;  %p941_p0 = scmp.ge.s32.totalorder %s1298_s18, 1  ;;  %s1298_s18 = sphi %s1332_s18, %s15_s18  }
   0x2   : > { %p186_p1 = scmp.lt.s32.totalorder %s1298_s18, 3 }
   0x4   : > { %p187_p2 = pnand %p941_p0, %p186_p1 }
   0x5   : > { %v1244_v0 = vld [vmem:[%s1574_s1 + $0x40] sm:$0xff] (!%p187_p2)   ;;  %v1300_v1 = vmov (!%p187_p2), 0.0   ;;  %v1246_v3 = vld [vmem:[%s1574_s1 + $0x48] sm:$0xff] (!%p187_p2)   ;;  %vm1301_vm0 = vmmov (!%p187_p2), 0   ;;  %v1248_v5 = vld [vmem:[%s1574_s1 + $0x50] sm:$0xff] (!%p187_p2)   ;;  %p212_p3 = scmp.lt.s32.totalorder (!%p187_p2), %s937_s19, 1 }
   0x6   : > { %190 = sbr.rel (%p187_p2) target bundleno = 549 (0x225), region = 40  ;;  %1114 = vmatprep.subr.bf16.mxu0 (!%p187_p2), %v1300_v1  ;;  %551 = vst [vmem:[#allocation2] sm:$0x3f] (!%p187_p2), %v1300_v1  ;;  %1134 = vmatprep.subr.bf16.mxu1 (!%p187_p2), %v1300_v1  ;;  %v1245_v2 = vld [vmem:[%s1574_s1] sm:$0xff] (!%p187_p2)   ;;  %v1247_v4 = vld [vmem:[%s1574_s1 + $0x8] sm:$0xff] (!%p187_p2)   ;;  %v1249_v6 = vld [vmem:[%s1574_s1 + $0x10] sm:$0xff] (!%p187_p2)  }
   0x7   : > { %1115 = vmatpush3.bf16.msra.mxu0 (!%p187_p2), %v1244_v0  ;;  %1130 = vmatprep.mubr.msk.bf16.mxu0 (!%p187_p2), %vm1301_vm0, %v1300_v1  ;;  %v1250_v7 = vld [vmem:[%s1574_s1 + $0x58] sm:$0xff] (!%p187_p2)   ;;  %v1252_v9 = vld [vmem:[%s1574_s1 + $0x60] sm:$0xff] (!%p187_p2)   ;;  %v1254_v11 = vld [vmem:[%s1574_s1 + $0x68] sm:$0xff] (!%p187_p2)  }
   0x8   : > { %1135 = vmatpush3.bf16.msra.mxu1 (!%p187_p2), %v1245_v2  ;;  %1116 = vmatprep.subr.bf16.mxu0 (!%p187_p2), %v1300_v1  ;;  %v1251_v8 = vld [vmem:[%s1574_s1 + $0x18] sm:$0xff] (!%p187_p2)   ;;  %v1253_v10 = vld [vmem:[%s1574_s1 + $0x20] sm:$0xff] (!%p187_p2)   ;;  %v1255_v12 = vld [vmem:[%s1574_s1 + $0x28] sm:$0xff] (!%p187_p2)  }
   0x9   : > { %1136 = vmatprep.subr.bf16.mxu1 (!%p187_p2), %v1300_v1  ;;  %1150 = vmatprep.mubr.msk.bf16.mxu1 (!%p187_p2), %vm1301_vm0, %v1300_v1  ;;  %v1256_v13 = vld [vmem:[%s1574_s1 + $0x70] sm:$0xff] (!%p187_p2)   ;;  %v1258_v15 = vld [vmem:[%s1574_s1 + $0x78] sm:$0xff] (!%p187_p2)   ;;  %v1260_v19 = vld [vmem:[%s1574_s1 + $0x80] sm:$0xff] (!%p187_p2)  }
   0xa   : > { %v1257_v14 = vld [vmem:[%s1574_s1 + $0x30] sm:$0xff] (!%p187_p2)   ;;  %v1259_v17 = vld [vmem:[%s1574_s1 + $0x38] sm:$0xff] (!%p187_p2)   ;;  %v1261_v22 = vld [vmem:[%s1574_s1 + $0x88] sm:$0xff] (!%p187_p2)  }
   0xb   : > { %1117 = vmatpush3.bf16.msra.mxu0 (!%p187_p2), %v1246_v3  ;;  %v1262_v23 = vld [vmem:[%s1574_s1 + $0x90] sm:$0xff] (!%p187_p2)   ;;  %v1263_v24 = vld [vmem:[%s1574_s1 + $0x98] sm:$0xff] (!%p187_p2)   ;;  %v1264_v25 = vld [vmem:[%s1574_s1 + $0xa0] sm:$0xff] (!%p187_p2)  }
   0xc   : > { %1137 = vmatpush3.bf16.msra.mxu1 (!%p187_p2), %v1247_v4  ;;  %1118 = vmatprep.subr.bf16.mxu0 (!%p187_p2), %v1300_v1  ;;  %v1265_v26 = vld [vmem:[%s1574_s1 + $0xa8] sm:$0xff] (!%p187_p2)   ;;  %v1266_v27 = vld [vmem:[%s1574_s1 + $0xb0] sm:$0xff] (!%p187_p2)   ;;  %v1267_v28 = vld [vmem:[%s1574_s1 + $0xb8] sm:$0xff] (!%p187_p2)  }
   0xd   : > { %1138 = vmatprep.subr.bf16.mxu1 %v1300_v1  ;;  %s1580_s19 = smov (!%p212_p3, %s937_s19), 1  ;;  %v1268_v31 = vld [vmem:[%s1576_s3 + $0x40] sm:$0xff]   ;;  %v1270_v33 = vld [vmem:[%s1576_s3 + $0x48] sm:$0xff]   ;;  %v1272_v35 = vld [vmem:[%s1576_s3 + $0x50] sm:$0xff]  }
   0xe   : > { %s942_s17 = sshll.u32 %s1580_s19, 3  ;;  %v1269_v32 = vld [vmem:[%s1576_s3] sm:$0xff]   ;;  %v1271_v34 = vld [vmem:[%s1576_s3 + $0x8] sm:$0xff]   ;;  %v1273_v36 = vld [vmem:[%s1576_s3 + $0x10] sm:$0xff]   ;;  %s943_s7 = sshll.u32 %s1580_s19, 2 }
   0xf   : > { %1119 = vmatpush3.bf16.msra.mxu0 %v1248_v5  ;;  %s1403_s24 = scalar_lea.vmem %s1573_s0, %s942_s17  ;;  %v1274_v37 = vld [vmem:[%s1576_s3 + $0x58] sm:$0xff]   ;;  %v1276_v39 = vld [vmem:[%s1576_s3 + $0x60] sm:$0xff]   ;;  %v1278_v41 = vld [vmem:[%s1576_s3 + $0x68] sm:$0xff]   ;;  %s219_s10 = scalar_lea.vmem %s1578_s5, %s943_s7 }
  0x10   : > { %1139 = vmatpush3.bf16.msra.mxu1 %v1249_v6  ;;  %1120 = vmatprep.subr.bf16.mxu0 %v1300_v1  ;;  %v239_v16 = vld [vmem:[%s1403_s24 + $0x1] sm:$0xf]  ;;  %v1275_v38 = vld [vmem:[%s1576_s3 + $0x18] sm:$0xff]   ;;  %v1279_v42 = vld [vmem:[%s1576_s3 + $0x28] sm:$0xff]  }
  0x11   : > { %1140 = vmatprep.subr.bf16.mxu1 %v1300_v1  ;;  %v221_v18 = vld [vmem:[%s1403_s24] sm:$0xf]  ;;  %v240_v20 = vpack.c.bf16 %v239_v16, %v239_v16  ;;  %v1280_v43 = vld [vmem:[%s1576_s3 + $0x70] sm:$0xff]   ;;  %v1282_v45 = vld [vmem:[%s1576_s3 + $0x78] sm:$0xff]  }
  0x12   : > { %v222_v21 = vpack.c.bf16 %v221_v18, %v221_v18  ;;  %v434_v29 = vld [vmem:[%s1403_s24 + $0x2] sm:$0xf]  ;;  %v1281_v44 = vld [vmem:[%s1576_s3 + $0x30] sm:$0xff]   ;;  %v1283_v46 = vld [vmem:[%s1576_s3 + $0x38] sm:$0xff]  }
  0x13   : > { %1121 = vmatpush3.bf16.msra.mxu0 %v1250_v7  ;;  %v435_v30 = vpack.c.bf16 %v434_v29, %v434_v29  ;;  %v1277_v40 = vld [vmem:[%s1576_s3 + $0x20] sm:$0xff]   ;;  %v1285_v6 = vld [vmem:[%s1576_s3 + $0x88] sm:$0xff]   ;;  %v1286_v7 = vld [vmem:[%s1576_s3 + $0x90] sm:$0xff]  }
  0x14   : > { %1141 = vmatpush3.bf16.msra.mxu1 %v1251_v8  ;;  %1122 = vmatprep.subr.bf16.mxu0 %v1300_v1  ;;  %v1000_v57 = vld [vmem:[%s1575_s2] ss:$0 sm:$0xff]  ;;  %v1287_v8 = vld [vmem:[%s1576_s3 + $0x98] sm:$0xff]  }
  0x15   : > { %1142 = vmatprep.subr.bf16.mxu1 %v1300_v1  ;;  %v1284_v3 = vld [vmem:[%s1576_s3 + $0x80] sm:$0xff]  }
  0x17   : > { %1123 = vmatpush3.bf16.msra.mxu0 %v1252_v9  ;;  %v1288_v9 = vld [vmem:[%s1576_s3 + $0xa0] sm:$0xff]  }
  0x18   : > { %1143 = vmatpush3.bf16.msra.mxu1 %v1253_v10  ;;  %1124 = vmatprep.subr.bf16.mxu0 %v1300_v1  ;;  %v1289_v10 = vld [vmem:[%s1576_s3 + $0xa8] sm:$0xff]  }
  0x19   : > { %1144 = vmatprep.subr.bf16.mxu1 %v1300_v1 }
  0x1b   : > { %1125 = vmatpush3.bf16.msra.mxu0 %v1254_v11  ;;  %v1290_v11 = vld [vmem:[%s1576_s3 + $0xb0] sm:$0xff]  }
  0x1c   : > { %1145 = vmatpush3.bf16.msra.mxu1 %v1255_v12  ;;  %1126 = vmatprep.subr.bf16.mxu0 %v1300_v1  ;;  %v1291_v12 = vld [vmem:[%s1576_s3 + $0xb8] sm:$0xff]  }
  0x1d   : > { %1146 = vmatprep.subr.bf16.mxu1 %v1300_v1 }
  0x1f   : > { %1127 = vmatpush3.bf16.msra.mxu0 %v1256_v13 }
  0x20   : > { %1147 = vmatpush3.bf16.msra.mxu1 %v1257_v14  ;;  %1128 = vmatprep.subr.bf16.mxu0 %v1300_v1 }
  0x21   : > { %1148 = vmatprep.subr.bf16.mxu1 %v1300_v1 }
  0x23   : > { %1129 = vmatpush3.bf16.msra.mxu0 %v1258_v15 }
  0x24   : > { %1149 = vmatpush3.bf16.msra.mxu1 %v1259_v17  ;;  %1154 = vmatprep.subr.bf16.mxu0 %v1300_v1 }
  0x25   : > { %1174 = vmatprep.subr.bf16.mxu1 %v1300_v1 }
  0x26   : > { %1131 = vmatmul.mubr.bf16.vlgmr.msra.gmra.mrb[0].mxu0 %v240_v20 }
  0x27   : > { %1151 = vmatmul.mubr.bf16.vlgmr.msra.gmra.mrb[0].mxu1 %v222_v21  ;;  %1155 = vmatpush3.bf16.msra.mxu0 %v1260_v19 }
  0x28   : > { %1156 = vmatprep.subr.bf16.mxu0 %v1300_v1  ;;  %1170 = vmatprep.mubr.msk.bf16.mxu0 %vm1301_vm0, %v1300_v1 }
  0x29   : > { %1190 = vmatprep.mubr.msk.bf16.mxu1 %vm1301_vm0, %v1300_v1  ;;  %1175 = vmatpush3.bf16.msra.mxu1 %v1268_v31 }
  0x2a   : > { %1176 = vmatprep.subr.bf16.mxu1 %v1300_v1 }
  0x2b   : > { %1157 = vmatpush3.bf16.msra.mxu0 %v1261_v22 }
  0x2c   : > { %1158 = vmatprep.subr.bf16.mxu0 %v1300_v1 }
  0x2d   : > { %1177 = vmatpush3.bf16.msra.mxu1 %v1270_v33 }
  0x2e   : > { %1178 = vmatprep.subr.bf16.mxu1 %v1300_v1 }
  0x2f   : > { %1159 = vmatpush3.bf16.msra.mxu0 %v1262_v23 }
  0x30   : > { %1160 = vmatprep.subr.bf16.mxu0 %v1300_v1 }
  0x31   : > { %1179 = vmatpush3.bf16.msra.mxu1 %v1272_v35 }
  0x32   : > { %1180 = vmatprep.subr.bf16.mxu1 %v1300_v1 }
  0x33   : > { %1161 = vmatpush3.bf16.msra.mxu0 %v1263_v24 }
  0x34   : > { %1162 = vmatprep.subr.bf16.mxu0 %v1300_v1 }
  0x35   : > { %1181 = vmatpush3.bf16.msra.mxu1 %v1274_v37 }
  0x36   : > { %1182 = vmatprep.subr.bf16.mxu1 %v1300_v1 }
  0x37   : > { %1163 = vmatpush3.bf16.msra.mxu0 %v1264_v25  ;;  %v1057_v25 = vld [vmem:[%s1577_s4] ss:$0 sm:$0xff] }
  0x38   : > { %1164 = vmatprep.subr.bf16.mxu0 %v1300_v1 }
  0x39   : > { %1183 = vmatpush3.bf16.msra.mxu1 %v1276_v39 }
  0x3a   : > { %1184 = vmatprep.subr.bf16.mxu1 %v1300_v1 }
  0x3b   : > { %1165 = vmatpush3.bf16.msra.mxu0 %v1265_v26 }
  0x3c   : > { %1166 = vmatprep.subr.bf16.mxu0 %v1300_v1 }
  0x3d   : > { %1185 = vmatpush3.bf16.msra.mxu1 %v1278_v41 }
  0x3e   : > { %1186 = vmatprep.subr.bf16.mxu1 %v1300_v1 }
  0x3f   : > { %1167 = vmatpush3.bf16.msra.mxu0 %v1266_v27 }
  0x40   : > { %1168 = vmatprep.subr.bf16.mxu0 %v1300_v1 }
  0x41   : > { %1187 = vmatpush3.bf16.msra.mxu1 %v1280_v43 }
  0x42   : > { %1188 = vmatprep.subr.bf16.mxu1 %v1300_v1 }
  0x43   : > { %1169 = vmatpush3.bf16.msra.mxu0 %v1267_v28 }
  0x44   : > { %1194 = vmatprep.subr.bf16.mxu0 %v1300_v1 }
  0x45   : > { %1189 = vmatpush3.bf16.msra.mxu1 %v1282_v45 }
  0x46   : > { %1171 = vmatmul.mubr.bf16.vlgmr.msra.gmra.mrb[4].mxu0 %v435_v30  ;;  %1214 = vmatprep.subr.bf16.mxu1 %v1300_v1 }
  0x47   : > { %1210 = vmatprep.mubr.msk.bf16.mxu0 %vm1301_vm0, %v1300_v1  ;;  %1195 = vmatpush3.bf16.msra.mxu0 %v1269_v32 }
  0x48   : > { %1196 = vmatprep.subr.bf16.mxu0 %v1300_v1 }
  0x4b   : > { %1197 = vmatpush3.bf16.msra.mxu0 %v1271_v34 }
  0x4c   : > { %1198 = vmatprep.subr.bf16.mxu0 %v1300_v1 }
  0x4f   : > { %1199 = vmatpush3.bf16.msra.mxu0 %v1273_v36 }
  0x50   : > { %1200 = vmatprep.subr.bf16.mxu0 %v1300_v1 }
  0x53   : > { %1201 = vmatpush3.bf16.msra.mxu0 %v1275_v38 }
  0x54   : > { %1202 = vmatprep.subr.bf16.mxu0 %v1300_v1 }
  0x57   : > { %1203 = vmatpush3.bf16.msra.mxu0 %v1277_v40 }
  0x58   : > { %1204 = vmatprep.subr.bf16.mxu0 %v1300_v1 }
  0x5b   : > { %1205 = vmatpush3.bf16.msra.mxu0 %v1279_v42 }
  0x5c   : > { %1206 = vmatprep.subr.bf16.mxu0 %v1300_v1 }
  0x5f   : > { %1207 = vmatpush3.bf16.msra.mxu0 %v1281_v44 }
  0x60   : > { %1208 = vmatprep.subr.bf16.mxu0 %v1300_v1 }
  0x63   : > { %1209 = vmatpush3.bf16.msra.mxu0 %v1283_v46 }
  0xf9   : > { %v340_v47 = vpop.f32.mrb[0].mxu0 }
  0xfa   : > { %v1132_v48 = vpop.f32.mrb[1].mxu0  ;;  %v428_v49 = vpop.f32.mrb[0].mxu1 }
  0xfb   : > { %v429_v50 = vadd.f32 %v428_v49, %v340_v47  ;;  %v343_v51 = vpop.f32.mrb[2].mxu0  ;;  %v1152_v52 = vpop.f32.mrb[1].mxu1 }
  0xfc   : > { %v1133_v53 = vpop.f32.mrb[3].mxu0  ;;  %v431_v54 = vpop.f32.mrb[2].mxu1 }
  0xfd   : > { %v1153_v55 = vpop.f32.mrb[3].mxu1 }
 0x119   : > { %v535_v56 = vpop.f32.mrb[4].mxu0 }
 0x11a   : > { %v541_v58 = vadd.f32 %v535_v56, %v429_v50  ;;  %v1172_v59 = vpop.f32.mrb[5].mxu0 }
 0x11b   : > { %v538_v60 = vpop.f32.mrb[6].mxu0 }
 0x11c   : > { %v549_v61 = vadd.f32 %v1000_v57, %v541_v58  ;;  %v1173_v62 = vpop.f32.mrb[7].mxu0 }
 0x11e   : > { %v550_v63 = vmax.f32 %v549_v61, 0.0 }
 0x120   : > { %552 = vst [vmem:[#allocation2 + $0x1] sm:$0xf] %v550_v63 }
 0x127   : > { %v571_v0 = vld [vmem:[#allocation2 + $0x1] sm:$0xf] }
 0x128   : > { %v553_v2 = vld [vmem:[#allocation2] sm:$0xf]  ;;  %v572_v4 = vpack.c.bf16 %v571_v0, %v571_v0 }
 0x129   : > { %v554_v5 = vpack.c.bf16 %v553_v2, %v553_v2  ;;  %v766_v13 = vld [vmem:[#allocation2 + $0x2] sm:$0xf] }
 0x12a   : > { %1191 = vmatmul.mubr.bf16.vlgmr.msra.gmra.mrb[4].mxu1 %v572_v4  ;;  %v767_v14 = vpack.c.bf16 %v766_v13, %v766_v13 }
 0x12b   : > { %1211 = vmatmul.mubr.bf16.vlgmr.msra.gmra.mrb[8].mxu0 %v554_v5  ;;  %1215 = vmatpush3.bf16.msra.mxu1 %v1284_v3 }
 0x12c   : > { %1230 = vmatprep.mubr.msk.bf16.mxu1 %vm1301_vm0, %v1300_v1  ;;  %1216 = vmatprep.subr.bf16.mxu1 %v1300_v1 }
 0x12f   : > { %1217 = vmatpush3.bf16.msra.mxu1 %v1285_v6 }
 0x130   : > { %1218 = vmatprep.subr.bf16.mxu1 %v1300_v1 }
 0x133   : > { %1219 = vmatpush3.bf16.msra.mxu1 %v1286_v7 }
 0x134   : > { %1220 = vmatprep.subr.bf16.mxu1 %v1300_v1 }
 0x137   : > { %1221 = vmatpush3.bf16.msra.mxu1 %v1287_v8 }
 0x138   : > { %1222 = vmatprep.subr.bf16.mxu1 %v1300_v1 }
 0x13b   : > { %1223 = vmatpush3.bf16.msra.mxu1 %v1288_v9 }
 0x13c   : > { %1224 = vmatprep.subr.bf16.mxu1 %v1300_v1 }
 0x13f   : > { %1225 = vmatpush3.bf16.msra.mxu1 %v1289_v10 }
 0x140   : > { %1226 = vmatprep.subr.bf16.mxu1 %v1300_v1 }
 0x143   : > { %1227 = vmatpush3.bf16.msra.mxu1 %v1290_v11 }
 0x144   : > { %1228 = vmatprep.subr.bf16.mxu1 %v1300_v1 }
 0x147   : > { %1229 = vmatpush3.bf16.msra.mxu1 %v1291_v12 }
 0x14a   : > { %1231 = vmatmul.mubr.bf16.vlgmr.msra.gmra.mrb[8].mxu1 %v767_v14 }
 0x1fd   : > { %v672_v15 = vpop.f32.mrb[4].mxu1 }
 0x1fe   : > { %v760_v16 = vpop.f32.mrb[8].mxu0  ;;  %v1192_v18 = vpop.f32.mrb[5].mxu1 }
 0x1ff   : > { %v761_v17 = vadd.f32 %v760_v16, %v672_v15  ;;  %v1212_v19 = vpop.f32.mrb[9].mxu0  ;;  %v675_v20 = vpop.f32.mrb[6].mxu1 }
 0x200   : > { %v763_v21 = vpop.f32.mrb[10].mxu0  ;;  %v1193_v22 = vpop.f32.mrb[7].mxu1 }
 0x201   : > { %v1213_v23 = vpop.f32.mrb[11].mxu0 }
 0x21d   : > { %v867_v24 = vpop.f32.mrb[8].mxu1 }
 0x21e   : > { %v873_v1 = vadd.f32 %v867_v24, %v761_v17  ;;  %v1232_v26 = vpop.f32.mrb[9].mxu1 }
 0x21f   : > { %v870_v27 = vpop.f32.mrb[10].mxu1 }
 0x220   : > { %v881_v28 = vadd.f32 %v1057_v25, %v873_v1  ;;  %v1233_v29 = vpop.f32.mrb[11].mxu1 }
 0x222   : > { %v882_v30 = vmax.f32 %v881_v28, 0.0 }
 0x224   : > { %883 = vst [vmem:[%s219_s10] sm:$0xf] %v882_v30 }
 0x225 PF: > { %s15_s18 = sadd.s32 1, %s1298_s18  }
 0x226   : > { %p12_p4 = scmp.ge.s32.totalorder %s15_s18, 4  }
 0x228   :  { %14 = sbr.rel (!%p12_p4) target bundleno = 1 (0x1), region = 74 }

// kernel: bcdunet_forward.31
= control target key start
LH: loop header
LB: loop body
LE: loop exit
PB: predicated region body
PF: predicated region fallthrough
CT: control target
= control target key end

     0   :  { %vm52_vm0 = vcmask 261120   ;;  %vm112_vm1 = vcmask 523264   ;;  %s191_s1 = inlined_call_operand.vmem [shape: bf16[32,64], index: 1, kind: input, shape index: {}]   ;;  %s192_s0 = inlined_call_operand.vmem [shape: bf16[32,32], index: 0, kind: input, shape index: {}]   ;;  %s193_s2 = inlined_call_operand.vmem [shape: f32[1,64], index: 2, kind: input, shape index: {}]   ;;  %s194_s3 = inlined_call_operand.vmem [shape: f32[32,64], index: 3, kind: output, shape index: {}]  }
   0x1   :  { %v140_v0 = vld [vmem:[%s191_s1] sm:$0xff]   ;;  %v141_v1 = vld [vmem:[%s191_s1 + $0x8] sm:$0xff]  }
   0x2   :  { %132 = vmatprep.subr.bf16.mxu0 %v140_v0  ;;  %v142_v2 = vld [vmem:[%s192_s0] sm:$0xff]   ;;  %v143_v3 = vld [vmem:[%s192_s0 + $0x8] sm:$0xff]  }
   0x3   :  { %133 = vmatpush3.bf16.msra.mxu0 %v140_v0  ;;  %136 = vmatprep.mubr.msk.bf16.mxu0 %vm52_vm0, %v142_v2  ;;  %v121_v4 = vld [vmem:[%s193_s2] ss:$0 sm:$0xff] }
   0x4   :  { %134 = vmatprep.subr.bf16.mxu0 %v141_v1 }
   0x7   :  { %135 = vmatpush3.bf16.msra.mxu0 %v141_v1 }
   0xa   :  { %137 = vmatmul.mubr.msk.bf16.vlgmr.msra.gmra.mrb[0].mxu0 %vm52_vm0, %v143_v3 }
  0xdd   :  { %v138_v5 = vpop.f32.mrb[0].mxu0 }
  0xde   :  { %v102_v6 = vadd.f32 %v138_v5, %v121_v4  ;;  %v93_v7 = vpop.f32.mrb[1].mxu0 }
  0xdf   :  { %v94_v8 = vadd.f32 %v121_v4, %v93_v7  ;;  %v139_v9 = vpop.f32.mrb[2].mxu0 }
  0xe0   :  { %v110_v10 = vmax.f32 %v102_v6, 0.0  ;;  %v105_v11 = vadd.f32 %v139_v9, %v121_v4  ;;  %v96_v12 = vpop.f32.mrb[3].mxu0 }
  0xe1   :  { %v108_v13 = vmax.f32 %v94_v8, 0.0  ;;  %v97_v14 = vadd.f32 %v121_v4, %v96_v12 }
  0xe2   :  { %115 = vst.msk [vmem:[%s194_s3 + $0x10] sm:$0xff] %vm112_vm1, %v110_v10  ;;  %v111_v15 = vmax.f32 %v105_v11, 0.0 }
  0xe3   :  { %113 = vst.msk [vmem:[%s194_s3] sm:$0xff] %vm112_vm1, %v108_v13  ;;  %v109_v16 = vmax.f32 %v97_v14, 0.0 }
  0xe4   :  { %116 = vst.msk [vmem:[%s194_s3 + $0x18] sm:$0xff] %vm112_vm1, %v111_v15 }
  0xe5   :  { %114 = vst.msk [vmem:[%s194_s3 + $0x8] sm:$0xff] %vm112_vm1, %v109_v16 }

// kernel: tile.267
= control target key start
LH: loop header
LB: loop body
LE: loop exit
PB: predicated region body
PF: predicated region fallthrough
CT: control target
= control target key end

     0   :  { %s67_s10 = smov 112   ;;  %s68_s11 = smov 80   ;;  %vm3_vm0 = vcmask 130048   ;;  %vm9_vm1 = vcmask 1048448   ;;  %vm15_vm2 = vcmask 917248   ;;  %vm21_vm3 = vcmask 786048   ;;  %s111_s0 = inlined_call_operand.vmem [shape: f32[8,16], index: 0, kind: input, shape index: {}]   ;;  %s112_s1 = inlined_call_operand.vmem [shape: f32[1,1,128], index: 1, kind: output, shape index: {}]  }
   0x1   :  { %v53_v0 = vld [vmem:[%s111_s0 + $0x7] sm:$0x1]   ;;  %v55_v1 = vld [vmem:[%s111_s0 + $0x5] sm:$0x1]   ;;  %v54_v2 = vld [vmem:[%s111_s0 + $0x6] sm:$0x1]  }
   0x2   :  { %7 = vrot.lane.b32.xlu0 %v53_v0, %s67_s10  ;;  %19 = vrot.lane.b32.xlu1 %v55_v1, %s68_s11  ;;  %v56_v3 = vld [vmem:[%s111_s0 + $0x4] sm:$0x1]   ;;  %v2_v4 = vld [vmem:[%s111_s0] sm:$0x1]   ;;  %s69_s18 = smov 96   ;;  %s70_s19 = smov 64  }
   0x3   :  { %4 = vst.msk [vmem:[#allocation0] sm:$0x1] %vm3_vm0, %v2_v4   ;;  %v57_v5 = vld [vmem:[%s111_s0 + $0x3] sm:$0x1]   ;;  %v58_v6 = vld [vmem:[%s111_s0 + $0x2] sm:$0x1]  }
   0x4   :  { %s71_s24 = smov 48   ;;  %s72_s25 = smov 32   ;;  %v59_v7 = vld [vmem:[%s111_s0 + $0x1] sm:$0x1]   ;;  %vm27_vm4 = vcmask 654848   ;;  %vm33_vm5 = vcmask 523648  }
   0x5   :  { %s73_s0 = smov 16   ;;  %vm39_vm6 = vcmask 392448   ;;  %vm45_vm7 = vcmask 261248  }
   0x6   :  { %13 = vrot.lane.b32.xlu0 %v54_v2, %s69_s18  ;;  %25 = vrot.lane.b32.xlu1 %v56_v3, %s70_s19 }
   0xa   :  { %31 = vrot.lane.b32.xlu0 %v57_v5, %s71_s24  ;;  %37 = vrot.lane.b32.xlu1 %v58_v6, %s72_s25 }
   0xe   :  { %43 = vrot.lane.b32.xlu0 %v59_v7, %s73_s0 }
  0x74   :  { %v8_v8 = vpop.permute.xlu0 %7   ;;  %v20_v9 = vpop.permute.xlu1 %19  }
  0x75   :  { %10 = vst.msk [vmem:[#allocation0] sm:$0x1] %vm9_vm1, %v8_v8  }
  0x78   :  { %v14_v10 = vpop.permute.xlu0 %13   ;;  %v26_v11 = vpop.permute.xlu1 %25  }
  0x79   :  { %16 = vst.msk [vmem:[#allocation0] sm:$0x1] %vm15_vm2, %v14_v10  }
  0x7a   :  { %22 = vst.msk [vmem:[#allocation0] sm:$0x1] %vm21_vm3, %v20_v9  }
  0x7b   :  { %28 = vst.msk [vmem:[#allocation0] sm:$0x1] %vm27_vm4, %v26_v11  }
  0x7c   :  { %v32_v12 = vpop.permute.xlu0 %31   ;;  %v38_v13 = vpop.permute.xlu1 %37  }
  0x7d   :  { %34 = vst.msk [vmem:[#allocation0] sm:$0x1] %vm33_vm5, %v32_v12  }
  0x7e   :  { %40 = vst.msk [vmem:[#allocation0] sm:$0x1] %vm39_vm6, %v38_v13  }
  0x80   :  { %v44_v14 = vpop.permute.xlu0 %43  }
  0x81   :  { %46 = vst.msk [vmem:[#allocation0] sm:$0x1] %vm45_vm7, %v44_v14  }
  0x88   :  { %v50_v15 = vld [vmem:[#allocation0] sm:$0x1] }
  0x89   :  { %52 = vst [vmem:[%s112_s1] sm:$0x1] %v50_v15 }

// kernel: bcdunet_forward.32
= control target key start
LH: loop header
LB: loop body
LE: loop exit
PB: predicated region body
PF: predicated region fallthrough
CT: control target
= control target key end

     0   :  { %s2635_s12 = smov 0   ;;  %s3133_s0 = inlined_call_operand.vmem [shape: f32[2,10,256], index: 0, kind: input, shape index: {}]   ;;  %s3134_s1 = inlined_call_operand.vmem [shape: bf16[3,3,256,128], index: 1, kind: input, shape index: {}]   ;;  %s3135_s2 = inlined_call_operand.vmem [shape: f32[3,1,128], index: 2, kind: input, shape index: {}]   ;;  %s3136_s3 = inlined_call_operand.vmem [shape: f32[2,8,128], index: 3, kind: output, shape index: {}]  }
   0x1 LB: > { %s1827_s13 = sadd.s32 4294967295, %s2613_s12   ;;  %p1831_p0 = scmp.ge.s32.totalorder %s2613_s12, 1  ;;  %s2613_s12 = sphi %s2635_s12, %s13_s12  }
   0x2   : > { %p137_p1 = scmp.lt.s32.totalorder %s2613_s12, 3 }
   0x4   : > { %p138_p2 = pnand %p1831_p0, %p137_p1 }
   0x5   : > { %v2451_v0 = vld [vmem:[%s3134_s1 + $0xc0] sm:$0xff] (!%p138_p2)   ;;  %v2455_v4 = vld [vmem:[%s3134_s1 + $0xc8] sm:$0xff] (!%p138_p2)   ;;  %v2459_v8 = vld [vmem:[%s3134_s1 + $0xd0] sm:$0xff] (!%p138_p2)   ;;  %p160_p3 = scmp.lt.s32.totalorder (!%p138_p2), %s1827_s13, 1 }
   0x6   : > { %141 = sbr.rel (%p138_p2) target bundleno = 415 (0x19f), region = 32  ;;  %v2452_v1 = vld [vmem:[%s3134_s1 + $0x40] sm:$0xff] (!%p138_p2)   ;;  %2245 = vmatprep.subr.bf16.mxu0 (!%p138_p2), %v2451_v0  ;;  %v2456_v5 = vld [vmem:[%s3134_s1 + $0x48] sm:$0xff] (!%p138_p2)   ;;  %v2460_v9 = vld [vmem:[%s3134_s1 + $0x50] sm:$0xff] (!%p138_p2)  }
   0x7   : > { %v2453_v2 = vld [vmem:[%s3134_s1 + $0x80] sm:$0xff] (!%p138_p2)   ;;  %2267 = vmatprep.subr.bf16.mxu1 (!%p138_p2), %v2452_v1  ;;  %v2457_v6 = vld [vmem:[%s3134_s1 + $0x88] sm:$0xff] (!%p138_p2)   ;;  %v2461_v10 = vld [vmem:[%s3134_s1 + $0x90] sm:$0xff] (!%p138_p2)  }
   0x8   : > { %v2454_v3 = vld [vmem:[%s3134_s1] sm:$0xff] (!%p138_p2)   ;;  %2246 = vmatpush3.bf16.msra.mxu0 (!%p138_p2), %v2453_v2  ;;  %v2458_v7 = vld [vmem:[%s3134_s1 + $0x8] sm:$0xff] (!%p138_p2)   ;;  %v2462_v11 = vld [vmem:[%s3134_s1 + $0x10] sm:$0xff] (!%p138_p2)  }
   0x9   : > { %2268 = vmatpush3.bf16.msra.mxu1 (!%p138_p2), %v2454_v3  ;;  %2247 = vmatprep.subr.bf16.mxu0 (!%p138_p2), %v2455_v4  ;;  %v2463_v12 = vld [vmem:[%s3134_s1 + $0xd8] sm:$0xff] (!%p138_p2)   ;;  %v2467_v16 = vld [vmem:[%s3134_s1 + $0xe0] sm:$0xff] (!%p138_p2)   ;;  %v2471_v20 = vld [vmem:[%s3134_s1 + $0xe8] sm:$0xff] (!%p138_p2)  }
   0xa   : > { %2269 = vmatprep.subr.bf16.mxu1 (!%p138_p2), %v2456_v5  ;;  %v2464_v13 = vld [vmem:[%s3134_s1 + $0x58] sm:$0xff] (!%p138_p2)   ;;  %v2468_v17 = vld [vmem:[%s3134_s1 + $0x60] sm:$0xff] (!%p138_p2)   ;;  %v2472_v21 = vld [vmem:[%s3134_s1 + $0x68] sm:$0xff] (!%p138_p2)  }
   0xb   : > { %v2465_v14 = vld [vmem:[%s3134_s1 + $0x98] sm:$0xff] (!%p138_p2)   ;;  %v2469_v18 = vld [vmem:[%s3134_s1 + $0xa0] sm:$0xff] (!%p138_p2)   ;;  %v2473_v22 = vld [vmem:[%s3134_s1 + $0xa8] sm:$0xff] (!%p138_p2)  }
   0xc   : > { %2248 = vmatpush3.bf16.msra.mxu0 (!%p138_p2), %v2457_v6  ;;  %v2466_v15 = vld [vmem:[%s3134_s1 + $0x18] sm:$0xff] (!%p138_p2)   ;;  %v2470_v19 = vld [vmem:[%s3134_s1 + $0x20] sm:$0xff] (!%p138_p2)   ;;  %v2474_v23 = vld [vmem:[%s3134_s1 + $0x28] sm:$0xff] (!%p138_p2)  }
   0xd   : > { %2270 = vmatpush3.bf16.msra.mxu1 %v2458_v7  ;;  %2249 = vmatprep.subr.bf16.mxu0 %v2459_v8  ;;  %s3138_s13 = smov (!%p160_p3, %s1827_s13), 1  ;;  %v2475_v24 = vld [vmem:[%s3134_s1 + $0xf0] sm:$0xff]   ;;  %v2479_v28 = vld [vmem:[%s3134_s1 + $0xf8] sm:$0xff]   ;;  %v2483_v42 = vld [vmem:[%s3134_s1 + $0x240] sm:$0xff]  }
   0xe   : > { %2271 = vmatprep.subr.bf16.mxu1 %v2460_v9  ;;  %v2476_v25 = vld [vmem:[%s3134_s1 + $0x70] sm:$0xff]   ;;  %s2244_s18 = sshll.u32 %s3138_s13, 5  ;;  %v2480_v29 = vld [vmem:[%s3134_s1 + $0x78] sm:$0xff]   ;;  %v2484_v47 = vld [vmem:[%s3134_s1 + $0x1c0] sm:$0xff]   ;;  %s1834_s19 = sshll.u32 %s3138_s13, 3 }
   0xf   : > { %v2477_v26 = vld [vmem:[%s3134_s1 + $0xb0] sm:$0xff]   ;;  %s2743_s27 = scalar_lea.vmem %s3133_s0, %s2244_s18  ;;  %v2481_v30 = vld [vmem:[%s3134_s1 + $0xb8] sm:$0xff]   ;;  %v2485_v49 = vld [vmem:[%s3134_s1 + $0x200] sm:$0xff]   ;;  %s168_s22 = scalar_lea.vmem %s3136_s3, %s1834_s19 }
  0x10   : > { %2250 = vmatpush3.bf16.msra.mxu0 %v2461_v10  ;;  %v2478_v27 = vld [vmem:[%s3134_s1 + $0x30] sm:$0xff]   ;;  %v2482_v31 = vld [vmem:[%s3134_s1 + $0x38] sm:$0xff]   ;;  %v273_v32 = vld [vmem:[%s2743_s27 + $0x8] sm:$0xfe] }
  0x11   : > { %2272 = vmatpush3.bf16.msra.mxu1 %v2462_v11  ;;  %2251 = vmatprep.subr.bf16.mxu0 %v2463_v12  ;;  %v275_v33 = vld [vmem:[%s2743_s27 + $0x18] sm:$0x1]  ;;  %v171_v34 = vld [vmem:[%s2743_s27 + $0x8] sm:$0xff]  ;;  %v272_v37 = vld [vmem:[%s2743_s27] sm:$0xfe] }
  0x12   : > { %2273 = vmatprep.subr.bf16.mxu1 %v2464_v13  ;;  %v277_v35 = vpack.c.bf16 %v275_v33, %v273_v32  ;;  %v2754_v36 = vpack.c.bf16 %v171_v34, %v171_v34  ;;  %v274_v38 = vld [vmem:[%s2743_s27 + $0x10] sm:$0x1]  ;;  %v170_v39 = vld [vmem:[%s2743_s27] sm:$0xff]  ;;  %v2487_v52 = vld [vmem:[%s3134_s1 + $0x248] sm:$0xff]  }
  0x13   : > { %v276_v40 = vpack.c.bf16 %v274_v38, %v272_v37  ;;  %v2759_v41 = vpack.c.bf16 %v170_v39, %v170_v39  ;;  %v2486_v50 = vld [vmem:[%s3134_s1 + $0x180] sm:$0xff]   ;;  %v2488_v55 = vld [vmem:[%s3134_s1 + $0x1c8] sm:$0xff]   ;;  %v2491_v58 = vld [vmem:[%s3134_s1 + $0x250] sm:$0xff]  }
  0x14   : > { %2252 = vmatpush3.bf16.msra.mxu0 %v2465_v14  ;;  %v319_v43 = vshrl.u32 %v277_v35, 16  ;;  %v321_v44 = vshll.u32 %v277_v35, 16  ;;  %591 = vmatprep.mubr.bf16.mxu1 %v2754_v36  ;;  %v2489_v56 = vld [vmem:[%s3134_s1 + $0x208] sm:$0xff]   ;;  %v2492_v59 = vld [vmem:[%s3134_s1 + $0x1d0] sm:$0xff]   ;;  %v2495_v62 = vld [vmem:[%s3134_s1 + $0x258] sm:$0xff]  }
  0x15   : > { %2274 = vmatpush3.bf16.msra.mxu1 %v2466_v15  ;;  %2253 = vmatprep.subr.bf16.mxu0 %v2467_v16  ;;  %v312_v45 = vshrl.u32 %v276_v40, 16  ;;  %v314_v46 = vshll.u32 %v276_v40, 16  ;;  %v2490_v57 = vld [vmem:[%s3134_s1 + $0x188] sm:$0xff]   ;;  %v2493_v60 = vld [vmem:[%s3134_s1 + $0x210] sm:$0xff]   ;;  %v2496_v63 = vld [vmem:[%s3134_s1 + $0x1d8] sm:$0xff]  }
  0x16   : > { %2275 = vmatprep.subr.bf16.mxu1 %v2468_v17  ;;  %v323_v48 = vrot.slane %v321_v44, 1  ;;  %v2494_v61 = vld [vmem:[%s3134_s1 + $0x190] sm:$0xff]   ;;  %v2497_v0 = vld [vmem:[%s3134_s1 + $0x218] sm:$0xff]   ;;  %v2499_v2 = vld [vmem:[%s3134_s1 + $0x260] sm:$0xff]  }
  0x17   : > { %v316_v51 = vrot.slane %v314_v46, 1  ;;  %v2498_v1 = vld [vmem:[%s3134_s1 + $0x198] sm:$0xff]   ;;  %v2500_v3 = vld [vmem:[%s3134_s1 + $0x1e0] sm:$0xff]   ;;  %v2503_v6 = vld [vmem:[%s3134_s1 + $0x268] sm:$0xff]  }
  0x18   : > { %2254 = vmatpush3.bf16.msra.mxu0 %v2469_v18  ;;  %v2779_v53 = vor.u32 %v323_v48, %v319_v43  ;;  %v2501_v4 = vld [vmem:[%s3134_s1 + $0x220] sm:$0xff]   ;;  %v2504_v7 = vld [vmem:[%s3134_s1 + $0x1e8] sm:$0xff]   ;;  %v2507_v10 = vld [vmem:[%s3134_s1 + $0x270] sm:$0xff]  }
  0x19   : > { %2276 = vmatpush3.bf16.msra.mxu1 %v2470_v19  ;;  %2255 = vmatprep.subr.bf16.mxu0 %v2471_v20  ;;  %v2781_v54 = vor.u32 %v316_v51, %v312_v45  ;;  %v2502_v5 = vld [vmem:[%s3134_s1 + $0x1a0] sm:$0xff]   ;;  %v2505_v8 = vld [vmem:[%s3134_s1 + $0x228] sm:$0xff]   ;;  %v2508_v11 = vld [vmem:[%s3134_s1 + $0x1f0] sm:$0xff]  }
  0x1a   : > { %2277 = vmatprep.subr.bf16.mxu1 %v2472_v21  ;;  %455 = vmatprep.mubr.bf16.mxu0 %v2779_v53  ;;  %v2506_v9 = vld [vmem:[%s3134_s1 + $0x1a8] sm:$0xff]   ;;  %v2509_v12 = vld [vmem:[%s3134_s1 + $0x230] sm:$0xff]   ;;  %v2511_v14 = vld [vmem:[%s3134_s1 + $0x278] sm:$0xff]  }
  0x1b   : > { %v2510_v13 = vld [vmem:[%s3134_s1 + $0x1b0] sm:$0xff]   ;;  %v2512_v15 = vld [vmem:[%s3134_s1 + $0x1f8] sm:$0xff]   ;;  %v2515_v18 = vld [vmem:[%s3134_s1 + $0x3c0] sm:$0xff]  }
  0x1c   : > { %2256 = vmatpush3.bf16.msra.mxu0 %v2473_v22  ;;  %v2513_v16 = vld [vmem:[%s3134_s1 + $0x238] sm:$0xff]   ;;  %v2516_v19 = vld [vmem:[%s3134_s1 + $0x340] sm:$0xff]   ;;  %v2519_v22 = vld [vmem:[%s3134_s1 + $0x3c8] sm:$0xff]  }
  0x1d   : > { %2278 = vmatpush3.bf16.msra.mxu1 %v2474_v23  ;;  %2257 = vmatprep.subr.bf16.mxu0 %v2475_v24  ;;  %v2514_v17 = vld [vmem:[%s3134_s1 + $0x1b8] sm:$0xff]   ;;  %v2517_v20 = vld [vmem:[%s3134_s1 + $0x380] sm:$0xff]   ;;  %v2520_v23 = vld [vmem:[%s3134_s1 + $0x348] sm:$0xff]  }
  0x1e   : > { %2279 = vmatprep.subr.bf16.mxu1 %v2476_v25  ;;  %v2518_v21 = vld [vmem:[%s3134_s1 + $0x300] sm:$0xff]   ;;  %v2521_v24 = vld [vmem:[%s3134_s1 + $0x388] sm:$0xff]   ;;  %v2529_v32 = vld [vmem:[%s3134_s1 + $0x398] sm:$0xff]  }
  0x1f   : > { %v2522_v25 = vld [vmem:[%s3134_s1 + $0x308] sm:$0xff]   ;;  %v2530_v33 = vld [vmem:[%s3134_s1 + $0x318] sm:$0xff]   ;;  %v2531_v34 = vld [vmem:[%s3134_s1 + $0x3e0] sm:$0xff]  }
  0x20   : > { %2258 = vmatpush3.bf16.msra.mxu0 %v2477_v26  ;;  %v2523_v26 = vld [vmem:[%s3134_s1 + $0x3d0] sm:$0xff]   ;;  %v2532_v35 = vld [vmem:[%s3134_s1 + $0x360] sm:$0xff]   ;;  %v2535_v38 = vld [vmem:[%s3134_s1 + $0x3e8] sm:$0xff]  }
  0x21   : > { %2280 = vmatpush3.bf16.msra.mxu1 %v2478_v27  ;;  %2259 = vmatprep.subr.bf16.mxu0 %v2479_v28  ;;  %v2524_v27 = vld [vmem:[%s3134_s1 + $0x350] sm:$0xff]   ;;  %v2534_v37 = vld [vmem:[%s3134_s1 + $0x320] sm:$0xff]   ;;  %v2536_v39 = vld [vmem:[%s3134_s1 + $0x368] sm:$0xff]  }
  0x22   : > { %2281 = vmatprep.subr.bf16.mxu1 %v2480_v29  ;;  %v2525_v28 = vld [vmem:[%s3134_s1 + $0x390] sm:$0xff]   ;;  %v2537_v40 = vld [vmem:[%s3134_s1 + $0x3a8] sm:$0xff]   ;;  %v2544_v48 = vld [vmem:[%s3134_s1 + $0x378] sm:$0xff]  }
  0x23   : > { %v2526_v29 = vld [vmem:[%s3134_s1 + $0x310] sm:$0xff]   ;;  %v2547_v51 = vld [vmem:[%s3134_s1 + $0x140] sm:$0xff]  }
  0x24   : > { %2260 = vmatpush3.bf16.msra.mxu0 %v2481_v30  ;;  %v2527_v30 = vld [vmem:[%s3134_s1 + $0x3d8] sm:$0xff]   ;;  %v2539_v43 = vld [vmem:[%s3134_s1 + $0x3f0] sm:$0xff]  }
  0x25   : > { %2282 = vmatpush3.bf16.msra.mxu1 %v2482_v31  ;;  %2289 = vmatprep.subr.bf16.mxu0 %v2483_v42  ;;  %v2528_v31 = vld [vmem:[%s3134_s1 + $0x358] sm:$0xff]   ;;  %v2538_v42 = vld [vmem:[%s3134_s1 + $0x328] sm:$0xff]   ;;  %v2540_v44 = vld [vmem:[%s3134_s1 + $0x370] sm:$0xff]  }
  0x26   : > { %2311 = vmatprep.subr.bf16.mxu1 %v2484_v47  ;;  %v2541_v45 = vld [vmem:[%s3134_s1 + $0x3b0] sm:$0xff]   ;;  %v2543_v47 = vld [vmem:[%s3134_s1 + $0x3f8] sm:$0xff]  }
  0x27   : > { %456 = vmatmul.mubr.bf16.vlgmr.msra.gmra.mrb[0].mxu0 %v2781_v54  ;;  %v2542_v46 = vld [vmem:[%s3134_s1 + $0x330] sm:$0xff]  }
  0x28   : > { %592 = vmatmul.mubr.bf16.vlgmr.msra.gmra.mrb[0].mxu1 %v2759_v41  ;;  %2290 = vmatpush3.bf16.msra.mxu0 %v2485_v49  ;;  %v2545_v49 = vld [vmem:[%s3134_s1 + $0x3b8] sm:$0xff]  }
  0x29   : > { %896 = vmatprep.mubr.bf16.mxu1 %v2754_v36  ;;  %2312 = vmatpush3.bf16.msra.mxu1 %v2486_v50  ;;  %v2546_v50 = vld [vmem:[%s3134_s1 + $0x338] sm:$0xff]  }
  0x2a   : > { %2313 = vmatprep.subr.bf16.mxu1 %v2488_v55  ;;  %760 = vmatprep.mubr.bf16.mxu0 %v2779_v53  ;;  %v2550_v55 = vld [vmem:[%s3134_s1 + $0x280] sm:$0xff]  }
  0x2b   : > { %2291 = vmatprep.subr.bf16.mxu0 %v2487_v52  ;;  %v2548_v52 = vld [vmem:[%s3134_s1 + $0x2c0] sm:$0xff]  }
  0x2c   : > { %2292 = vmatpush3.bf16.msra.mxu0 %v2489_v56  ;;  %v2551_v56 = vld [vmem:[%s3134_s1 + $0x148] sm:$0xff]  }
  0x2d   : > { %2314 = vmatpush3.bf16.msra.mxu1 %v2490_v57  ;;  %2293 = vmatprep.subr.bf16.mxu0 %v2491_v58  ;;  %v2552_v57 = vld [vmem:[%s3134_s1 + $0x2c8] sm:$0xff]  }
  0x2e   : > { %2315 = vmatprep.subr.bf16.mxu1 %v2492_v59  ;;  %v2553_v58 = vld [vmem:[%s3134_s1 + $0x108] sm:$0xff]   ;;  %v2555_v59 = vld [vmem:[%s3134_s1 + $0x150] sm:$0xff]  }
  0x30   : > { %2294 = vmatpush3.bf16.msra.mxu0 %v2493_v60  ;;  %v2556_v60 = vld [vmem:[%s3134_s1 + $0x2d0] sm:$0xff]  }
  0x31   : > { %2316 = vmatpush3.bf16.msra.mxu1 %v2494_v61  ;;  %2295 = vmatprep.subr.bf16.mxu0 %v2495_v62  ;;  %v2558_v61 = vld [vmem:[%s3134_s1 + $0x290] sm:$0xff]   ;;  %v2559_v62 = vld [vmem:[%s3134_s1 + $0x158] sm:$0xff]  }
  0x32   : > { %2317 = vmatprep.subr.bf16.mxu1 %v2496_v63  ;;  %v2560_v63 = vld [vmem:[%s3134_s1 + $0x2d8] sm:$0xff]  }
  0x34   : > { %2296 = vmatpush3.bf16.msra.mxu0 %v2497_v0  ;;  %v2561_v0 = vld [vmem:[%s3134_s1 + $0x118] sm:$0xff]  }
  0x35   : > { %2318 = vmatpush3.bf16.msra.mxu1 %v2498_v1  ;;  %2297 = vmatprep.subr.bf16.mxu0 %v2499_v2  ;;  %v2562_v1 = vld [vmem:[%s3134_s1 + $0x298] sm:$0xff]   ;;  %v2563_v2 = vld [vmem:[%s3134_s1 + $0x160] sm:$0xff]  }
  0x36   : > { %2319 = vmatprep.subr.bf16.mxu1 %v2500_v3  ;;  %v2564_v3 = vld [vmem:[%s3134_s1 + $0x2e0] sm:$0xff]  }
  0x38   : > { %2298 = vmatpush3.bf16.msra.mxu0 %v2501_v4  ;;  %v2565_v4 = vld [vmem:[%s3134_s1 + $0x120] sm:$0xff]  }
  0x39   : > { %2320 = vmatpush3.bf16.msra.mxu1 %v2502_v5  ;;  %2299 = vmatprep.subr.bf16.mxu0 %v2503_v6  ;;  %v2566_v5 = vld [vmem:[%s3134_s1 + $0x2a0] sm:$0xff]   ;;  %v2567_v6 = vld [vmem:[%s3134_s1 + $0x168] sm:$0xff]  }
  0x3a   : > { %2321 = vmatprep.subr.bf16.mxu1 %v2504_v7  ;;  %v2568_v7 = vld [vmem:[%s3134_s1 + $0x2e8] sm:$0xff]  }
  0x3c   : > { %2300 = vmatpush3.bf16.msra.mxu0 %v2505_v8  ;;  %v2569_v8 = vld [vmem:[%s3134_s1 + $0x128] sm:$0xff]  }
  0x3d   : > { %2322 = vmatpush3.bf16.msra.mxu1 %v2506_v9  ;;  %2301 = vmatprep.subr.bf16.mxu0 %v2507_v10  ;;  %v2570_v9 = vld [vmem:[%s3134_s1 + $0x2a8] sm:$0xff]   ;;  %v2571_v10 = vld [vmem:[%s3134_s1 + $0x170] sm:$0xff]  }
  0x3e   : > { %2323 = vmatprep.subr.bf16.mxu1 %v2508_v11  ;;  %v2572_v11 = vld [vmem:[%s3134_s1 + $0x2f0] sm:$0xff]  }
  0x40   : > { %2302 = vmatpush3.bf16.msra.mxu0 %v2509_v12  ;;  %v2573_v12 = vld [vmem:[%s3134_s1 + $0x130] sm:$0xff]  }
  0x41   : > { %2324 = vmatpush3.bf16.msra.mxu1 %v2510_v13  ;;  %2303 = vmatprep.subr.bf16.mxu0 %v2511_v14  ;;  %v2574_v13 = vld [vmem:[%s3134_s1 + $0x2b0] sm:$0xff]   ;;  %v2575_v14 = vld [vmem:[%s3134_s1 + $0x178] sm:$0xff]  }
  0x42   : > { %2325 = vmatprep.subr.bf16.mxu1 %v2512_v15  ;;  %v2576_v15 = vld [vmem:[%s3134_s1 + $0x2f8] sm:$0xff]  }
  0x44   : > { %2304 = vmatpush3.bf16.msra.mxu0 %v2513_v16  ;;  %v2577_v16 = vld [vmem:[%s3134_s1 + $0x138] sm:$0xff]  }
  0x45   : > { %2326 = vmatpush3.bf16.msra.mxu1 %v2514_v17  ;;  %2333 = vmatprep.subr.bf16.mxu0 %v2515_v18  ;;  %v2578_v17 = vld [vmem:[%s3134_s1 + $0x2b8] sm:$0xff]   ;;  %v1210_v18 = vld [vmem:[%s2743_s27 + $0x8] sm:$0xfc] }
  0x46   : > { %2355 = vmatprep.subr.bf16.mxu1 %v2516_v19  ;;  %v1212_v19 = vld [vmem:[%s2743_s27 + $0x18] sm:$0x3] }
  0x47   : > { %761 = vmatmul.mubr.bf16.vlgmr.msra.gmra.mrb[4].mxu0 %v2781_v54 }
  0x48   : > { %897 = vmatmul.mubr.bf16.vlgmr.msra.gmra.mrb[4].mxu1 %v2759_v41  ;;  %2334 = vmatpush3.bf16.msra.mxu0 %v2517_v20  ;;  %v1214_v20 = vpack.c.bf16 %v1212_v19, %v1210_v18 }
  0x49   : > { %2356 = vmatpush3.bf16.msra.mxu1 %v2518_v21  ;;  %1201 = vmatprep.mubr.bf16.mxu1 %v2754_v36  ;;  %v2533_v36 = vld [vmem:[%s3134_s1 + $0x3a0] sm:$0xff]  }
  0x4a   : > { %2357 = vmatprep.subr.bf16.mxu1 %v2520_v23  ;;  %1065 = vmatprep.mubr.bf16.mxu0 %v2779_v53  ;;  %v2549_v53 = vld [vmem:[%s3134_s1 + $0x100] sm:$0xff]  }
  0x4b   : > { %2335 = vmatprep.subr.bf16.mxu0 %v2519_v22  ;;  %v1209_v21 = vld [vmem:[%s2743_s27] sm:$0xfc]  ;;  %v1211_v22 = vld [vmem:[%s2743_s27 + $0x10] sm:$0x3] }
  0x4c   : > { %2336 = vmatpush3.bf16.msra.mxu0 %v2521_v24  ;;  %v1213_v23 = vpack.c.bf16 %v1211_v22, %v1209_v21  ;;  %v2579_v24 = vld [vmem:[%s3134_s1 + $0x440] sm:$0xff]  }
  0x4d   : > { %2358 = vmatpush3.bf16.msra.mxu1 %v2522_v25  ;;  %2337 = vmatprep.subr.bf16.mxu0 %v2523_v26  ;;  %v1251_v25 = vrot.slane %v1214_v20, 1  ;;  %v2235_v20 = vld [vmem:[%s3135_s2] ss:$0 sm:$0xff] }
  0x4e   : > { %2359 = vmatprep.subr.bf16.mxu1 %v2524_v27  ;;  %v1250_v26 = vrot.slane %v1213_v23, 1  ;;  %v2580_v27 = vld [vmem:[%s3134_s1 + $0x400] sm:$0xff]  }
  0x50   : > { %2338 = vmatpush3.bf16.msra.mxu0 %v2525_v28  ;;  %v2581_v28 = vld [vmem:[%s3134_s1 + $0x448] sm:$0xff]  }
  0x51   : > { %2360 = vmatpush3.bf16.msra.mxu1 %v2526_v29  ;;  %2339 = vmatprep.subr.bf16.mxu0 %v2527_v30  ;;  %v2582_v29 = vld [vmem:[%s3134_s1 + $0x408] sm:$0xff]   ;;  %v2583_v30 = vld [vmem:[%s3134_s1 + $0x450] sm:$0xff]  }
  0x52   : > { %2361 = vmatprep.subr.bf16.mxu1 %v2528_v31  ;;  %v2584_v31 = vld [vmem:[%s3134_s1 + $0x410] sm:$0xff]  }
  0x54   : > { %2340 = vmatpush3.bf16.msra.mxu0 %v2529_v32  ;;  %v2585_v32 = vld [vmem:[%s3134_s1 + $0x458] sm:$0xff]  }
  0x55   : > { %2362 = vmatpush3.bf16.msra.mxu1 %v2530_v33  ;;  %2341 = vmatprep.subr.bf16.mxu0 %v2531_v34  ;;  %v2586_v33 = vld [vmem:[%s3134_s1 + $0x418] sm:$0xff]   ;;  %v2587_v34 = vld [vmem:[%s3134_s1 + $0x460] sm:$0xff]  }
  0x56   : > { %2363 = vmatprep.subr.bf16.mxu1 %v2532_v35  ;;  %v2588_v35 = vld [vmem:[%s3134_s1 + $0x420] sm:$0xff]  }
  0x58   : > { %2342 = vmatpush3.bf16.msra.mxu0 %v2533_v36  ;;  %v2589_v36 = vld [vmem:[%s3134_s1 + $0x468] sm:$0xff]  }
  0x59   : > { %2364 = vmatpush3.bf16.msra.mxu1 %v2534_v37  ;;  %2343 = vmatprep.subr.bf16.mxu0 %v2535_v38  ;;  %v2590_v37 = vld [vmem:[%s3134_s1 + $0x428] sm:$0xff]   ;;  %v2591_v38 = vld [vmem:[%s3134_s1 + $0x470] sm:$0xff]  }
  0x5a   : > { %2365 = vmatprep.subr.bf16.mxu1 %v2536_v39  ;;  %v2592_v39 = vld [vmem:[%s3134_s1 + $0x430] sm:$0xff]  }
  0x5c   : > { %2344 = vmatpush3.bf16.msra.mxu0 %v2537_v40  ;;  %v2593_v40 = vld [vmem:[%s3134_s1 + $0x478] sm:$0xff]  }
  0x5d   : > { %2366 = vmatpush3.bf16.msra.mxu1 %v2538_v42  ;;  %2345 = vmatprep.subr.bf16.mxu0 %v2539_v43  ;;  %v2594_v42 = vld [vmem:[%s3134_s1 + $0x438] sm:$0xff]  }
  0x5e   : > { %2367 = vmatprep.subr.bf16.mxu1 %v2540_v44 }
  0x60   : > { %2346 = vmatpush3.bf16.msra.mxu0 %v2541_v45 }
  0x61   : > { %2368 = vmatpush3.bf16.msra.mxu1 %v2542_v46  ;;  %2347 = vmatprep.subr.bf16.mxu0 %v2543_v47 }
  0x62   : > { %2369 = vmatprep.subr.bf16.mxu1 %v2544_v48 }
  0x64   : > { %2348 = vmatpush3.bf16.msra.mxu0 %v2545_v49 }
  0x65   : > { %2370 = vmatpush3.bf16.msra.mxu1 %v2546_v50  ;;  %2377 = vmatprep.subr.bf16.mxu0 %v2547_v51 }
  0x66   : > { %2399 = vmatprep.subr.bf16.mxu1 %v2548_v52 }
  0x67   : > { %1066 = vmatmul.mubr.bf16.vlgmr.msra.gmra.mrb[8].mxu0 %v2781_v54  ;;  %v2557_v54 = vld [vmem:[%s3134_s1 + $0x110] sm:$0xff]  }
  0x68   : > { %1202 = vmatmul.mubr.bf16.vlgmr.msra.gmra.mrb[8].mxu1 %v2759_v41  ;;  %v2554_v41 = vld [vmem:[%s3134_s1 + $0x288] sm:$0xff]   ;;  %2378 = vmatpush3.bf16.msra.mxu0 %v2549_v53 }
  0x69   : > { %2400 = vmatpush3.bf16.msra.mxu1 %v2550_v55  ;;  %2379 = vmatprep.subr.bf16.mxu0 %v2551_v56 }
  0x6a   : > { %2401 = vmatprep.subr.bf16.mxu1 %v2552_v57  ;;  %1382 = vmatprep.mubr.bf16.mxu0 %v1251_v25 }
  0x6b   : > { %1552 = vmatprep.mubr.bf16.mxu1 %v1251_v25 }
  0x6c   : > { %2380 = vmatpush3.bf16.msra.mxu0 %v2553_v58 }
  0x6d   : > { %2402 = vmatpush3.bf16.msra.mxu1 %v2554_v41  ;;  %2381 = vmatprep.subr.bf16.mxu0 %v2555_v59 }
  0x6e   : > { %2403 = vmatprep.subr.bf16.mxu1 %v2556_v60 }
  0x70   : > { %2382 = vmatpush3.bf16.msra.mxu0 %v2557_v54 }
  0x71   : > { %2404 = vmatpush3.bf16.msra.mxu1 %v2558_v61  ;;  %2383 = vmatprep.subr.bf16.mxu0 %v2559_v62 }
  0x72   : > { %2405 = vmatprep.subr.bf16.mxu1 %v2560_v63 }
  0x74   : > { %2384 = vmatpush3.bf16.msra.mxu0 %v2561_v0 }
  0x75   : > { %2406 = vmatpush3.bf16.msra.mxu1 %v2562_v1  ;;  %2385 = vmatprep.subr.bf16.mxu0 %v2563_v2 }
  0x76   : > { %2407 = vmatprep.subr.bf16.mxu1 %v2564_v3 }
  0x78   : > { %2386 = vmatpush3.bf16.msra.mxu0 %v2565_v4 }
  0x79   : > { %2408 = vmatpush3.bf16.msra.mxu1 %v2566_v5  ;;  %2387 = vmatprep.subr.bf16.mxu0 %v2567_v6 }
  0x7a   : > { %2409 = vmatprep.subr.bf16.mxu1 %v2568_v7 }
  0x7c   : > { %2388 = vmatpush3.bf16.msra.mxu0 %v2569_v8 }
  0x7d   : > { %2410 = vmatpush3.bf16.msra.mxu1 %v2570_v9  ;;  %2389 = vmatprep.subr.bf16.mxu0 %v2571_v10 }
  0x7e   : > { %2411 = vmatprep.subr.bf16.mxu1 %v2572_v11 }
  0x80   : > { %2390 = vmatpush3.bf16.msra.mxu0 %v2573_v12 }
  0x81   : > { %2412 = vmatpush3.bf16.msra.mxu1 %v2574_v13  ;;  %2391 = vmatprep.subr.bf16.mxu0 %v2575_v14 }
  0x82   : > { %2413 = vmatprep.subr.bf16.mxu1 %v2576_v15 }
  0x84   : > { %2392 = vmatpush3.bf16.msra.mxu0 %v2577_v16 }
  0x85   : > { %2414 = vmatpush3.bf16.msra.mxu1 %v2578_v17  ;;  %2421 = vmatprep.subr.bf16.mxu0 %v2579_v24 }
  0x87   : > { %1383 = vmatmul.mubr.bf16.vlgmr.msra.gmra.mrb[12].mxu0 %v1250_v26 }
  0x88   : > { %1553 = vmatmul.mubr.bf16.vlgmr.msra.gmra.mrb[12].mxu1 %v1250_v26  ;;  %2422 = vmatpush3.bf16.msra.mxu0 %v2580_v27 }
  0x89   : > { %1722 = vmatprep.mubr.bf16.mxu0 %v1251_v25  ;;  %2423 = vmatprep.subr.bf16.mxu0 %v2581_v28 }
  0x8c   : > { %2424 = vmatpush3.bf16.msra.mxu0 %v2582_v29 }
  0x8d   : > { %2425 = vmatprep.subr.bf16.mxu0 %v2583_v30 }
  0x90   : > { %2426 = vmatpush3.bf16.msra.mxu0 %v2584_v31 }
  0x91   : > { %2427 = vmatprep.subr.bf16.mxu0 %v2585_v32 }
  0x94   : > { %2428 = vmatpush3.bf16.msra.mxu0 %v2586_v33 }
  0x95   : > { %2429 = vmatprep.subr.bf16.mxu0 %v2587_v34 }
  0x98   : > { %2430 = vmatpush3.bf16.msra.mxu0 %v2588_v35 }
  0x99   : > { %2431 = vmatprep.subr.bf16.mxu0 %v2589_v36 }
  0x9c   : > { %2432 = vmatpush3.bf16.msra.mxu0 %v2590_v37  ;;  %v2240_v37 = vld [vmem:[%s3135_s2 + $0x2] ss:$0 sm:$0xff] }
  0x9d   : > { %2433 = vmatprep.subr.bf16.mxu0 %v2591_v38 }
  0xa0   : > { %2434 = vmatpush3.bf16.msra.mxu0 %v2592_v39 }
  0xa1   : > { %2435 = vmatprep.subr.bf16.mxu0 %v2593_v40 }
  0xa4   : > { %2436 = vmatpush3.bf16.msra.mxu0 %v2594_v42 }
  0xa7   : > { %1723 = vmatmul.mubr.bf16.vlgmr.msra.gmra.mrb[16].mxu0 %v1250_v26  ;;  %v2238_v26 = vld [vmem:[%s3135_s2 + $0x1] ss:$0 sm:$0xff] }
  0xfa   : > { %v2261_v48 = vpop.f32.mrb[0].mxu0 }
  0xfb   : > { %v2283_v43 = vpop.f32.mrb[0].mxu1  ;;  %v2262_v49 = vpop.f32.mrb[1].mxu0 }
  0xfc   : > { %v2284_v44 = vpop.f32.mrb[1].mxu1  ;;  %v2263_v50 = vadd.f32 %v2262_v49, %v2261_v48  ;;  %v2264_v51 = vpop.f32.mrb[2].mxu0 }
  0xfd   : > { %v2285_v45 = vadd.f32 %v2284_v44, %v2283_v43  ;;  %v2286_v46 = vpop.f32.mrb[2].mxu1  ;;  %v2265_v52 = vpop.f32.mrb[3].mxu0 }
  0xfe   : > { %v2287_v47 = vpop.f32.mrb[3].mxu1 }
  0xff   : > { %v594_v53 = vadd.f32 %v2285_v45, %v2263_v50 }
 0x11a   : > { %v2305_v41 = vpop.f32.mrb[4].mxu0 }
 0x11b   : > { %v2327_v55 = vpop.f32.mrb[4].mxu1  ;;  %v2306_v60 = vpop.f32.mrb[5].mxu0 }
 0x11c   : > { %v2328_v56 = vpop.f32.mrb[5].mxu1  ;;  %v2307_v54 = vadd.f32 %v2306_v60, %v2305_v41  ;;  %v2308_v61 = vpop.f32.mrb[6].mxu0 }
 0x11d   : > { %v2329_v57 = vadd.f32 %v2328_v56, %v2327_v55  ;;  %v2330_v58 = vpop.f32.mrb[6].mxu1  ;;  %v2309_v62 = vpop.f32.mrb[7].mxu0 }
 0x11e   : > { %v2331_v59 = vpop.f32.mrb[7].mxu1 }
 0x11f   : > { %v899_v63 = vadd.f32 %v2329_v57, %v2307_v54 }
 0x13a   : > { %v2349_v4 = vpop.f32.mrb[8].mxu0 }
 0x13b   : > { %v2371_v0 = vpop.f32.mrb[8].mxu1  ;;  %v2350_v6 = vpop.f32.mrb[9].mxu0 }
 0x13c   : > { %v2372_v1 = vpop.f32.mrb[9].mxu1  ;;  %v2351_v7 = vadd.f32 %v2350_v6, %v2349_v4  ;;  %v2352_v8 = vpop.f32.mrb[10].mxu0 }
 0x13d   : > { %v2373_v2 = vadd.f32 %v2372_v1, %v2371_v0  ;;  %v2374_v3 = vpop.f32.mrb[10].mxu1  ;;  %v2353_v9 = vpop.f32.mrb[11].mxu0 }
 0x13e   : > { %v2375_v5 = vpop.f32.mrb[11].mxu1 }
 0x13f   : > { %v1204_v10 = vadd.f32 %v2373_v2, %v2351_v7 }
 0x15a   : > { %v2393_v12 = vpop.f32.mrb[12].mxu0 }
 0x15b   : > { %v2415_v11 = vpop.f32.mrb[12].mxu1  ;;  %v2394_v14 = vpop.f32.mrb[13].mxu0 }
 0x15c   : > { %v2416_v13 = vpop.f32.mrb[13].mxu1  ;;  %v2395_v17 = vadd.f32 %v2394_v14, %v2393_v12  ;;  %v2396_v18 = vpop.f32.mrb[14].mxu0 }
 0x15d   : > { %v2417_v15 = vadd.f32 %v2416_v13, %v2415_v11  ;;  %v2418_v16 = vpop.f32.mrb[14].mxu1  ;;  %v2397_v22 = vpop.f32.mrb[15].mxu0 }
 0x15e   : > { %v2419_v19 = vpop.f32.mrb[15].mxu1  ;;  %v1390_v23 = vadd.f32 %v2395_v17, %v594_v53 }
 0x15f   : > { %v1560_v21 = vadd.f32 %v2417_v15, %v899_v63 }
 0x160   : > { %v1738_v24 = vadd.f32 %v2235_v20, %v1390_v23 }
 0x161   : > { %v1753_v27 = vadd.f32 %v2238_v26, %v1560_v21 }
 0x162   : > { %v2236_v25 = vmul.f32 -1.442695, %v1738_v24 }
 0x164   : > { %2595 = vpow2.f32 %v2236_v25 }
 0x165   : > { %2597 = vtanh.f32 %v1753_v27 }
 0x16e   : > { %v2596_v28 = vpop.eup %2595 }
 0x16f   : > { %v1742_v29 = vadd.f32 1.0, %v2596_v28  ;;  %v2598_v30 = vpop.eup %2597 }
 0x171   : > { %2599 = vrcp.f32 %v1742_v29 }
 0x17a   : > { %v2437_v31 = vpop.f32.mrb[16].mxu0 }
 0x17b   : > { %v2600_v32 = vpop.eup %2599  ;;  %v2438_v33 = vpop.f32.mrb[17].mxu0 }
 0x17c   : > { %v1770_v34 = vmul.f32 %v2600_v32, %v2598_v30  ;;  %v2439_v35 = vadd.f32 %v2438_v33, %v2437_v31  ;;  %v2440_v36 = vpop.f32.mrb[18].mxu0 }
 0x17d   : > { %v2441_v38 = vpop.f32.mrb[19].mxu0 }
 0x17e   : > { %v1730_v39 = vadd.f32 %v2439_v35, %v1204_v10 }
 0x180   : > { %v1763_v40 = vadd.f32 %v2240_v37, %v1730_v39 }
 0x182   : > { %v2241_v42 = vmul.f32 -1.442695, %v1763_v40 }
 0x184   : > { %2601 = vpow2.f32 %v2241_v42 }
 0x185   : > { %2603 = vtanh.f32 %v1770_v34 }
 0x18e   : > { %v2602_v43 = vpop.eup %2601 }
 0x18f   : > { %v1767_v44 = vadd.f32 1.0, %v2602_v43  ;;  %v2604_v45 = vpop.eup %2603 }
 0x191   : > { %2605 = vrcp.f32 %v1767_v44 }
 0x19b   : > { %v2606_v46 = vpop.eup %2605 }
 0x19c   : > { %v1772_v47 = vmul.f32 %v2606_v46, %v2604_v45 }
 0x19e   : > { %1773 = vst [vmem:[%s168_s22] sm:$0xff] %v1772_v47 }
 0x19f PF: > { %s13_s12 = sadd.s32 1, %s2613_s12  }
 0x1a0   : > { %p10_p4 = scmp.ge.s32.totalorder %s13_s12, 4  }
 0x1a2   :  { %12 = sbr.rel (!%p10_p4) target bundleno = 1 (0x1), region = 72 }

// kernel: bcdunet_forward.33
= control target key start
LH: loop header
LB: loop body
LE: loop exit
PB: predicated region body
PF: predicated region fallthrough
CT: control target
= control target key end

     0   :  { %s1338_s18 = smov 0   ;;  %s1580_s0 = inlined_call_operand.vmem [shape: f32[2,10,128], index: 0, kind: input, shape index: {}]   ;;  %s1581_s1 = inlined_call_operand.vmem [shape: bf16[3,128,128], index: 1, kind: input, shape index: {}]   ;;  %s1582_s2 = inlined_call_operand.vmem [shape: f32[1,128], index: 2, kind: input, shape index: {}]   ;;  %s1583_s3 = inlined_call_operand.vmem [shape: bf16[3,128,128], index: 3, kind: input, shape index: {}]   ;;  %s1584_s4 = inlined_call_operand.vmem [shape: f32[1,128], index: 4, kind: input, shape index: {}]   ;;  %s1585_s5 = inlined_call_operand.vmem [shape: f32[2,8,128], index: 5, kind: output, shape index: {}]  }
   0x1 LB: > { %s941_s19 = sadd.s32 4294967295, %s1304_s18   ;;  %p945_p0 = scmp.ge.s32.totalorder %s1304_s18, 1  ;;  %s1304_s18 = sphi %s1338_s18, %s15_s18  }
   0x2   : > { %p187_p1 = scmp.lt.s32.totalorder %s1304_s18, 3 }
   0x4   : > { %p188_p2 = pnand %p945_p0, %p187_p1 }
   0x5   : > { %v1250_v0 = vld [vmem:[%s1581_s1 + $0x40] sm:$0xff] (!%p188_p2)   ;;  %v1306_v1 = vmov (!%p188_p2), 0.0   ;;  %v1252_v3 = vld [vmem:[%s1581_s1 + $0x48] sm:$0xff] (!%p188_p2)   ;;  %vm1307_vm0 = vmmov (!%p188_p2), 0   ;;  %v1254_v5 = vld [vmem:[%s1581_s1 + $0x50] sm:$0xff] (!%p188_p2)   ;;  %p214_p3 = scmp.lt.s32.totalorder (!%p188_p2), %s941_s19, 1 }
   0x6   : > { %191 = sbr.rel (%p188_p2) target bundleno = 541 (0x21d), region = 40  ;;  %1120 = vmatprep.subr.bf16.mxu0 (!%p188_p2), %v1306_v1  ;;  %554 = vst [vmem:[#allocation2] sm:$0xff] (!%p188_p2), %v1306_v1  ;;  %555 = vst [vmem:[#allocation2 + $0x8] sm:$0x3] (!%p188_p2), %v1306_v1  ;;  %1140 = vmatprep.subr.bf16.mxu1 (!%p188_p2), %v1306_v1  ;;  %v1251_v2 = vld [vmem:[%s1581_s1] sm:$0xff] (!%p188_p2)   ;;  %v1253_v4 = vld [vmem:[%s1581_s1 + $0x8] sm:$0xff] (!%p188_p2)  }
   0x7   : > { %1121 = vmatpush3.bf16.msra.mxu0 (!%p188_p2), %v1250_v0  ;;  %1136 = vmatprep.mubr.msk.bf16.mxu0 (!%p188_p2), %vm1307_vm0, %v1306_v1  ;;  %v1255_v6 = vld [vmem:[%s1581_s1 + $0x10] sm:$0xff] (!%p188_p2)   ;;  %v1256_v7 = vld [vmem:[%s1581_s1 + $0x58] sm:$0xff] (!%p188_p2)   ;;  %v1258_v9 = vld [vmem:[%s1581_s1 + $0x60] sm:$0xff] (!%p188_p2)  }
   0x8   : > { %1141 = vmatpush3.bf16.msra.mxu1 (!%p188_p2), %v1251_v2  ;;  %1122 = vmatprep.subr.bf16.mxu0 (!%p188_p2), %v1306_v1  ;;  %v1257_v8 = vld [vmem:[%s1581_s1 + $0x18] sm:$0xff] (!%p188_p2)   ;;  %v1259_v10 = vld [vmem:[%s1581_s1 + $0x20] sm:$0xff] (!%p188_p2)   ;;  %v1260_v11 = vld [vmem:[%s1581_s1 + $0x68] sm:$0xff] (!%p188_p2)  }
   0x9   : > { %1142 = vmatprep.subr.bf16.mxu1 (!%p188_p2), %v1306_v1  ;;  %1156 = vmatprep.mubr.msk.bf16.mxu1 (!%p188_p2), %vm1307_vm0, %v1306_v1  ;;  %v1261_v12 = vld [vmem:[%s1581_s1 + $0x28] sm:$0xff] (!%p188_p2)   ;;  %v1262_v13 = vld [vmem:[%s1581_s1 + $0x70] sm:$0xff] (!%p188_p2)   ;;  %v1264_v15 = vld [vmem:[%s1581_s1 + $0x78] sm:$0xff] (!%p188_p2)  }
   0xa   : > { %v1263_v14 = vld [vmem:[%s1581_s1 + $0x30] sm:$0xff] (!%p188_p2)   ;;  %v1265_v17 = vld [vmem:[%s1581_s1 + $0x38] sm:$0xff] (!%p188_p2)   ;;  %v1266_v19 = vld [vmem:[%s1581_s1 + $0x80] sm:$0xff] (!%p188_p2)  }
   0xb   : > { %1123 = vmatpush3.bf16.msra.mxu0 (!%p188_p2), %v1252_v3  ;;  %v1267_v22 = vld [vmem:[%s1581_s1 + $0x88] sm:$0xff] (!%p188_p2)   ;;  %v1268_v23 = vld [vmem:[%s1581_s1 + $0x90] sm:$0xff] (!%p188_p2)   ;;  %v1269_v24 = vld [vmem:[%s1581_s1 + $0x98] sm:$0xff] (!%p188_p2)  }
   0xc   : > { %1143 = vmatpush3.bf16.msra.mxu1 (!%p188_p2), %v1253_v4  ;;  %1124 = vmatprep.subr.bf16.mxu0 (!%p188_p2), %v1306_v1  ;;  %v1270_v25 = vld [vmem:[%s1581_s1 + $0xa0] sm:$0xff] (!%p188_p2)   ;;  %v1271_v26 = vld [vmem:[%s1581_s1 + $0xa8] sm:$0xff] (!%p188_p2)   ;;  %v1272_v27 = vld [vmem:[%s1581_s1 + $0xb0] sm:$0xff] (!%p188_p2)  }
   0xd   : > { %1144 = vmatprep.subr.bf16.mxu1 %v1306_v1  ;;  %s1587_s19 = smov (!%p214_p3, %s941_s19), 1  ;;  %v1273_v28 = vld [vmem:[%s1581_s1 + $0xb8] sm:$0xff]   ;;  %v1274_v31 = vld [vmem:[%s1583_s3 + $0x40] sm:$0xff]   ;;  %v1276_v33 = vld [vmem:[%s1583_s3 + $0x48] sm:$0xff]  }
   0xe   : > { %s1065_s17 = sshll.u32 %s1587_s19, 4  ;;  %v1275_v32 = vld [vmem:[%s1583_s3] sm:$0xff]   ;;  %v1277_v34 = vld [vmem:[%s1583_s3 + $0x8] sm:$0xff]   ;;  %v1278_v35 = vld [vmem:[%s1583_s3 + $0x50] sm:$0xff]   ;;  %s948_s7 = sshll.u32 %s1587_s19, 3 }
   0xf   : > { %1125 = vmatpush3.bf16.msra.mxu0 %v1254_v5  ;;  %s1410_s24 = scalar_lea.vmem %s1580_s0, %s1065_s17  ;;  %v1279_v36 = vld [vmem:[%s1583_s3 + $0x10] sm:$0xff]   ;;  %v1280_v37 = vld [vmem:[%s1583_s3 + $0x58] sm:$0xff]   ;;  %v1282_v39 = vld [vmem:[%s1583_s3 + $0x60] sm:$0xff]   ;;  %s222_s10 = scalar_lea.vmem %s1585_s5, %s948_s7 }
  0x10   : > { %1145 = vmatpush3.bf16.msra.mxu1 %v1255_v6  ;;  %1126 = vmatprep.subr.bf16.mxu0 %v1306_v1  ;;  %v242_v16 = vld [vmem:[%s1410_s24 + $0x1] sm:$0xff]  ;;  %v1281_v38 = vld [vmem:[%s1583_s3 + $0x18] sm:$0xff]   ;;  %v1286_v41 = vld [vmem:[%s1583_s3 + $0x70] sm:$0xff]  }
  0x11   : > { %1146 = vmatprep.subr.bf16.mxu1 %v1306_v1  ;;  %v224_v18 = vld [vmem:[%s1410_s24] sm:$0xff]  ;;  %v243_v20 = vpack.c.bf16 %v242_v16, %v242_v16  ;;  %v1284_v40 = vld [vmem:[%s1583_s3 + $0x68] sm:$0xff]   ;;  %v1288_v43 = vld [vmem:[%s1583_s3 + $0x78] sm:$0xff]  }
  0x12   : > { %v225_v21 = vpack.c.bf16 %v224_v18, %v224_v18  ;;  %v437_v29 = vld [vmem:[%s1410_s24 + $0x2] sm:$0xff]  ;;  %v1287_v45 = vld [vmem:[%s1583_s3 + $0x30] sm:$0xff]   ;;  %v1289_v46 = vld [vmem:[%s1583_s3 + $0x38] sm:$0xff]  }
  0x13   : > { %1127 = vmatpush3.bf16.msra.mxu0 %v1256_v7  ;;  %v438_v30 = vpack.c.bf16 %v437_v29, %v437_v29  ;;  %v1283_v42 = vld [vmem:[%s1583_s3 + $0x20] sm:$0xff]   ;;  %v1285_v44 = vld [vmem:[%s1583_s3 + $0x28] sm:$0xff]   ;;  %v1292_v5 = vld [vmem:[%s1583_s3 + $0x90] sm:$0xff]  }
  0x14   : > { %1147 = vmatpush3.bf16.msra.mxu1 %v1257_v8  ;;  %1128 = vmatprep.subr.bf16.mxu0 %v1306_v1  ;;  %v1005_v57 = vld [vmem:[%s1582_s2] ss:$0 sm:$0xff]  ;;  %v1291_v3 = vld [vmem:[%s1583_s3 + $0x88] sm:$0xff]   ;;  %v1293_v7 = vld [vmem:[%s1583_s3 + $0x98] sm:$0xff]  }
  0x15   : > { %1148 = vmatprep.subr.bf16.mxu1 %v1306_v1  ;;  %v1290_v0 = vld [vmem:[%s1583_s3 + $0x80] sm:$0xff]  }
  0x16   : > { %v1294_v8 = vld [vmem:[%s1583_s3 + $0xa0] sm:$0xff]  }
  0x17   : > { %1129 = vmatpush3.bf16.msra.mxu0 %v1258_v9  ;;  %v1295_v9 = vld [vmem:[%s1583_s3 + $0xa8] sm:$0xff]  }
  0x18   : > { %1149 = vmatpush3.bf16.msra.mxu1 %v1259_v10  ;;  %1130 = vmatprep.subr.bf16.mxu0 %v1306_v1  ;;  %v1296_v10 = vld [vmem:[%s1583_s3 + $0xb0] sm:$0xff]  }
  0x19   : > { %1150 = vmatprep.subr.bf16.mxu1 %v1306_v1 }
  0x1b   : > { %1131 = vmatpush3.bf16.msra.mxu0 %v1260_v11  ;;  %v1297_v11 = vld [vmem:[%s1583_s3 + $0xb8] sm:$0xff]  }
  0x1c   : > { %1151 = vmatpush3.bf16.msra.mxu1 %v1261_v12  ;;  %1132 = vmatprep.subr.bf16.mxu0 %v1306_v1 }
  0x1d   : > { %1152 = vmatprep.subr.bf16.mxu1 %v1306_v1 }
  0x1f   : > { %1133 = vmatpush3.bf16.msra.mxu0 %v1262_v13 }
  0x20   : > { %1153 = vmatpush3.bf16.msra.mxu1 %v1263_v14  ;;  %1134 = vmatprep.subr.bf16.mxu0 %v1306_v1 }
  0x21   : > { %1154 = vmatprep.subr.bf16.mxu1 %v1306_v1 }
  0x23   : > { %1135 = vmatpush3.bf16.msra.mxu0 %v1264_v15 }
  0x24   : > { %1155 = vmatpush3.bf16.msra.mxu1 %v1265_v17  ;;  %1160 = vmatprep.subr.bf16.mxu0 %v1306_v1 }
  0x25   : > { %1180 = vmatprep.subr.bf16.mxu1 %v1306_v1 }
  0x26   : > { %1137 = vmatmul.mubr.bf16.vlgmr.msra.gmra.mrb[0].mxu0 %v243_v20 }
  0x27   : > { %1157 = vmatmul.mubr.bf16.vlgmr.msra.gmra.mrb[0].mxu1 %v225_v21  ;;  %1161 = vmatpush3.bf16.msra.mxu0 %v1266_v19 }
  0x28   : > { %1162 = vmatprep.subr.bf16.mxu0 %v1306_v1  ;;  %1176 = vmatprep.mubr.msk.bf16.mxu0 %vm1307_vm0, %v1306_v1 }
  0x29   : > { %1196 = vmatprep.mubr.msk.bf16.mxu1 %vm1307_vm0, %v1306_v1  ;;  %1181 = vmatpush3.bf16.msra.mxu1 %v1274_v31 }
  0x2a   : > { %1182 = vmatprep.subr.bf16.mxu1 %v1306_v1 }
  0x2b   : > { %1163 = vmatpush3.bf16.msra.mxu0 %v1267_v22 }
  0x2c   : > { %1164 = vmatprep.subr.bf16.mxu0 %v1306_v1 }
  0x2d   : > { %1183 = vmatpush3.bf16.msra.mxu1 %v1276_v33 }
  0x2e   : > { %1184 = vmatprep.subr.bf16.mxu1 %v1306_v1 }
  0x2f   : > { %1165 = vmatpush3.bf16.msra.mxu0 %v1268_v23 }
  0x30   : > { %1166 = vmatprep.subr.bf16.mxu0 %v1306_v1 }
  0x31   : > { %1185 = vmatpush3.bf16.msra.mxu1 %v1278_v35 }
  0x32   : > { %1186 = vmatprep.subr.bf16.mxu1 %v1306_v1 }
  0x33   : > { %1167 = vmatpush3.bf16.msra.mxu0 %v1269_v24  ;;  %v1062_v24 = vld [vmem:[%s1584_s4] ss:$0 sm:$0xff] }
  0x34   : > { %1168 = vmatprep.subr.bf16.mxu0 %v1306_v1 }
  0x35   : > { %1187 = vmatpush3.bf16.msra.mxu1 %v1280_v37 }
  0x36   : > { %1188 = vmatprep.subr.bf16.mxu1 %v1306_v1 }
  0x37   : > { %1169 = vmatpush3.bf16.msra.mxu0 %v1270_v25 }
  0x38   : > { %1170 = vmatprep.subr.bf16.mxu0 %v1306_v1 }
  0x39   : > { %1189 = vmatpush3.bf16.msra.mxu1 %v1282_v39 }
  0x3a   : > { %1190 = vmatprep.subr.bf16.mxu1 %v1306_v1 }
  0x3b   : > { %1171 = vmatpush3.bf16.msra.mxu0 %v1271_v26 }
  0x3c   : > { %1172 = vmatprep.subr.bf16.mxu0 %v1306_v1 }
  0x3d   : > { %1191 = vmatpush3.bf16.msra.mxu1 %v1284_v40 }
  0x3e   : > { %1192 = vmatprep.subr.bf16.mxu1 %v1306_v1 }
  0x3f   : > { %1173 = vmatpush3.bf16.msra.mxu0 %v1272_v27 }
  0x40   : > { %1174 = vmatprep.subr.bf16.mxu0 %v1306_v1 }
  0x41   : > { %1193 = vmatpush3.bf16.msra.mxu1 %v1286_v41 }
  0x42   : > { %1194 = vmatprep.subr.bf16.mxu1 %v1306_v1 }
  0x43   : > { %1175 = vmatpush3.bf16.msra.mxu0 %v1273_v28 }
  0x44   : > { %1200 = vmatprep.subr.bf16.mxu0 %v1306_v1 }
  0x45   : > { %1195 = vmatpush3.bf16.msra.mxu1 %v1288_v43 }
  0x46   : > { %1177 = vmatmul.mubr.bf16.vlgmr.msra.gmra.mrb[4].mxu0 %v438_v30  ;;  %1220 = vmatprep.subr.bf16.mxu1 %v1306_v1 }
  0x47   : > { %1216 = vmatprep.mubr.msk.bf16.mxu0 %vm1307_vm0, %v1306_v1  ;;  %1201 = vmatpush3.bf16.msra.mxu0 %v1275_v32 }
  0x48   : > { %1202 = vmatprep.subr.bf16.mxu0 %v1306_v1 }
  0x4b   : > { %1203 = vmatpush3.bf16.msra.mxu0 %v1277_v34 }
  0x4c   : > { %1204 = vmatprep.subr.bf16.mxu0 %v1306_v1 }
  0x4f   : > { %1205 = vmatpush3.bf16.msra.mxu0 %v1279_v36 }
  0x50   : > { %1206 = vmatprep.subr.bf16.mxu0 %v1306_v1 }
  0x53   : > { %1207 = vmatpush3.bf16.msra.mxu0 %v1281_v38 }
  0x54   : > { %1208 = vmatprep.subr.bf16.mxu0 %v1306_v1 }
  0x57   : > { %1209 = vmatpush3.bf16.msra.mxu0 %v1283_v42 }
  0x58   : > { %1210 = vmatprep.subr.bf16.mxu0 %v1306_v1 }
  0x5b   : > { %1211 = vmatpush3.bf16.msra.mxu0 %v1285_v44 }
  0x5c   : > { %1212 = vmatprep.subr.bf16.mxu0 %v1306_v1 }
  0x5f   : > { %1213 = vmatpush3.bf16.msra.mxu0 %v1287_v45 }
  0x60   : > { %1214 = vmatprep.subr.bf16.mxu0 %v1306_v1 }
  0x63   : > { %1215 = vmatpush3.bf16.msra.mxu0 %v1289_v46 }
  0xf9   : > { %v343_v47 = vpop.f32.mrb[0].mxu0 }
  0xfa   : > { %v1138_v48 = vpop.f32.mrb[1].mxu0  ;;  %v431_v49 = vpop.f32.mrb[0].mxu1 }
  0xfb   : > { %v432_v50 = vadd.f32 %v431_v49, %v343_v47  ;;  %v346_v51 = vpop.f32.mrb[2].mxu0  ;;  %v1158_v52 = vpop.f32.mrb[1].mxu1 }
  0xfc   : > { %v1139_v53 = vpop.f32.mrb[3].mxu0  ;;  %v434_v54 = vpop.f32.mrb[2].mxu1 }
  0xfd   : > { %v1159_v55 = vpop.f32.mrb[3].mxu1 }
 0x119   : > { %v538_v56 = vpop.f32.mrb[4].mxu0 }
 0x11a   : > { %v544_v58 = vadd.f32 %v538_v56, %v432_v50  ;;  %v1178_v59 = vpop.f32.mrb[5].mxu0 }
 0x11b   : > { %v541_v60 = vpop.f32.mrb[6].mxu0 }
 0x11c   : > { %v552_v61 = vadd.f32 %v1005_v57, %v544_v58  ;;  %v1179_v62 = vpop.f32.mrb[7].mxu0 }
 0x11e   : > { %v553_v63 = vmax.f32 %v552_v61, 0.0 }
 0x120   : > { %556 = vst [vmem:[#allocation2 + $0x1] sm:$0xff] %v553_v63  ;;  %v576_v2 = vpack.c.bf16 %v553_v63, %v553_v63 }
 0x122   : > { %1197 = vmatmul.mubr.bf16.vlgmr.msra.gmra.mrb[4].mxu1 %v576_v2 }
 0x123   : > { %1221 = vmatpush3.bf16.msra.mxu1 %v1290_v0  ;;  %1236 = vmatprep.mubr.msk.bf16.mxu1 %vm1307_vm0, %v1306_v1 }
 0x124   : > { %1222 = vmatprep.subr.bf16.mxu1 %v1306_v1 }
 0x127   : > { %v557_v4 = vld [vmem:[#allocation2] sm:$0xff]  ;;  %1223 = vmatpush3.bf16.msra.mxu1 %v1291_v3 }
 0x128   : > { %v558_v6 = vpack.c.bf16 %v557_v4, %v557_v4  ;;  %1224 = vmatprep.subr.bf16.mxu1 %v1306_v1  ;;  %v770_v12 = vld [vmem:[#allocation2 + $0x2] sm:$0xff] }
 0x129   : > { %v771_v13 = vpack.c.bf16 %v770_v12, %v770_v12 }
 0x12a   : > { %1217 = vmatmul.mubr.bf16.vlgmr.msra.gmra.mrb[8].mxu0 %v558_v6 }
 0x12b   : > { %1225 = vmatpush3.bf16.msra.mxu1 %v1292_v5 }
 0x12c   : > { %1226 = vmatprep.subr.bf16.mxu1 %v1306_v1 }
 0x12f   : > { %1227 = vmatpush3.bf16.msra.mxu1 %v1293_v7 }
 0x130   : > { %1228 = vmatprep.subr.bf16.mxu1 %v1306_v1 }
 0x133   : > { %1229 = vmatpush3.bf16.msra.mxu1 %v1294_v8 }
 0x134   : > { %1230 = vmatprep.subr.bf16.mxu1 %v1306_v1 }
 0x137   : > { %1231 = vmatpush3.bf16.msra.mxu1 %v1295_v9 }
 0x138   : > { %1232 = vmatprep.subr.bf16.mxu1 %v1306_v1 }
 0x13b   : > { %1233 = vmatpush3.bf16.msra.mxu1 %v1296_v10 }
 0x13c   : > { %1234 = vmatprep.subr.bf16.mxu1 %v1306_v1 }
 0x13f   : > { %1235 = vmatpush3.bf16.msra.mxu1 %v1297_v11 }
 0x142   : > { %1237 = vmatmul.mubr.bf16.vlgmr.msra.gmra.mrb[8].mxu1 %v771_v13 }
 0x1f5   : > { %v676_v14 = vpop.f32.mrb[4].mxu1 }
 0x1f6   : > { %v1198_v15 = vpop.f32.mrb[5].mxu1 }
 0x1f7   : > { %v679_v16 = vpop.f32.mrb[6].mxu1 }
 0x1f8   : > { %v1199_v17 = vpop.f32.mrb[7].mxu1 }
 0x1fd   : > { %v764_v18 = vpop.f32.mrb[8].mxu0 }
 0x1fe   : > { %v765_v19 = vadd.f32 %v764_v18, %v676_v14  ;;  %v1218_v20 = vpop.f32.mrb[9].mxu0 }
 0x1ff   : > { %v767_v21 = vpop.f32.mrb[10].mxu0 }
 0x200   : > { %v1219_v22 = vpop.f32.mrb[11].mxu0 }
 0x215   : > { %v871_v23 = vpop.f32.mrb[8].mxu1 }
 0x216   : > { %v877_v1 = vadd.f32 %v871_v23, %v765_v19  ;;  %v1238_v25 = vpop.f32.mrb[9].mxu1 }
 0x217   : > { %v874_v26 = vpop.f32.mrb[10].mxu1 }
 0x218   : > { %v885_v27 = vadd.f32 %v1062_v24, %v877_v1  ;;  %v1239_v28 = vpop.f32.mrb[11].mxu1 }
 0x21a   : > { %v886_v29 = vmax.f32 %v885_v27, 0.0 }
 0x21c   : > { %887 = vst [vmem:[%s222_s10] sm:$0xff] %v886_v29 }
 0x21d PF: > { %s15_s18 = sadd.s32 1, %s1304_s18  }
 0x21e   : > { %p12_p4 = scmp.ge.s32.totalorder %s15_s18, 4  }
 0x220   :  { %14 = sbr.rel (!%p12_p4) target bundleno = 1 (0x1), region = 74 }

// kernel: tile.283
= control target key start
LH: loop header
LB: loop body
LE: loop exit
PB: predicated region body
PF: predicated region fallthrough
CT: control target
= control target key end

     0   :  { %s22_s0 = inlined_call_operand.vmem [shape: f32[8], index: 0, kind: input, shape index: {}]   ;;  %s23_s1 = inlined_call_operand.vmem [shape: f32[4,8], index: 1, kind: output, shape index: {}]  }
   0x1   :  { %v4_v0 = vld [vmem:[%s22_s0] ss:$0 sm:$0xff] }
   0x2   :  { %5 = vst [vmem:[%s23_s1] sm:$0xf] %v4_v0 }

// kernel: tile.284
= control target key start
LH: loop header
LB: loop body
LE: loop exit
PB: predicated region body
PF: predicated region fallthrough
CT: control target
= control target key end

     0   :  { %vm7_vm0 = vcmask 64512   ;;  %s37_s8 = smov 8   ;;  %s38_s9 = smov 16   ;;  %vm13_vm1 = vcmask 261312   ;;  %vm19_vm2 = vcmask 195712   ;;  %vm25_vm3 = vcmask 130112   ;;  %s55_s0 = inlined_call_operand.vmem [shape: f32[4,8], index: 0, kind: input, shape index: {}]   ;;  %s56_s1 = inlined_call_operand.vmem [shape: f32[1,32], index: 1, kind: output, shape index: {}]  }
   0x1   :  { %v4_v0 = vld [vmem:[%s55_s0] sm:$0xf]  ;;  %s36_s0 = smov 24  }
   0x2   :  { %5 = vst [vmem:[#allocation1] sm:$0xf] %v4_v0 }
   0x9   :  { %v10_v1 = vld [vmem:[#allocation1 + $0x3] sm:$0x1]   ;;  %v22_v2 = vld [vmem:[#allocation1 + $0x1] sm:$0x1]   ;;  %v6_v3 = vld [vmem:[#allocation1] sm:$0x1]  }
   0xa   :  { %11 = vrot.lane.b32.xlu0 %v10_v1, %s36_s0  ;;  %23 = vrot.lane.b32.xlu1 %v22_v2, %s37_s8  ;;  %v16_v4 = vld [vmem:[#allocation1 + $0x2] sm:$0x1]   ;;  %8 = vst.msk [vmem:[#allocation0] sm:$0x1] %vm7_vm0, %v6_v3  }
   0xe   :  { %17 = vrot.lane.b32.xlu0 %v16_v4, %s38_s9 }
  0x7c   :  { %v12_v5 = vpop.permute.xlu0 %11   ;;  %v24_v6 = vpop.permute.xlu1 %23  }
  0x7d   :  { %14 = vst.msk [vmem:[#allocation0] sm:$0x1] %vm13_vm1, %v12_v5  }
  0x80   :  { %v18_v7 = vpop.permute.xlu0 %17  }
  0x81   :  { %20 = vst.msk [vmem:[#allocation0] sm:$0x1] %vm19_vm2, %v18_v7  }
  0x82   :  { %26 = vst.msk [vmem:[#allocation0] sm:$0x1] %vm25_vm3, %v24_v6  }
  0x89   :  { %v30_v8 = vld [vmem:[#allocation0] sm:$0x1] }
  0x8a   :  { %32 = vst [vmem:[%s56_s1] sm:$0x1] %v30_v8 }

// kernel: bcdunet_forward.34
= control target key start
LH: loop header
LB: loop body
LE: loop exit
PB: predicated region body
PF: predicated region fallthrough
CT: control target
= control target key end

     0   :  { %vm86_vm0 = vcmask 130048   ;;  %vm224_vm1 = vcmask 261120   ;;  %s423_s1 = inlined_call_operand.vmem [shape: bf16[16,32], index: 1, kind: input, shape index: {}]   ;;  %s424_s0 = inlined_call_operand.vmem [shape: bf16[128,16], index: 0, kind: input, shape index: {}]   ;;  %s425_s2 = inlined_call_operand.vmem [shape: f32[1,32], index: 2, kind: input, shape index: {}]   ;;  %s426_s3 = inlined_call_operand.vmem [shape: f32[128,32], index: 3, kind: output, shape index: {}]  }
   0x1   :  { %v292_v0 = vld [vmem:[%s423_s1] sm:$0xff]   ;;  %v295_v3 = vld [vmem:[%s424_s0 + $0x8] sm:$0xff]   ;;  %v297_v5 = vld [vmem:[%s424_s0 + $0x10] sm:$0xff]  }
   0x2   :  { %v293_v1 = vld [vmem:[%s424_s0] sm:$0xff]   ;;  %272 = vmatprep.subr.bf16.mxu0 %v292_v0  ;;  %290 = vmatprep.subr.bf16.mxu1 %v292_v0  ;;  %v296_v4 = vld [vmem:[%s424_s0 + $0x28] sm:$0xff]   ;;  %v298_v6 = vld [vmem:[%s424_s0 + $0x30] sm:$0xff]  }
   0x3   :  { %v294_v2 = vld [vmem:[%s424_s0 + $0x20] sm:$0xff]   ;;  %273 = vmatpush3.bf16.msra.mxu0 %v292_v0  ;;  %291 = vmatpush3.bf16.msra.mxu1 %v292_v0  ;;  %v299_v7 = vld [vmem:[%s424_s0 + $0x18] sm:$0xff]  }
   0x4   :  { %274 = vmatprep.mubr.msk.bf16.mxu0 %vm86_vm0, %v293_v1  ;;  %282 = vmatprep.mubr.msk.bf16.mxu1 %vm86_vm0, %v294_v2  ;;  %v300_v8 = vld [vmem:[%s424_s0 + $0x38] sm:$0xff]   ;;  %v245_v9 = vld [vmem:[%s425_s2] ss:$0 sm:$0xff] }
   0x6   :  { %275 = vmatmul.mubr.msk.bf16.vlgmr.msra.gmra.mrb[0].mxu0 %vm86_vm0, %v295_v3  ;;  %283 = vmatmul.mubr.msk.bf16.vlgmr.msra.gmra.mrb[0].mxu1 %vm86_vm0, %v296_v4 }
   0x7   :  { %278 = vmatprep.mubr.msk.bf16.mxu0 %vm86_vm0, %v297_v5  ;;  %286 = vmatprep.mubr.msk.bf16.mxu1 %vm86_vm0, %v298_v6 }
   0xe   :  { %279 = vmatmul.mubr.msk.bf16.gmra.mrb[4].mxu0 %vm86_vm0, %v299_v7  ;;  %287 = vmatmul.mubr.msk.bf16.gmra.mrb[4].mxu1 %vm86_vm0, %v300_v8 }
  0xd9   :  { %v276_v10 = vpop.f32.mrb[0].mxu0  ;;  %v284_v11 = vpop.f32.mrb[0].mxu1 }
  0xda   :  { %v154_v12 = vadd.f32 %v276_v10, %v245_v9  ;;  %v186_v13 = vadd.f32 %v284_v11, %v245_v9  ;;  %v145_v14 = vpop.f32.mrb[1].mxu0  ;;  %v177_v15 = vpop.f32.mrb[1].mxu1 }
  0xdb   :  { %v146_v16 = vadd.f32 %v245_v9, %v145_v14  ;;  %v178_v17 = vadd.f32 %v245_v9, %v177_v15  ;;  %v277_v18 = vpop.f32.mrb[2].mxu0  ;;  %v285_v19 = vpop.f32.mrb[2].mxu1 }
  0xdc   :  { %v210_v20 = vmax.f32 %v154_v12, 0.0  ;;  %v218_v21 = vmax.f32 %v186_v13, 0.0  ;;  %v157_v22 = vadd.f32 %v277_v18, %v245_v9  ;;  %v189_v23 = vadd.f32 %v285_v19, %v245_v9  ;;  %v148_v24 = vpop.f32.mrb[3].mxu0  ;;  %v180_v25 = vpop.f32.mrb[3].mxu1 }
  0xdd   :  { %v208_v26 = vmax.f32 %v146_v16, 0.0  ;;  %v216_v27 = vmax.f32 %v178_v17, 0.0  ;;  %v149_v28 = vadd.f32 %v245_v9, %v148_v24  ;;  %v181_v29 = vadd.f32 %v245_v9, %v180_v25 }
  0xde   :  { %227 = vst.msk [vmem:[%s426_s3 + $0x10] sm:$0xff] %vm224_vm1, %v210_v20  ;;  %235 = vst.msk [vmem:[%s426_s3 + $0x50] sm:$0xff] %vm224_vm1, %v218_v21  ;;  %v211_v30 = vmax.f32 %v157_v22, 0.0  ;;  %v219_v31 = vmax.f32 %v189_v23, 0.0 }
  0xdf   :  { %225 = vst.msk [vmem:[%s426_s3] sm:$0xff] %vm224_vm1, %v208_v26  ;;  %233 = vst.msk [vmem:[%s426_s3 + $0x40] sm:$0xff] %vm224_vm1, %v216_v27  ;;  %v209_v32 = vmax.f32 %v149_v28, 0.0  ;;  %v217_v33 = vmax.f32 %v181_v29, 0.0 }
  0xe0   :  { %228 = vst.msk [vmem:[%s426_s3 + $0x18] sm:$0xff] %vm224_vm1, %v211_v30  ;;  %236 = vst.msk [vmem:[%s426_s3 + $0x58] sm:$0xff] %vm224_vm1, %v219_v31 }
  0xe1   :  { %226 = vst.msk [vmem:[%s426_s3 + $0x8] sm:$0xff] %vm224_vm1, %v209_v32  ;;  %234 = vst.msk [vmem:[%s426_s3 + $0x48] sm:$0xff] %vm224_vm1, %v217_v33  ;;  %v280_v34 = vpop.f32.mrb[4].mxu0  ;;  %v288_v35 = vpop.f32.mrb[4].mxu1 }
  0xe2   :  { %v170_v36 = vadd.f32 %v280_v34, %v245_v9  ;;  %v202_v37 = vadd.f32 %v288_v35, %v245_v9  ;;  %v161_v38 = vpop.f32.mrb[5].mxu0  ;;  %v193_v39 = vpop.f32.mrb[5].mxu1 }
  0xe3   :  { %v162_v40 = vadd.f32 %v245_v9, %v161_v38  ;;  %v194_v41 = vadd.f32 %v245_v9, %v193_v39  ;;  %v281_v42 = vpop.f32.mrb[6].mxu0  ;;  %v289_v43 = vpop.f32.mrb[6].mxu1 }
  0xe4   :  { %v214_v44 = vmax.f32 %v170_v36, 0.0  ;;  %v222_v45 = vmax.f32 %v202_v37, 0.0  ;;  %v173_v46 = vadd.f32 %v281_v42, %v245_v9  ;;  %v205_v47 = vadd.f32 %v289_v43, %v245_v9  ;;  %v164_v48 = vpop.f32.mrb[7].mxu0  ;;  %v196_v49 = vpop.f32.mrb[7].mxu1 }
  0xe5   :  { %v212_v50 = vmax.f32 %v162_v40, 0.0  ;;  %v220_v51 = vmax.f32 %v194_v41, 0.0  ;;  %v165_v52 = vadd.f32 %v245_v9, %v164_v48  ;;  %v197_v53 = vadd.f32 %v245_v9, %v196_v49 }
  0xe6   :  { %231 = vst.msk [vmem:[%s426_s3 + $0x30] sm:$0xff] %vm224_vm1, %v214_v44  ;;  %239 = vst.msk [vmem:[%s426_s3 + $0x70] sm:$0xff] %vm224_vm1, %v222_v45  ;;  %v215_v54 = vmax.f32 %v173_v46, 0.0  ;;  %v223_v55 = vmax.f32 %v205_v47, 0.0 }
  0xe7   :  { %229 = vst.msk [vmem:[%s426_s3 + $0x20] sm:$0xff] %vm224_vm1, %v212_v50  ;;  %237 = vst.msk [vmem:[%s426_s3 + $0x60] sm:$0xff] %vm224_vm1, %v220_v51  ;;  %v213_v56 = vmax.f32 %v165_v52, 0.0  ;;  %v221_v57 = vmax.f32 %v197_v53, 0.0 }
  0xe8   :  { %232 = vst.msk [vmem:[%s426_s3 + $0x38] sm:$0xff] %vm224_vm1, %v215_v54  ;;  %240 = vst.msk [vmem:[%s426_s3 + $0x78] sm:$0xff] %vm224_vm1, %v223_v55 }
  0xe9   :  { %230 = vst.msk [vmem:[%s426_s3 + $0x28] sm:$0xff] %vm224_vm1, %v213_v56  ;;  %238 = vst.msk [vmem:[%s426_s3 + $0x68] sm:$0xff] %vm224_vm1, %v221_v57 }

// kernel: tile.297
= control target key start
LH: loop header
LB: loop body
LE: loop exit
PB: predicated region body
PF: predicated region fallthrough
CT: control target
= control target key end

     0   :  { %s131_s10 = smov 120   ;;  %s132_s11 = smov 104   ;;  %vm3_vm0 = vcmask 64512   ;;  %vm9_vm1 = vcmask 1048512   ;;  %vm15_vm2 = vcmask 982912   ;;  %vm21_vm3 = vcmask 917312   ;;  %s207_s0 = inlined_call_operand.vmem [shape: f32[16,8], index: 0, kind: input, shape index: {}]   ;;  %s208_s1 = inlined_call_operand.vmem [shape: f32[1,1,128], index: 1, kind: output, shape index: {}]  }
   0x1   :  { %v101_v0 = vld [vmem:[%s207_s0 + $0xf] sm:$0x1]   ;;  %v103_v1 = vld [vmem:[%s207_s0 + $0xd] sm:$0x1]   ;;  %v102_v2 = vld [vmem:[%s207_s0 + $0xe] sm:$0x1]  }
   0x2   :  { %7 = vrot.lane.b32.xlu0 %v101_v0, %s131_s10  ;;  %19 = vrot.lane.b32.xlu1 %v103_v1, %s132_s11  ;;  %v104_v3 = vld [vmem:[%s207_s0 + $0xc] sm:$0x1]   ;;  %s133_s16 = smov 112   ;;  %s134_s17 = smov 96   ;;  %v105_v4 = vld [vmem:[%s207_s0 + $0xb] sm:$0x1]  }
   0x3   :  { %v106_v5 = vld [vmem:[%s207_s0 + $0xa] sm:$0x1]   ;;  %v2_v6 = vld [vmem:[%s207_s0] sm:$0x1]   ;;  %s135_s24 = smov 88   ;;  %s136_s25 = smov 80  }
   0x4   :  { %4 = vst.msk [vmem:[#allocation0] sm:$0x1] %vm3_vm0, %v2_v6   ;;  %v107_v7 = vld [vmem:[%s207_s0 + $0x9] sm:$0x1]   ;;  %v108_v8 = vld [vmem:[%s207_s0 + $0x8] sm:$0x1]  }
   0x5   :  { %s137_s30 = smov 72   ;;  %s138_s2 = smov 64   ;;  %v109_v9 = vld [vmem:[%s207_s0 + $0x7] sm:$0x1]   ;;  %v110_v10 = vld [vmem:[%s207_s0 + $0x6] sm:$0x1]  }
   0x6   :  { %13 = vrot.lane.b32.xlu0 %v102_v2, %s133_s16  ;;  %25 = vrot.lane.b32.xlu1 %v104_v3, %s134_s17  ;;  %s139_s7 = smov 56   ;;  %s140_s8 = smov 48   ;;  %v111_v11 = vld [vmem:[%s207_s0 + $0x5] sm:$0x1]   ;;  %v112_v12 = vld [vmem:[%s207_s0 + $0x4] sm:$0x1]  }
   0x7   :  { %s141_s13 = smov 40   ;;  %s142_s14 = smov 32   ;;  %v113_v13 = vld [vmem:[%s207_s0 + $0x3] sm:$0x1]   ;;  %v114_v14 = vld [vmem:[%s207_s0 + $0x2] sm:$0x1]  }
   0x8   :  { %s143_s19 = smov 24   ;;  %s144_s20 = smov 16   ;;  %v115_v15 = vld [vmem:[%s207_s0 + $0x1] sm:$0x1]   ;;  %vm27_vm4 = vcmask 851712   ;;  %vm33_vm5 = vcmask 786112  }
   0x9   :  { %s145_s0 = smov 8   ;;  %vm39_vm6 = vcmask 720512   ;;  %vm45_vm7 = vcmask 654912   ;;  %vm51_vm8 = vcmask 589312   ;;  %vm57_vm9 = vcmask 523712  }
   0xa   :  { %31 = vrot.lane.b32.xlu0 %v105_v4, %s135_s24  ;;  %37 = vrot.lane.b32.xlu1 %v106_v5, %s136_s25  ;;  %vm63_vm10 = vcmask 458112   ;;  %vm69_vm11 = vcmask 392512   ;;  %vm75_vm12 = vcmask 326912   ;;  %vm81_vm13 = vcmask 261312  }
   0xb   :  { %vm87_vm14 = vcmask 195712   ;;  %vm93_vm15 = vcmask 130112  }
   0xe   :  { %43 = vrot.lane.b32.xlu0 %v107_v7, %s137_s30  ;;  %49 = vrot.lane.b32.xlu1 %v108_v8, %s138_s2 }
  0x12   :  { %55 = vrot.lane.b32.xlu0 %v109_v9, %s139_s7  ;;  %61 = vrot.lane.b32.xlu1 %v110_v10, %s140_s8 }
  0x16   :  { %67 = vrot.lane.b32.xlu0 %v111_v11, %s141_s13  ;;  %73 = vrot.lane.b32.xlu1 %v112_v12, %s142_s14 }
  0x1a   :  { %79 = vrot.lane.b32.xlu0 %v113_v13, %s143_s19  ;;  %85 = vrot.lane.b32.xlu1 %v114_v14, %s144_s20 }
  0x1e   :  { %91 = vrot.lane.b32.xlu0 %v115_v15, %s145_s0 }
  0x74   :  { %v8_v16 = vpop.permute.xlu0 %7   ;;  %v20_v17 = vpop.permute.xlu1 %19  }
  0x75   :  { %10 = vst.msk [vmem:[#allocation0] sm:$0x1] %vm9_vm1, %v8_v16  }
  0x78   :  { %v14_v18 = vpop.permute.xlu0 %13   ;;  %v26_v19 = vpop.permute.xlu1 %25  }
  0x79   :  { %16 = vst.msk [vmem:[#allocation0] sm:$0x1] %vm15_vm2, %v14_v18  }
  0x7a   :  { %22 = vst.msk [vmem:[#allocation0] sm:$0x1] %vm21_vm3, %v20_v17  }
  0x7b   :  { %28 = vst.msk [vmem:[#allocation0] sm:$0x1] %vm27_vm4, %v26_v19  }
  0x7c   :  { %v32_v20 = vpop.permute.xlu0 %31   ;;  %v38_v21 = vpop.permute.xlu1 %37  }
  0x7d   :  { %34 = vst.msk [vmem:[#allocation0] sm:$0x1] %vm33_vm5, %v32_v20  }
  0x7e   :  { %40 = vst.msk [vmem:[#allocation0] sm:$0x1] %vm39_vm6, %v38_v21  }
  0x80   :  { %v44_v22 = vpop.permute.xlu0 %43   ;;  %v50_v23 = vpop.permute.xlu1 %49  }
  0x81   :  { %46 = vst.msk [vmem:[#allocation0] sm:$0x1] %vm45_vm7, %v44_v22  }
  0x82   :  { %52 = vst.msk [vmem:[#allocation0] sm:$0x1] %vm51_vm8, %v50_v23  }
  0x84   :  { %v56_v24 = vpop.permute.xlu0 %55   ;;  %v62_v25 = vpop.permute.xlu1 %61  }
  0x85   :  { %58 = vst.msk [vmem:[#allocation0] sm:$0x1] %vm57_vm9, %v56_v24  }
  0x86   :  { %64 = vst.msk [vmem:[#allocation0] sm:$0x1] %vm63_vm10, %v62_v25  }
  0x88   :  { %v68_v26 = vpop.permute.xlu0 %67   ;;  %v74_v27 = vpop.permute.xlu1 %73  }
  0x89   :  { %70 = vst.msk [vmem:[#allocation0] sm:$0x1] %vm69_vm11, %v68_v26  }
  0x8a   :  { %76 = vst.msk [vmem:[#allocation0] sm:$0x1] %vm75_vm12, %v74_v27  }
  0x8c   :  { %v80_v28 = vpop.permute.xlu0 %79   ;;  %v86_v29 = vpop.permute.xlu1 %85  }
  0x8d   :  { %82 = vst.msk [vmem:[#allocation0] sm:$0x1] %vm81_vm13, %v80_v28  }
  0x8e   :  { %88 = vst.msk [vmem:[#allocation0] sm:$0x1] %vm87_vm14, %v86_v29  }
  0x90   :  { %v92_v30 = vpop.permute.xlu0 %91  }
  0x91   :  { %94 = vst.msk [vmem:[#allocation0] sm:$0x1] %vm93_vm15, %v92_v30  }
  0x98   :  { %v98_v31 = vld [vmem:[#allocation0] sm:$0x1] }
  0x99   :  { %100 = vst [vmem:[%s208_s1] sm:$0x1] %v98_v31 }

// kernel: bcdunet_forward.35
= control target key start
LH: loop header
LB: loop body
LE: loop exit
PB: predicated region body
PF: predicated region fallthrough
CT: control target
= control target key end

     0   :  { %s2710_s12 = smov 0   ;;  %s3222_s0 = inlined_call_operand.vmem [shape: f32[2,18,256], index: 0, kind: input, shape index: {}]   ;;  %s3223_s1 = inlined_call_operand.vmem [shape: bf16[3,3,256,128], index: 1, kind: input, shape index: {}]   ;;  %s3224_s2 = inlined_call_operand.vmem [shape: f32[3,1,128], index: 2, kind: input, shape index: {}]   ;;  %s3225_s3 = inlined_call_operand.vmem [shape: f32[2,16,128], index: 3, kind: output, shape index: {}]  }
   0x1 LB: > { %s1887_s13 = sadd.s32 4294967295, %s2688_s12   ;;  %p1891_p0 = scmp.ge.s32.totalorder %s2688_s12, 1  ;;  %s2688_s12 = sphi %s2710_s12, %s13_s12  }
   0x2   : > { %p137_p1 = scmp.lt.s32.totalorder %s2688_s12, 3 }
   0x4   : > { %p138_p2 = pnand %p1891_p0, %p137_p1 }
   0x5   : > { %v2514_v0 = vld [vmem:[%s3223_s1 + $0xc0] sm:$0xff] (!%p138_p2)   ;;  %v2518_v4 = vld [vmem:[%s3223_s1 + $0xc8] sm:$0xff] (!%p138_p2)   ;;  %v2522_v8 = vld [vmem:[%s3223_s1 + $0xd0] sm:$0xff] (!%p138_p2)   ;;  %p161_p3 = scmp.lt.s32.totalorder (!%p138_p2), %s1887_s13, 1  ;;  %vm317_vm0 = vsmask.f32 (!%p138_p2), 7424 }
   0x6   : > { %141 = sbr.rel (%p138_p2) target bundleno = 417 (0x1a1), region = 32  ;;  %v2515_v1 = vld [vmem:[%s3223_s1 + $0x40] sm:$0xff] (!%p138_p2)   ;;  %2307 = vmatprep.subr.bf16.mxu0 (!%p138_p2), %v2514_v0  ;;  %v2519_v5 = vld [vmem:[%s3223_s1 + $0x48] sm:$0xff] (!%p138_p2)   ;;  %v2523_v9 = vld [vmem:[%s3223_s1 + $0x50] sm:$0xff] (!%p138_p2)   ;;  %vm1277_vm1 = vcmask (!%p138_p2), 1046528  }
   0x7   : > { %v2516_v2 = vld [vmem:[%s3223_s1 + $0x80] sm:$0xff] (!%p138_p2)   ;;  %2329 = vmatprep.subr.bf16.mxu1 (!%p138_p2), %v2515_v1  ;;  %v2520_v6 = vld [vmem:[%s3223_s1 + $0x88] sm:$0xff] (!%p138_p2)   ;;  %v2524_v10 = vld [vmem:[%s3223_s1 + $0x90] sm:$0xff] (!%p138_p2)  }
   0x8   : > { %v2517_v3 = vld [vmem:[%s3223_s1] sm:$0xff] (!%p138_p2)   ;;  %2308 = vmatpush3.bf16.msra.mxu0 (!%p138_p2), %v2516_v2  ;;  %v2521_v7 = vld [vmem:[%s3223_s1 + $0x8] sm:$0xff] (!%p138_p2)   ;;  %v2525_v11 = vld [vmem:[%s3223_s1 + $0x10] sm:$0xff] (!%p138_p2)  }
   0x9   : > { %2330 = vmatpush3.bf16.msra.mxu1 (!%p138_p2), %v2517_v3  ;;  %2309 = vmatprep.subr.bf16.mxu0 (!%p138_p2), %v2518_v4  ;;  %v2526_v12 = vld [vmem:[%s3223_s1 + $0xd8] sm:$0xff] (!%p138_p2)   ;;  %v2530_v16 = vld [vmem:[%s3223_s1 + $0xe0] sm:$0xff] (!%p138_p2)   ;;  %v2534_v20 = vld [vmem:[%s3223_s1 + $0xe8] sm:$0xff] (!%p138_p2)  }
   0xa   : > { %2331 = vmatprep.subr.bf16.mxu1 (!%p138_p2), %v2519_v5  ;;  %v2527_v13 = vld [vmem:[%s3223_s1 + $0x58] sm:$0xff] (!%p138_p2)   ;;  %v2531_v17 = vld [vmem:[%s3223_s1 + $0x60] sm:$0xff] (!%p138_p2)   ;;  %v2535_v21 = vld [vmem:[%s3223_s1 + $0x68] sm:$0xff] (!%p138_p2)  }
   0xb   : > { %v2528_v14 = vld [vmem:[%s3223_s1 + $0x98] sm:$0xff] (!%p138_p2)   ;;  %v2532_v18 = vld [vmem:[%s3223_s1 + $0xa0] sm:$0xff] (!%p138_p2)   ;;  %v2536_v22 = vld [vmem:[%s3223_s1 + $0xa8] sm:$0xff] (!%p138_p2)  }
   0xc   : > { %2310 = vmatpush3.bf16.msra.mxu0 (!%p138_p2), %v2520_v6  ;;  %v2529_v15 = vld [vmem:[%s3223_s1 + $0x18] sm:$0xff] (!%p138_p2)   ;;  %v2533_v19 = vld [vmem:[%s3223_s1 + $0x20] sm:$0xff] (!%p138_p2)   ;;  %v2537_v23 = vld [vmem:[%s3223_s1 + $0x28] sm:$0xff] (!%p138_p2)  }
   0xd   : > { %2332 = vmatpush3.bf16.msra.mxu1 %v2521_v7  ;;  %2311 = vmatprep.subr.bf16.mxu0 %v2522_v8  ;;  %s3227_s13 = smov (!%p161_p3, %s1887_s13), 1  ;;  %v2538_v24 = vld [vmem:[%s3223_s1 + $0xf0] sm:$0xff]   ;;  %v2542_v28 = vld [vmem:[%s3223_s1 + $0xf8] sm:$0xff]   ;;  %v2546_v48 = vld [vmem:[%s3223_s1 + $0x240] sm:$0xff]  }
   0xe   : > { %2333 = vmatprep.subr.bf16.mxu1 %v2523_v9  ;;  %v2539_v25 = vld [vmem:[%s3223_s1 + $0x70] sm:$0xff]   ;;  %s2505_s16 = smul.u32 48, %s3227_s13  ;;  %v2543_v29 = vld [vmem:[%s3223_s1 + $0x78] sm:$0xff]   ;;  %v2547_v55 = vld [vmem:[%s3223_s1 + $0x1c0] sm:$0xff]   ;;  %s2306_s19 = sshll.u32 %s3227_s13, 4 }
   0xf   : > { %v2540_v26 = vld [vmem:[%s3223_s1 + $0xb0] sm:$0xff]   ;;  %v2544_v30 = vld [vmem:[%s3223_s1 + $0xb8] sm:$0xff]   ;;  %v2548_v57 = vld [vmem:[%s3223_s1 + $0x200] sm:$0xff]   ;;  %s170_s22 = scalar_lea.vmem %s3225_s3, %s2306_s19 }
  0x10   : > { %2312 = vmatpush3.bf16.msra.mxu0 %v2524_v10  ;;  %v2541_v27 = vld [vmem:[%s3223_s1 + $0x30] sm:$0xff]   ;;  %s2818_s27 = scalar_lea.vmem %s3222_s0, %s2505_s16  ;;  %v2545_v31 = vld [vmem:[%s3223_s1 + $0x38] sm:$0xff]   ;;  %v2549_v60 = vld [vmem:[%s3223_s1 + $0x180] sm:$0xff]  }
  0x11   : > { %2334 = vmatpush3.bf16.msra.mxu1 %v2525_v11  ;;  %2313 = vmatprep.subr.bf16.mxu0 %v2526_v12  ;;  %v2827_v32 = vld [vmem:[%s2818_s27 + $0x18] sm:$0xff]  ;;  %v277_v33 = vld [vmem:[%s2818_s27 + $0x8] sm:$0xfe]  ;;  %v279_v34 = vld [vmem:[%s2818_s27 + $0x28] sm:$0x1] }
  0x12   : > { %2335 = vmatprep.subr.bf16.mxu1 %v2527_v13  ;;  %v281_v35 = vpack.c.bf16 %v2827_v32, %v277_v33  ;;  %v283_v36 = vpack.c.bf16 %v279_v34, %v279_v34  ;;  %v173_v37 = vld [vmem:[%s2818_s27 + $0x8] sm:$0xff]  ;;  %v2834_v38 = vld [vmem:[%s2818_s27 + $0x10] sm:$0xff]  ;;  %v276_v39 = vld [vmem:[%s2818_s27] sm:$0xfe] }
  0x13   : > { %v2838_v40 = vpack.c.bf16 %v2827_v32, %v173_v37  ;;  %v278_v41 = vld [vmem:[%s2818_s27 + $0x20] sm:$0x1]  ;;  %v280_v42 = vpack.c.bf16 %v2834_v38, %v276_v39  ;;  %v2550_v62 = vld [vmem:[%s3223_s1 + $0x248] sm:$0xff]   ;;  %v2554_v4 = vld [vmem:[%s3223_s1 + $0x250] sm:$0xff]  }
  0x14   : > { %2314 = vmatpush3.bf16.msra.mxu0 %v2528_v14  ;;  %v172_v43 = vld [vmem:[%s2818_s27] sm:$0xff]  ;;  %v331_v44 = vshrl.u32 %v281_v35, 16  ;;  %v333_v45 = vshll.u32 %v281_v35, 16  ;;  %v338_v46 = vshll.u32 %v283_v36, 16  ;;  %v282_v47 = vpack.c.bf16 %v278_v41, %v278_v41  ;;  %v2551_v0 = vld [vmem:[%s3223_s1 + $0x1c8] sm:$0xff]   ;;  %v2555_v5 = vld [vmem:[%s3223_s1 + $0x1d0] sm:$0xff]  }
  0x15   : > { %2336 = vmatpush3.bf16.msra.mxu1 %v2529_v15  ;;  %2315 = vmatprep.subr.bf16.mxu0 %v2530_v16  ;;  %v319_v49 = vshrl.u32 %v280_v42, 16  ;;  %v321_v50 = vshll.u32 %v280_v42, 16  ;;  %v2848_v51 = vpack.c.bf16 %v2834_v38, %v172_v43  ;;  %v2552_v2 = vld [vmem:[%s3223_s1 + $0x208] sm:$0xff]   ;;  %v2556_v6 = vld [vmem:[%s3223_s1 + $0x210] sm:$0xff]   ;;  %v2558_v8 = vld [vmem:[%s3223_s1 + $0x258] sm:$0xff]  }
  0x16   : > { %2337 = vmatprep.subr.bf16.mxu1 %v2531_v17  ;;  %609 = vmatprep.mubr.bf16.mxu1 %v2838_v40  ;;  %v335_v52 = vrot.slane %v333_v45, 1  ;;  %v340_v53 = vrot.slane %v338_v46, 1  ;;  %v326_v54 = vshll.u32 %v282_v47, 16  ;;  %v2553_v3 = vld [vmem:[%s3223_s1 + $0x188] sm:$0xff]   ;;  %v2557_v7 = vld [vmem:[%s3223_s1 + $0x190] sm:$0xff]   ;;  %v2559_v9 = vld [vmem:[%s3223_s1 + $0x1d8] sm:$0xff]  }
  0x17   : > { %v323_v56 = vrot.slane %v321_v50, 1  ;;  %v2560_v10 = vld [vmem:[%s3223_s1 + $0x218] sm:$0xff]   ;;  %v2562_v12 = vld [vmem:[%s3223_s1 + $0x260] sm:$0xff]   ;;  %v2566_v16 = vld [vmem:[%s3223_s1 + $0x268] sm:$0xff]  }
  0x18   : > { %2316 = vmatpush3.bf16.msra.mxu0 %v2532_v18  ;;  %v336_v58 = vor.u32 %v335_v52, %v331_v44  ;;  %v328_v59 = vrot.slane %v326_v54, 1  ;;  %v2561_v11 = vld [vmem:[%s3223_s1 + $0x198] sm:$0xff]   ;;  %v2563_v13 = vld [vmem:[%s3223_s1 + $0x1e0] sm:$0xff]   ;;  %v2567_v17 = vld [vmem:[%s3223_s1 + $0x1e8] sm:$0xff]  }
  0x19   : > { %2338 = vmatpush3.bf16.msra.mxu1 %v2533_v19  ;;  %2317 = vmatprep.subr.bf16.mxu0 %v2534_v20  ;;  %v324_v61 = vor.u32 %v323_v56, %v319_v49  ;;  %v2564_v14 = vld [vmem:[%s3223_s1 + $0x220] sm:$0xff]   ;;  %v2568_v18 = vld [vmem:[%s3223_s1 + $0x228] sm:$0xff]   ;;  %v2570_v20 = vld [vmem:[%s3223_s1 + $0x270] sm:$0xff]  }
  0x1a   : > { %2339 = vmatprep.subr.bf16.mxu1 %v2535_v21  ;;  %v2865_v63 = vsel %vm317_vm0, %v336_v58, %v340_v53  ;;  %v2565_v15 = vld [vmem:[%s3223_s1 + $0x1a0] sm:$0xff]   ;;  %v2569_v19 = vld [vmem:[%s3223_s1 + $0x1a8] sm:$0xff]   ;;  %v2571_v21 = vld [vmem:[%s3223_s1 + $0x1f0] sm:$0xff]  }
  0x1b   : > { %472 = vmatprep.mubr.bf16.mxu0 %v2865_v63  ;;  %v2872_v1 = vsel %vm317_vm0, %v324_v61, %v328_v59  ;;  %v2582_v33 = vld [vmem:[%s3223_s1 + $0x3c8] sm:$0xff]   ;;  %v2586_v37 = vld [vmem:[%s3223_s1 + $0x3d0] sm:$0xff]   ;;  %v2590_v42 = vld [vmem:[%s3223_s1 + $0x3d8] sm:$0xff]  }
  0x1c   : > { %2318 = vmatpush3.bf16.msra.mxu0 %v2536_v22  ;;  %v2572_v22 = vld [vmem:[%s3223_s1 + $0x230] sm:$0xff]   ;;  %v2583_v34 = vld [vmem:[%s3223_s1 + $0x348] sm:$0xff]   ;;  %v2591_v43 = vld [vmem:[%s3223_s1 + $0x358] sm:$0xff]  }
  0x1d   : > { %2340 = vmatpush3.bf16.msra.mxu1 %v2537_v23  ;;  %2319 = vmatprep.subr.bf16.mxu0 %v2538_v24  ;;  %v2573_v23 = vld [vmem:[%s3223_s1 + $0x1b0] sm:$0xff]   ;;  %v2574_v24 = vld [vmem:[%s3223_s1 + $0x278] sm:$0xff]   ;;  %v2584_v35 = vld [vmem:[%s3223_s1 + $0x388] sm:$0xff]  }
  0x1e   : > { %2341 = vmatprep.subr.bf16.mxu1 %v2539_v25  ;;  %v2575_v25 = vld [vmem:[%s3223_s1 + $0x1f8] sm:$0xff]   ;;  %v2585_v36 = vld [vmem:[%s3223_s1 + $0x308] sm:$0xff]   ;;  %v2587_v39 = vld [vmem:[%s3223_s1 + $0x350] sm:$0xff]  }
  0x1f   : > { %v2589_v41 = vld [vmem:[%s3223_s1 + $0x310] sm:$0xff]   ;;  %v2592_v44 = vld [vmem:[%s3223_s1 + $0x398] sm:$0xff]   ;;  %v2594_v46 = vld [vmem:[%s3223_s1 + $0x3e0] sm:$0xff]  }
  0x20   : > { %2320 = vmatpush3.bf16.msra.mxu0 %v2540_v26  ;;  %v2576_v26 = vld [vmem:[%s3223_s1 + $0x238] sm:$0xff]   ;;  %v2595_v47 = vld [vmem:[%s3223_s1 + $0x360] sm:$0xff]   ;;  %v2598_v50 = vld [vmem:[%s3223_s1 + $0x3e8] sm:$0xff]  }
  0x21   : > { %2342 = vmatpush3.bf16.msra.mxu1 %v2541_v27  ;;  %2321 = vmatprep.subr.bf16.mxu0 %v2542_v28  ;;  %v2577_v27 = vld [vmem:[%s3223_s1 + $0x1b8] sm:$0xff]   ;;  %v2578_v28 = vld [vmem:[%s3223_s1 + $0x3c0] sm:$0xff]   ;;  %v2599_v52 = vld [vmem:[%s3223_s1 + $0x368] sm:$0xff]  }
  0x22   : > { %2343 = vmatprep.subr.bf16.mxu1 %v2543_v29  ;;  %v2579_v29 = vld [vmem:[%s3223_s1 + $0x340] sm:$0xff]   ;;  %v2593_v45 = vld [vmem:[%s3223_s1 + $0x318] sm:$0xff]   ;;  %v2600_v53 = vld [vmem:[%s3223_s1 + $0x3a8] sm:$0xff]  }
  0x23   : > { %v2597_v49 = vld [vmem:[%s3223_s1 + $0x320] sm:$0xff]   ;;  %v2601_v54 = vld [vmem:[%s3223_s1 + $0x328] sm:$0xff]   ;;  %v2603_v56 = vld [vmem:[%s3223_s1 + $0x370] sm:$0xff]  }
  0x24   : > { %2322 = vmatpush3.bf16.msra.mxu0 %v2544_v30  ;;  %v2580_v30 = vld [vmem:[%s3223_s1 + $0x380] sm:$0xff]   ;;  %v2605_v58 = vld [vmem:[%s3223_s1 + $0x330] sm:$0xff]   ;;  %v2606_v59 = vld [vmem:[%s3223_s1 + $0x3f8] sm:$0xff]  }
  0x25   : > { %2344 = vmatpush3.bf16.msra.mxu1 %v2545_v31  ;;  %2351 = vmatprep.subr.bf16.mxu0 %v2546_v48  ;;  %v2581_v31 = vld [vmem:[%s3223_s1 + $0x300] sm:$0xff]   ;;  %v2608_v61 = vld [vmem:[%s3223_s1 + $0x3b8] sm:$0xff]  }
  0x26   : > { %2373 = vmatprep.subr.bf16.mxu1 %v2547_v55  ;;  %v2596_v48 = vld [vmem:[%s3223_s1 + $0x3a0] sm:$0xff]   ;;  %v2602_v55 = vld [vmem:[%s3223_s1 + $0x3f0] sm:$0xff]  }
  0x27   : > { %473 = vmatmul.mubr.bf16.vlgmr.msra.gmra.mrb[0].mxu0 %v2872_v1 }
  0x28   : > { %610 = vmatmul.mubr.bf16.vlgmr.msra.gmra.mrb[0].mxu1 %v2848_v51  ;;  %2352 = vmatpush3.bf16.msra.mxu0 %v2548_v57  ;;  %v2604_v57 = vld [vmem:[%s3223_s1 + $0x3b0] sm:$0xff]  }
  0x29   : > { %916 = vmatprep.mubr.bf16.mxu1 %v2838_v40  ;;  %2374 = vmatpush3.bf16.msra.mxu1 %v2549_v60  ;;  %v2607_v60 = vld [vmem:[%s3223_s1 + $0x378] sm:$0xff]  }
  0x2a   : > { %2375 = vmatprep.subr.bf16.mxu1 %v2551_v0  ;;  %779 = vmatprep.mubr.bf16.mxu0 %v2865_v63  ;;  %v2611_v0 = vld [vmem:[%s3223_s1 + $0x2c0] sm:$0xff]  }
  0x2b   : > { %2353 = vmatprep.subr.bf16.mxu0 %v2550_v62  ;;  %v2609_v62 = vld [vmem:[%s3223_s1 + $0x338] sm:$0xff]  }
  0x2c   : > { %2354 = vmatpush3.bf16.msra.mxu0 %v2552_v2  ;;  %v2612_v2 = vld [vmem:[%s3223_s1 + $0x100] sm:$0xff]  }
  0x2d   : > { %2376 = vmatpush3.bf16.msra.mxu1 %v2553_v3  ;;  %2355 = vmatprep.subr.bf16.mxu0 %v2554_v4  ;;  %v2613_v3 = vld [vmem:[%s3223_s1 + $0x280] sm:$0xff]   ;;  %v2614_v4 = vld [vmem:[%s3223_s1 + $0x148] sm:$0xff]  }
  0x2e   : > { %2377 = vmatprep.subr.bf16.mxu1 %v2555_v5  ;;  %v2615_v5 = vld [vmem:[%s3223_s1 + $0x2c8] sm:$0xff]  }
  0x30   : > { %2356 = vmatpush3.bf16.msra.mxu0 %v2556_v6  ;;  %v2616_v6 = vld [vmem:[%s3223_s1 + $0x108] sm:$0xff]  }
  0x31   : > { %2378 = vmatpush3.bf16.msra.mxu1 %v2557_v7  ;;  %2357 = vmatprep.subr.bf16.mxu0 %v2558_v8  ;;  %v2618_v7 = vld [vmem:[%s3223_s1 + $0x150] sm:$0xff]  }
  0x32   : > { %2379 = vmatprep.subr.bf16.mxu1 %v2559_v9  ;;  %v2619_v8 = vld [vmem:[%s3223_s1 + $0x2d0] sm:$0xff]  }
  0x33   : > { %v2621_v9 = vld [vmem:[%s3223_s1 + $0x290] sm:$0xff]  }
  0x34   : > { %2358 = vmatpush3.bf16.msra.mxu0 %v2560_v10  ;;  %v2622_v10 = vld [vmem:[%s3223_s1 + $0x158] sm:$0xff]  }
  0x35   : > { %2380 = vmatpush3.bf16.msra.mxu1 %v2561_v11  ;;  %2359 = vmatprep.subr.bf16.mxu0 %v2562_v12  ;;  %v2623_v11 = vld [vmem:[%s3223_s1 + $0x2d8] sm:$0xff]  }
  0x36   : > { %2381 = vmatprep.subr.bf16.mxu1 %v2563_v13  ;;  %v2624_v12 = vld [vmem:[%s3223_s1 + $0x118] sm:$0xff]  }
  0x37   : > { %v2625_v13 = vld [vmem:[%s3223_s1 + $0x298] sm:$0xff]  }
  0x38   : > { %2360 = vmatpush3.bf16.msra.mxu0 %v2564_v14  ;;  %v2626_v14 = vld [vmem:[%s3223_s1 + $0x160] sm:$0xff]  }
  0x39   : > { %2382 = vmatpush3.bf16.msra.mxu1 %v2565_v15  ;;  %2361 = vmatprep.subr.bf16.mxu0 %v2566_v16  ;;  %v2627_v15 = vld [vmem:[%s3223_s1 + $0x2e0] sm:$0xff]  }
  0x3a   : > { %2383 = vmatprep.subr.bf16.mxu1 %v2567_v17  ;;  %v2628_v16 = vld [vmem:[%s3223_s1 + $0x120] sm:$0xff]  }
  0x3b   : > { %v2629_v17 = vld [vmem:[%s3223_s1 + $0x2a0] sm:$0xff]  }
  0x3c   : > { %2362 = vmatpush3.bf16.msra.mxu0 %v2568_v18  ;;  %v2630_v18 = vld [vmem:[%s3223_s1 + $0x168] sm:$0xff]  }
  0x3d   : > { %2384 = vmatpush3.bf16.msra.mxu1 %v2569_v19  ;;  %2363 = vmatprep.subr.bf16.mxu0 %v2570_v20  ;;  %v2631_v19 = vld [vmem:[%s3223_s1 + $0x2e8] sm:$0xff]  }
  0x3e   : > { %2385 = vmatprep.subr.bf16.mxu1 %v2571_v21  ;;  %v2632_v20 = vld [vmem:[%s3223_s1 + $0x128] sm:$0xff]  }
  0x3f   : > { %v2633_v21 = vld [vmem:[%s3223_s1 + $0x2a8] sm:$0xff]  }
  0x40   : > { %2364 = vmatpush3.bf16.msra.mxu0 %v2572_v22  ;;  %v2634_v22 = vld [vmem:[%s3223_s1 + $0x170] sm:$0xff]  }
  0x41   : > { %2386 = vmatpush3.bf16.msra.mxu1 %v2573_v23  ;;  %2365 = vmatprep.subr.bf16.mxu0 %v2574_v24  ;;  %v2635_v23 = vld [vmem:[%s3223_s1 + $0x2f0] sm:$0xff]  }
  0x42   : > { %2387 = vmatprep.subr.bf16.mxu1 %v2575_v25  ;;  %v2636_v24 = vld [vmem:[%s3223_s1 + $0x130] sm:$0xff]  }
  0x43   : > { %v2637_v25 = vld [vmem:[%s3223_s1 + $0x2b0] sm:$0xff]  }
  0x44   : > { %2366 = vmatpush3.bf16.msra.mxu0 %v2576_v26  ;;  %v2638_v26 = vld [vmem:[%s3223_s1 + $0x178] sm:$0xff]  }
  0x45   : > { %2388 = vmatpush3.bf16.msra.mxu1 %v2577_v27  ;;  %2395 = vmatprep.subr.bf16.mxu0 %v2578_v28  ;;  %v2639_v27 = vld [vmem:[%s3223_s1 + $0x2f8] sm:$0xff]  }
  0x46   : > { %2417 = vmatprep.subr.bf16.mxu1 %v2579_v29  ;;  %v2640_v28 = vld [vmem:[%s3223_s1 + $0x138] sm:$0xff]  }
  0x47   : > { %780 = vmatmul.mubr.bf16.vlgmr.msra.gmra.mrb[4].mxu0 %v2872_v1  ;;  %v2641_v29 = vld [vmem:[%s3223_s1 + $0x2b8] sm:$0xff]  }
  0x48   : > { %917 = vmatmul.mubr.bf16.vlgmr.msra.gmra.mrb[4].mxu1 %v2848_v51  ;;  %2396 = vmatpush3.bf16.msra.mxu0 %v2580_v30  ;;  %v1233_v30 = vld [vmem:[%s2818_s27 + $0x8] sm:$0xfc] }
  0x49   : > { %2418 = vmatpush3.bf16.msra.mxu1 %v2581_v31  ;;  %1223 = vmatprep.mubr.bf16.mxu1 %v2838_v40  ;;  %v2588_v40 = vld [vmem:[%s3223_s1 + $0x390] sm:$0xff]   ;;  %v1235_v31 = vld [vmem:[%s2818_s27 + $0x28] sm:$0x3] }
  0x4a   : > { %2419 = vmatprep.subr.bf16.mxu1 %v2583_v34  ;;  %1086 = vmatprep.mubr.bf16.mxu0 %v2865_v63  ;;  %v2610_v63 = vld [vmem:[%s3223_s1 + $0x140] sm:$0xff]  }
  0x4b   : > { %2397 = vmatprep.subr.bf16.mxu0 %v2582_v33  ;;  %v1237_v33 = vpack.c.bf16 %v2827_v32, %v1233_v30  ;;  %v1232_v34 = vld [vmem:[%s2818_s27] sm:$0xfc] }
  0x4c   : > { %2398 = vmatpush3.bf16.msra.mxu0 %v2584_v35  ;;  %v1234_v35 = vld [vmem:[%s2818_s27 + $0x20] sm:$0x3] }
  0x4d   : > { %2420 = vmatpush3.bf16.msra.mxu1 %v2585_v36  ;;  %2399 = vmatprep.subr.bf16.mxu0 %v2586_v37  ;;  %v1239_v36 = vpack.c.bf16 %v1235_v31, %v1235_v31  ;;  %v1236_v37 = vpack.c.bf16 %v2834_v38, %v1232_v34  ;;  %v2643_v32 = vld [vmem:[%s3223_s1 + $0x400] sm:$0xff]   ;;  %v2644_v38 = vld [vmem:[%s3223_s1 + $0x448] sm:$0xff]  }
  0x4e   : > { %2421 = vmatprep.subr.bf16.mxu1 %v2587_v39  ;;  %v1238_v39 = vpack.c.bf16 %v1234_v35, %v1234_v35 }
  0x50   : > { %2400 = vmatpush3.bf16.msra.mxu0 %v2588_v40  ;;  %v2642_v40 = vld [vmem:[%s3223_s1 + $0x440] sm:$0xff]  }
  0x51   : > { %2422 = vmatpush3.bf16.msra.mxu1 %v2589_v41  ;;  %2401 = vmatprep.subr.bf16.mxu0 %v2590_v42  ;;  %v1281_v41 = vrot.slane %v1237_v33, 1  ;;  %v1282_v42 = vrot.slane %v1239_v36, 1 }
  0x52   : > { %2423 = vmatprep.subr.bf16.mxu1 %v2591_v43  ;;  %v1278_v43 = vrot.slane %v1236_v37, 1 }
  0x54   : > { %2402 = vmatpush3.bf16.msra.mxu0 %v2592_v44  ;;  %v1279_v44 = vrot.slane %v1238_v39, 1 }
  0x55   : > { %2424 = vmatpush3.bf16.msra.mxu1 %v2593_v45  ;;  %2403 = vmatprep.subr.bf16.mxu0 %v2594_v46  ;;  %v1283_v45 = vsel %vm1277_vm1, %v1281_v41, %v1282_v42 }
  0x56   : > { %2425 = vmatprep.subr.bf16.mxu1 %v2595_v47  ;;  %v1280_v46 = vsel %vm1277_vm1, %v1278_v43, %v1279_v44  ;;  %v2645_v47 = vld [vmem:[%s3223_s1 + $0x408] sm:$0xff]  }
  0x58   : > { %2404 = vmatpush3.bf16.msra.mxu0 %v2596_v48  ;;  %v2646_v48 = vld [vmem:[%s3223_s1 + $0x450] sm:$0xff]  }
  0x59   : > { %2426 = vmatpush3.bf16.msra.mxu1 %v2597_v49  ;;  %2405 = vmatprep.subr.bf16.mxu0 %v2598_v50  ;;  %v2647_v49 = vld [vmem:[%s3223_s1 + $0x410] sm:$0xff]   ;;  %v2648_v50 = vld [vmem:[%s3223_s1 + $0x458] sm:$0xff]  }
  0x5a   : > { %2427 = vmatprep.subr.bf16.mxu1 %v2599_v52  ;;  %v2649_v52 = vld [vmem:[%s3223_s1 + $0x418] sm:$0xff]  }
  0x5c   : > { %2406 = vmatpush3.bf16.msra.mxu0 %v2600_v53  ;;  %v2650_v53 = vld [vmem:[%s3223_s1 + $0x460] sm:$0xff]  }
  0x5d   : > { %2428 = vmatpush3.bf16.msra.mxu1 %v2601_v54  ;;  %2407 = vmatprep.subr.bf16.mxu0 %v2602_v55  ;;  %v2651_v54 = vld [vmem:[%s3223_s1 + $0x420] sm:$0xff]   ;;  %v2652_v55 = vld [vmem:[%s3223_s1 + $0x468] sm:$0xff]  }
  0x5e   : > { %2429 = vmatprep.subr.bf16.mxu1 %v2603_v56  ;;  %v2653_v56 = vld [vmem:[%s3223_s1 + $0x428] sm:$0xff]  }
  0x60   : > { %2408 = vmatpush3.bf16.msra.mxu0 %v2604_v57  ;;  %v2654_v57 = vld [vmem:[%s3223_s1 + $0x470] sm:$0xff]  }
  0x61   : > { %2430 = vmatpush3.bf16.msra.mxu1 %v2605_v58  ;;  %2409 = vmatprep.subr.bf16.mxu0 %v2606_v59  ;;  %v2655_v58 = vld [vmem:[%s3223_s1 + $0x430] sm:$0xff]   ;;  %v2656_v59 = vld [vmem:[%s3223_s1 + $0x478] sm:$0xff]  }
  0x62   : > { %2431 = vmatprep.subr.bf16.mxu1 %v2607_v60  ;;  %v2657_v60 = vld [vmem:[%s3223_s1 + $0x438] sm:$0xff]  }
  0x64   : > { %2410 = vmatpush3.bf16.msra.mxu0 %v2608_v61 }
  0x65   : > { %2432 = vmatpush3.bf16.msra.mxu1 %v2609_v62  ;;  %2439 = vmatprep.subr.bf16.mxu0 %v2610_v63 }
  0x66   : > { %2461 = vmatprep.subr.bf16.mxu1 %v2611_v0 }
  0x67   : > { %1087 = vmatmul.mubr.bf16.vlgmr.msra.gmra.mrb[8].mxu0 %v2872_v1  ;;  %v2620_v1 = vld [vmem:[%s3223_s1 + $0x110] sm:$0xff]  }
  0x68   : > { %1224 = vmatmul.mubr.bf16.vlgmr.msra.gmra.mrb[8].mxu1 %v2848_v51  ;;  %v2617_v51 = vld [vmem:[%s3223_s1 + $0x288] sm:$0xff]   ;;  %2440 = vmatpush3.bf16.msra.mxu0 %v2612_v2 }
  0x69   : > { %2462 = vmatpush3.bf16.msra.mxu1 %v2613_v3  ;;  %2441 = vmatprep.subr.bf16.mxu0 %v2614_v4 }
  0x6a   : > { %2463 = vmatprep.subr.bf16.mxu1 %v2615_v5  ;;  %1414 = vmatprep.mubr.bf16.mxu0 %v1283_v45 }
  0x6b   : > { %1586 = vmatprep.mubr.bf16.mxu1 %v1283_v45 }
  0x6c   : > { %2442 = vmatpush3.bf16.msra.mxu0 %v2616_v6 }
  0x6d   : > { %2464 = vmatpush3.bf16.msra.mxu1 %v2617_v51  ;;  %2443 = vmatprep.subr.bf16.mxu0 %v2618_v7 }
  0x6e   : > { %2465 = vmatprep.subr.bf16.mxu1 %v2619_v8 }
  0x70   : > { %2444 = vmatpush3.bf16.msra.mxu0 %v2620_v1 }
  0x71   : > { %2466 = vmatpush3.bf16.msra.mxu1 %v2621_v9  ;;  %2445 = vmatprep.subr.bf16.mxu0 %v2622_v10 }
  0x72   : > { %2467 = vmatprep.subr.bf16.mxu1 %v2623_v11 }
  0x74   : > { %2446 = vmatpush3.bf16.msra.mxu0 %v2624_v12 }
  0x75   : > { %2468 = vmatpush3.bf16.msra.mxu1 %v2625_v13  ;;  %2447 = vmatprep.subr.bf16.mxu0 %v2626_v14 }
  0x76   : > { %2469 = vmatprep.subr.bf16.mxu1 %v2627_v15 }
  0x78   : > { %2448 = vmatpush3.bf16.msra.mxu0 %v2628_v16 }
  0x79   : > { %2470 = vmatpush3.bf16.msra.mxu1 %v2629_v17  ;;  %2449 = vmatprep.subr.bf16.mxu0 %v2630_v18 }
  0x7a   : > { %2471 = vmatprep.subr.bf16.mxu1 %v2631_v19 }
  0x7c   : > { %2450 = vmatpush3.bf16.msra.mxu0 %v2632_v20 }
  0x7d   : > { %2472 = vmatpush3.bf16.msra.mxu1 %v2633_v21  ;;  %2451 = vmatprep.subr.bf16.mxu0 %v2634_v22 }
  0x7e   : > { %2473 = vmatprep.subr.bf16.mxu1 %v2635_v23 }
  0x80   : > { %2452 = vmatpush3.bf16.msra.mxu0 %v2636_v24 }
  0x81   : > { %2474 = vmatpush3.bf16.msra.mxu1 %v2637_v25  ;;  %2453 = vmatprep.subr.bf16.mxu0 %v2638_v26 }
  0x82   : > { %2475 = vmatprep.subr.bf16.mxu1 %v2639_v27 }
  0x84   : > { %2454 = vmatpush3.bf16.msra.mxu0 %v2640_v28 }
  0x85   : > { %2476 = vmatpush3.bf16.msra.mxu1 %v2641_v29  ;;  %2483 = vmatprep.subr.bf16.mxu0 %v2642_v40 }
  0x87   : > { %1415 = vmatmul.mubr.bf16.vlgmr.msra.gmra.mrb[12].mxu0 %v1280_v46 }
  0x88   : > { %1587 = vmatmul.mubr.bf16.vlgmr.msra.gmra.mrb[12].mxu1 %v1280_v46  ;;  %2484 = vmatpush3.bf16.msra.mxu0 %v2643_v32 }
  0x89   : > { %1758 = vmatprep.mubr.bf16.mxu0 %v1283_v45  ;;  %2485 = vmatprep.subr.bf16.mxu0 %v2644_v38  ;;  %v2295_v38 = vld [vmem:[%s3224_s2] ss:$0 sm:$0xff] }
  0x8c   : > { %2486 = vmatpush3.bf16.msra.mxu0 %v2645_v47 }
  0x8d   : > { %2487 = vmatprep.subr.bf16.mxu0 %v2646_v48 }
  0x90   : > { %2488 = vmatpush3.bf16.msra.mxu0 %v2647_v49 }
  0x91   : > { %2489 = vmatprep.subr.bf16.mxu0 %v2648_v50 }
  0x94   : > { %2490 = vmatpush3.bf16.msra.mxu0 %v2649_v52 }
  0x95   : > { %2491 = vmatprep.subr.bf16.mxu0 %v2650_v53 }
  0x98   : > { %2492 = vmatpush3.bf16.msra.mxu0 %v2651_v54 }
  0x99   : > { %2493 = vmatprep.subr.bf16.mxu0 %v2652_v55 }
  0x9c   : > { %2494 = vmatpush3.bf16.msra.mxu0 %v2653_v56 }
  0x9d   : > { %2495 = vmatprep.subr.bf16.mxu0 %v2654_v57 }
  0xa0   : > { %2496 = vmatpush3.bf16.msra.mxu0 %v2655_v58 }
  0xa1   : > { %2497 = vmatprep.subr.bf16.mxu0 %v2656_v59 }
  0xa4   : > { %2498 = vmatpush3.bf16.msra.mxu0 %v2657_v60  ;;  %v2299_v60 = vld [vmem:[%s3224_s2 + $0x1] ss:$0 sm:$0xff] }
  0xa7   : > { %1759 = vmatmul.mubr.bf16.vlgmr.msra.gmra.mrb[16].mxu0 %v1280_v46 }
  0xfa   : > { %v2323_v4 = vpop.f32.mrb[0].mxu0 }
  0xfb   : > { %v2345_v61 = vpop.f32.mrb[0].mxu1  ;;  %v2324_v5 = vpop.f32.mrb[1].mxu0 }
  0xfc   : > { %v2346_v62 = vpop.f32.mrb[1].mxu1  ;;  %v2325_v6 = vadd.f32 %v2324_v5, %v2323_v4  ;;  %v2326_v51 = vpop.f32.mrb[2].mxu0 }
  0xfd   : > { %v2347_v63 = vadd.f32 %v2346_v62, %v2345_v61  ;;  %v2348_v0 = vpop.f32.mrb[2].mxu1  ;;  %v2327_v7 = vpop.f32.mrb[3].mxu0 }
  0xfe   : > { %v2349_v2 = vpop.f32.mrb[3].mxu1  ;;  %v2328_v1 = vadd.f32 %v2327_v7, %v2326_v51 }
  0xff   : > { %v2350_v3 = vadd.f32 %v2349_v2, %v2348_v0  ;;  %v612_v8 = vadd.f32 %v2347_v63, %v2325_v6 }
 0x101   : > { %v615_v9 = vadd.f32 %v2350_v3, %v2328_v1 }
 0x11a   : > { %v2367_v14 = vpop.f32.mrb[4].mxu0 }
 0x11b   : > { %v2389_v10 = vpop.f32.mrb[4].mxu1  ;;  %v2368_v16 = vpop.f32.mrb[5].mxu0 }
 0x11c   : > { %v2390_v11 = vpop.f32.mrb[5].mxu1  ;;  %v2369_v18 = vadd.f32 %v2368_v16, %v2367_v14  ;;  %v2370_v19 = vpop.f32.mrb[6].mxu0 }
 0x11d   : > { %v2391_v12 = vadd.f32 %v2390_v11, %v2389_v10  ;;  %v2392_v13 = vpop.f32.mrb[6].mxu1  ;;  %v2371_v20 = vpop.f32.mrb[7].mxu0  ;;  %v2301_v11 = vld [vmem:[%s3224_s2 + $0x2] ss:$0 sm:$0xff] }
 0x11e   : > { %v2393_v15 = vpop.f32.mrb[7].mxu1  ;;  %v2372_v22 = vadd.f32 %v2371_v20, %v2370_v19 }
 0x11f   : > { %v2394_v17 = vadd.f32 %v2393_v15, %v2392_v13  ;;  %v919_v21 = vadd.f32 %v2391_v12, %v2369_v18 }
 0x121   : > { %v922_v23 = vadd.f32 %v2394_v17, %v2372_v22 }
 0x13a   : > { %v2411_v28 = vpop.f32.mrb[8].mxu0 }
 0x13b   : > { %v2433_v24 = vpop.f32.mrb[8].mxu1  ;;  %v2412_v30 = vpop.f32.mrb[9].mxu0 }
 0x13c   : > { %v2434_v25 = vpop.f32.mrb[9].mxu1  ;;  %v2413_v33 = vadd.f32 %v2412_v30, %v2411_v28  ;;  %v2414_v34 = vpop.f32.mrb[10].mxu0 }
 0x13d   : > { %v2435_v26 = vadd.f32 %v2434_v25, %v2433_v24  ;;  %v2436_v27 = vpop.f32.mrb[10].mxu1  ;;  %v2415_v35 = vpop.f32.mrb[11].mxu0 }
 0x13e   : > { %v2437_v29 = vpop.f32.mrb[11].mxu1  ;;  %v2416_v37 = vadd.f32 %v2415_v35, %v2414_v34 }
 0x13f   : > { %v2438_v31 = vadd.f32 %v2437_v29, %v2436_v27  ;;  %v1226_v36 = vadd.f32 %v2435_v26, %v2413_v33 }
 0x141   : > { %v1229_v39 = vadd.f32 %v2438_v31, %v2416_v37 }
 0x15a   : > { %v2455_v40 = vpop.f32.mrb[12].mxu0 }
 0x15b   : > { %v2477_v41 = vpop.f32.mrb[12].mxu1  ;;  %v2456_v42 = vpop.f32.mrb[13].mxu0 }
 0x15c   : > { %v2478_v43 = vpop.f32.mrb[13].mxu1  ;;  %v2457_v44 = vadd.f32 %v2456_v42, %v2455_v40  ;;  %v2458_v45 = vpop.f32.mrb[14].mxu0 }
 0x15d   : > { %v2479_v32 = vadd.f32 %v2478_v43, %v2477_v41  ;;  %v2480_v46 = vpop.f32.mrb[14].mxu1  ;;  %v2459_v47 = vpop.f32.mrb[15].mxu0 }
 0x15e   : > { %v2481_v48 = vpop.f32.mrb[15].mxu1  ;;  %v1423_v49 = vadd.f32 %v2457_v44, %v612_v8  ;;  %v2460_v52 = vadd.f32 %v2459_v47, %v2458_v45 }
 0x15f   : > { %v1595_v50 = vadd.f32 %v2479_v32, %v919_v21  ;;  %v2482_v53 = vadd.f32 %v2481_v48, %v2480_v46 }
 0x160   : > { %v1776_v54 = vadd.f32 %v2295_v38, %v1423_v49  ;;  %v1424_v55 = vadd.f32 %v2460_v52, %v615_v9 }
 0x161   : > { %v1596_v56 = vadd.f32 %v2482_v53, %v922_v23  ;;  %v1798_v61 = vadd.f32 %v2299_v60, %v1595_v50 }
 0x162   : > { %v2296_v57 = vmul.f32 -1.442695, %v1776_v54  ;;  %v1777_v58 = vadd.f32 %v2295_v38, %v1424_v55 }
 0x163   : > { %v1799_v63 = vadd.f32 %v2299_v60, %v1596_v56 }
 0x164   : > { %2658 = vpow2.f32 %v2296_v57  ;;  %v2297_v59 = vmul.f32 -1.442695, %v1777_v58 }
 0x166   : > { %2660 = vpow2.f32 %v2297_v59 }
 0x167   : > { %2662 = vtanh.f32 %v1798_v61 }
 0x16e   : > { %v2659_v62 = vpop.eup %2658 }
 0x16f   : > { %v1784_v0 = vadd.f32 1.0, %v2659_v62 }
 0x170   : > { %v2661_v2 = vpop.eup %2660 }
 0x171   : > { %2664 = vrcp.f32 %v1784_v0  ;;  %v1785_v3 = vadd.f32 1.0, %v2661_v2  ;;  %v2663_v4 = vpop.eup %2662 }
 0x172   : > { %2666 = vtanh.f32 %v1799_v63 }
 0x173   : > { %2668 = vrcp.f32 %v1785_v3 }
 0x17a   : > { %v2499_v5 = vpop.f32.mrb[16].mxu0 }
 0x17b   : > { %v2665_v6 = vpop.eup %2664  ;;  %v2500_v51 = vpop.f32.mrb[17].mxu0 }
 0x17c   : > { %v2667_v7 = vpop.eup %2666  ;;  %v1824_v8 = vmul.f32 %v2665_v6, %v2663_v4  ;;  %v2501_v1 = vadd.f32 %v2500_v51, %v2499_v5  ;;  %v2502_v9 = vpop.f32.mrb[18].mxu0 }
 0x17d   : > { %v2669_v10 = vpop.eup %2668  ;;  %v2503_v12 = vpop.f32.mrb[19].mxu0 }
 0x17e   : > { %v1825_v13 = vmul.f32 %v2669_v10, %v2667_v7  ;;  %v1767_v14 = vadd.f32 %v2501_v1, %v1226_v36  ;;  %v2504_v15 = vadd.f32 %v2503_v12, %v2502_v9 }
 0x180   : > { %v1810_v16 = vadd.f32 %v2301_v11, %v1767_v14  ;;  %v1768_v17 = vadd.f32 %v2504_v15, %v1229_v39 }
 0x182   : > { %v2302_v18 = vmul.f32 -1.442695, %v1810_v16  ;;  %v1811_v19 = vadd.f32 %v2301_v11, %v1768_v17 }
 0x184   : > { %2670 = vpow2.f32 %v2302_v18  ;;  %v2303_v20 = vmul.f32 -1.442695, %v1811_v19 }
 0x186   : > { %2672 = vpow2.f32 %v2303_v20 }
 0x187   : > { %2674 = vtanh.f32 %v1824_v8 }
 0x18e   : > { %v2671_v21 = vpop.eup %2670 }
 0x18f   : > { %v1818_v22 = vadd.f32 1.0, %v2671_v21 }
 0x190   : > { %v2673_v23 = vpop.eup %2672 }
 0x191   : > { %2676 = vrcp.f32 %v1818_v22  ;;  %v1819_v24 = vadd.f32 1.0, %v2673_v23  ;;  %v2675_v25 = vpop.eup %2674 }
 0x192   : > { %2678 = vtanh.f32 %v1825_v13 }
 0x193   : > { %2680 = vrcp.f32 %v1819_v24 }
 0x19b   : > { %v2677_v26 = vpop.eup %2676 }
 0x19c   : > { %v2679_v27 = vpop.eup %2678  ;;  %v1828_v28 = vmul.f32 %v2677_v26, %v2675_v25 }
 0x19d   : > { %v2681_v29 = vpop.eup %2680 }
 0x19e   : > { %1830 = vst [vmem:[%s170_s22] sm:$0xff] %v1828_v28  ;;  %v1829_v30 = vmul.f32 %v2681_v29, %v2679_v27 }
 0x1a0   : > { %1831 = vst [vmem:[%s170_s22 + $0x8] sm:$0xff] %v1829_v30 }
 0x1a1 PF: > { %s13_s12 = sadd.s32 1, %s2688_s12  }
 0x1a2   : > { %p10_p4 = scmp.ge.s32.totalorder %s13_s12, 4  }
 0x1a4   :  { %12 = sbr.rel (!%p10_p4) target bundleno = 1 (0x1), region = 72 }

// kernel: bcdunet_forward.36
= control target key start
LH: loop header
LB: loop body
LE: loop exit
PB: predicated region body
PF: predicated region fallthrough
CT: control target
= control target key end

     0   :  { %s1364_s18 = smov 0   ;;  %s1610_s0 = inlined_call_operand.vmem [shape: f32[2,18,128], index: 0, kind: input, shape index: {}]   ;;  %s1611_s1 = inlined_call_operand.vmem [shape: bf16[3,128,128], index: 1, kind: input, shape index: {}]   ;;  %s1612_s2 = inlined_call_operand.vmem [shape: f32[1,128], index: 2, kind: input, shape index: {}]   ;;  %s1613_s3 = inlined_call_operand.vmem [shape: bf16[3,128,128], index: 3, kind: input, shape index: {}]   ;;  %s1614_s4 = inlined_call_operand.vmem [shape: f32[1,128], index: 4, kind: input, shape index: {}]   ;;  %s1615_s5 = inlined_call_operand.vmem [shape: f32[2,16,128], index: 5, kind: output, shape index: {}]  }
   0x1 LB: > { %s966_s19 = sadd.s32 4294967295, %s1330_s18   ;;  %p970_p0 = scmp.ge.s32.totalorder %s1330_s18, 1  ;;  %s1330_s18 = sphi %s1364_s18, %s15_s18  }
   0x2   : > { %p187_p1 = scmp.lt.s32.totalorder %s1330_s18, 3 }
   0x4   : > { %p188_p2 = pnand %p970_p0, %p187_p1 }
   0x5   : > { %v1276_v0 = vld [vmem:[%s1611_s1 + $0x40] sm:$0xff] (!%p188_p2)   ;;  %v1332_v1 = vmov (!%p188_p2), 0.0   ;;  %v1278_v3 = vld [vmem:[%s1611_s1 + $0x48] sm:$0xff] (!%p188_p2)   ;;  %vm1333_vm0 = vmmov (!%p188_p2), 0   ;;  %v1280_v5 = vld [vmem:[%s1611_s1 + $0x50] sm:$0xff] (!%p188_p2)   ;;  %p215_p3 = scmp.lt.s32.totalorder (!%p188_p2), %s966_s19, 1 }
   0x6   : > { %191 = sbr.rel (%p188_p2) target bundleno = 545 (0x221), region = 40  ;;  %1145 = vmatprep.subr.bf16.mxu0 (!%p188_p2), %v1332_v1  ;;  %565 = vst [vmem:[#allocation2] sm:$0xff] (!%p188_p2), %v1332_v1  ;;  %566 = vst [vmem:[#allocation2 + $0x8] sm:$0xff] (!%p188_p2), %v1332_v1  ;;  %1165 = vmatprep.subr.bf16.mxu1 (!%p188_p2), %v1332_v1  ;;  %v1277_v2 = vld [vmem:[%s1611_s1] sm:$0xff] (!%p188_p2)   ;;  %v1279_v4 = vld [vmem:[%s1611_s1 + $0x8] sm:$0xff] (!%p188_p2)  }
   0x7   : > { %567 = vst [vmem:[#allocation2 + $0x10] sm:$0x3] (!%p188_p2), %v1332_v1  ;;  %1146 = vmatpush3.bf16.msra.mxu0 (!%p188_p2), %v1276_v0  ;;  %1161 = vmatprep.mubr.msk.bf16.mxu0 (!%p188_p2), %vm1333_vm0, %v1332_v1  ;;  %v1281_v6 = vld [vmem:[%s1611_s1 + $0x10] sm:$0xff] (!%p188_p2)   ;;  %v1282_v7 = vld [vmem:[%s1611_s1 + $0x58] sm:$0xff] (!%p188_p2)   ;;  %v1284_v9 = vld [vmem:[%s1611_s1 + $0x60] sm:$0xff] (!%p188_p2)  }
   0x8   : > { %1166 = vmatpush3.bf16.msra.mxu1 (!%p188_p2), %v1277_v2  ;;  %1147 = vmatprep.subr.bf16.mxu0 (!%p188_p2), %v1332_v1  ;;  %v1283_v8 = vld [vmem:[%s1611_s1 + $0x18] sm:$0xff] (!%p188_p2)   ;;  %v1285_v10 = vld [vmem:[%s1611_s1 + $0x20] sm:$0xff] (!%p188_p2)   ;;  %v1286_v11 = vld [vmem:[%s1611_s1 + $0x68] sm:$0xff] (!%p188_p2)  }
   0x9   : > { %1167 = vmatprep.subr.bf16.mxu1 (!%p188_p2), %v1332_v1  ;;  %1181 = vmatprep.mubr.msk.bf16.mxu1 (!%p188_p2), %vm1333_vm0, %v1332_v1  ;;  %v1287_v12 = vld [vmem:[%s1611_s1 + $0x28] sm:$0xff] (!%p188_p2)   ;;  %v1288_v13 = vld [vmem:[%s1611_s1 + $0x70] sm:$0xff] (!%p188_p2)   ;;  %v1290_v15 = vld [vmem:[%s1611_s1 + $0x78] sm:$0xff] (!%p188_p2)  }
   0xa   : > { %v1289_v14 = vld [vmem:[%s1611_s1 + $0x30] sm:$0xff] (!%p188_p2)   ;;  %v1291_v17 = vld [vmem:[%s1611_s1 + $0x38] sm:$0xff] (!%p188_p2)   ;;  %v1292_v21 = vld [vmem:[%s1611_s1 + $0x80] sm:$0xff] (!%p188_p2)  }
   0xb   : > { %1148 = vmatpush3.bf16.msra.mxu0 (!%p188_p2), %v1278_v3  ;;  %v1293_v24 = vld [vmem:[%s1611_s1 + $0x88] sm:$0xff] (!%p188_p2)   ;;  %v1294_v25 = vld [vmem:[%s1611_s1 + $0x90] sm:$0xff] (!%p188_p2)   ;;  %v1295_v26 = vld [vmem:[%s1611_s1 + $0x98] sm:$0xff] (!%p188_p2)  }
   0xc   : > { %1168 = vmatpush3.bf16.msra.mxu1 (!%p188_p2), %v1279_v4  ;;  %1149 = vmatprep.subr.bf16.mxu0 (!%p188_p2), %v1332_v1  ;;  %v1296_v27 = vld [vmem:[%s1611_s1 + $0xa0] sm:$0xff] (!%p188_p2)   ;;  %v1297_v28 = vld [vmem:[%s1611_s1 + $0xa8] sm:$0xff] (!%p188_p2)   ;;  %v1298_v29 = vld [vmem:[%s1611_s1 + $0xb0] sm:$0xff] (!%p188_p2)  }
   0xd   : > { %1169 = vmatprep.subr.bf16.mxu1 %v1332_v1  ;;  %s1617_s19 = smov (!%p215_p3, %s966_s19), 1  ;;  %v1299_v30 = vld [vmem:[%s1611_s1 + $0xb8] sm:$0xff]   ;;  %v1300_v34 = vld [vmem:[%s1613_s3 + $0x40] sm:$0xff]   ;;  %v1302_v36 = vld [vmem:[%s1613_s3 + $0x48] sm:$0xff]  }
   0xe   : > { %s1265_s15 = smul.u32 24, %s1617_s19  ;;  %v1301_v35 = vld [vmem:[%s1613_s3] sm:$0xff]   ;;  %v1303_v37 = vld [vmem:[%s1613_s3 + $0x8] sm:$0xff]   ;;  %v1304_v38 = vld [vmem:[%s1613_s3 + $0x50] sm:$0xff]   ;;  %s1090_s7 = sshll.u32 %s1617_s19, 4 }
   0xf   : > { %1150 = vmatpush3.bf16.msra.mxu0 %v1280_v5  ;;  %v1305_v39 = vld [vmem:[%s1613_s3 + $0x10] sm:$0xff]   ;;  %v1306_v40 = vld [vmem:[%s1613_s3 + $0x58] sm:$0xff]   ;;  %v1308_v41 = vld [vmem:[%s1613_s3 + $0x60] sm:$0xff]   ;;  %s224_s10 = scalar_lea.vmem %s1615_s5, %s1090_s7 }
  0x10   : > { %1170 = vmatpush3.bf16.msra.mxu1 %v1281_v6  ;;  %1151 = vmatprep.subr.bf16.mxu0 %v1332_v1  ;;  %s1437_s24 = scalar_lea.vmem %s1610_s0, %s1265_s15  ;;  %v1310_v42 = vld [vmem:[%s1613_s3 + $0x68] sm:$0xff]   ;;  %v1307_v43 = vld [vmem:[%s1613_s3 + $0x18] sm:$0xff]   ;;  %v1312_v44 = vld [vmem:[%s1613_s3 + $0x70] sm:$0xff]  }
  0x11   : > { %1171 = vmatprep.subr.bf16.mxu1 %v1332_v1  ;;  %v245_v16 = vld [vmem:[%s1437_s24 + $0x1] sm:$0xff]  ;;  %v246_v18 = vld [vmem:[%s1437_s24 + $0x9] sm:$0xff]  ;;  %v1314_v46 = vld [vmem:[%s1613_s3 + $0x78] sm:$0xff]  }
  0x12   : > { %v226_v19 = vld [vmem:[%s1437_s24] sm:$0xff]  ;;  %v227_v20 = vld [vmem:[%s1437_s24 + $0x8] sm:$0xff]  ;;  %v247_v22 = vpack.c.bf16 %v246_v18, %v245_v16  ;;  %v1313_v48 = vld [vmem:[%s1613_s3 + $0x30] sm:$0xff]  }
  0x13   : > { %1152 = vmatpush3.bf16.msra.mxu0 %v1282_v7  ;;  %v228_v23 = vpack.c.bf16 %v227_v20, %v226_v19  ;;  %v443_v31 = vld [vmem:[%s1437_s24 + $0x2] sm:$0xff]  ;;  %v444_v32 = vld [vmem:[%s1437_s24 + $0xa] sm:$0xff]  ;;  %v1315_v49 = vld [vmem:[%s1613_s3 + $0x38] sm:$0xff]  }
  0x14   : > { %1172 = vmatpush3.bf16.msra.mxu1 %v1283_v8  ;;  %1153 = vmatprep.subr.bf16.mxu0 %v1332_v1  ;;  %v445_v33 = vpack.c.bf16 %v444_v32, %v443_v31  ;;  %v1309_v45 = vld [vmem:[%s1613_s3 + $0x20] sm:$0xff]   ;;  %v1311_v47 = vld [vmem:[%s1613_s3 + $0x28] sm:$0xff]   ;;  %v1322_v18 = vld [vmem:[%s1613_s3 + $0xb0] sm:$0xff]  }
  0x15   : > { %1173 = vmatprep.subr.bf16.mxu1 %v1332_v1  ;;  %v1030_v61 = vld [vmem:[%s1612_s2] ss:$0 sm:$0xff]  ;;  %v1323_v19 = vld [vmem:[%s1613_s3 + $0xb8] sm:$0xff]  }
  0x16   : > { %v1316_v8 = vld [vmem:[%s1613_s3 + $0x80] sm:$0xff]  }
  0x17   : > { %1154 = vmatpush3.bf16.msra.mxu0 %v1284_v9  ;;  %v1320_v16 = vld [vmem:[%s1613_s3 + $0xa0] sm:$0xff]  }
  0x18   : > { %1174 = vmatpush3.bf16.msra.mxu1 %v1285_v10  ;;  %1155 = vmatprep.subr.bf16.mxu0 %v1332_v1  ;;  %v1317_v10 = vld [vmem:[%s1613_s3 + $0x88] sm:$0xff]  }
  0x19   : > { %1175 = vmatprep.subr.bf16.mxu1 %v1332_v1 }
  0x1b   : > { %1156 = vmatpush3.bf16.msra.mxu0 %v1286_v11 }
  0x1c   : > { %1176 = vmatpush3.bf16.msra.mxu1 %v1287_v12  ;;  %1157 = vmatprep.subr.bf16.mxu0 %v1332_v1 }
  0x1d   : > { %1177 = vmatprep.subr.bf16.mxu1 %v1332_v1 }
  0x1f   : > { %1158 = vmatpush3.bf16.msra.mxu0 %v1288_v13  ;;  %v1318_v13 = vld [vmem:[%s1613_s3 + $0x90] sm:$0xff]  }
  0x20   : > { %1178 = vmatpush3.bf16.msra.mxu1 %v1289_v14  ;;  %1159 = vmatprep.subr.bf16.mxu0 %v1332_v1 }
  0x21   : > { %1179 = vmatprep.subr.bf16.mxu1 %v1332_v1 }
  0x23   : > { %1160 = vmatpush3.bf16.msra.mxu0 %v1290_v15  ;;  %v1319_v15 = vld [vmem:[%s1613_s3 + $0x98] sm:$0xff]  }
  0x24   : > { %1180 = vmatpush3.bf16.msra.mxu1 %v1291_v17  ;;  %1185 = vmatprep.subr.bf16.mxu0 %v1332_v1  ;;  %v1321_v17 = vld [vmem:[%s1613_s3 + $0xa8] sm:$0xff]  }
  0x25   : > { %1205 = vmatprep.subr.bf16.mxu1 %v1332_v1 }
  0x26   : > { %1162 = vmatmul.mubr.bf16.vlgmr.msra.gmra.mrb[0].mxu0 %v247_v22 }
  0x27   : > { %1182 = vmatmul.mubr.bf16.vlgmr.msra.gmra.mrb[0].mxu1 %v228_v23  ;;  %1186 = vmatpush3.bf16.msra.mxu0 %v1292_v21 }
  0x28   : > { %1187 = vmatprep.subr.bf16.mxu0 %v1332_v1  ;;  %1201 = vmatprep.mubr.msk.bf16.mxu0 %vm1333_vm0, %v1332_v1 }
  0x29   : > { %1221 = vmatprep.mubr.msk.bf16.mxu1 %vm1333_vm0, %v1332_v1  ;;  %1206 = vmatpush3.bf16.msra.mxu1 %v1300_v34 }
  0x2a   : > { %1207 = vmatprep.subr.bf16.mxu1 %v1332_v1 }
  0x2b   : > { %1188 = vmatpush3.bf16.msra.mxu0 %v1293_v24 }
  0x2c   : > { %1189 = vmatprep.subr.bf16.mxu0 %v1332_v1 }
  0x2d   : > { %1208 = vmatpush3.bf16.msra.mxu1 %v1302_v36 }
  0x2e   : > { %1209 = vmatprep.subr.bf16.mxu1 %v1332_v1 }
  0x2f   : > { %1190 = vmatpush3.bf16.msra.mxu0 %v1294_v25 }
  0x30   : > { %1191 = vmatprep.subr.bf16.mxu0 %v1332_v1 }
  0x31   : > { %1210 = vmatpush3.bf16.msra.mxu1 %v1304_v38 }
  0x32   : > { %1211 = vmatprep.subr.bf16.mxu1 %v1332_v1 }
  0x33   : > { %1192 = vmatpush3.bf16.msra.mxu0 %v1295_v26 }
  0x34   : > { %1193 = vmatprep.subr.bf16.mxu0 %v1332_v1 }
  0x35   : > { %1212 = vmatpush3.bf16.msra.mxu1 %v1306_v40 }
  0x36   : > { %1213 = vmatprep.subr.bf16.mxu1 %v1332_v1 }
  0x37   : > { %1194 = vmatpush3.bf16.msra.mxu0 %v1296_v27 }
  0x38   : > { %1195 = vmatprep.subr.bf16.mxu0 %v1332_v1 }
  0x39   : > { %1214 = vmatpush3.bf16.msra.mxu1 %v1308_v41 }
  0x3a   : > { %1215 = vmatprep.subr.bf16.mxu1 %v1332_v1 }
  0x3b   : > { %1196 = vmatpush3.bf16.msra.mxu0 %v1297_v28 }
  0x3c   : > { %1197 = vmatprep.subr.bf16.mxu0 %v1332_v1 }
  0x3d   : > { %1216 = vmatpush3.bf16.msra.mxu1 %v1310_v42 }
  0x3e   : > { %1217 = vmatprep.subr.bf16.mxu1 %v1332_v1 }
  0x3f   : > { %1198 = vmatpush3.bf16.msra.mxu0 %v1298_v29 }
  0x40   : > { %1199 = vmatprep.subr.bf16.mxu0 %v1332_v1 }
  0x41   : > { %1218 = vmatpush3.bf16.msra.mxu1 %v1312_v44 }
  0x42   : > { %1219 = vmatprep.subr.bf16.mxu1 %v1332_v1 }
  0x43   : > { %1200 = vmatpush3.bf16.msra.mxu0 %v1299_v30 }
  0x44   : > { %1225 = vmatprep.subr.bf16.mxu0 %v1332_v1 }
  0x45   : > { %1220 = vmatpush3.bf16.msra.mxu1 %v1314_v46 }
  0x46   : > { %1202 = vmatmul.mubr.bf16.vlgmr.msra.gmra.mrb[4].mxu0 %v445_v33  ;;  %1245 = vmatprep.subr.bf16.mxu1 %v1332_v1 }
  0x47   : > { %1241 = vmatprep.mubr.msk.bf16.mxu0 %vm1333_vm0, %v1332_v1  ;;  %1226 = vmatpush3.bf16.msra.mxu0 %v1301_v35 }
  0x48   : > { %1227 = vmatprep.subr.bf16.mxu0 %v1332_v1 }
  0x4b   : > { %1228 = vmatpush3.bf16.msra.mxu0 %v1303_v37 }
  0x4c   : > { %1229 = vmatprep.subr.bf16.mxu0 %v1332_v1 }
  0x4f   : > { %1230 = vmatpush3.bf16.msra.mxu0 %v1305_v39 }
  0x50   : > { %1231 = vmatprep.subr.bf16.mxu0 %v1332_v1 }
  0x53   : > { %1232 = vmatpush3.bf16.msra.mxu0 %v1307_v43 }
  0x54   : > { %1233 = vmatprep.subr.bf16.mxu0 %v1332_v1 }
  0x57   : > { %1234 = vmatpush3.bf16.msra.mxu0 %v1309_v45 }
  0x58   : > { %1235 = vmatprep.subr.bf16.mxu0 %v1332_v1 }
  0x5b   : > { %1236 = vmatpush3.bf16.msra.mxu0 %v1311_v47 }
  0x5c   : > { %1237 = vmatprep.subr.bf16.mxu0 %v1332_v1 }
  0x5f   : > { %1238 = vmatpush3.bf16.msra.mxu0 %v1313_v48 }
  0x60   : > { %1239 = vmatprep.subr.bf16.mxu0 %v1332_v1 }
  0x63   : > { %1240 = vmatpush3.bf16.msra.mxu0 %v1315_v49 }
  0xf9   : > { %v347_v50 = vpop.f32.mrb[0].mxu0 }
  0xfa   : > { %v436_v51 = vpop.f32.mrb[0].mxu1  ;;  %v1163_v52 = vpop.f32.mrb[1].mxu0 }
  0xfb   : > { %v437_v53 = vadd.f32 %v436_v51, %v347_v50  ;;  %v1183_v54 = vpop.f32.mrb[1].mxu1  ;;  %v350_v55 = vpop.f32.mrb[2].mxu0 }
  0xfc   : > { %v439_v56 = vpop.f32.mrb[2].mxu1  ;;  %v1164_v57 = vpop.f32.mrb[3].mxu0 }
  0xfd   : > { %v440_v58 = vadd.f32 %v439_v56, %v350_v55  ;;  %v1184_v59 = vpop.f32.mrb[3].mxu1 }
 0x119   : > { %v545_v60 = vpop.f32.mrb[4].mxu0 }
 0x11a   : > { %v552_v62 = vadd.f32 %v545_v60, %v437_v53  ;;  %v1203_v63 = vpop.f32.mrb[5].mxu0 }
 0x11b   : > { %v548_v0 = vpop.f32.mrb[6].mxu0 }
 0x11c   : > { %v561_v2 = vadd.f32 %v1030_v61, %v552_v62  ;;  %v553_v3 = vadd.f32 %v548_v0, %v440_v58  ;;  %v1204_v4 = vpop.f32.mrb[7].mxu0 }
 0x11e   : > { %v563_v5 = vmax.f32 %v561_v2, 0.0  ;;  %v562_v6 = vadd.f32 %v1030_v61, %v553_v3 }
 0x120   : > { %568 = vst [vmem:[#allocation2 + $0x1] sm:$0xff] %v563_v5  ;;  %v564_v7 = vmax.f32 %v562_v6, 0.0 }
 0x122   : > { %569 = vst [vmem:[#allocation2 + $0x9] sm:$0xff] %v564_v7  ;;  %v591_v9 = vpack.c.bf16 %v564_v7, %v563_v5 }
 0x124   : > { %1222 = vmatmul.mubr.bf16.vlgmr.msra.gmra.mrb[4].mxu1 %v591_v9 }
 0x125   : > { %1246 = vmatpush3.bf16.msra.mxu1 %v1316_v8  ;;  %1261 = vmatprep.mubr.msk.bf16.mxu1 %vm1333_vm0, %v1332_v1 }
 0x126   : > { %1247 = vmatprep.subr.bf16.mxu1 %v1332_v1 }
 0x127   : > { %v570_v11 = vld [vmem:[#allocation2] sm:$0xff] }
 0x129   : > { %v571_v12 = vld [vmem:[#allocation2 + $0x8] sm:$0xff]  ;;  %1248 = vmatpush3.bf16.msra.mxu1 %v1317_v10 }
 0x12a   : > { %v572_v14 = vpack.c.bf16 %v571_v12, %v570_v11  ;;  %1249 = vmatprep.subr.bf16.mxu1 %v1332_v1  ;;  %v787_v20 = vld [vmem:[#allocation2 + $0x2] sm:$0xff]  ;;  %v788_v21 = vld [vmem:[#allocation2 + $0xa] sm:$0xff] }
 0x12b   : > { %v789_v22 = vpack.c.bf16 %v788_v21, %v787_v20 }
 0x12c   : > { %1242 = vmatmul.mubr.bf16.vlgmr.msra.gmra.mrb[8].mxu0 %v572_v14 }
 0x12d   : > { %1250 = vmatpush3.bf16.msra.mxu1 %v1318_v13 }
 0x12e   : > { %1251 = vmatprep.subr.bf16.mxu1 %v1332_v1 }
 0x131   : > { %1252 = vmatpush3.bf16.msra.mxu1 %v1319_v15 }
 0x132   : > { %1253 = vmatprep.subr.bf16.mxu1 %v1332_v1 }
 0x135   : > { %1254 = vmatpush3.bf16.msra.mxu1 %v1320_v16 }
 0x136   : > { %1255 = vmatprep.subr.bf16.mxu1 %v1332_v1 }
 0x139   : > { %1256 = vmatpush3.bf16.msra.mxu1 %v1321_v17 }
 0x13a   : > { %1257 = vmatprep.subr.bf16.mxu1 %v1332_v1 }
 0x13d   : > { %1258 = vmatpush3.bf16.msra.mxu1 %v1322_v18 }
 0x13e   : > { %1259 = vmatprep.subr.bf16.mxu1 %v1332_v1  ;;  %v1087_v1 = vld [vmem:[%s1614_s4] ss:$0 sm:$0xff] }
 0x141   : > { %1260 = vmatpush3.bf16.msra.mxu1 %v1323_v19 }
 0x144   : > { %1262 = vmatmul.mubr.bf16.vlgmr.msra.gmra.mrb[8].mxu1 %v789_v22 }
 0x1f7   : > { %v691_v23 = vpop.f32.mrb[4].mxu1 }
 0x1f8   : > { %v1223_v24 = vpop.f32.mrb[5].mxu1 }
 0x1f9   : > { %v694_v25 = vpop.f32.mrb[6].mxu1 }
 0x1fa   : > { %v1224_v26 = vpop.f32.mrb[7].mxu1 }
 0x1ff   : > { %v780_v27 = vpop.f32.mrb[8].mxu0 }
 0x200   : > { %v781_v28 = vadd.f32 %v780_v27, %v691_v23  ;;  %v1243_v29 = vpop.f32.mrb[9].mxu0 }
 0x201   : > { %v783_v30 = vpop.f32.mrb[10].mxu0 }
 0x202   : > { %v784_v31 = vadd.f32 %v783_v30, %v694_v25  ;;  %v1244_v32 = vpop.f32.mrb[11].mxu0 }
 0x217   : > { %v889_v33 = vpop.f32.mrb[8].mxu1 }
 0x218   : > { %v896_v34 = vadd.f32 %v889_v33, %v781_v28  ;;  %v1263_v35 = vpop.f32.mrb[9].mxu1 }
 0x219   : > { %v892_v36 = vpop.f32.mrb[10].mxu1 }
 0x21a   : > { %v905_v37 = vadd.f32 %v1087_v1, %v896_v34  ;;  %v897_v38 = vadd.f32 %v892_v36, %v784_v31  ;;  %v1264_v39 = vpop.f32.mrb[11].mxu1 }
 0x21c   : > { %v907_v40 = vmax.f32 %v905_v37, 0.0  ;;  %v906_v41 = vadd.f32 %v1087_v1, %v897_v38 }
 0x21e   : > { %909 = vst [vmem:[%s224_s10] sm:$0xff] %v907_v40  ;;  %v908_v42 = vmax.f32 %v906_v41, 0.0 }
 0x220   : > { %910 = vst [vmem:[%s224_s10 + $0x8] sm:$0xff] %v908_v42 }
 0x221 PF: > { %s15_s18 = sadd.s32 1, %s1330_s18  }
 0x222   : > { %p12_p4 = scmp.ge.s32.totalorder %s15_s18, 4  }
 0x224   :  { %14 = sbr.rel (!%p12_p4) target bundleno = 1 (0x1), region = 74 }

// kernel: tile.313
= control target key start
LH: loop header
LB: loop body
LE: loop exit
PB: predicated region body
PF: predicated region fallthrough
CT: control target
= control target key end

     0   :  { %s28_s0 = inlined_call_operand.vmem [shape: f32[2], index: 0, kind: input, shape index: {}]   ;;  %s29_s1 = inlined_call_operand.vmem [shape: f32[16,2], index: 1, kind: output, shape index: {}]  }
   0x1   :  { %v4_v0 = vld [vmem:[%s28_s0] ss:$0 sm:$0xff] }
   0x2   :  { %5 = vst [vmem:[%s29_s1] sm:$0xff] %v4_v0  ;;  %8 = vst [vmem:[%s29_s1 + $0x8] sm:$0xff] %v4_v0 }

// kernel: tile.314
= control target key start
LH: loop header
LB: loop body
LE: loop exit
PB: predicated region body
PF: predicated region fallthrough
CT: control target
= control target key end

     0   :  { %s131_s10 = smov 30   ;;  %s132_s11 = smov 26   ;;  %vm3_vm0 = vcmask 15360   ;;  %vm9_vm1 = vcmask 261360   ;;  %vm15_vm2 = vcmask 244960   ;;  %vm21_vm3 = vcmask 228560   ;;  %s207_s0 = inlined_call_operand.vmem [shape: f32[16,2], index: 0, kind: input, shape index: {}]   ;;  %s208_s1 = inlined_call_operand.vmem [shape: f32[1,32], index: 1, kind: output, shape index: {}]  }
   0x1   :  { %v101_v0 = vld [vmem:[%s207_s0 + $0xf] sm:$0x1]   ;;  %v103_v1 = vld [vmem:[%s207_s0 + $0xd] sm:$0x1]   ;;  %v102_v2 = vld [vmem:[%s207_s0 + $0xe] sm:$0x1]  }
   0x2   :  { %7 = vrot.lane.b32.xlu0 %v101_v0, %s131_s10  ;;  %19 = vrot.lane.b32.xlu1 %v103_v1, %s132_s11  ;;  %v104_v3 = vld [vmem:[%s207_s0 + $0xc] sm:$0x1]   ;;  %s133_s16 = smov 28   ;;  %s134_s17 = smov 24   ;;  %v105_v4 = vld [vmem:[%s207_s0 + $0xb] sm:$0x1]  }
   0x3   :  { %v106_v5 = vld [vmem:[%s207_s0 + $0xa] sm:$0x1]   ;;  %v2_v6 = vld [vmem:[%s207_s0] sm:$0x1]   ;;  %s135_s24 = smov 22   ;;  %s136_s25 = smov 20  }
   0x4   :  { %4 = vst.msk [vmem:[#allocation0] sm:$0x1] %vm3_vm0, %v2_v6   ;;  %v107_v7 = vld [vmem:[%s207_s0 + $0x9] sm:$0x1]   ;;  %v108_v8 = vld [vmem:[%s207_s0 + $0x8] sm:$0x1]  }
   0x5   :  { %s137_s30 = smov 18   ;;  %s138_s2 = smov 16   ;;  %v109_v9 = vld [vmem:[%s207_s0 + $0x7] sm:$0x1]   ;;  %v110_v10 = vld [vmem:[%s207_s0 + $0x6] sm:$0x1]  }
   0x6   :  { %13 = vrot.lane.b32.xlu0 %v102_v2, %s133_s16  ;;  %25 = vrot.lane.b32.xlu1 %v104_v3, %s134_s17  ;;  %s139_s7 = smov 14   ;;  %s140_s8 = smov 12   ;;  %v111_v11 = vld [vmem:[%s207_s0 + $0x5] sm:$0x1]   ;;  %v112_v12 = vld [vmem:[%s207_s0 + $0x4] sm:$0x1]  }
   0x7   :  { %s141_s13 = smov 10   ;;  %s142_s14 = smov 8   ;;  %v113_v13 = vld [vmem:[%s207_s0 + $0x3] sm:$0x1]   ;;  %v114_v14 = vld [vmem:[%s207_s0 + $0x2] sm:$0x1]  }
   0x8   :  { %s143_s19 = smov 6   ;;  %s144_s20 = smov 4   ;;  %v115_v15 = vld [vmem:[%s207_s0 + $0x1] sm:$0x1]   ;;  %vm27_vm4 = vcmask 212160   ;;  %vm33_vm5 = vcmask 195760  }
   0x9   :  { %s145_s0 = smov 2   ;;  %vm39_vm6 = vcmask 179360   ;;  %vm45_vm7 = vcmask 162960   ;;  %vm51_vm8 = vcmask 146560   ;;  %vm57_vm9 = vcmask 130160  }
   0xa   :  { %31 = vrot.lane.b32.xlu0 %v105_v4, %s135_s24  ;;  %37 = vrot.lane.b32.xlu1 %v106_v5, %s136_s25  ;;  %vm63_vm10 = vcmask 113760   ;;  %vm69_vm11 = vcmask 97360   ;;  %vm75_vm12 = vcmask 80960   ;;  %vm81_vm13 = vcmask 64560  }
   0xb   :  { %vm87_vm14 = vcmask 48160   ;;  %vm93_vm15 = vcmask 31760  }
   0xe   :  { %43 = vrot.lane.b32.xlu0 %v107_v7, %s137_s30  ;;  %49 = vrot.lane.b32.xlu1 %v108_v8, %s138_s2 }
  0x12   :  { %55 = vrot.lane.b32.xlu0 %v109_v9, %s139_s7  ;;  %61 = vrot.lane.b32.xlu1 %v110_v10, %s140_s8 }
  0x16   :  { %67 = vrot.lane.b32.xlu0 %v111_v11, %s141_s13  ;;  %73 = vrot.lane.b32.xlu1 %v112_v12, %s142_s14 }
  0x1a   :  { %79 = vrot.lane.b32.xlu0 %v113_v13, %s143_s19  ;;  %85 = vrot.lane.b32.xlu1 %v114_v14, %s144_s20 }
  0x1e   :  { %91 = vrot.lane.b32.xlu0 %v115_v15, %s145_s0 }
  0x74   :  { %v8_v16 = vpop.permute.xlu0 %7   ;;  %v20_v17 = vpop.permute.xlu1 %19  }
  0x75   :  { %10 = vst.msk [vmem:[#allocation0] sm:$0x1] %vm9_vm1, %v8_v16  }
  0x78   :  { %v14_v18 = vpop.permute.xlu0 %13   ;;  %v26_v19 = vpop.permute.xlu1 %25  }
  0x79   :  { %16 = vst.msk [vmem:[#allocation0] sm:$0x1] %vm15_vm2, %v14_v18  }
  0x7a   :  { %22 = vst.msk [vmem:[#allocation0] sm:$0x1] %vm21_vm3, %v20_v17  }
  0x7b   :  { %28 = vst.msk [vmem:[#allocation0] sm:$0x1] %vm27_vm4, %v26_v19  }
  0x7c   :  { %v32_v20 = vpop.permute.xlu0 %31   ;;  %v38_v21 = vpop.permute.xlu1 %37  }
  0x7d   :  { %34 = vst.msk [vmem:[#allocation0] sm:$0x1] %vm33_vm5, %v32_v20  }
  0x7e   :  { %40 = vst.msk [vmem:[#allocation0] sm:$0x1] %vm39_vm6, %v38_v21  }
  0x80   :  { %v44_v22 = vpop.permute.xlu0 %43   ;;  %v50_v23 = vpop.permute.xlu1 %49  }
  0x81   :  { %46 = vst.msk [vmem:[#allocation0] sm:$0x1] %vm45_vm7, %v44_v22  }
  0x82   :  { %52 = vst.msk [vmem:[#allocation0] sm:$0x1] %vm51_vm8, %v50_v23  }
  0x84   :  { %v56_v24 = vpop.permute.xlu0 %55   ;;  %v62_v25 = vpop.permute.xlu1 %61  }
  0x85   :  { %58 = vst.msk [vmem:[#allocation0] sm:$0x1] %vm57_vm9, %v56_v24  }
  0x86   :  { %64 = vst.msk [vmem:[#allocation0] sm:$0x1] %vm63_vm10, %v62_v25  }
  0x88   :  { %v68_v26 = vpop.permute.xlu0 %67   ;;  %v74_v27 = vpop.permute.xlu1 %73  }
  0x89   :  { %70 = vst.msk [vmem:[#allocation0] sm:$0x1] %vm69_vm11, %v68_v26  }
  0x8a   :  { %76 = vst.msk [vmem:[#allocation0] sm:$0x1] %vm75_vm12, %v74_v27  }
  0x8c   :  { %v80_v28 = vpop.permute.xlu0 %79   ;;  %v86_v29 = vpop.permute.xlu1 %85  }
  0x8d   :  { %82 = vst.msk [vmem:[#allocation0] sm:$0x1] %vm81_vm13, %v80_v28  }
  0x8e   :  { %88 = vst.msk [vmem:[#allocation0] sm:$0x1] %vm87_vm14, %v86_v29  }
  0x90   :  { %v92_v30 = vpop.permute.xlu0 %91  }
  0x91   :  { %94 = vst.msk [vmem:[#allocation0] sm:$0x1] %vm93_vm15, %v92_v30  }
  0x98   :  { %v98_v31 = vld [vmem:[#allocation0] sm:$0x1] }
  0x99   :  { %100 = vst [vmem:[%s208_s1] sm:$0x1] %v98_v31 }

// kernel: bcdunet_forward.37
= control target key start
LH: loop header
LB: loop body
LE: loop exit
PB: predicated region body
PF: predicated region fallthrough
CT: control target
= control target key end

     0   :  { %10 = vsyncpa [#allocation3], 0  ;;  %s1302_s0 = inlined_call_operand.vmem [shape: f32[2,18,128], index: 0, kind: input, shape index: {}]   ;;  %s1303_s1 = inlined_call_operand.vmem [shape: bf16[3,128,32], index: 1, kind: input, shape index: {}]   ;;  %s1304_s2 = inlined_call_operand.vmem [shape: f32[1,32], index: 2, kind: input, shape index: {}]   ;;  %s1305_s3 = inlined_call_operand.vmem [shape: bf16[32,16], index: 3, kind: input, shape index: {}]   ;;  %s1306_s4 = inlined_call_operand.vmem [shape: f32[1,16], index: 4, kind: input, shape index: {}]   ;;  %s1307_s5 = inlined_call_operand.hbm [shape: f32[2,16,16], index: 5, kind: output, shape index: {}]  }
   0x1   :  { %12 = vsyncpa [#allocation3 + $0x1], 0  ;;  %s1073_s18 = smov 0   ;;  %s1075_s19 = smov 0  }
   0x2   :  { %s1077_s20 = smov 0   ;;  %s1079_s21 = smov 0  }
   0x3 LB: > { %s1094_s22 = sadd.s32 4294967295, %s1036_s21   ;;  %s723_s23 = sadd.s32 4294967294, %s1036_s21   ;;  %s1036_s21 = sphi %s1079_s21, %s1313_s21   ;;  %s1032_s20 = sphi %s1077_s20, %s1312_s20   ;;  %s1028_s19 = sphi %s1075_s19, %s1311_s19   ;;  %s1024_s18 = sphi %s1073_s18, %s1310_s18  }
   0x4   : > { %s1098_s24 = sadd.s32 1, %s1036_s21   ;;  %s135_s25 = sadd.s32 1, %s1032_s20 }
   0x5   : > { %s132_s26 = ssub.s32 %s1036_s21, %s1098_s24  ;;  %p145_p0 = scmp.ne.s32.totalorder %s1032_s20, %s1028_s19 }
   0x6   : > { %p133_p1 = scmp.eq.s32.totalorder %s132_s26, 0  ;;  %p146_p2 = scmp.eq.s32.totalorder %s1094_s22, 1 }
   0x7   : > { %p151_p3 = scmp.ne.s32.totalorder %s1028_s19, %s1024_s18  ;;  %p152_p4 = scmp.eq.s32.totalorder %s723_s23, 1 }
   0x8   : > { %s1109_s27 = scalar_select %p133_p1, %s1032_s20, %s135_s25  }
   0x9   : > { %p1111_p5 = por %p146_p2, %p145_p0  ;;  %p1115_p6 = por %p152_p4, %p151_p3 }
   0xa   : > { %p726_p7 = scmp.ge.s32.totalorder %s1036_s21, 1  ;;  %p190_p8 = scmp.lt.s32.totalorder %s1036_s21, 3 }
   0xc   : > { %p191_p9 = pnand %p726_p7, %p190_p8 }
   0xd   : > { %v940_v0 = vld [vmem:[%s1303_s1 + $0x40] sm:$0xff] (!%p191_p9)   ;;  %v1038_v1 = vmov (!%p191_p9), 0.0   ;;  %v942_v3 = vld [vmem:[%s1303_s1 + $0x48] sm:$0xff] (!%p191_p9)   ;;  %vm1039_vm0 = vmmov (!%p191_p9), 0   ;;  %v944_v5 = vld [vmem:[%s1303_s1 + $0x50] sm:$0xff] (!%p191_p9)   ;;  %p218_p10 = scmp.lt.s32.totalorder (!%p191_p9), %s1094_s22, 1 }
   0xe   : > { %194 = sbr.rel (%p191_p9) target bundleno = 557 (0x22d), region = 40  ;;  %828 = vmatprep.subr.bf16.mxu0 (!%p191_p9), %v1038_v1  ;;  %848 = vmatprep.subr.bf16.mxu1 (!%p191_p9), %v1038_v1  ;;  %v941_v2 = vld [vmem:[%s1303_s1] sm:$0xff] (!%p191_p9)   ;;  %v943_v4 = vld [vmem:[%s1303_s1 + $0x8] sm:$0xff] (!%p191_p9)   ;;  %v945_v6 = vld [vmem:[%s1303_s1 + $0x10] sm:$0xff] (!%p191_p9)   ;;  %vm587_vm1 = vcmask (!%p191_p9), 261120   ;;  %s215_s23 = sand.u32 (!%p191_p9), 1, %s1028_s19  }
   0xf   : > { %829 = vmatpush3.bf16.msra.mxu0 (!%p191_p9), %v940_v0  ;;  %844 = vmatprep.mubr.msk.bf16.mxu0 (!%p191_p9), %vm1039_vm0, %v1038_v1  ;;  %v946_v7 = vld [vmem:[%s1303_s1 + $0x58] sm:$0xff] (!%p191_p9)   ;;  %v948_v9 = vld [vmem:[%s1303_s1 + $0x60] sm:$0xff] (!%p191_p9)   ;;  %v950_v11 = vld [vmem:[%s1303_s1 + $0x68] sm:$0xff] (!%p191_p9)   ;;  %s727_s26 = sshll.u32 (!%p191_p9), %s215_s23, 4  ;;  %s797_s30 = sshll.u32 (!%p191_p9), %s1094_s22, 8  ;;  %vm644_vm2 = vcmask (!%p191_p9), 130048  }
  0x10   : > { %849 = vmatpush3.bf16.msra.mxu1 (!%p191_p9), %v941_v2  ;;  %830 = vmatprep.subr.bf16.mxu0 (!%p191_p9), %v1038_v1  ;;  %v947_v8 = vld [vmem:[%s1303_s1 + $0x18] sm:$0xff] (!%p191_p9)   ;;  %v949_v10 = vld [vmem:[%s1303_s1 + $0x20] sm:$0xff] (!%p191_p9)   ;;  %v951_v12 = vld [vmem:[%s1303_s1 + $0x28] sm:$0xff] (!%p191_p9)   ;;  %s217_s6 = scalar_lea.vmem (!%p191_p9), [#allocation2], %s727_s26  ;;  %s1257_s10 = scalar_lea.hbm (!%p191_p9), %s1307_s5, %s797_s30 }
  0x11   : > { %850 = vmatprep.subr.bf16.mxu1 (!%p191_p9), %v1038_v1  ;;  %864 = vmatprep.mubr.msk.bf16.mxu1 (!%p191_p9), %vm1039_vm0, %v1038_v1  ;;  %v952_v13 = vld [vmem:[%s1303_s1 + $0x70] sm:$0xff] (!%p191_p9)   ;;  %v954_v15 = vld [vmem:[%s1303_s1 + $0x78] sm:$0xff] (!%p191_p9)   ;;  %v956_v23 = vld [vmem:[%s1303_s1 + $0x80] sm:$0xff] (!%p191_p9)   ;;  %s1261_s11 = scalar_lea.sflag (!%p191_p9), [#allocation3], %s215_s23 }
  0x12   : > { %v953_v14 = vld [vmem:[%s1303_s1 + $0x30] sm:$0xff] (!%p191_p9)   ;;  %v955_v16 = vld [vmem:[%s1303_s1 + $0x38] sm:$0xff] (!%p191_p9)   ;;  %v957_v24 = vld [vmem:[%s1303_s1 + $0x88] sm:$0xff] (!%p191_p9)  }
  0x13   : > { %831 = vmatpush3.bf16.msra.mxu0 (!%p191_p9), %v942_v3  ;;  %v958_v25 = vld [vmem:[%s1303_s1 + $0x90] sm:$0xff] (!%p191_p9)   ;;  %v959_v26 = vld [vmem:[%s1303_s1 + $0x98] sm:$0xff] (!%p191_p9)   ;;  %v960_v27 = vld [vmem:[%s1303_s1 + $0xa0] sm:$0xff] (!%p191_p9)  }
  0x14   : > { %851 = vmatpush3.bf16.msra.mxu1 (!%p191_p9), %v943_v4  ;;  %832 = vmatprep.subr.bf16.mxu0 (!%p191_p9), %v1038_v1  ;;  %v961_v28 = vld [vmem:[%s1303_s1 + $0xa8] sm:$0xff] (!%p191_p9)   ;;  %v962_v29 = vld [vmem:[%s1303_s1 + $0xb0] sm:$0xff] (!%p191_p9)   ;;  %v963_v30 = vld [vmem:[%s1303_s1 + $0xb8] sm:$0xff] (!%p191_p9)  }
  0x15   : > { %852 = vmatprep.subr.bf16.mxu1 %v1038_v1  ;;  %s219_s7 = scalar_select %p218_p10, %s1094_s22, 1  ;;  %v964_v34 = vld [vmem:[%s1305_s3] sm:$0xff]   ;;  %v965_v35 = vld [vmem:[%s1305_s3 + $0x8] sm:$0xff]  }
  0x16   : > { %v785_v47 = vld [vmem:[%s1304_s2] ss:$0 sm:$0xff] }
  0x17   : > { %833 = vmatpush3.bf16.msra.mxu0 %v944_v5  ;;  %s896_s12 = smul.u32 24, %s219_s7  ;;  %v786_v58 = vld [vmem:[%s1306_s4] ss:$0 sm:$0xff]  ;;  %s661_s7 = sshll.u32 %s217_s6, 4  ;;  %s1259_s7 = int_to_ptr.vmem [resolvable:$true] %s661_s7 }
  0x18   : > { %853 = vmatpush3.bf16.msra.mxu1 %v945_v6  ;;  %834 = vmatprep.subr.bf16.mxu0 %v1038_v1  ;;  %s974_s22 = scalar_lea.vmem %s1259_s7, 256 }
  0x19   : > { %854 = vmatprep.subr.bf16.mxu1 %v1038_v1  ;;  %s1181_s25 = scalar_lea.vmem %s1302_s0, %s896_s12  ;;  %p975_p11 = scmp.ne.s32.totalorder %s1259_s7, %s974_s22 }
  0x1a   : > { %v243_v17 = vld [vmem:[%s1181_s25 + $0x1] sm:$0xff]  ;;  %v244_v18 = vld [vmem:[%s1181_s25 + $0x9] sm:$0xff]  ;;  %s1040_s12 = smov [#allocation2]  }
  0x1b   : > { %835 = vmatpush3.bf16.msra.mxu0 %v946_v7  ;;  %v224_v19 = vld [vmem:[%s1181_s25] sm:$0xff]  ;;  %v225_v20 = vld [vmem:[%s1181_s25 + $0x8] sm:$0xff]  ;;  %v245_v21 = vpack.c.bf16 %v244_v18, %v243_v17  ;;  %p976_p12 = pnand %p975_p11, %p1111_p5  ;;  %s978_s13 = sshll.u32 %s1040_s12, 4  ;;  %s979_s13 = int_to_ptr.vmem [resolvable:$false] %s978_s13 }
  0x1c   : > { %855 = vmatpush3.bf16.msra.mxu1 %v947_v8  ;;  %836 = vmatprep.subr.bf16.mxu0 %v1038_v1  ;;  %v226_v22 = vpack.c.bf16 %v225_v20, %v224_v19  ;;  %v441_v31 = vld [vmem:[%s1181_s25 + $0x2] sm:$0xff]  ;;  %v442_v32 = vld [vmem:[%s1181_s25 + $0xa] sm:$0xff]  ;;  %s980_s14 = scalar_lea.vmem %s979_s13, 512  ;;  %p981_p0 = scmp.lt.s32.totalorder %s1259_s7, %s979_s13 }
  0x1d   : > { %856 = vmatprep.subr.bf16.mxu1 %v1038_v1  ;;  %v443_v33 = vpack.c.bf16 %v442_v32, %v441_v31  ;;  %p977_p13 = pneg %p976_p12  ;;  %p982_p1 = scmp.lt.s32.totalorder %s980_s14, %s974_s22 }
  0x1f   : > { %837 = vmatpush3.bf16.msra.mxu0 %v948_v9  ;;  %p983_p2 = por %p982_p1, %p981_p0 }
  0x20   : > { %857 = vmatpush3.bf16.msra.mxu1 %v949_v10  ;;  %838 = vmatprep.subr.bf16.mxu0 %v1038_v1 }
  0x21   : > { %858 = vmatprep.subr.bf16.mxu1 %v1038_v1  ;;  %p984_p3 = pnand %p983_p2, %p977_p13 }
  0x23   : > { %839 = vmatpush3.bf16.msra.mxu0 %v950_v11 }
  0x24   : > { %859 = vmatpush3.bf16.msra.mxu1 %v951_v12  ;;  %840 = vmatprep.subr.bf16.mxu0 %v1038_v1 }
  0x25   : > { %860 = vmatprep.subr.bf16.mxu1 %v1038_v1 }
  0x27   : > { %841 = vmatpush3.bf16.msra.mxu0 %v952_v13 }
  0x28   : > { %861 = vmatpush3.bf16.msra.mxu1 %v953_v14  ;;  %842 = vmatprep.subr.bf16.mxu0 %v1038_v1 }
  0x29   : > { %862 = vmatprep.subr.bf16.mxu1 %v1038_v1 }
  0x2b   : > { %843 = vmatpush3.bf16.msra.mxu0 %v954_v15 }
  0x2c   : > { %863 = vmatpush3.bf16.msra.mxu1 %v955_v16  ;;  %868 = vmatprep.subr.bf16.mxu0 %v1038_v1 }
  0x2d   : > { %888 = vmatprep.subr.bf16.mxu1 %v1038_v1 }
  0x2e   : > { %845 = vmatmul.mubr.bf16.vlgmr.msra.gmra.mrb[0].mxu0 %v245_v21 }
  0x2f   : > { %865 = vmatmul.mubr.bf16.vlgmr.msra.gmra.mrb[0].mxu1 %v226_v22  ;;  %869 = vmatpush3.bf16.msra.mxu0 %v956_v23 }
  0x30   : > { %870 = vmatprep.subr.bf16.mxu0 %v1038_v1  ;;  %884 = vmatprep.mubr.msk.bf16.mxu0 %vm1039_vm0, %v1038_v1 }
  0x31   : > { %892 = vmatprep.mubr.msk.bf16.mxu1 %vm1039_vm0, %v1038_v1  ;;  %889 = vmatpush3.bf16.msra.mxu1 %v964_v34 }
  0x32   : > { %890 = vmatprep.subr.bf16.mxu1 %v1038_v1 }
  0x33   : > { %871 = vmatpush3.bf16.msra.mxu0 %v957_v24 }
  0x34   : > { %872 = vmatprep.subr.bf16.mxu0 %v1038_v1 }
  0x35   : > { %891 = vmatpush3.bf16.msra.mxu1 %v965_v35 }
  0x37   : > { %873 = vmatpush3.bf16.msra.mxu0 %v958_v25 }
  0x38   : > { %874 = vmatprep.subr.bf16.mxu0 %v1038_v1 }
  0x3b   : > { %875 = vmatpush3.bf16.msra.mxu0 %v959_v26 }
  0x3c   : > { %876 = vmatprep.subr.bf16.mxu0 %v1038_v1 }
  0x3f   : > { %877 = vmatpush3.bf16.msra.mxu0 %v960_v27 }
  0x40   : > { %878 = vmatprep.subr.bf16.mxu0 %v1038_v1 }
  0x43   : > { %879 = vmatpush3.bf16.msra.mxu0 %v961_v28 }
  0x44   : > { %880 = vmatprep.subr.bf16.mxu0 %v1038_v1 }
  0x47   : > { %881 = vmatpush3.bf16.msra.mxu0 %v962_v29 }
  0x48   : > { %882 = vmatprep.subr.bf16.mxu0 %v1038_v1 }
  0x4b   : > { %883 = vmatpush3.bf16.msra.mxu0 %v963_v30 }
  0x4e   : > { %885 = vmatmul.mubr.bf16.vlgmr.msra.gmra.mrb[4].mxu0 %v443_v33 }
 0x101   : > { %v345_v36 = vpop.f32.mrb[0].mxu0 }
 0x102   : > { %v434_v37 = vpop.f32.mrb[0].mxu1  ;;  %v846_v38 = vpop.f32.mrb[1].mxu0 }
 0x103   : > { %v435_v39 = vadd.f32 %v434_v37, %v345_v36  ;;  %v866_v40 = vpop.f32.mrb[1].mxu1  ;;  %v348_v41 = vpop.f32.mrb[2].mxu0 }
 0x104   : > { %v437_v42 = vpop.f32.mrb[2].mxu1  ;;  %v847_v43 = vpop.f32.mrb[3].mxu0 }
 0x105   : > { %v438_v44 = vadd.f32 %v437_v42, %v348_v41  ;;  %v867_v45 = vpop.f32.mrb[3].mxu1 }
 0x121   : > { %v543_v46 = vpop.f32.mrb[4].mxu0 }
 0x122   : > { %v550_v48 = vadd.f32 %v543_v46, %v435_v39  ;;  %v886_v49 = vpop.f32.mrb[5].mxu0 }
 0x123   : > { %v546_v50 = vpop.f32.mrb[6].mxu0 }
 0x124   : > { %v559_v51 = vadd.f32 %v785_v47, %v550_v48  ;;  %v551_v52 = vadd.f32 %v546_v50, %v438_v44  ;;  %v887_v53 = vpop.f32.mrb[7].mxu0 }
 0x126   : > { %v560_v54 = vadd.f32 %v785_v47, %v551_v52  ;;  %v561_v55 = vmax.f32 %v559_v51, 0.0 }
 0x128   : > { %v562_v56 = vmax.f32 %v560_v54, 0.0 }
 0x12a   : > { %v563_v57 = vpack.c.bf16 %v562_v56, %v561_v55 }
 0x12c   : > { %893 = vmatmul.mubr.msk.bf16.vlgmr.msra.gmra.mrb[4].mxu1 %vm587_vm1, %v563_v57 }
 0x1ff   : > { %v625_v59 = vpop.f32.mrb[4].mxu1 }
 0x200   : > { %v626_v60 = vadd.f32 %v786_v58, %v625_v59  ;;  %v894_v61 = vpop.f32.mrb[5].mxu1 }
 0x201   : > { %v628_v62 = vpop.f32.mrb[6].mxu1 }
 0x202   : > { %v790_v63 = vmul.f32 -1.442695, %v626_v60  ;;  %v629_v0 = vadd.f32 %v786_v58, %v628_v62  ;;  %v895_v1 = vpop.f32.mrb[7].mxu1 }
 0x204   : > { %966 = vpow2.f32 %v790_v63  ;;  %v791_v2 = vmul.f32 -1.442695, %v629_v0 }
 0x206   : > { %968 = vpow2.f32 %v791_v2 }
 0x20e   : > { %v967_v3 = vpop.eup %966 }
 0x20f   : > { %v638_v4 = vadd.f32 1.0, %v967_v3 }
 0x210   : > { %v969_v5 = vpop.eup %968 }
 0x211   : > { %970 = vrcp.f32 %v638_v4  ;;  %v639_v6 = vadd.f32 1.0, %v969_v5 }
 0x213   : > { %972 = vrcp.f32 %v639_v6 }
 0x21b   : > { %v971_v7 = vpop.eup %970 }
 0x21c   : > { %645 = vst.msk [vmem:[%s217_s6] sm:$0xff] %vm644_vm2, %v971_v7 }
 0x21d   : > { %v973_v8 = vpop.eup %972 }
 0x21e   : > { %646 = vst.msk [vmem:[%s217_s6 + $0x8] sm:$0xff] %vm644_vm2, %v973_v8 }
 0x21f   : > { %987 = shalt.err (!%p984_p3)
}
 0x220   : > { %s988_s25 = scalar_lea.hbm %s1257_s10, 256  ;;  %s992_s17 = scalar_lea.hbm %s1307_s5, 512 }
 0x221   : > { %p989_p4 = scmp.ne.s32.totalorder %s1257_s10, %s988_s25  ;;  %p993_p9 = scmp.lt.u32.totalorder %s1257_s10, %s1307_s5 }
 0x222   : > { %p994_p10 = scmp.lt.u32.totalorder %s992_s17, %s988_s25  ;;  %p996_p12 = scmp.lt.u32.totalorder %s988_s25, %s1257_s10 }
 0x223   : > { %p990_p7 = pnand %p989_p4, %p1111_p5 }
 0x224   : > { %p995_p11 = por %p994_p10, %p993_p9 }
 0x225   : > { %p991_p8 = pneg %p990_p7 }
 0x226   : > { %p997_p13 = por %p996_p12, %p995_p11 }
 0x228   : > { %p998_p0 = pnand %p997_p13, %p991_p8 }
 0x22a   : > { %1001 = shalt.err (!%p998_p0)
}
 0x22b   : > { %s1041_s30 = smov 128   ;;  %s1042_s6 = smov 8  }
 0x22c   : > { %897 = dma.vmem_to_hbm [thread:$0]  (%p1111_p5), %s1259_s7, 256, %s1257_s10, %s1261_s11, %s1041_s30, %s1041_s30, %s1042_s6  }
 0x22d PF: > { %p903_p1 = scmp.ge.s32.totalorder %s1036_s21, 2  ;;  %s676_s8 = sand.u32 1, %s1024_s18  }
 0x22e   : > { %s677_s9 = scalar_lea.sflag [#allocation3], %s676_s8 }
 0x22f   : > { %p900_p2 = pnand %p903_p1, %p1115_p6 }
 0x231   : > { %1019 = dma.done.wait (!%p900_p2), %s677_s9, 256  }
 0x232   : > { %1021 = vsyncadd (!%p900_p2), %s677_s9, 4294967040  ;;  %p15_p3 = scmp.ge.s32.totalorder %s1098_s24, 4   ;;  %s1310_s18 = smov %s1028_s19 }
 0x233   : > { %s1311_s19 = smov %s1032_s20  ;;  %s1312_s20 = smov %s1109_s27 }
 0x234   : > { %s1313_s21 = smov %s1098_s24  ;;  %17 = sbr.rel (!%p15_p3) target bundleno = 3 (0x3), region = 77 }
 0x23b   :  { %682 = vsyncpa [#allocation3], 1 }
 0x23c   :  { %684 = vsyncpa [#allocation3 + $0x1], 1 }

</bundles_post_ra>
